<compile_context>
chip_gen: v5e
topology: v5e:2x2
jax: 0.10.0
libtpu: 0.0.40
codegen_flags: <defaults>
</compile_context>

<pallas_src>
import math
import jax
import jax.numpy as jnp
from jax import lax
from jax.experimental import pallas as pl
from jax.experimental.pallas import tpu as pltpu


def linear_gelu_kernel(x_ref, w_ref, b_ref, o_ref):
    # x_ref: (rows, K) f32 (full activation block, resident across grid steps)
    # w_ref: (K, TN) bf16 weight column tile
    # b_ref: (1, TN) f32 bias tile
    # o_ref: (rows, TN) f32 output tile
    x_bf = x_ref[...].astype(jnp.bfloat16)          # in-kernel cast, hidden under DMA
    acc = jnp.dot(x_bf, w_ref[...], preferred_element_type=jnp.float32)
    acc = acc + b_ref[...]                           # broadcast bias over rows (f32)
    # Exact GELU (approximate='none'): 0.5 * x * (1 + erf(x / sqrt(2)))
    inv_sqrt2 = jnp.float32(1.0 / math.sqrt(2.0))
    y = 0.5 * acc * (1.0 + lax.erf(acc * inv_sqrt2))
    # Dropout(p=0.0) is the identity; nothing to do.
    o_ref[...] = y.astype(o_ref.dtype)


def linear_gelu_dropout(x, w_bf16, b, *, tn=512):
    """x: (N, H, W, C_in) f32; w_bf16: (C_in, C_out) bf16 (pre-cast, at rest);
    b: (C_out,) f32. Returns (N, H, W, C_out) in x.dtype."""
    n, h, wdim, cin = x.shape
    cout = w_bf16.shape[1]
    rows = n * h * wdim                      # 196 -- no padding, no post-slice

    x2d = x.reshape(rows, cin)               # f32, cast happens in-kernel
    b2d = b.reshape(1, cout)

    assert cout % tn == 0 and tn % 128 == 0
    grid = (cout // tn,)

    bytes_accessed = (
        rows * cin * 4        # f32 activations (read once, resident)
        + cin * cout * 2      # bf16 weights (dominant)
        + cout * 4            # f32 bias
        + rows * cout * 4     # f32 output
    )
    cost = pl.CostEstimate(
        flops=2 * rows * cin * cout,
        transcendentals=rows * cout,
        bytes_accessed=bytes_accessed,
    )

    out2d = pl.pallas_call(
        linear_gelu_kernel,
        out_shape=jax.ShapeDtypeStruct((rows, cout), x.dtype),
        grid_spec=pltpu.PrefetchScalarGridSpec(
            num_scalar_prefetch=0,
            grid=grid,
            in_specs=[
                # Full activation block; constant block index -> stays resident.
                pl.BlockSpec((rows, cin), lambda j: (0, 0)),
                # Weight column tile.
                pl.BlockSpec((cin, tn), lambda j: (0, j)),
                # Bias tile.
                pl.BlockSpec((1, tn), lambda j: (0, j)),
            ],
            out_specs=pl.BlockSpec((rows, tn), lambda j: (0, j)),
        ),
        compiler_params=pltpu.CompilerParams(
            dimension_semantics=("parallel",),
        ),
        cost_estimate=cost,
    )(x2d, w_bf16, b2d)

    return out2d.reshape(n, h, wdim, cout)


if __name__ == "__main__":
    key = jax.random.PRNGKey(0)
    kx, kw, kb = jax.random.split(key, 3)

    in_features, out_features = 512, 2048
    # Deterministic parameter init mimicking nn.Linear's U(-1/sqrt(fan_in), 1/sqrt(fan_in))
    bound = 1.0 / math.sqrt(in_features)
    w = jax.random.uniform(kw, (in_features, out_features), jnp.float32, -bound, bound)
    b = jax.random.uniform(kb, (out_features,), jnp.float32, -bound, bound)

    # Cast weights to bf16 ONCE, outside the hot path (storage format).
    w_bf = jax.block_until_ready(w.astype(jnp.bfloat16))

    # Input matching the module: (1, 14, 14, 512)
    x = jax.random.normal(kx, (1, 14, 14, in_features), jnp.float32)

    fwd = jax.jit(linear_gelu_dropout)
    out = fwd(x, w_bf, b)
    out = jax.block_until_ready(out)
    assert out.shape == (1, 14, 14, out_features)

    # Reference with the same bf16 input/weight precision (f32 accumulation).
    xb = x.reshape(-1, in_features).astype(jnp.bfloat16)
    ref = jnp.dot(xb, w_bf, preferred_element_type=jnp.float32) + b
    ref = 0.5 * ref * (1.0 + lax.erf(ref / jnp.sqrt(2.0)))
    assert jnp.allclose(out.reshape(-1, out_features), ref, atol=2e-2, rtol=2e-2)

    # Loose check against the full-f32 math path as well (bf16 rounding only).
    ref32 = x.reshape(-1, in_features) @ w + b
    ref32 = 0.5 * ref32 * (1.0 + lax.erf(ref32 / jnp.sqrt(2.0)))
    assert jnp.allclose(out.reshape(-1, out_features), ref32, atol=5e-2, rtol=5e-2)

    print("KERNEL_OK")
</pallas_src>

<mosaic_0001>
module attributes {stable_mosaic.version = 11 : i64} {
  func.func @linear_gelu_kernel(%arg0: i32, %arg1: memref<196x512xf32, #tpu.memory_space<vmem>>, %arg2: memref<512x512xbf16, #tpu.memory_space<vmem>>, %arg3: memref<1x512xf32, #tpu.memory_space<vmem>>, %arg4: memref<196x512xf32, #tpu.memory_space<vmem>>) attributes {dimension_semantics = [#tpu.dimension_semantics<parallel>], iteration_bounds = array<i64: 4>, scalar_prefetch = 0 : i64, scratch_operands = 0 : i64, tpu.core_type = #tpu.core_type<tc>, window_params = [{pipeline_mode = #tpu.pipeline_mode<synchronous>, transform_indices = @transform_0, window_bounds = array<i64: 196, 512>}, {transform_indices = @transform_1, window_bounds = array<i64: 512, 512>}, {transform_indices = @transform_2, window_bounds = array<i64: 1, 512>}, {transform_indices = @transform_3, window_bounds = array<i64: 196, 512>}]} {
    %c0 = arith.constant 0 : index
    %c0_0 = arith.constant 0 : index
    %0 = vector.load %arg1[%c0, %c0_0] : memref<196x512xf32, #tpu.memory_space<vmem>>, vector<196x512xf32>
    %1 = arith.truncf %0 : vector<196x512xf32> to vector<196x512xbf16>
    %c0_1 = arith.constant 0 : index
    %c0_2 = arith.constant 0 : index
    %2 = vector.load %arg2[%c0_1, %c0_2] : memref<512x512xbf16, #tpu.memory_space<vmem>>, vector<512x512xbf16>
    %cst = arith.constant dense<0.000000e+00> : vector<196x512xf32>
    %3 = tpu.matmul %1, %2, %cst {dimension_numbers = #tpu.dot_dimension_numbers<[1], [0], [0], [1], [0, 0, 1, 1], [], []>} : vector<196x512xbf16>, vector<512x512xbf16>, vector<196x512xf32> -> vector<196x512xf32>
    %c0_3 = arith.constant 0 : index
    %c0_4 = arith.constant 0 : index
    %4 = vector.load %arg3[%c0_3, %c0_4] : memref<1x512xf32, #tpu.memory_space<vmem>>, vector<1x512xf32>
    %5 = vector.broadcast %4 : vector<1x512xf32> to vector<196x512xf32>
    %6 = arith.addf %3, %5 : vector<196x512xf32>
    %cst_5 = arith.constant 5.000000e-01 : f32
    %7 = vector.broadcast %cst_5 : f32 to vector<196x512xf32>
    %8 = arith.mulf %7, %6 : vector<196x512xf32>
    %cst_6 = arith.constant 0.707106769 : f32
    %9 = vector.broadcast %cst_6 : f32 to vector<196x512xf32>
    %10 = arith.mulf %6, %9 : vector<196x512xf32>
    %11 = math.erf %10 : vector<196x512xf32>
    %cst_7 = arith.constant 1.000000e+00 : f32
    %12 = vector.broadcast %cst_7 : f32 to vector<196x512xf32>
    %13 = arith.addf %12, %11 : vector<196x512xf32>
    %14 = arith.mulf %8, %13 : vector<196x512xf32>
    %c0_8 = arith.constant 0 : index
    %c0_9 = arith.constant 0 : index
    %15 = vector.load %arg4[%c0_8, %c0_9] : memref<196x512xf32, #tpu.memory_space<vmem>>, vector<196x512xf32>
    tpu.vector_store %arg4[%c0_8, %c0_9], %14 {strides = array<i32>} : memref<196x512xf32, #tpu.memory_space<vmem>>, vector<196x512xf32>,
    return
  }
  func.func @transform_0(%arg0: i32) -> (i32, i32) {
    %c0_i32 = arith.constant 0 : i32
    %c0_i32_0 = arith.constant 0 : i32
    %c0_i32_1 = arith.constant 0 : i32
    return %c0_i32, %c0_i32_0 : i32, i32
  }
  func.func @transform_1(%arg0: i32) -> (i32, i32) {
    %c0_i32 = arith.constant 0 : i32
    %c0_i32_0 = arith.constant 0 : i32
    return %c0_i32, %arg0 : i32, i32
  }
  func.func @transform_2(%arg0: i32) -> (i32, i32) {
    %c0_i32 = arith.constant 0 : i32
    %c0_i32_0 = arith.constant 0 : i32
    return %c0_i32, %arg0 : i32, i32
  }
  func.func @transform_3(%arg0: i32) -> (i32, i32) {
    %c0_i32 = arith.constant 0 : i32
    %c0_i32_0 = arith.constant 0 : i32
    return %c0_i32, %arg0 : i32, i32
  }
}

</mosaic_0001>

<bundles_post_ra>
// kernel: linear_gelu_dropout.1
= control target key start
LH: loop header
LB: loop body
LE: loop exit
PB: predicated region body
PF: predicated region fallthrough
CT: control target
= control target key end

     0   :  { %8 = vsyncpa [#allocation3], 0  ;;  %s13842_s0 = inlined_call_operand.vmem [shape: f32[196,512], index: 0, kind: input, shape index: {}]   ;;  %s13843_s1 = inlined_call_operand.hbm [shape: bf16[512,2048], index: 1, kind: input, shape index: {}]   ;;  %s13844_s2 = inlined_call_operand.vmem [shape: f32[1,2048], index: 2, kind: input, shape index: {}]   ;;  %s13845_s3 = inlined_call_operand.vmem [shape: f32[196,2048], index: 3, kind: output, shape index: {}]  }
   0x1   :  { %10 = vsyncpa [#allocation3 + $0x1], 0  ;;  %s8192_s12 = smov 0   ;;  %s8194_s13 = smov 0  }
   0x2   :  { %s8196_s14 = smov 0   ;;  %s8198_s15 = smov 0  }
   0x3 LB: > { %s8211_s16 = sadd.s32 4294967295, %s8167_s15   ;;  %s8214_s17 = sadd.s32 1, %s8167_s15   ;;  %s8167_s15 = sphi %s8198_s15, %s14226_s15   ;;  %s8163_s14 = sphi %s8196_s14, %s14225_s14   ;;  %s8159_s13 = sphi %s8194_s13, %s14224_s13   ;;  %s8155_s12 = sphi %s8192_s12, %s14223_s12  }
   0x4   : > { %s41_s18 = ssub.s32 %s8167_s15, %s8214_s17  ;;  %s44_s19 = sadd.s32 1, %s8163_s14 }
   0x5   : > { %p42_p0 = scmp.eq.s32.totalorder %s41_s18, 0  ;;  %p51_p1 = scmp.ne.s32.totalorder %s8163_s14, %s8159_s13 }
   0x6   : > { %p52_p2 = scmp.eq.s32.totalorder %s8167_s15, 0  ;;  %p57_p3 = scmp.ne.s32.totalorder %s8159_s13, %s8155_s12 }
   0x7   : > { %s8224_s20 = scalar_select %p42_p0, %s8163_s14, %s44_s19  }
   0x8   : > { %p8226_p4 = por %p52_p2, %p51_p1  ;;  %p58_p5 = scmp.eq.s32.totalorder %s8211_s16, 0 }
   0x9   : > { %p107_p6 = scmp.eq.s32.totalorder %s8211_s16, 3  ;;  %p7864_p8 = scmp.lt.s32.totalorder %s8167_s15, 4 }
   0xa   : > { %p8232_p7 = por %p58_p5, %p57_p3  ;;  %s136_s24 = sand.u32 1, %s8163_s14  }
   0xb   : > { %p8237_p9 = por %p107_p6, %p51_p1  ;;  %s7105_s25 = sshll.u32 %s136_s24, 10 }
   0xc   : > { %s7727_s26 = sshll.u32 %s8167_s15, 4  ;;  %s140_s30 = scalar_lea.vmem [#allocation2], %s7105_s25 }
   0xd   : > { %s145_s29 = scalar_lea.hbm %s13843_s1, %s7727_s26  ;;  %s148_s4 = sshll.u32 %s140_s30, 4  ;;  %s149_s4 = int_to_ptr.vmem [resolvable:$true] %s148_s4 }
   0xe   : > { %s146_s5 = sshll.u32 %s145_s29, 4  ;;  %p8248_p10 = pnand %p7864_p8, %p8226_p4  ;;  %s147_s5 = int_to_ptr.hbm [resolvable:$true] %s146_s5 }
   0xf   : > { %s137_s7 = scalar_lea.sflag [#allocation3], %s136_s24  ;;  %s8103_s8 = sshra.s32 %s147_s5, 4  ;;  %s8104_s8 = int_to_ptr.hbm [resolvable:$true] %s8103_s8 }
  0x10   : > { %s8105_s9 = scalar_lea.hbm %s8104_s8, 1024  ;;  %p8107_p12 = pneg %p8248_p10 }
  0x11   : > { %p8106_p11 = scmp.ne.s32.totalorder %s8104_s8, %s8105_s9  ;;  %s8110_s12 = scalar_lea.hbm %s13843_s1, 4096 }
  0x12   : > { %p8111_p1 = scmp.lt.s32.totalorder %s8104_s8, %s13843_s1  ;;  %p8112_p2 = scmp.lt.s32.totalorder %s8110_s12, %s8105_s9 }
  0x13   : > { %p8108_p13 = pnand %p8107_p12, %p8106_p11 }
  0x14   : > { %p8113_p3 = por %p8112_p2, %p8111_p1 }
  0x15   : > { %p8109_p0 = pneg %p8108_p13 }
  0x17   : > { %p8114_p4 = pnand %p8113_p3, %p8109_p0 }
  0x19   : > { %8117 = shalt.err (!%p8114_p4)
}
  0x1a   : > { %s8169_s21 = smov 1024   ;;  %s8170_s24 = smov 256  }
  0x1b   : > { %s8171_s25 = smov 16   ;;  %p7108_p5 = scmp.ge.s32.totalorder %s8167_s15, 1 }
  0x1c   : > { %7863 = dma.hbm_to_vmem [thread:$0]  (!%p8248_p10), %s147_s5, 16384, %s149_s4, %s137_s7, %s8169_s21, %s8170_s24, %s8171_s25  }
  0x1d   : > { %p164_p6 = scmp.lt.s32.totalorder %s8167_s15, 5 }
  0x1f   : > { %p165_p8 = pnand %p7108_p5, %p164_p6 }
  0x21   : > { %168 = sbr.rel (%p165_p8) target bundleno = 1485 (0x5cd), region = 32 }
  0x26   : > { %s8265_s26 = sand.u32 1, %s8159_s13  }
  0x27   : > { %s7109_s27 = sshll.u32 %s8265_s26, 10  ;;  %s171_s28 = scalar_lea.sflag [#allocation3], %s8265_s26 }
  0x28   : > { %s8269_s29 = scalar_lea.vmem [#allocation2], %s7109_s27 }
  0x29   : > { %8150 = dma.done.wait (%p8232_p7), %s171_s28, 16384  }
  0x2a   : > { %8152 = vsyncadd (%p8232_p7), %s171_s28, 4294950912  ;;  %v7225_v0 = vld [vmem:[%s8269_s29 + $0xe0] sm:$0xf]  ;;  %v7758_v1 = vld [vmem:[%s8269_s29 + $0xec] sm:$0xf0]  ;;  %s7110_s5 = sshll.u32 %s8211_s16, 2 }
  0x2b   : > { %v7353_v2 = vld [vmem:[%s8269_s29 + $0x1e0] sm:$0xf]  ;;  %v7226_v3 = vor.u32 %v7758_v1, %v7225_v0  ;;  %v7790_v4 = vld [vmem:[%s8269_s29 + $0x1ec] sm:$0xf0]  ;;  %p203_p7 = scmp.lt.s32.totalorder %s7110_s5, 15  ;;  %s7857_s10 = smul.u32 800, %s8265_s26 }
  0x2c   : > { %v7481_v5 = vld [vmem:[%s8269_s29 + $0x2e0] sm:$0xf]  ;;  %v7822_v6 = vld [vmem:[%s8269_s29 + $0x2ec] sm:$0xf0]  ;;  %v7354_v7 = vor.u32 %v7790_v4, %v7353_v2 }
  0x2d   : > { %v7482_v8 = vor.u32 %v7822_v6, %v7481_v5  ;;  %v7609_v9 = vld [vmem:[%s8269_s29 + $0x3e0] sm:$0xf]  ;;  %v7854_v10 = vld [vmem:[%s8269_s29 + $0x3ec] sm:$0xf0]  ;;  %1138 = vmatpush.bf16.msra.mxu0 %v7226_v3  ;;  %s14228_s5 = smov (!%p203_p7, %s7110_s5), 15  ;;  %s8982_s18 = scalar_lea.vmem [#allocation4], %s7857_s10 }
  0x2e   : > { %v7209_v11 = vld [vmem:[%s8269_s29 + $0xc0] sm:$0xf]  ;;  %v7610_v12 = vor.u32 %v7854_v10, %v7609_v9  ;;  %v7754_v13 = vld [vmem:[%s8269_s29 + $0xcc] sm:$0xf0]  ;;  %1211 = vmatpush.bf16.msra.mxu1 %v7354_v7  ;;  %s8673_s27 = scalar_lea.vmem %s13844_s2, %s14228_s5 }
  0x2f   : > { %v7337_v14 = vld [vmem:[%s8269_s29 + $0x1c0] sm:$0xf]  ;;  %v7786_v15 = vld [vmem:[%s8269_s29 + $0x1cc] sm:$0xf0]  ;;  %1284 = vmatpush.bf16.msra.mxu2 %v7482_v8  ;;  %v7210_v16 = vor.u32 %v7754_v13, %v7209_v11 }
  0x30   : > { %v7338_v17 = vor.u32 %v7786_v15, %v7337_v14  ;;  %v7465_v18 = vld [vmem:[%s8269_s29 + $0x2c0] sm:$0xf]  ;;  %v7818_v19 = vld [vmem:[%s8269_s29 + $0x2cc] sm:$0xf0]  ;;  %1357 = vmatpush.bf16.msra.mxu3 %v7610_v12 }
  0x31   : > { %v7593_v20 = vld [vmem:[%s8269_s29 + $0x3c0] sm:$0xf]  ;;  %v7466_v21 = vor.u32 %v7818_v19, %v7465_v18  ;;  %v7850_v22 = vld [vmem:[%s8269_s29 + $0x3cc] sm:$0xf0]  ;;  %1139 = vmatpush.bf16.msra.mxu0 %v7210_v16 }
  0x32   : > { %v7193_v23 = vld [vmem:[%s8269_s29 + $0xa0] sm:$0xf]  ;;  %v7750_v24 = vld [vmem:[%s8269_s29 + $0xac] sm:$0xf0]  ;;  %v7594_v25 = vor.u32 %v7850_v22, %v7593_v20  ;;  %1212 = vmatpush.bf16.msra.mxu1 %v7338_v17 }
  0x33   : > { %v7321_v26 = vld [vmem:[%s8269_s29 + $0x1a0] sm:$0xf]  ;;  %v7782_v27 = vld [vmem:[%s8269_s29 + $0x1ac] sm:$0xf0]  ;;  %v7194_v29 = vor.u32 %v7750_v24, %v7193_v23  ;;  %1285 = vmatpush.bf16.msra.mxu2 %v7466_v21 }
  0x34   : > { %v7449_v28 = vld [vmem:[%s8269_s29 + $0x2a0] sm:$0xf]  ;;  %v7814_v30 = vld [vmem:[%s8269_s29 + $0x2ac] sm:$0xf0]  ;;  %v7322_v33 = vor.u32 %v7782_v27, %v7321_v26  ;;  %1358 = vmatpush.bf16.msra.mxu3 %v7594_v25 }
  0x35   : > { %v7577_v31 = vld [vmem:[%s8269_s29 + $0x3a0] sm:$0xf]  ;;  %v7846_v32 = vld [vmem:[%s8269_s29 + $0x3ac] sm:$0xf0]  ;;  %v7450_v34 = vor.u32 %v7814_v30, %v7449_v28  ;;  %1140 = vmatpush.bf16.msra.mxu0 %v7194_v29  ;;  %v209_v30 = vld [vmem:[%s13842_s0 + $0x8] sm:$0xff] }
  0x36   : > { %v7177_v35 = vld [vmem:[%s8269_s29 + $0x80] sm:$0xf]  ;;  %v7746_v36 = vld [vmem:[%s8269_s29 + $0x8c] sm:$0xf0]  ;;  %v7578_v38 = vor.u32 %v7846_v32, %v7577_v31  ;;  %1213 = vmatpush.bf16.msra.mxu1 %v7322_v33  ;;  %v213_v31 = vld [vmem:[%s13842_s0 + $0x28] sm:$0xff] }
  0x37   : > { %v7305_v37 = vld [vmem:[%s8269_s29 + $0x180] sm:$0xf]  ;;  %v7778_v39 = vld [vmem:[%s8269_s29 + $0x18c] sm:$0xf0]  ;;  %v7178_v44 = vor.u32 %v7746_v36, %v7177_v35  ;;  %1286 = vmatpush.bf16.msra.mxu2 %v7450_v34  ;;  %v7820_v32 = vld [vmem:[%s8269_s29 + $0x2e4] sm:$0xf] }
  0x38   : > { %v7433_v40 = vld [vmem:[%s8269_s29 + $0x280] sm:$0xf]  ;;  %v7810_v41 = vld [vmem:[%s8269_s29 + $0x28c] sm:$0xf0]  ;;  %v7306_v45 = vor.u32 %v7778_v39, %v7305_v37  ;;  %1359 = vmatpush.bf16.msra.mxu3 %v7578_v38  ;;  %v7483_v33 = vld [vmem:[%s8269_s29 + $0x2f0] sm:$0xf0] }
  0x39   : > { %v7561_v42 = vld [vmem:[%s8269_s29 + $0x380] sm:$0xf]  ;;  %v7842_v43 = vld [vmem:[%s8269_s29 + $0x38c] sm:$0xf0]  ;;  %v7434_v46 = vor.u32 %v7810_v41, %v7433_v40  ;;  %1141 = vmatpush.bf16.msra.mxu0 %v7178_v44  ;;  %v7852_v36 = vld [vmem:[%s8269_s29 + $0x3e4] sm:$0xf]  ;;  %v7486_v44 = vor.u32 %v7820_v32, %v7483_v33 }
  0x3a   : > { %v7161_v47 = vld [vmem:[%s8269_s29 + $0x60] sm:$0xf]  ;;  %v7742_v48 = vld [vmem:[%s8269_s29 + $0x6c] sm:$0xf0]  ;;  %v7562_v50 = vor.u32 %v7842_v43, %v7561_v42  ;;  %1214 = vmatpush.bf16.msra.mxu1 %v7306_v45  ;;  %v7611_v37 = vld [vmem:[%s8269_s29 + $0x3f0] sm:$0xf0] }
  0x3b   : > { %v7289_v49 = vld [vmem:[%s8269_s29 + $0x160] sm:$0xf]  ;;  %v7774_v51 = vld [vmem:[%s8269_s29 + $0x16c] sm:$0xf0]  ;;  %v7162_v56 = vor.u32 %v7742_v48, %v7161_v47  ;;  %1287 = vmatpush.bf16.msra.mxu2 %v7434_v46  ;;  %v211_v41 = vld [vmem:[%s13842_s0 + $0x18] sm:$0xff] }
  0x3c   : > { %v7417_v52 = vld [vmem:[%s8269_s29 + $0x260] sm:$0xf]  ;;  %v7806_v53 = vld [vmem:[%s8269_s29 + $0x26c] sm:$0xf0]  ;;  %v7290_v57 = vor.u32 %v7774_v51, %v7289_v49  ;;  %1360 = vmatpush.bf16.msra.mxu3 %v7562_v50  ;;  %v215_v42 = vld [vmem:[%s13842_s0 + $0x38] sm:$0xff]  ;;  %v7614_v49 = vor.u32 %v7852_v36, %v7611_v37 }
  0x3d   : > { %v7545_v54 = vld [vmem:[%s8269_s29 + $0x360] sm:$0xf]  ;;  %v7838_v55 = vld [vmem:[%s8269_s29 + $0x36c] sm:$0xf0]  ;;  %v7418_v58 = vor.u32 %v7806_v53, %v7417_v52  ;;  %1142 = vmatpush.bf16.msra.mxu0 %v7162_v56  ;;  %v7756_v45 = vld [vmem:[%s8269_s29 + $0xe4] sm:$0xf]  ;;  %v8375_v53 = vpack.c.bf16 %v213_v31, %v209_v30 }
  0x3e   : > { %v7145_v59 = vld [vmem:[%s8269_s29 + $0x40] sm:$0xf]  ;;  %v7738_v60 = vld [vmem:[%s8269_s29 + $0x4c] sm:$0xf0]  ;;  %v7546_v62 = vor.u32 %v7838_v55, %v7545_v54  ;;  %1215 = vmatpush.bf16.msra.mxu1 %v7290_v57  ;;  %v7227_v46 = vld [vmem:[%s8269_s29 + $0xf0] sm:$0xf0]  ;;  %v8381_v57 = vpack.c.bf16 %v215_v42, %v211_v41 }
  0x3f   : > { %v7273_v61 = vld [vmem:[%s8269_s29 + $0x140] sm:$0xf]  ;;  %v7770_v63 = vld [vmem:[%s8269_s29 + $0x14c] sm:$0xf0]  ;;  %v7146_v4 = vor.u32 %v7738_v60, %v7145_v59  ;;  %1288 = vmatpush.bf16.msra.mxu2 %v7418_v58  ;;  %v7788_v47 = vld [vmem:[%s8269_s29 + $0x1e4] sm:$0xf]  ;;  %v7230_v58 = vor.u32 %v7756_v45, %v7227_v46 }
  0x40   : > { %v7401_v0 = vld [vmem:[%s8269_s29 + $0x240] sm:$0xf]  ;;  %v7802_v1 = vld [vmem:[%s8269_s29 + $0x24c] sm:$0xf0]  ;;  %v7274_v5 = vor.u32 %v7770_v63, %v7273_v61  ;;  %1361 = vmatpush.bf16.msra.mxu3 %v7546_v62  ;;  %v7355_v50 = vld [vmem:[%s8269_s29 + $0x1f0] sm:$0xf0] }
  0x41   : > { %v7529_v2 = vld [vmem:[%s8269_s29 + $0x340] sm:$0xf]  ;;  %v7834_v3 = vld [vmem:[%s8269_s29 + $0x34c] sm:$0xf0]  ;;  %v7402_v6 = vor.u32 %v7802_v1, %v7401_v0  ;;  %1143 = vmatpush.bf16.msra.mxu0 %v7146_v4  ;;  %v7816_v51 = vld [vmem:[%s8269_s29 + $0x2c4] sm:$0xf]  ;;  %v7358_v59 = vor.u32 %v7788_v47, %v7355_v50 }
  0x42   : > { %v7129_v7 = vld [vmem:[%s8269_s29 + $0x20] sm:$0xf]  ;;  %v7734_v8 = vld [vmem:[%s8269_s29 + $0x2c] sm:$0xf0]  ;;  %v7530_v10 = vor.u32 %v7834_v3, %v7529_v2  ;;  %1216 = vmatpush.bf16.msra.mxu1 %v7274_v5  ;;  %v7467_v52 = vld [vmem:[%s8269_s29 + $0x2d0] sm:$0xf0] }
  0x43   : > { %v7257_v9 = vld [vmem:[%s8269_s29 + $0x120] sm:$0xf]  ;;  %v7766_v11 = vld [vmem:[%s8269_s29 + $0x12c] sm:$0xf0]  ;;  %v7130_v17 = vor.u32 %v7734_v8, %v7129_v7  ;;  %1289 = vmatpush.bf16.msra.mxu2 %v7402_v6  ;;  %13944 = vst [vmem:[#allocation7_spill] sm:$0xff] %v8375_v53  ;;  %v7470_v60 = vor.u32 %v7816_v51, %v7467_v52  ;;  %v217_v6 = vld [vmem:[%s13842_s0 + $0x48] sm:$0xff] }
  0x44   : > { %v7385_v12 = vld [vmem:[%s8269_s29 + $0x220] sm:$0xf]  ;;  %v7798_v13 = vld [vmem:[%s8269_s29 + $0x22c] sm:$0xf0]  ;;  %v7258_v21 = vor.u32 %v7766_v11, %v7257_v9  ;;  %1362 = vmatpush.bf16.msra.mxu3 %v7530_v10  ;;  %v7848_v55 = vld [vmem:[%s8269_s29 + $0x3c4] sm:$0xf] }
  0x45   : > { %v7513_v14 = vld [vmem:[%s8269_s29 + $0x320] sm:$0xf]  ;;  %v7830_v15 = vld [vmem:[%s8269_s29 + $0x32c] sm:$0xf0]  ;;  %v7386_v22 = vor.u32 %v7798_v13, %v7385_v12  ;;  %1144 = vmatpush.bf16.msra.mxu0 %v7130_v17  ;;  %v7595_v56 = vld [vmem:[%s8269_s29 + $0x3d0] sm:$0xf0] }
  0x46   : > { %v7113_v16 = vld [vmem:[%s8269_s29] sm:$0xf]  ;;  %v7730_v18 = vld [vmem:[%s8269_s29 + $0xc] sm:$0xf0]  ;;  %v7514_v26 = vor.u32 %v7830_v15, %v7513_v14  ;;  %1217 = vmatpush.bf16.msra.mxu1 %v7258_v21  ;;  %v7752_v61 = vld [vmem:[%s8269_s29 + $0xc4] sm:$0xf]  ;;  %v7598_v63 = vor.u32 %v7848_v55, %v7595_v56 }
  0x47   : > { %v7241_v19 = vld [vmem:[%s8269_s29 + $0x100] sm:$0xf]  ;;  %v7762_v20 = vld [vmem:[%s8269_s29 + $0x10c] sm:$0xf0]  ;;  %v7114_v34 = vor.u32 %v7730_v18, %v7113_v16  ;;  %1290 = vmatpush.bf16.msra.mxu2 %v7386_v22  ;;  %v7211_v62 = vld [vmem:[%s8269_s29 + $0xd0] sm:$0xf0] }
  0x48   : > { %v7369_v23 = vld [vmem:[%s8269_s29 + $0x200] sm:$0xf]  ;;  %v7794_v24 = vld [vmem:[%s8269_s29 + $0x20c] sm:$0xf0]  ;;  %v7242_v38 = vor.u32 %v7762_v20, %v7241_v19  ;;  %1363 = vmatpush.bf16.msra.mxu3 %v7514_v26  ;;  %v7784_v0 = vld [vmem:[%s8269_s29 + $0x1c4] sm:$0xf]  ;;  %v7214_v2 = vor.u32 %v7752_v61, %v7211_v62 }
  0x49   : > { %v7497_v25 = vld [vmem:[%s8269_s29 + $0x300] sm:$0xf]  ;;  %v7826_v27 = vld [vmem:[%s8269_s29 + $0x30c] sm:$0xf0]  ;;  %v7370_v39 = vor.u32 %v7794_v24, %v7369_v23  ;;  %1145 = vmatpush.bf16.msra.mxu0 %v7114_v34  ;;  %v7339_v1 = vld [vmem:[%s8269_s29 + $0x1d0] sm:$0xf0] }
  0x4a   : > { %v208_v28 = vld [vmem:[%s13842_s0] sm:$0xff]  ;;  %v210_v35 = vld [vmem:[%s13842_s0 + $0x10] sm:$0xff]  ;;  %v7498_v43 = vor.u32 %v7826_v27, %v7497_v25  ;;  %1218 = vmatpush.bf16.msra.mxu1 %v7242_v38  ;;  %v7342_v3 = vor.u32 %v7784_v0, %v7339_v1  ;;  %v221_v7 = vld [vmem:[%s13842_s0 + $0x68] sm:$0xff] }
  0x4b   : > { %v212_v29 = vld [vmem:[%s13842_s0 + $0x20] sm:$0xff]  ;;  %v214_v40 = vld [vmem:[%s13842_s0 + $0x30] sm:$0xff]  ;;  %1291 = vmatpush.bf16.msra.mxu2 %v7370_v39  ;;  %v219_v10 = vld [vmem:[%s13842_s0 + $0x58] sm:$0xff]  ;;  %v8417_v13 = vpack.c.bf16 %v221_v7, %v217_v6 }
  0x4c   : > { %v8370_v48 = vpack.c.bf16 %v212_v29, %v208_v28  ;;  %v8377_v54 = vpack.c.bf16 %v214_v40, %v210_v35  ;;  %1364 = vmatpush.bf16.msra.mxu3 %v7498_v43  ;;  %v216_v4 = vld [vmem:[%s13842_s0 + $0x40] sm:$0xff]  ;;  %v218_v8 = vld [vmem:[%s13842_s0 + $0x50] sm:$0xff]  ;;  %v223_v11 = vld [vmem:[%s13842_s0 + $0x78] sm:$0xff] }
  0x4d   : > { %1219 = vmatmul.bf16.vlgmr.msra.gmra.mxu1 %v8375_v53  ;;  %1430 = vmatpush.bf16.msrb.mxu0 %v7230_v58  ;;  %v220_v5 = vld [vmem:[%s13842_s0 + $0x60] sm:$0xff]  ;;  %v222_v9 = vld [vmem:[%s13842_s0 + $0x70] sm:$0xff]  ;;  %13946 = vst [vmem:[#allocation9_spill] sm:$0xff] %v8417_v13  ;;  %v8421_v15 = vpack.c.bf16 %v223_v11, %v219_v10  ;;  %v225_v30 = vld [vmem:[%s13842_s0 + $0x88] sm:$0xff] }
  0x4e   : > { %13943 = vst [vmem:[#allocation6_spill] sm:$0xff] %v8370_v48  ;;  %1146 = vmatmul.bf16.vlgmr.msra.gmra.mxu0 %v8370_v48  ;;  %1292 = vmatmul.bf16.vlgmr.msra.gmra.mxu2 %v8377_v54  ;;  %v8415_v12 = vpack.c.bf16 %v220_v5, %v216_v4  ;;  %v8419_v14 = vpack.c.bf16 %v222_v9, %v218_v8  ;;  %v7812_v16 = vld [vmem:[%s8269_s29 + $0x2a4] sm:$0xf]  ;;  %v7451_v17 = vld [vmem:[%s8269_s29 + $0x2b0] sm:$0xf0]  ;;  %v229_v31 = vld [vmem:[%s13842_s0 + $0xa8] sm:$0xff] }
  0x4f   : > { %1576 = vmatpush.bf16.msrb.mxu2 %v7486_v44  ;;  %1365 = vmatmul.bf16.vlgmr.msra.gmra.mxu3 %v8381_v57  ;;  %13948 = vst [vmem:[#allocation11_spill] sm:$0xff] %v8421_v15  ;;  %v7748_v18 = vld [vmem:[%s8269_s29 + $0xa4] sm:$0xf]  ;;  %v7454_v19 = vor.u32 %v7812_v16, %v7451_v17  ;;  %v7195_v20 = vld [vmem:[%s8269_s29 + $0xb0] sm:$0xf0]  ;;  %v227_v34 = vld [vmem:[%s13842_s0 + $0x98] sm:$0xff]  ;;  %v8461_v37 = vpack.c.bf16 %v229_v31, %v225_v30 }
  0x50   : > { %1649 = vmatpush.bf16.msrb.mxu3 %v7614_v49  ;;  %1503 = vmatpush.bf16.msrb.mxu1 %v7358_v59  ;;  %13945 = vst [vmem:[#allocation8_spill] sm:$0xff] %v8415_v12  ;;  %v7844_v21 = vld [vmem:[%s8269_s29 + $0x3a4] sm:$0xf]  ;;  %v7579_v22 = vld [vmem:[%s8269_s29 + $0x3b0] sm:$0xf0]  ;;  %v7198_v23 = vor.u32 %v7748_v18, %v7195_v20  ;;  %v231_v35 = vld [vmem:[%s13842_s0 + $0xb8] sm:$0xff] }
  0x51   : > { %1431 = vmatpush.bf16.msrb.mxu0 %v7214_v2  ;;  %13947 = vst [vmem:[#allocation10_spill] sm:$0xff] %v8419_v14  ;;  %v7582_v24 = vor.u32 %v7844_v21, %v7579_v22  ;;  %v7780_v25 = vld [vmem:[%s8269_s29 + $0x1a4] sm:$0xf]  ;;  %v7323_v26 = vld [vmem:[%s8269_s29 + $0x1b0] sm:$0xf0]  ;;  %v8465_v39 = vpack.c.bf16 %v231_v35, %v227_v34  ;;  %v233_v45 = vld [vmem:[%s13842_s0 + $0xc8] sm:$0xff] }
  0x52   : > { %v7326_v27 = vor.u32 %v7780_v25, %v7323_v26  ;;  %v224_v28 = vld [vmem:[%s13842_s0 + $0x80] sm:$0xff]  ;;  %v226_v32 = vld [vmem:[%s13842_s0 + $0x90] sm:$0xff]  ;;  %13950 = vst [vmem:[#allocation13_spill] sm:$0xff] %v8461_v37  ;;  %v237_v46 = vld [vmem:[%s13842_s0 + $0xe8] sm:$0xff] }
  0x53   : > { %1577 = vmatpush.bf16.msrb.mxu2 %v7470_v60  ;;  %v228_v29 = vld [vmem:[%s13842_s0 + $0xa0] sm:$0xff]  ;;  %v230_v33 = vld [vmem:[%s13842_s0 + $0xb0] sm:$0xff]  ;;  %13952 = vst [vmem:[#allocation15_spill] sm:$0xff] %v8465_v39  ;;  %v235_v50 = vld [vmem:[%s13842_s0 + $0xd8] sm:$0xff]  ;;  %v8499_v55 = vpack.c.bf16 %v237_v46, %v233_v45 }
  0x54   : > { %1650 = vmatpush.bf16.msrb.mxu3 %v7598_v63  ;;  %1504 = vmatpush.bf16.msrb.mxu1 %v7342_v3  ;;  %v8459_v36 = vpack.c.bf16 %v228_v29, %v224_v28  ;;  %v8463_v38 = vpack.c.bf16 %v230_v33, %v226_v32  ;;  %v7808_v40 = vld [vmem:[%s8269_s29 + $0x284] sm:$0xf]  ;;  %v7435_v41 = vld [vmem:[%s8269_s29 + $0x290] sm:$0xf0]  ;;  %v239_v51 = vld [vmem:[%s13842_s0 + $0xf8] sm:$0xff] }
  0x55   : > { %1432 = vmatpush.bf16.msrb.mxu0 %v7198_v23  ;;  %v7438_v42 = vor.u32 %v7808_v40, %v7435_v41  ;;  %v232_v43 = vld [vmem:[%s13842_s0 + $0xc0] sm:$0xff]  ;;  %v234_v47 = vld [vmem:[%s13842_s0 + $0xd0] sm:$0xff]  ;;  %13954 = vst [vmem:[#allocation17_spill] sm:$0xff] %v8499_v55  ;;  %v8503_v58 = vpack.c.bf16 %v239_v51, %v235_v50  ;;  %v241_v6 = vld [vmem:[%s13842_s0 + $0x108] sm:$0xff] }
  0x56   : > { %13949 = vst [vmem:[#allocation12_spill] sm:$0xff] %v8459_v36  ;;  %v236_v44 = vld [vmem:[%s13842_s0 + $0xe0] sm:$0xff]  ;;  %v238_v49 = vld [vmem:[%s13842_s0 + $0xf0] sm:$0xff]  ;;  %v245_v7 = vld [vmem:[%s13842_s0 + $0x128] sm:$0xff] }
  0x57   : > { %1578 = vmatpush.bf16.msrb.mxu2 %v7454_v19  ;;  %13951 = vst [vmem:[#allocation14_spill] sm:$0xff] %v8463_v38  ;;  %v8497_v52 = vpack.c.bf16 %v236_v44, %v232_v43  ;;  %v8501_v56 = vpack.c.bf16 %v238_v49, %v234_v47  ;;  %v7744_v59 = vld [vmem:[%s8269_s29 + $0x84] sm:$0xf]  ;;  %v7179_v60 = vld [vmem:[%s8269_s29 + $0x90] sm:$0xf0]  ;;  %v243_v10 = vld [vmem:[%s13842_s0 + $0x118] sm:$0xff]  ;;  %v8541_v17 = vpack.c.bf16 %v245_v7, %v241_v6 }
  0x58   : > { %1651 = vmatpush.bf16.msrb.mxu3 %v7582_v24  ;;  %1505 = vmatpush.bf16.msrb.mxu1 %v7326_v27  ;;  %v7840_v61 = vld [vmem:[%s8269_s29 + $0x384] sm:$0xf]  ;;  %v7182_v62 = vor.u32 %v7744_v59, %v7179_v60  ;;  %v7563_v63 = vld [vmem:[%s8269_s29 + $0x390] sm:$0xf0]  ;;  %v247_v11 = vld [vmem:[%s13842_s0 + $0x138] sm:$0xff] }
  0x59   : > { %13953 = vst [vmem:[#allocation16_spill] sm:$0xff] %v8497_v52  ;;  %v7776_v0 = vld [vmem:[%s8269_s29 + $0x184] sm:$0xf]  ;;  %v7307_v1 = vld [vmem:[%s8269_s29 + $0x190] sm:$0xf0]  ;;  %v7566_v2 = vor.u32 %v7840_v61, %v7563_v63  ;;  %v8545_v19 = vpack.c.bf16 %v247_v11, %v243_v10  ;;  %v249_v34 = vld [vmem:[%s13842_s0 + $0x148] sm:$0xff] }
  0x5a   : > { %13955 = vst [vmem:[#allocation18_spill] sm:$0xff] %v8501_v56  ;;  %v7310_v3 = vor.u32 %v7776_v0, %v7307_v1  ;;  %1433 = vmatpush.bf16.msrb.mxu0 %v7182_v62  ;;  %v240_v4 = vld [vmem:[%s13842_s0 + $0x100] sm:$0xff]  ;;  %v242_v8 = vld [vmem:[%s13842_s0 + $0x110] sm:$0xff]  ;;  %v253_v35 = vld [vmem:[%s13842_s0 + $0x168] sm:$0xff] }
  0x5b   : > { %1579 = vmatpush.bf16.msrb.mxu2 %v7438_v42  ;;  %v244_v5 = vld [vmem:[%s13842_s0 + $0x120] sm:$0xff]  ;;  %v246_v9 = vld [vmem:[%s13842_s0 + $0x130] sm:$0xff]  ;;  %13957 = vst [vmem:[#allocation20_spill] sm:$0xff] %v8541_v17  ;;  %v251_v42 = vld [vmem:[%s13842_s0 + $0x158] sm:$0xff]  ;;  %v8585_v45 = vpack.c.bf16 %v253_v35, %v249_v34 }
  0x5c   : > { %1652 = vmatpush.bf16.msrb.mxu3 %v7566_v2  ;;  %1506 = vmatpush.bf16.msrb.mxu1 %v7310_v3  ;;  %v8539_v16 = vpack.c.bf16 %v244_v5, %v240_v4  ;;  %v8543_v18 = vpack.c.bf16 %v246_v9, %v242_v8  ;;  %13959 = vst [vmem:[#allocation22_spill] sm:$0xff] %v8545_v19  ;;  %v7804_v20 = vld [vmem:[%s8269_s29 + $0x264] sm:$0xf]  ;;  %v7419_v21 = vld [vmem:[%s8269_s29 + $0x270] sm:$0xf0]  ;;  %v255_v43 = vld [vmem:[%s13842_s0 + $0x178] sm:$0xff] }
  0x5d   : > { %1224 = vmatmul.bf16.gmra.mxu1 %v8417_v13  ;;  %v7740_v22 = vld [vmem:[%s8269_s29 + $0x64] sm:$0xf]  ;;  %v7422_v23 = vor.u32 %v7804_v20, %v7419_v21  ;;  %v7163_v24 = vld [vmem:[%s8269_s29 + $0x70] sm:$0xf0]  ;;  %13961 = vst [vmem:[#allocation24_spill] sm:$0xff] %v8585_v45  ;;  %v8589_v47 = vpack.c.bf16 %v255_v43, %v251_v42  ;;  %v257_v51 = vld [vmem:[%s13842_s0 + $0x188] sm:$0xff] }
  0x5e   : > { %1151 = vmatmul.bf16.gmra.mxu0 %v8415_v12  ;;  %1297 = vmatmul.bf16.gmra.mxu2 %v8419_v14  ;;  %13956 = vst [vmem:[#allocation19_spill] sm:$0xff] %v8539_v16  ;;  %v7836_v25 = vld [vmem:[%s8269_s29 + $0x364] sm:$0xf]  ;;  %v7547_v26 = vld [vmem:[%s8269_s29 + $0x370] sm:$0xf0]  ;;  %v7166_v27 = vor.u32 %v7740_v22, %v7163_v24  ;;  %v261_v59 = vld [vmem:[%s13842_s0 + $0x1a8] sm:$0xff] }
  0x5f   : > { %1370 = vmatmul.bf16.gmra.mxu3 %v8421_v15  ;;  %13958 = vst [vmem:[#allocation21_spill] sm:$0xff] %v8543_v18  ;;  %v7550_v28 = vor.u32 %v7836_v25, %v7547_v26  ;;  %v7772_v29 = vld [vmem:[%s8269_s29 + $0x164] sm:$0xf]  ;;  %v7291_v30 = vld [vmem:[%s8269_s29 + $0x170] sm:$0xf0]  ;;  %1580 = vmatpush.bf16.msrb.mxu2 %v7422_v23  ;;  %v259_v62 = vld [vmem:[%s13842_s0 + $0x198] sm:$0xff]  ;;  %v8621_v1 = vpack.c.bf16 %v261_v59, %v257_v51 }
  0x60   : > { %v7294_v31 = vor.u32 %v7772_v29, %v7291_v30  ;;  %1434 = vmatpush.bf16.msrb.mxu0 %v7166_v27  ;;  %v248_v32 = vld [vmem:[%s13842_s0 + $0x140] sm:$0xff]  ;;  %v250_v40 = vld [vmem:[%s13842_s0 + $0x150] sm:$0xff]  ;;  %13963 = vst [vmem:[#allocation26_spill] sm:$0xff] %v8589_v47  ;;  %v263_v63 = vld [vmem:[%s13842_s0 + $0x1b8] sm:$0xff] }
  0x61   : > { %1653 = vmatpush.bf16.msrb.mxu3 %v7550_v28  ;;  %v252_v33 = vld [vmem:[%s13842_s0 + $0x160] sm:$0xff]  ;;  %v254_v41 = vld [vmem:[%s13842_s0 + $0x170] sm:$0xff]  ;;  %13965 = vst [vmem:[#allocation28_spill] sm:$0xff] %v8621_v1  ;;  %v8625_v3 = vpack.c.bf16 %v263_v63, %v259_v62  ;;  %v265_v9 = vld [vmem:[%s13842_s0 + $0x1c8] sm:$0xff] }
  0x62   : > { %1507 = vmatpush.bf16.msrb.mxu1 %v7294_v31  ;;  %v8583_v44 = vpack.c.bf16 %v252_v33, %v248_v32  ;;  %v8587_v46 = vpack.c.bf16 %v254_v41, %v250_v40  ;;  %v256_v49 = vld [vmem:[%s13842_s0 + $0x180] sm:$0xff]  ;;  %v258_v60 = vld [vmem:[%s13842_s0 + $0x190] sm:$0xff]  ;;  %v269_v10 = vld [vmem:[%s13842_s0 + $0x1e8] sm:$0xff] }
  0x63   : > { %v260_v50 = vld [vmem:[%s13842_s0 + $0x1a0] sm:$0xff]  ;;  %v262_v61 = vld [vmem:[%s13842_s0 + $0x1b0] sm:$0xff]  ;;  %13967 = vst [vmem:[#allocation30_spill] sm:$0xff] %v8625_v3  ;;  %v267_v21 = vld [vmem:[%s13842_s0 + $0x1d8] sm:$0xff]  ;;  %v8660_v24 = vpack.c.bf16 %v269_v10, %v265_v9 }
  0x64   : > { %13960 = vst [vmem:[#allocation23_spill] sm:$0xff] %v8583_v44  ;;  %v8619_v0 = vpack.c.bf16 %v260_v50, %v256_v49  ;;  %v8623_v2 = vpack.c.bf16 %v262_v61, %v258_v60  ;;  %v7800_v4 = vld [vmem:[%s8269_s29 + $0x244] sm:$0xf]  ;;  %v7403_v5 = vld [vmem:[%s8269_s29 + $0x250] sm:$0xf0]  ;;  %v271_v22 = vld [vmem:[%s13842_s0 + $0x1f8] sm:$0xff] }
  0x65   : > { %13962 = vst [vmem:[#allocation25_spill] sm:$0xff] %v8587_v46  ;;  %v7406_v6 = vor.u32 %v7800_v4, %v7403_v5  ;;  %v264_v7 = vld [vmem:[%s13842_s0 + $0x1c0] sm:$0xff]  ;;  %v266_v11 = vld [vmem:[%s13842_s0 + $0x1d0] sm:$0xff]  ;;  %v8664_v26 = vpack.c.bf16 %v271_v22, %v267_v21  ;;  %v273_v30 = vld [vmem:[%s13842_s0 + $0x208] sm:$0xff] }
  0x66   : > { %13964 = vst [vmem:[#allocation27_spill] sm:$0xff] %v8619_v0  ;;  %v268_v8 = vld [vmem:[%s13842_s0 + $0x1e0] sm:$0xff]  ;;  %v270_v20 = vld [vmem:[%s13842_s0 + $0x1f0] sm:$0xff]  ;;  %v277_v32 = vld [vmem:[%s13842_s0 + $0x228] sm:$0xff] }
  0x67   : > { %13966 = vst [vmem:[#allocation29_spill] sm:$0xff] %v8623_v2  ;;  %1581 = vmatpush.bf16.msrb.mxu2 %v7406_v6  ;;  %v8658_v23 = vpack.c.bf16 %v268_v8, %v264_v7  ;;  %v8662_v25 = vpack.c.bf16 %v270_v20, %v266_v11  ;;  %v488_v27 = vld [vmem:[%s8673_s27] sm:$0xf]  ;;  %v274_v33 = vld [vmem:[%s13842_s0 + $0x210] sm:$0xff]  ;;  %v275_v35 = vld [vmem:[%s13842_s0 + $0x218] sm:$0xff]  ;;  %v8704_v43 = vpack.c.bf16 %v277_v32, %v273_v30 }
  0x68   : > { %13969 = vst [vmem:[#allocation32_spill] sm:$0xff] %v8660_v24  ;;  %v272_v28 = vld [vmem:[%s13842_s0 + $0x200] sm:$0xff]  ;;  %v8685_v31 = vperm.slane %v488_v27, 0  ;;  %v278_v34 = vld [vmem:[%s13842_s0 + $0x230] sm:$0xff]  ;;  %v279_v40 = vld [vmem:[%s13842_s0 + $0x238] sm:$0xff] }
  0x69   : > { %13968 = vst [vmem:[#allocation31_spill] sm:$0xff] %v8658_v23  ;;  %v276_v29 = vld [vmem:[%s13842_s0 + $0x220] sm:$0xff]  ;;  %v8706_v49 = vpack.c.bf16 %v278_v34, %v274_v33  ;;  %v8709_v59 = vpack.c.bf16 %v279_v40, %v275_v35  ;;  %v281_v11 = vld [vmem:[%s13842_s0 + $0x248] sm:$0xff]  ;;  %v282_v21 = vld [vmem:[%s13842_s0 + $0x250] sm:$0xff] }
  0x6a   : > { %13970 = vst [vmem:[#allocation33_spill] sm:$0xff] %v8662_v25  ;;  %v8702_v41 = vpack.c.bf16 %v276_v29, %v272_v28  ;;  %v280_v9 = vld [vmem:[%s13842_s0 + $0x240] sm:$0xff]  ;;  %v285_v20 = vld [vmem:[%s13842_s0 + $0x268] sm:$0xff]  ;;  %v286_v22 = vld [vmem:[%s13842_s0 + $0x270] sm:$0xff] }
  0x6b   : > { %13971 = vst [vmem:[#allocation34_spill] sm:$0xff] %v8664_v26  ;;  %v284_v10 = vld [vmem:[%s13842_s0 + $0x260] sm:$0xff]  ;;  %v283_v29 = vld [vmem:[%s13842_s0 + $0x258] sm:$0xff] }
  0x6c   : > { %13972 = vst [vmem:[#allocation35_spill] sm:$0xff] %v8702_v41  ;;  %v287_v30 = vld [vmem:[%s13842_s0 + $0x278] sm:$0xff]  ;;  %v8747_v33 = vpack.c.bf16 %v284_v10, %v280_v9 }
  0x6d   : > { %1229 = vmatmul.bf16.gmra.mxu1 %v8461_v37  ;;  %13973 = vst [vmem:[#allocation36_spill] sm:$0xff] %v8704_v43 }
  0x6e   : > { %1156 = vmatmul.bf16.gmra.mxu0 %v8459_v36  ;;  %1302 = vmatmul.bf16.gmra.mxu2 %v8463_v38  ;;  %13974 = vst [vmem:[#allocation37_spill] sm:$0xff] %v8706_v49 }
  0x6f   : > { %1375 = vmatmul.bf16.gmra.mxu3 %v8465_v39  ;;  %13975 = vst [vmem:[#allocation38_spill] sm:$0xff] %v8709_v59 }
  0x70   : > { %13976 = vst [vmem:[#allocation39_spill] sm:$0xff] %v8747_v33 }
  0x7d   : > { %1234 = vmatmul.bf16.gmra.mxu1 %v8499_v55 }
  0x7e   : > { %1161 = vmatmul.bf16.gmra.mxu0 %v8497_v52  ;;  %1307 = vmatmul.bf16.gmra.mxu2 %v8501_v56 }
  0x7f   : > { %1380 = vmatmul.bf16.gmra.mxu3 %v8503_v58 }
  0x8d   : > { %1239 = vmatmul.bf16.gmra.mxu1 %v8541_v17 }
  0x8e   : > { %1166 = vmatmul.bf16.gmra.mxu0 %v8539_v16  ;;  %1312 = vmatmul.bf16.gmra.mxu2 %v8543_v18 }
  0x8f   : > { %1385 = vmatmul.bf16.gmra.mxu3 %v8545_v19 }
  0x9d   : > { %1244 = vmatmul.bf16.gmra.mxu1 %v8585_v45 }
  0x9e   : > { %1171 = vmatmul.bf16.gmra.mxu0 %v8583_v44  ;;  %1317 = vmatmul.bf16.gmra.mxu2 %v8587_v46 }
  0x9f   : > { %1390 = vmatmul.bf16.gmra.mxu3 %v8589_v47 }
  0xad   : > { %1249 = vmatmul.bf16.gmra.mxu1 %v8621_v1 }
  0xae   : > { %1176 = vmatmul.bf16.gmra.mxu0 %v8619_v0  ;;  %1322 = vmatmul.bf16.gmra.mxu2 %v8623_v2  ;;  %v7275_v2 = vld [vmem:[%s8269_s29 + $0x150] sm:$0xf0] }
  0xaf   : > { %1395 = vmatmul.bf16.gmra.mxu3 %v8625_v3  ;;  %v7768_v3 = vld [vmem:[%s8269_s29 + $0x144] sm:$0xf] }
  0xbd   : > { %1254 = vmatmul.bf16.gmra.mxu1 %v8660_v24 }
  0xbe   : > { %1181 = vmatmul.bf16.gmra.mxu0 %v8658_v23  ;;  %1327 = vmatmul.bf16.gmra.mxu2 %v8662_v25  ;;  %v7531_v25 = vld [vmem:[%s8269_s29 + $0x350] sm:$0xf0] }
  0xbf   : > { %1400 = vmatmul.bf16.gmra.mxu3 %v8664_v26 }
  0xca   : > { %v1220_v51 = vpop.f32.mrf.mxu1 }
  0xcb   : > { %v1147_v42 = vpop.f32.mrf.mxu0 }
  0xcc   : > { %v1148_v50 = vadd.f32 %v1147_v42, %v8685_v31 }
  0xcd   : > { %1259 = vmatmul.bf16.gmra.mxu1 %v8704_v43 }
  0xce   : > { %1186 = vmatmul.bf16.gmra.mxu0 %v8702_v41  ;;  %v1221_v60 = vadd.f32 %v1220_v51, %v1148_v50  ;;  %1332 = vmatmul.bf16.gmra.mxu2 %v8706_v49  ;;  %v8751_v50 = vpack.c.bf16 %v285_v20, %v281_v11  ;;  %v8753_v51 = vpack.c.bf16 %v286_v22, %v282_v21 }
  0xcf   : > { %1405 = vmatmul.bf16.gmra.mxu3 %v8709_v59 }
  0xd0   : > { %13977 = vst [vmem:[#allocation40_spill] sm:$0xff] %v8751_v50 }
  0xd1   : > { %v1293_v61 = vpop.f32.mrf.mxu2  ;;  %13978 = vst [vmem:[#allocation41_spill] sm:$0xff] %v8753_v51 }
  0xd2   : > { %v1294_v62 = vadd.f32 %v1293_v61, %v1221_v60  ;;  %v1366_v63 = vpop.f32.mrf.mxu3  ;;  %v1222_v5 = vpop.f32.mrf.mxu1  ;;  %v8756_v61 = vpack.c.bf16 %v287_v30, %v283_v29 }
  0xd3   : > { %v1149_v4 = vpop.f32.mrf.mxu0 }
  0xd4   : > { %v8715_v6 = vadd.f32 %v1366_v63, %v1294_v62  ;;  %v1150_v7 = vadd.f32 %v1149_v4, %v8685_v31  ;;  %13979 = vst [vmem:[#allocation42_spill] sm:$0xff] %v8756_v61 }
  0xd6   : > { %v8719_v8 = vmul.f32 0.70710677, %v8715_v6  ;;  %v1223_v28 = vadd.f32 %v1222_v5, %v1150_v7 }
  0xd8   : > { %v2506_v27 = vmul.f32 %v8719_v8, %v8719_v8 }
  0xd9   : > { %v1295_v32 = vpop.f32.mrf.mxu2 }
  0xda   : > { %v8749_v34 = vmin.f32 %v2506_v27, 16.0  ;;  %v1296_v35 = vadd.f32 %v1295_v32, %v1223_v28  ;;  %v1368_v40 = vpop.f32.mrf.mxu3  ;;  %v1225_v5 = vpop.f32.mrf.mxu1 }
  0xdb   : > { %v1152_v42 = vpop.f32.mrf.mxu0 }
  0xdc   : > { %v1153_v60 = vadd.f32 %v1152_v42, %v8685_v31  ;;  %v2508_v62 = vmul.f32 2.1237322e-06, %v8749_v34  ;;  %v2519_v63 = vmul.f32 3.8918573e-05, %v8749_v34  ;;  %v8760_v4 = vadd.f32 %v1368_v40, %v1296_v35 }
  0xdd   : > { %1264 = vmatmul.bf16.gmra.mxu1 %v8751_v50  ;;  %v293_v50 = vld [vmem:[%s13842_s0 + $0x2a8] sm:$0xff] }
  0xde   : > { %1191 = vmatmul.bf16.gmra.mxu0 %v8747_v33  ;;  %v2509_v7 = vadd.f32 0.00028619796, %v2508_v62  ;;  %v2520_v9 = vadd.f32 0.001143296, %v2519_v63  ;;  %v1226_v10 = vadd.f32 %v1225_v5, %v1153_v60  ;;  %1337 = vmatmul.bf16.gmra.mxu2 %v8753_v51  ;;  %v8766_v11 = vmul.f32 0.70710677, %v8760_v4 }
  0xdf   : > { %1410 = vmatmul.bf16.gmra.mxu3 %v8756_v61 }
  0xe0   : > { %v2510_v20 = vmul.f32 %v2509_v7, %v8749_v34  ;;  %v2521_v21 = vmul.f32 %v2520_v9, %v8749_v34  ;;  %v2666_v22 = vmul.f32 %v8766_v11, %v8766_v11  ;;  %v288_v9 = vld [vmem:[%s13842_s0 + $0x280] sm:$0xff] }
  0xe1   : > { %v1298_v27 = vpop.f32.mrf.mxu2 }
  0xe2   : > { %v2511_v28 = vadd.f32 0.0036580483, %v2510_v20  ;;  %v2522_v29 = vadd.f32 0.014752088, %v2521_v21  ;;  %v1299_v30 = vadd.f32 %v1298_v27, %v1226_v10  ;;  %v8773_v35 = vmin.f32 %v2666_v22, 16.0  ;;  %v1371_v40 = vpop.f32.mrf.mxu3  ;;  %v292_v10 = vld [vmem:[%s13842_s0 + $0x2a0] sm:$0xff] }
  0xe3   : > { %v1154_v32 = vpop.f32.mrf.mxu0  ;;  %v289_v22 = vld [vmem:[%s13842_s0 + $0x288] sm:$0xff]  ;;  %v290_v27 = vld [vmem:[%s13842_s0 + $0x290] sm:$0xff]  ;;  %v8802_v51 = vpack.c.bf16 %v292_v10, %v288_v9 }
  0xe4   : > { %v2512_v42 = vmul.f32 %v2511_v28, %v8749_v34  ;;  %v2523_v60 = vmul.f32 %v2522_v29, %v8749_v34  ;;  %v8777_v62 = vadd.f32 %v1371_v40, %v1299_v30  ;;  %v1155_v63 = vadd.f32 %v1154_v32, %v8685_v31  ;;  %v294_v28 = vld [vmem:[%s13842_s0 + $0x2b0] sm:$0xff]  ;;  %v1227_v40 = vpop.f32.mrf.mxu1 }
  0xe5   : > { %v2668_v5 = vmul.f32 2.1237322e-06, %v8773_v35  ;;  %v2679_v7 = vmul.f32 3.8918573e-05, %v8773_v35  ;;  %13980 = vst [vmem:[#allocation43_spill] sm:$0xff] %v8802_v51  ;;  %v8820_v49 = vpack.c.bf16 %v294_v28, %v290_v27  ;;  %v8825_v47 = vpack.c.bf16 %v293_v50, %v289_v22 }
  0xe6   : > { %v2513_v20 = vadd.f32 0.05243302, %v2512_v42  ;;  %v2524_v21 = vadd.f32 0.112945676, %v2523_v60  ;;  %v8798_v32 = vmul.f32 0.70710677, %v8777_v62  ;;  %v1228_v61 = vadd.f32 %v1227_v40, %v1155_v63 }
  0xe7   : > { %v2669_v29 = vadd.f32 0.00028619796, %v2668_v5  ;;  %v2680_v30 = vadd.f32 0.001143296, %v2679_v7  ;;  %v291_v5 = vld [vmem:[%s13842_s0 + $0x298] sm:$0xff]  ;;  %13981 = vst [vmem:[#allocation44_spill] sm:$0xff] %v8820_v49  ;;  %v7278_v27 = vor.u32 %v7768_v3, %v7275_v2 }
  0xe8   : > { %v2514_v42 = vmul.f32 %v2513_v20, %v8749_v34  ;;  %v2525_v60 = vmul.f32 %v2524_v21, %v8749_v34  ;;  %v295_v7 = vld [vmem:[%s13842_s0 + $0x2b8] sm:$0xff]  ;;  %v7736_v20 = vld [vmem:[%s8269_s29 + $0x44] sm:$0xf]  ;;  %v7147_v21 = vld [vmem:[%s8269_s29 + $0x50] sm:$0xf0]  ;;  %v2826_v40 = vmul.f32 %v8798_v32, %v8798_v32  ;;  %13982 = vst [vmem:[#allocation45_spill] sm:$0xff] %v8825_v47 }
  0xe9   : > { %v7832_v63 = vld [vmem:[%s8269_s29 + $0x344] sm:$0xf]  ;;  %v2670_v9 = vmul.f32 %v2669_v29, %v8773_v35  ;;  %v2681_v10 = vmul.f32 %v2680_v30, %v8773_v35  ;;  %v1300_v59 = vpop.f32.mrf.mxu2  ;;  %v7150_v26 = vor.u32 %v7736_v20, %v7147_v21  ;;  %v8827_v29 = vpack.c.bf16 %v295_v7, %v291_v5  ;;  %1508 = vmatpush.bf16.msrb.mxu1 %v7278_v27  ;;  %v301_v7 = vld [vmem:[%s13842_s0 + $0x2e8] sm:$0xff] }
  0xea   : > { %v2515_v43 = vadd.f32 0.18741608, %v2514_v42  ;;  %v2526_v33 = vadd.f32 0.4994258, %v2525_v60  ;;  %v1301_v24 = vadd.f32 %v1300_v59, %v1228_v61  ;;  %v7534_v41 = vor.u32 %v7832_v63, %v7531_v25  ;;  %v1373_v25 = vpop.f32.mrf.mxu3 }
  0xeb   : > { %v2671_v1 = vadd.f32 0.0036580483, %v2670_v9  ;;  %v1157_v23 = vpop.f32.mrf.mxu0  ;;  %13983 = vst [vmem:[#allocation46_spill] sm:$0xff] %v8827_v29  ;;  %1435 = vmatpush.bf16.msrb.mxu0 %v7150_v26  ;;  %v2682_v28 = vadd.f32 0.014752088, %v2681_v10  ;;  %v8832_v59 = vmin.f32 %v2826_v40, 16.0 }
  0xec   : > { %v2516_v30 = vmul.f32 %v2515_v43, %v8749_v34  ;;  %v2527_v46 = vmul.f32 %v2526_v33, %v8749_v34  ;;  %1654 = vmatpush.bf16.msrb.mxu3 %v7534_v41  ;;  %v8838_v22 = vadd.f32 %v1373_v25, %v1301_v24  ;;  %v296_v24 = vld [vmem:[%s13842_s0 + $0x2c0] sm:$0xff]  ;;  %v1230_v60 = vpop.f32.mrf.mxu1  ;;  %v8864_v20 = vmul.f32 0.5, %v8760_v4 }
  0xed   : > { %v2672_v42 = vmul.f32 %v2671_v1, %v8773_v35  ;;  %v2683_v50 = vmul.f32 %v2682_v28, %v8773_v35  ;;  %v2828_v2 = vmul.f32 2.1237322e-06, %v8832_v59  ;;  %v2839_v3 = vmul.f32 3.8918573e-05, %v8832_v59  ;;  %1269 = vmatmul.bf16.gmra.mxu1 %v8825_v47  ;;  %v300_v43 = vld [vmem:[%s13842_s0 + $0x2e0] sm:$0xff] }
  0xee   : > { %1196 = vmatmul.bf16.gmra.mxu0 %v8802_v51  ;;  %v8835_v61 = vadd.f32 1.0, %v2527_v46  ;;  %1342 = vmatmul.bf16.gmra.mxu2 %v8820_v49  ;;  %v1158_v1 = vadd.f32 %v1157_v23, %v8685_v31  ;;  %v8847_v46 = vmul.f32 0.5, %v8715_v6  ;;  %v2517_v41 = vadd.f32 1.1283791, %v2516_v30  ;;  %v297_v6 = vld [vmem:[%s13842_s0 + $0x2c8] sm:$0xff] }
  0xef   : > { %v2673_v26 = vadd.f32 0.05243302, %v2672_v42  ;;  %1415 = vmatmul.bf16.gmra.mxu3 %v8827_v29  ;;  %v2684_v33 = vadd.f32 0.112945676, %v2683_v50  ;;  %v2829_v34 = vadd.f32 0.00028619796, %v2828_v2  ;;  %v8877_v4 = vpack.c.bf16 %v300_v43, %v296_v24 }
  0xf0   : > { %7900 = vrcp.f32 %v8835_v61  ;;  %v8867_v21 = vmul.f32 0.5, %v8777_v62  ;;  %v2840_v63 = vadd.f32 0.001143296, %v2839_v3  ;;  %v8870_v9 = vmul.f32 0.70710677, %v8838_v22 }
  0xf1   : > { %v2674_v23 = vmul.f32 %v2673_v26, %v8773_v35  ;;  %v1303_v5 = vpop.f32.mrf.mxu2  ;;  %v2685_v40 = vmul.f32 %v2684_v33, %v8773_v35  ;;  %v2830_v30 = vmul.f32 %v2829_v34, %v8832_v59  ;;  %v1231_v27 = vadd.f32 %v1230_v60, %v1158_v1  ;;  %13984 = vst [vmem:[#allocation47_spill] sm:$0xff] %v8877_v4  ;;  %v298_v60 = vld [vmem:[%s13842_s0 + $0x2d0] sm:$0xff]  ;;  %v7796_v47 = vld [vmem:[%s8269_s29 + $0x224] sm:$0xf] }
  0xf2   : > { %v2841_v28 = vmul.f32 %v2840_v63, %v8832_v59  ;;  %v2986_v42 = vmul.f32 %v8870_v9, %v8870_v9  ;;  %v8879_v25 = vpack.c.bf16 %v301_v7, %v297_v6  ;;  %v8882_v62 = vmul.f32 %v2517_v41, %v8719_v8  ;;  %v302_v6 = vld [vmem:[%s13842_s0 + $0x2f0] sm:$0xff] }
  0xf3   : > { %v2675_v10 = vadd.f32 0.18741608, %v2674_v23  ;;  %v2686_v26 = vadd.f32 0.4994258, %v2685_v40  ;;  %v2831_v2 = vadd.f32 0.0036580483, %v2830_v30  ;;  %v1159_v3 = vpop.f32.mrf.mxu0  ;;  %vm2534_vm0 = vweird.f32 %v8835_v61 }
  0xf4   : > { %13985 = vst [vmem:[#allocation48_spill] sm:$0xff] %v8879_v25  ;;  %v2538_v1 = vand.u32 2147483647, %v8835_v61  ;;  %v2842_v33 = vadd.f32 0.014752088, %v2841_v28  ;;  %v8887_v34 = vmin.f32 %v2986_v42, 16.0  ;;  %v1304_v41 = vadd.f32 %v1303_v5, %v1231_v27  ;;  %v1376_v27 = vpop.f32.mrf.mxu3 }
  0xf5   : > { %v2676_v50 = vmul.f32 %v2675_v10, %v8773_v35  ;;  %v2540_v43 = vand.u32 2147483648, %v8835_v61  ;;  %v2687_v8 = vmul.f32 %v2686_v26, %v8773_v35  ;;  %v2832_v7 = vmul.f32 %v2831_v2, %v8832_v59 }
  0xf6   : > { %v7901_v23 = vpop.eup %7900  ;;  %v2843_v63 = vmul.f32 %v2842_v33, %v8832_v59  ;;  %v2988_v10 = vmul.f32 2.1237322e-06, %v8887_v34  ;;  %v1160_v40 = vadd.f32 %v1159_v3, %v8685_v31  ;;  %v2999_v5 = vmul.f32 3.8918573e-05, %v8887_v34 }
  0xf7   : > { %v2530_v24 = vmul.f32 %v7901_v23, %v8835_v61  ;;  %v2677_v28 = vadd.f32 1.1283791, %v2676_v50  ;;  %v8902_v35 = vadd.f32 1.0, %v2687_v8  ;;  %v2833_v42 = vadd.f32 0.05243302, %v2832_v7  ;;  %v1232_v50 = vpop.f32.mrf.mxu1 }
  0xf8   : > { %v2844_v26 = vadd.f32 0.112945676, %v2843_v63  ;;  %v2989_v29 = vadd.f32 0.00028619796, %v2988_v10  ;;  %v8905_v49 = vpack.c.bf16 %v302_v6, %v298_v60  ;;  %vm2535_vm1 = vweird.f32 %v7901_v23  ;;  %v299_v60 = vld [vmem:[%s13842_s0 + $0x2d8] sm:$0xff] }
  0xf9   : > { %v2531_v30 = vsub.f32 1.0, %v2530_v24  ;;  %vm8907_vm2 = vcmp.eq.f32.partialorder %v2538_v1, 8.507059e+37  ;;  %7902 = vrcp.f32 %v8902_v35  ;;  %v1305_v3 = vpop.f32.mrf.mxu2  ;;  %v2834_v24 = vmul.f32 %v2833_v42, %v8832_v59  ;;  %v303_v1 = vld [vmem:[%s13842_s0 + $0x2f8] sm:$0xff]  ;;  %vm2536_vm3 = vmor %vm2534_vm0, %vm2535_vm1 }
  0xfa   : > { %13986 = vst [vmem:[#allocation49_spill] sm:$0xff] %v8905_v49  ;;  %v2845_v8 = vmul.f32 %v2844_v26, %v8832_v59  ;;  %v2990_v7 = vmul.f32 %v2989_v29, %v8887_v34  ;;  %v1233_v63 = vadd.f32 %v1232_v50, %v1160_v40  ;;  %v2541_v10 = vor.u32 1.1754944e-38, %v2540_v43  ;;  %v7732_v50 = vld [vmem:[%s8269_s29 + $0x24] sm:$0xf] }
  0xfb   : > { %v2532_v2 = vmul.f32 %v7901_v23, %v2531_v30  ;;  %v3000_v30 = vadd.f32 0.001143296, %v2999_v5  ;;  %v8922_v42 = vadd.f32 %v1376_v27, %v1304_v41  ;;  %v8929_v29 = vmul.f32 %v2677_v28, %v8766_v11  ;;  %v7387_v27 = vld [vmem:[%s8269_s29 + $0x230] sm:$0xf0] }
  0xfc   : > { %v2835_v40 = vadd.f32 0.18741608, %v2834_v24  ;;  %v2846_v26 = vadd.f32 0.4994258, %v2845_v8  ;;  %v2991_v41 = vadd.f32 0.0036580483, %v2990_v7  ;;  %v8936_v61 = vpack.c.bf16 %v303_v1, %v299_v60 }
  0xfd   : > { %v2533_v6 = vadd.f32 %v7901_v23, %v2532_v2  ;;  %v1306_v2 = vadd.f32 %v1305_v3, %v1233_v63  ;;  %v3001_v5 = vmul.f32 %v3000_v30, %v8887_v34  ;;  %1274 = vmatmul.bf16.gmra.mxu1 %v8879_v25  ;;  %vm2694_vm4 = vweird.f32 %v8902_v35  ;;  %v7131_v24 = vld [vmem:[%s8269_s29 + $0x30] sm:$0xf0]  ;;  %v7828_v8 = vld [vmem:[%s8269_s29 + $0x324] sm:$0xf]  ;;  %v1162_v63 = vpop.f32.mrf.mxu0 }
  0xfe   : > { %1201 = vmatmul.bf16.gmra.mxu0 %v8877_v4  ;;  %1347 = vmatmul.bf16.gmra.mxu2 %v8905_v49  ;;  %13989 = vst [vmem:[#allocation50_spill] sm:$0xff] %v8936_v61  ;;  %v2836_v28 = vmul.f32 %v2835_v40, %v8832_v59  ;;  %v2847_v3 = vmul.f32 %v2846_v26, %v8832_v59  ;;  %v7515_v7 = vld [vmem:[%s8269_s29 + $0x330] sm:$0xf0]  ;;  %v2700_v59 = vand.u32 2147483648, %v8902_v35  ;;  %v7764_v26 = vld [vmem:[%s8269_s29 + $0x124] sm:$0xf] }
  0xff   : > { %v2537_v43 = vsel %vm2536_vm3, %v7901_v23, %v2533_v6  ;;  %v7390_v23 = vor.u32 %v7796_v47, %v7387_v27  ;;  %v7903_v6 = vpop.eup %7902  ;;  %v2992_v33 = vmul.f32 %v2991_v41, %v8887_v34  ;;  %v3002_v1 = vadd.f32 0.014752088, %v3001_v5  ;;  %1420 = vmatmul.bf16.gmra.mxu3 %v8936_v61  ;;  %v7259_v5 = vld [vmem:[%s8269_s29 + $0x130] sm:$0xf0] }
 0x100   : > { %v2542_v11 = vsel %vm8907_vm2, %v2541_v10, %v2537_v43  ;;  %v7134_v10 = vor.u32 %v7732_v50, %v7131_v24  ;;  %v2690_v30 = vmul.f32 %v7903_v6, %v8902_v35  ;;  %v2698_v47 = vand.u32 2147483647, %v8902_v35  ;;  %v1378_v50 = vpop.f32.mrf.mxu3 }
 0x101   : > { %v2543_v60 = vmul.f32 %v2542_v11, %v8882_v62  ;;  %v8953_v40 = vadd.f32 1.0, %v2847_v3  ;;  %1582 = vmatpush.bf16.msrb.mxu2 %v7390_v23  ;;  %v2993_v27 = vadd.f32 0.05243302, %v2992_v33  ;;  %v3003_v62 = vmul.f32 %v3002_v1, %v8887_v34 }
 0x102   : > { %1436 = vmatpush.bf16.msrb.mxu0 %v7134_v10  ;;  %v7518_v41 = vor.u32 %v7828_v8, %v7515_v7  ;;  %v2691_v11 = vsub.f32 1.0, %v2690_v30  ;;  %v2837_v24 = vadd.f32 1.1283791, %v2836_v28  ;;  %v8959_v61 = vadd.f32 %v1378_v50, %v1306_v2  ;;  %v1235_v30 = vpop.f32.mrf.mxu1 }
 0x103   : > { %v7623_v43 = vclamps-f32 %v2543_v60, 1.0  ;;  %7904 = vrcp.f32 %v8953_v40  ;;  %vm2695_vm5 = vweird.f32 %v7903_v6  ;;  %v2994_v3 = vmul.f32 %v2993_v27, %v8887_v34 }
 0x104   : > { %1655 = vmatpush.bf16.msrb.mxu3 %v7518_v41  ;;  %v1163_v23 = vadd.f32 %v1162_v63, %v8685_v31  ;;  %v2692_v60 = vmul.f32 %v7903_v6, %v2691_v11  ;;  %v3004_v33 = vadd.f32 0.112945676, %v3003_v62  ;;  %v7262_v1 = vor.u32 %v7764_v26, %v7259_v5  ;;  %v304_v63 = vld [vmem:[%s13842_s0 + $0x300] sm:$0xf]  ;;  %vm2696_vm7 = vmor %vm2694_vm4, %vm2695_vm5  ;;  %v1308_v11 = vpop.f32.mrf.mxu2 }
 0x105   : > { %v6506_v49 = vadd.f32 1.0, %v7623_v43  ;;  %v8964_v8 = vmul.f32 0.70710677, %v8922_v42  ;;  %vm8967_vm6 = vcmp.eq.f32.partialorder %v2698_v47, 8.507059e+37  ;;  %v2701_v2 = vor.u32 1.1754944e-38, %v2700_v59 }
 0x106   : > { %v2995_v10 = vadd.f32 0.18741608, %v2994_v3  ;;  %v2693_v43 = vadd.f32 %v7903_v6, %v2692_v60  ;;  %v8975_v27 = vmul.f32 %v2837_v24, %v8798_v32  ;;  %v3005_v26 = vmul.f32 %v3004_v33, %v8887_v34  ;;  %1509 = vmatpush.bf16.msrb.mxu1 %v7262_v1  ;;  %v1164_v24 = vpop.f32.mrf.mxu0 }
 0x107   : > { %v6606_v28 = vmul.f32 %v6506_v49, %v8847_v46  ;;  %v3146_v49 = vmul.f32 %v8964_v8, %v8964_v8  ;;  %vm2854_vm8 = vweird.f32 %v8953_v40  ;;  %v2858_v32 = vand.u32 2147483647, %v8953_v40 }
 0x108   : > { %v2996_v46 = vmul.f32 %v2995_v10, %v8887_v34  ;;  %v8992_v47 = vmul.f32 0.70710677, %v8959_v61  ;;  %v1236_v59 = vadd.f32 %v1235_v30, %v1163_v23  ;;  %v2697_v41 = vsel %vm2696_vm7, %v7903_v6, %v2693_v43 }
 0x109   : > { %6706 = vst [vmem:[%s8982_s18] sm:$0xff] %v6606_v28  ;;  %v7905_v62 = vpop.eup %7904  ;;  %v3006_v5 = vadd.f32 0.4994258, %v3005_v26  ;;  %v8994_v50 = vmin.f32 %v3146_v49, 16.0  ;;  %v8996_v3 = vpack.c.bf16 %v304_v63, %v304_v63  ;;  %v2702_v35 = vsel %vm8967_vm6, %v2701_v2, %v2697_v41 }
 0x10a   : > { %v2850_v60 = vmul.f32 %v7905_v62, %v8953_v40  ;;  %v2860_v33 = vand.u32 2147483648, %v8953_v40  ;;  %v2997_v1 = vadd.f32 1.1283791, %v2996_v46  ;;  %v2703_v28 = vmul.f32 %v2702_v35, %v8929_v29 }
 0x10b   : > { %13992 = vst [vmem:[#allocation51_spill] sm:$0xff] %v8996_v3  ;;  %v3007_v23 = vmul.f32 %v3006_v5, %v8887_v34  ;;  %v3148_v6 = vmul.f32 2.1237322e-06, %v8994_v50  ;;  %v3159_v10 = vmul.f32 3.8918573e-05, %v8994_v50  ;;  %v3306_v63 = vmul.f32 %v8992_v47, %v8992_v47 }
 0x10c   : > { %v2851_v30 = vsub.f32 1.0, %v2850_v60  ;;  %v1309_v43 = vadd.f32 %v1308_v11, %v1236_v59  ;;  %v1165_v7 = vadd.f32 %v1164_v24, %v8685_v31  ;;  %v7627_v2 = vclamps-f32 %v2703_v28, 1.0  ;;  %v1381_v24 = vpop.f32.mrf.mxu3 }
 0x10d   : > { %v9010_v26 = vadd.f32 1.0, %v3007_v23  ;;  %v3149_v49 = vadd.f32 0.00028619796, %v3148_v6  ;;  %v3160_v29 = vadd.f32 0.001143296, %v3159_v10  ;;  %vm2855_vm9 = vweird.f32 %v7905_v62  ;;  %v1237_v23 = vpop.f32.mrf.mxu1 }
 0x10e   : > { %1206 = vmatmul.bf16.gmra.mxu0 %v8996_v3  ;;  %v2852_v34 = vmul.f32 %v7905_v62, %v2851_v30  ;;  %vm9012_vm10 = vcmp.eq.f32.partialorder %v2858_v32, 8.507059e+37  ;;  %v9016_v41 = vmin.f32 %v3306_v63, 16.0  ;;  %v6510_v59 = vadd.f32 1.0, %v7627_v2  ;;  %v7792_v6 = vld [vmem:[%s8269_s29 + $0x204] sm:$0xf]  ;;  %vm2856_vm11 = vmor %vm2854_vm8, %vm2855_vm9 }
 0x10f   : > { %v2861_v5 = vor.u32 1.1754944e-38, %v2860_v33  ;;  %v9019_v11 = vmul.f32 %v2997_v1, %v8870_v9  ;;  %7906 = vrcp.f32 %v9010_v26  ;;  %v3150_v60 = vmul.f32 %v3149_v49, %v8994_v50  ;;  %v7371_v10 = vld [vmem:[%s8269_s29 + $0x210] sm:$0xf0]  ;;  %v7728_v30 = vld [vmem:[%s8269_s29 + $0x4] sm:$0xf] }
 0x110   : > { %v2853_v35 = vadd.f32 %v7905_v62, %v2852_v34  ;;  %v3161_v28 = vmul.f32 %v3160_v29, %v8994_v50  ;;  %v9024_v32 = vadd.f32 %v1381_v24, %v1309_v43  ;;  %v6610_v33 = vmul.f32 %v6510_v59, %v8864_v20  ;;  %v7115_v2 = vld [vmem:[%s8269_s29 + $0x10] sm:$0xf0] }
 0x111   : > { %v3308_v9 = vmul.f32 2.1237322e-06, %v9016_v41  ;;  %v3319_v1 = vmul.f32 3.8918573e-05, %v9016_v41  ;;  %v9035_v63 = vadd.f32 %v1237_v23, %v1165_v7  ;;  %v3018_v43 = vand.u32 2147483647, %v9010_v26 }
 0x112   : > { %v2857_v49 = vsel %vm2856_vm11, %v7905_v62, %v2853_v35  ;;  %v3151_v29 = vadd.f32 0.0036580483, %v3150_v60  ;;  %v3162_v34 = vadd.f32 0.014752088, %v3161_v28  ;;  %6710 = vst [vmem:[%s8982_s18 + $0x20] sm:$0xff] %v6610_v33  ;;  %v3020_v40 = vand.u32 2147483648, %v9010_v26 }
 0x113   : > { %v2862_v20 = vsel %vm9012_vm10, %v2861_v5, %v2857_v49  ;;  %v3309_v59 = vadd.f32 0.00028619796, %v3308_v9  ;;  %v3320_v24 = vadd.f32 0.001143296, %v3319_v1  ;;  %v9047_v35 = vmul.f32 0.70710677, %v9024_v32 }
 0x114   : > { %v2863_v7 = vmul.f32 %v2862_v20, %v8975_v27  ;;  %v3152_v23 = vmul.f32 %v3151_v29, %v8994_v50  ;;  %v3163_v62 = vmul.f32 %v3162_v34, %v8994_v50  ;;  %v7374_v5 = vor.u32 %v7792_v6, %v7371_v10  ;;  %v7824_v49 = vld [vmem:[%s8269_s29 + $0x304] sm:$0xf]  ;;  %v7499_v9 = vld [vmem:[%s8269_s29 + $0x310] sm:$0xf0] }
 0x115   : > { %v7907_v60 = vpop.eup %7906  ;;  %v3310_v28 = vmul.f32 %v3309_v59, %v9016_v41  ;;  %v3321_v46 = vmul.f32 %v3320_v24, %v9016_v41  ;;  %v7118_v33 = vor.u32 %v7728_v30, %v7115_v2  ;;  %v7760_v1 = vld [vmem:[%s8269_s29 + $0x104] sm:$0xf]  ;;  %vm9055_vm13 = vcmp.eq.f32.partialorder %v3018_v43, 8.507059e+37  ;;  %v7243_v20 = vld [vmem:[%s8269_s29 + $0x110] sm:$0xf0] }
 0x116   : > { %v7631_v25 = vclamps-f32 %v2863_v7, 1.0  ;;  %v3010_v27 = vmul.f32 %v7907_v60, %v9010_v26  ;;  %vm3015_vm12 = vweird.f32 %v7907_v60  ;;  %v3153_v34 = vadd.f32 0.05243302, %v3152_v23  ;;  %1583 = vmatpush.bf16.msrb.mxu2 %v7374_v5 }
 0x117   : > { %v3164_v3 = vadd.f32 0.112945676, %v3163_v62  ;;  %v3311_v4 = vadd.f32 0.0036580483, %v3310_v28  ;;  %v3322_v59 = vadd.f32 0.014752088, %v3321_v46  ;;  %v3466_v6 = vmul.f32 %v9047_v35, %v9047_v35  ;;  %1437 = vmatpush.bf16.msrb.mxu0 %v7118_v33 }
 0x118   : > { %v6514_v10 = vadd.f32 1.0, %v7631_v25  ;;  %v3011_v30 = vsub.f32 1.0, %v3010_v27  ;;  %v3154_v2 = vmul.f32 %v3153_v34, %v8994_v50  ;;  %v7502_v24 = vor.u32 %v7824_v49, %v7499_v9  ;;  %v1310_v25 = vpop.f32.mrf.mxu2 }
 0x119   : > { %v3165_v43 = vmul.f32 %v3164_v3, %v8994_v50  ;;  %v3312_v7 = vmul.f32 %v3311_v4, %v9016_v41  ;;  %v3323_v23 = vmul.f32 %v3322_v59, %v9016_v41  ;;  %v9066_v62 = vmin.f32 %v3466_v6, 16.0  ;;  %v1167_v59 = vpop.f32.mrf.mxu0 }
 0x11a   : > { %v6614_v28 = vmul.f32 %v6514_v10, %v8867_v21  ;;  %v3012_v46 = vmul.f32 %v7907_v60, %v3011_v30  ;;  %v3155_v51 = vadd.f32 0.18741608, %v3154_v2  ;;  %1656 = vmatpush.bf16.msrb.mxu3 %v7502_v24  ;;  %v7246_v5 = vor.u32 %v7760_v1, %v7243_v20 }
 0x11b   : > { %vm3014_vm14 = vweird.f32 %v9010_v26  ;;  %v3166_v33 = vadd.f32 0.4994258, %v3165_v43  ;;  %v3313_v27 = vadd.f32 0.05243302, %v3312_v7  ;;  %v3324_v49 = vadd.f32 0.112945676, %v3323_v23  ;;  %v1383_v23 = vpop.f32.mrf.mxu3 }
 0x11c   : > { %6714 = vst [vmem:[%s8982_s18 + $0x40] sm:$0xff] %v6614_v28  ;;  %v3013_v3 = vadd.f32 %v7907_v60, %v3012_v46  ;;  %v3021_v9 = vor.u32 1.1754944e-38, %v3020_v40  ;;  %v3468_v4 = vmul.f32 2.1237322e-06, %v9066_v62  ;;  %v3479_v34 = vmul.f32 3.8918573e-05, %v9066_v62  ;;  %1510 = vmatpush.bf16.msrb.mxu1 %v7246_v5  ;;  %vm3016_vm15 = vmor %vm3014_vm14, %vm3015_vm12 }
 0x11d   : > { %v3167_v21 = vmul.f32 %v3166_v33, %v8994_v50  ;;  %v3314_v26 = vmul.f32 %v3313_v27, %v9016_v41  ;;  %v3325_v1 = vmul.f32 %v3324_v49, %v9016_v41  ;;  %v1311_v20 = vadd.f32 %v1310_v25, %v9035_v63  ;;  %v1240_v27 = vpop.f32.mrf.mxu1 }
 0x11e   : > { %1438 = vmatmul.bf16.vlgmr.msrb.gmra.mxu0 %v8370_v48  ;;  %v3017_v6 = vsel %vm3016_vm15, %v7907_v60, %v3013_v3  ;;  %v3156_v40 = vmul.f32 %v3155_v51, %v8994_v50  ;;  %v3469_v10 = vadd.f32 0.00028619796, %v3468_v4  ;;  %v3480_v30 = vadd.f32 0.001143296, %v3479_v34  ;;  %v305_v60 = vld [vmem:[%s13842_s0 + $0x308] sm:$0xf] }
 0x11f   : > { %v3022_v2 = vsel %vm9055_vm13, %v3021_v9, %v3017_v6  ;;  %v9082_v24 = vadd.f32 1.0, %v3167_v21  ;;  %v3315_v43 = vadd.f32 0.18741608, %v3314_v26  ;;  %v3326_v7 = vadd.f32 0.4994258, %v3325_v1 }
 0x120   : > { %v3023_v28 = vmul.f32 %v3022_v2, %v9019_v11  ;;  %v3470_v46 = vmul.f32 %v3469_v10, %v9066_v62  ;;  %v3481_v5 = vmul.f32 %v3480_v30, %v9066_v62  ;;  %v2318_v63 = vmul.f32 0.5, %v8838_v22  ;;  %v1313_v26 = vpop.f32.mrf.mxu2  ;;  %v306_v30 = vld [vmem:[%s13842_s0 + $0x310] sm:$0xf] }
 0x121   : > { %v9089_v51 = vmul.f32 0.5, %v8922_v42  ;;  %7908 = vrcp.f32 %v9082_v24  ;;  %v9092_v50 = vadd.f32 %v1383_v23, %v1311_v20  ;;  %v3157_v25 = vadd.f32 1.1283791, %v3156_v40  ;;  %v1169_v2 = vpop.f32.mrf.mxu0 }
 0x122   : > { %v7635_v29 = vclamps-f32 %v3023_v28, 1.0  ;;  %v3327_v11 = vmul.f32 %v3326_v7, %v9016_v41  ;;  %v3471_v33 = vadd.f32 0.0036580483, %v3470_v46  ;;  %v3178_v49 = vand.u32 2147483647, %v9082_v24 }
 0x123   : > { %v9100_v22 = vmul.f32 0.5, %v8959_v61  ;;  %v3316_v42 = vmul.f32 %v3315_v43, %v9016_v41  ;;  %v3482_v3 = vadd.f32 0.014752088, %v3481_v5  ;;  %v3180_v4 = vand.u32 2147483648, %v9082_v24 }
 0x124   : > { %v6518_v9 = vadd.f32 1.0, %v7635_v29  ;;  %v9104_v34 = vadd.f32 1.0, %v3327_v11  ;;  %v3472_v21 = vmul.f32 %v3471_v33, %v9066_v62  ;;  %v9109_v20 = vmul.f32 0.70710677, %v9092_v50  ;;  %v1386_v11 = vpop.f32.mrf.mxu3 }
 0x125   : > { %v3483_v1 = vmul.f32 %v3482_v3, %v9066_v62  ;;  %v1168_v61 = vadd.f32 %v1167_v59, %v8685_v31  ;;  %v9112_v6 = vpack.c.bf16 %v305_v60, %v305_v60  ;;  %v3158_v40 = vmul.f32 %v3157_v25, %v8964_v8  ;;  %v307_v8 = vld [vmem:[%s13842_s0 + $0x318] sm:$0xf] }
 0x126   : > { %v6618_v41 = vmul.f32 %v6518_v9, %v2318_v63  ;;  %7910 = vrcp.f32 %v9104_v34  ;;  %v9117_v10 = vmul.f32 0.5, %v9024_v32  ;;  %vm3174_vm0 = vweird.f32 %v9082_v24 }
 0x127   : > { %13997 = vst [vmem:[#allocation52_spill] sm:$0xff] %v9112_v6  ;;  %v7909_v43 = vpop.eup %7908  ;;  %v3317_v7 = vadd.f32 1.1283791, %v3316_v42  ;;  %v3473_v59 = vadd.f32 0.05243302, %v3472_v21  ;;  %v3626_v23 = vmul.f32 %v9109_v20, %v9109_v20  ;;  %1279 = vmatmul.bf16.gmra.mxu1 %v9112_v6  ;;  %vm9131_vm1 = vcmp.eq.f32.partialorder %v3178_v49, 8.507059e+37 }
 0x128   : > { %6718 = vst [vmem:[%s8982_s18 + $0x60] sm:$0xff] %v6618_v41  ;;  %v3170_v32 = vmul.f32 %v7909_v43, %v9082_v24  ;;  %v3484_v46 = vadd.f32 0.112945676, %v3483_v1  ;;  %v1241_v5 = vadd.f32 %v1240_v27, %v1168_v61  ;;  %v3181_v63 = vor.u32 1.1754944e-38, %v3180_v4 }
 0x129   : > { %v3338_v60 = vand.u32 2147483647, %v9104_v34  ;;  %v3474_v29 = vmul.f32 %v3473_v59, %v9066_v62  ;;  %v9137_v25 = vmin.f32 %v3626_v23, 16.0  ;;  %v9140_v3 = vpack.c.bf16 %v306_v30, %v306_v30  ;;  %v1242_v30 = vpop.f32.mrf.mxu1 }
 0x12a   : > { %v3171_v33 = vsub.f32 1.0, %v3170_v32  ;;  %v3485_v42 = vmul.f32 %v3484_v46, %v9066_v62  ;;  %v9142_v9 = vpack.c.bf16 %v307_v8, %v307_v8  ;;  %v3318_v49 = vmul.f32 %v3317_v7, %v8992_v47 }
 0x12b   : > { %v3475_v21 = vadd.f32 0.18741608, %v3474_v29  ;;  %v3628_v27 = vmul.f32 2.1237322e-06, %v9137_v25  ;;  %v3639_v4 = vmul.f32 3.8918573e-05, %v9137_v25  ;;  %vm3175_vm2 = vweird.f32 %v7909_v43  ;;  %1352 = vmatmul.bf16.gmra.mxu2 %v9140_v3 }
 0x12c   : > { %14000 = vst [vmem:[#allocation53_spill] sm:$0xff] %v9142_v9  ;;  %v7911_v1 = vpop.eup %7910  ;;  %v3172_v61 = vmul.f32 %v7909_v43, %v3171_v33  ;;  %v3486_v41 = vadd.f32 0.4994258, %v3485_v42  ;;  %1425 = vmatmul.bf16.gmra.mxu3 %v9142_v9  ;;  %v1314_v59 = vadd.f32 %v1313_v26, %v1241_v5  ;;  %vm3334_vm3 = vweird.f32 %v9104_v34  ;;  %v1315_v33 = vpop.f32.mrf.mxu2  ;;  %vm3176_vm4 = vmor %vm3174_vm0, %vm3175_vm2 }
 0x12d   : > { %v3330_v23 = vmul.f32 %v7911_v1, %v9104_v34  ;;  %v3340_v47 = vand.u32 2147483648, %v9104_v34  ;;  %v3629_v7 = vadd.f32 0.00028619796, %v3628_v27  ;;  %v3640_v46 = vadd.f32 0.001143296, %v3639_v4 }
 0x12e   : > { %1443 = vmatmul.bf16.gmra.mxu0 %v8415_v12  ;;  %v3173_v8 = vadd.f32 %v7909_v43, %v3172_v61  ;;  %v3487_v32 = vmul.f32 %v3486_v41, %v9066_v62  ;;  %v1170_v29 = vadd.f32 %v1169_v2, %v8685_v31  ;;  %vm9158_vm5 = vcmp.eq.f32.partialorder %v3338_v60, 8.507059e+37  ;;  %v1172_v41 = vpop.f32.mrf.mxu0 }
 0x12f   : > { %v3331_v26 = vsub.f32 1.0, %v3330_v23  ;;  %v3476_v42 = vmul.f32 %v3475_v21, %v9066_v62  ;;  %v3630_v27 = vmul.f32 %v3629_v7, %v9137_v25  ;;  %v3641_v4 = vmul.f32 %v3640_v46, %v9137_v25 }
 0x130   : > { %v3177_v61 = vsel %vm3176_vm4, %v7909_v43, %v3173_v8  ;;  %v9164_v12 = vadd.f32 1.0, %v3487_v32  ;;  %v9167_v2 = vadd.f32 %v1386_v11, %v1314_v59  ;;  %vm3335_vm6 = vweird.f32 %v7911_v1  ;;  %v1388_v8 = vpop.f32.mrf.mxu3 }
 0x131   : > { %v3182_v24 = vsel %vm9131_vm1, %v3181_v63, %v3177_v61  ;;  %v3332_v23 = vmul.f32 %v7911_v1, %v3331_v26  ;;  %v3631_v60 = vadd.f32 0.0036580483, %v3630_v27  ;;  %v3341_v9 = vor.u32 1.1754944e-38, %v3340_v47  ;;  %vm3336_vm7 = vmor %vm3334_vm3, %vm3335_vm6 }
 0x132   : > { %v3183_v48 = vmul.f32 %v3182_v24, %v3158_v40  ;;  %7912 = vrcp.f32 %v9164_v12  ;;  %v1243_v62 = vadd.f32 %v1242_v30, %v1170_v29  ;;  %v3642_v7 = vadd.f32 0.014752088, %v3641_v4 }
 0x133   : > { %v3333_v21 = vadd.f32 %v7911_v1, %v3332_v23  ;;  %v3632_v43 = vmul.f32 %v3631_v60, %v9137_v25  ;;  %v1173_v11 = vadd.f32 %v1172_v41, %v8685_v31  ;;  %v3477_v28 = vadd.f32 1.1283791, %v3476_v42  ;;  %v1245_v42 = vpop.f32.mrf.mxu1 }
 0x134   : > { %v7639_v59 = vclamps-f32 %v3183_v48, 1.0  ;;  %v9177_v63 = vmul.f32 0.70710677, %v9167_v2  ;;  %v1316_v40 = vadd.f32 %v1315_v33, %v1243_v62  ;;  %v3498_v32 = vand.u32 2147483647, %v9164_v12  ;;  %v1318_v23 = vpop.f32.mrf.mxu2 }
 0x135   : > { %v3337_v47 = vsel %vm3336_vm7, %v7911_v1, %v3333_v21  ;;  %v3633_v30 = vadd.f32 0.05243302, %v3632_v43  ;;  %v3643_v46 = vmul.f32 %v3642_v7, %v9137_v25  ;;  %v1246_v61 = vadd.f32 %v1245_v42, %v1173_v11 }
 0x136   : > { %v6522_v29 = vadd.f32 1.0, %v7639_v59  ;;  %v3342_v26 = vsel %vm9158_vm5, %v3341_v9, %v3337_v47  ;;  %v3786_v48 = vmul.f32 %v9177_v63, %v9177_v63  ;;  %v9185_v34 = vadd.f32 %v1388_v8, %v1316_v40  ;;  %v1174_v8 = vpop.f32.mrf.mxu0 }
 0x137   : > { %v3343_v27 = vmul.f32 %v3342_v26, %v3318_v49  ;;  %v3634_v33 = vmul.f32 %v3633_v30, %v9137_v25  ;;  %v3644_v1 = vadd.f32 0.112945676, %v3643_v46  ;;  %1511 = vmatmul.bf16.vlgmr.msrb.gmra.mxu1 %v8375_v53  ;;  %v3478_v5 = vmul.f32 %v3477_v28, %v9047_v35 }
 0x138   : > { %v7913_v4 = vpop.eup %7912  ;;  %v6622_v41 = vmul.f32 %v6522_v29, %v9089_v51  ;;  %v9191_v9 = vmin.f32 %v3786_v48, 16.0  ;;  %v9194_v24 = vmul.f32 0.70710677, %v9185_v34  ;;  %vm9197_vm8 = vcmp.eq.f32.partialorder %v3498_v32, 8.507059e+37  ;;  %v1391_v48 = vpop.f32.mrf.mxu3 }
 0x139   : > { %v7643_v60 = vclamps-f32 %v3343_v27, 1.0  ;;  %v3490_v49 = vmul.f32 %v7913_v4, %v9164_v12  ;;  %v3500_v21 = vand.u32 2147483648, %v9164_v12  ;;  %v3645_v51 = vmul.f32 %v3644_v1, %v9137_v25 }
 0x13a   : > { %6722 = vst [vmem:[%s8982_s18 + $0x80] sm:$0xff] %v6622_v41  ;;  %v3788_v35 = vmul.f32 2.1237322e-06, %v9191_v9  ;;  %v3799_v43 = vmul.f32 3.8918573e-05, %v9191_v9  ;;  %v3946_v7 = vmul.f32 %v9194_v24, %v9194_v24  ;;  %v1319_v40 = vadd.f32 %v1318_v23, %v1246_v61 }
 0x13b   : > { %v6526_v11 = vadd.f32 1.0, %v7643_v60  ;;  %v3491_v59 = vsub.f32 1.0, %v3490_v49  ;;  %v3635_v28 = vadd.f32 0.18741608, %v3634_v33  ;;  %vm3494_vm9 = vweird.f32 %v9164_v12  ;;  %1584 = vmatmul.bf16.vlgmr.msrb.gmra.mxu2 %v8377_v54 }
 0x13c   : > { %v3646_v47 = vadd.f32 0.4994258, %v3645_v51  ;;  %v3789_v32 = vadd.f32 0.00028619796, %v3788_v35  ;;  %v3800_v30 = vadd.f32 0.001143296, %v3799_v43  ;;  %1657 = vmatmul.bf16.vlgmr.msrb.gmra.mxu3 %v8381_v57  ;;  %vm3495_vm10 = vweird.f32 %v7913_v4 }
 0x13d   : > { %v6626_v46 = vmul.f32 %v6526_v11, %v9100_v22  ;;  %v3492_v29 = vmul.f32 %v7913_v4, %v3491_v59  ;;  %v9212_v26 = vmin.f32 %v3946_v7, 16.0  ;;  %v9218_v1 = vadd.f32 %v1391_v48, %v1319_v40  ;;  %vm3496_vm11 = vmor %vm3494_vm9, %vm3495_vm10  ;;  %v1247_v40 = vpop.f32.mrf.mxu1 }
 0x13e   : > { %1448 = vmatmul.bf16.gmra.mxu0 %v8459_v36  ;;  %v3647_v42 = vmul.f32 %v3646_v47, %v9137_v25  ;;  %v3790_v27 = vmul.f32 %v3789_v32, %v9191_v9  ;;  %v3801_v33 = vmul.f32 %v3800_v30, %v9191_v9  ;;  %v3636_v41 = vmul.f32 %v3635_v28, %v9137_v25 }
 0x13f   : > { %6726 = vst [vmem:[%s8982_s18 + $0xa0] sm:$0xff] %v6626_v46  ;;  %v3493_v61 = vadd.f32 %v7913_v4, %v3492_v29  ;;  %v3948_v22 = vmul.f32 2.1237322e-06, %v9212_v26  ;;  %v3959_v23 = vmul.f32 3.8918573e-05, %v9212_v26  ;;  %v3501_v60 = vor.u32 1.1754944e-38, %v3500_v21  ;;  %v1177_v29 = vpop.f32.mrf.mxu0 }
 0x140   : > { %v9226_v49 = vadd.f32 1.0, %v3647_v42  ;;  %v3791_v51 = vadd.f32 0.0036580483, %v3790_v27  ;;  %v3802_v35 = vadd.f32 0.014752088, %v3801_v33  ;;  %v9234_v28 = vmul.f32 0.5, %v9092_v50 }
 0x141   : > { %v3497_v43 = vsel %vm3496_vm11, %v7913_v4, %v3493_v61  ;;  %v3949_v7 = vadd.f32 0.00028619796, %v3948_v22  ;;  %v3960_v11 = vadd.f32 0.001143296, %v3959_v23  ;;  %v9229_v59 = vmul.f32 0.70710677, %v9218_v1 }
 0x142   : > { %v3502_v25 = vsel %vm9197_vm8, %v3501_v60, %v3497_v43  ;;  %7914 = vrcp.f32 %v9226_v49  ;;  %v9238_v12 = vmul.f32 0.5, %v9167_v2  ;;  %v3637_v47 = vadd.f32 1.1283791, %v3636_v41  ;;  %v1393_v43 = vpop.f32.mrf.mxu3 }
 0x143   : > { %v3503_v21 = vmul.f32 %v3502_v25, %v3478_v5  ;;  %v3792_v4 = vmul.f32 %v3791_v51, %v9191_v9  ;;  %v3803_v32 = vmul.f32 %v3802_v35, %v9191_v9  ;;  %v3658_v30 = vand.u32 2147483647, %v9226_v49  ;;  %v1320_v35 = vpop.f32.mrf.mxu2 }
 0x144   : > { %v3950_v46 = vmul.f32 %v3949_v7, %v9212_v26  ;;  %v3961_v62 = vmul.f32 %v3960_v11, %v9212_v26  ;;  %v4106_v50 = vmul.f32 %v9229_v59, %v9229_v59  ;;  %v1175_v5 = vadd.f32 %v1174_v8, %v8685_v31 }
 0x145   : > { %v7647_v48 = vclamps-f32 %v3503_v21, 1.0  ;;  %v3793_v42 = vadd.f32 0.05243302, %v3792_v4  ;;  %v3804_v2 = vadd.f32 0.112945676, %v3803_v32  ;;  %v9249_v27 = vmul.f32 0.5, %v9185_v34 }
 0x146   : > { %v3951_v33 = vadd.f32 0.0036580483, %v3950_v46  ;;  %v3962_v61 = vadd.f32 0.014752088, %v3961_v62  ;;  %v9251_v41 = vmin.f32 %v4106_v50, 16.0  ;;  %v3660_v23 = vand.u32 2147483648, %v9226_v49 }
 0x147   : > { %v6530_v22 = vadd.f32 1.0, %v7647_v48  ;;  %v3794_v60 = vmul.f32 %v3793_v42, %v9191_v9  ;;  %v3805_v51 = vmul.f32 %v3804_v2, %v9191_v9  ;;  %1516 = vmatmul.bf16.gmra.mxu1 %v8417_v13  ;;  %v1248_v46 = vadd.f32 %v1247_v40, %v1175_v5 }
 0x148   : > { %v7915_v8 = vpop.eup %7914  ;;  %v3952_v34 = vmul.f32 %v3951_v33, %v9212_v26  ;;  %v3963_v7 = vmul.f32 %v3962_v61, %v9212_v26  ;;  %v4108_v11 = vmul.f32 2.1237322e-06, %v9251_v41  ;;  %v4119_v25 = vmul.f32 3.8918573e-05, %v9251_v41  ;;  %v1250_v61 = vpop.f32.mrf.mxu1 }
 0x149   : > { %v6630_v21 = vmul.f32 %v6530_v22, %v9117_v10  ;;  %v3650_v4 = vmul.f32 %v7915_v8, %v9226_v49  ;;  %v3795_v32 = vadd.f32 0.18741608, %v3794_v60  ;;  %v3806_v62 = vadd.f32 0.4994258, %v3805_v51 }
 0x14a   : > { %v3953_v50 = vadd.f32 0.05243302, %v3952_v34  ;;  %v3964_v48 = vadd.f32 0.112945676, %v3963_v7  ;;  %v4109_v33 = vadd.f32 0.00028619796, %v4108_v11  ;;  %v1321_v36 = vadd.f32 %v1320_v35, %v1248_v46  ;;  %v1179_v7 = vpop.f32.mrf.mxu0 }
 0x14b   : > { %6730 = vst [vmem:[%s8982_s18 + $0xc0] sm:$0xff] %v6630_v21  ;;  %v3651_v42 = vsub.f32 1.0, %v3650_v4  ;;  %v3796_v2 = vmul.f32 %v3795_v32, %v9191_v9  ;;  %v3807_v13 = vmul.f32 %v3806_v62, %v9191_v9  ;;  %v4120_v22 = vadd.f32 0.001143296, %v4119_v25  ;;  %1589 = vmatmul.bf16.gmra.mxu2 %v8419_v14  ;;  %v7233_v21 = vld [vmem:[%s8269_s29 + $0xe8] sm:$0xf] }
 0x14c   : > { %v3954_v53 = vmul.f32 %v3953_v50, %v9212_v26  ;;  %v3965_v10 = vmul.f32 %v3964_v48, %v9212_v26  ;;  %vm3655_vm12 = vweird.f32 %v7915_v8  ;;  %vm9269_vm13 = vcmp.eq.f32.partialorder %v3658_v30, 8.507059e+37  ;;  %1662 = vmatmul.bf16.gmra.mxu3 %v8421_v15  ;;  %v7489_v30 = vld [vmem:[%s8269_s29 + $0x2e8] sm:$0xf]  ;;  %v7855_v50 = vld [vmem:[%s8269_s29 + $0x3f4] sm:$0xf0] }
 0x14d   : > { %v3652_v40 = vmul.f32 %v7915_v8, %v3651_v42  ;;  %v3661_v60 = vor.u32 1.1754944e-38, %v3660_v23  ;;  %v9275_v9 = vadd.f32 1.0, %v3807_v13  ;;  %v1178_v34 = vadd.f32 %v1177_v29, %v8685_v31  ;;  %v7823_v23 = vld [vmem:[%s8269_s29 + $0x2f4] sm:$0xf0]  ;;  %v7617_v62 = vld [vmem:[%s8269_s29 + $0x3e8] sm:$0xf] }
 0x14e   : > { %1453 = vmatmul.bf16.gmra.mxu0 %v8497_v52  ;;  %v3955_v51 = vadd.f32 0.18741608, %v3954_v53  ;;  %v3966_v35 = vadd.f32 0.4994258, %v3965_v10  ;;  %v3638_v11 = vmul.f32 %v3637_v47, %v9109_v20  ;;  %vm3654_vm14 = vweird.f32 %v9226_v49  ;;  %v7759_v53 = vld [vmem:[%s8269_s29 + $0xf4] sm:$0xf0] }
 0x14f   : > { %v3653_v25 = vadd.f32 %v7915_v8, %v3652_v40  ;;  %v9283_v4 = vadd.f32 %v1393_v43, %v1321_v36  ;;  %vm3656_vm15 = vmor %vm3654_vm14, %vm3655_vm12  ;;  %v3797_v13 = vadd.f32 1.1283791, %v3796_v2  ;;  %7916 = vrcp.f32 %v9275_v9  ;;  %v1323_v36 = vpop.f32.mrf.mxu2  ;;  %v1396_v43 = vpop.f32.mrf.mxu3 }
 0x150   : > { %v4110_v29 = vmul.f32 %v4109_v33, %v9251_v41  ;;  %v4121_v20 = vmul.f32 %v4120_v22, %v9251_v41  ;;  %v3956_v32 = vmul.f32 %v3955_v51, %v9212_v26  ;;  %v3967_v49 = vmul.f32 %v3966_v35, %v9212_v26 }
 0x151   : > { %v3657_v47 = vsel %vm3656_vm15, %v7915_v8, %v3653_v25  ;;  %v7490_v46 = vor.u32 %v7823_v23, %v7489_v30  ;;  %v3818_v42 = vand.u32 2147483647, %v9275_v9  ;;  %v7234_v2 = vor.u32 %v7759_v53, %v7233_v21 }
 0x152   : > { %v3662_v48 = vsel %vm9269_vm13, %v3661_v60, %v3657_v47  ;;  %v1251_v10 = vadd.f32 %v1250_v61, %v1178_v34  ;;  %v3820_v22 = vand.u32 2147483648, %v9275_v9  ;;  %v9298_v8 = vadd.f32 1.0, %v3967_v49  ;;  %v1252_v61 = vpop.f32.mrf.mxu1 }
 0x153   : > { %v3663_v33 = vmul.f32 %v3662_v48, %v3638_v11  ;;  %1868 = vmatpush.bf16.msra.mxu2 %v7490_v46  ;;  %v7618_v40 = vor.u32 %v7855_v50, %v7617_v62  ;;  %1722 = vmatpush.bf16.msra.mxu0 %v7234_v2  ;;  %v4111_v26 = vadd.f32 0.0036580483, %v4110_v29  ;;  %v4122_v51 = vadd.f32 0.014752088, %v4121_v20 }
 0x154   : > { %v9301_v35 = vmul.f32 0.70710677, %v9283_v4  ;;  %v9304_v5 = vmul.f32 %v3797_v13, %v9177_v63  ;;  %v3957_v60 = vadd.f32 1.1283791, %v3956_v32  ;;  %7918 = vrcp.f32 %v9298_v8 }
 0x155   : > { %v7651_v25 = vclamps-f32 %v3663_v33, 1.0  ;;  %1941 = vmatpush.bf16.msra.mxu3 %v7618_v40  ;;  %v7917_v34 = vpop.eup %7916  ;;  %v4112_v11 = vmul.f32 %v4111_v26, %v9251_v41  ;;  %v4123_v30 = vmul.f32 %v4122_v51, %v9251_v41  ;;  %v1324_v23 = vadd.f32 %v1323_v36, %v1251_v10  ;;  %v7791_v40 = vld [vmem:[%s8269_s29 + $0x1f4] sm:$0xf0] }
 0x156   : > { %v1180_v21 = vadd.f32 %v1179_v7, %v8685_v31  ;;  %v3810_v29 = vmul.f32 %v7917_v34, %v9275_v9  ;;  %vm3814_vm0 = vweird.f32 %v9275_v9  ;;  %v4266_v63 = vmul.f32 %v9301_v35, %v9301_v35  ;;  %v1182_v7 = vpop.f32.mrf.mxu0 }
 0x157   : > { %v6534_v53 = vadd.f32 1.0, %v7651_v25  ;;  %1521 = vmatmul.bf16.gmra.mxu1 %v8461_v37  ;;  %vm9315_vm1 = vcmp.eq.f32.partialorder %v3818_v42, 8.507059e+37  ;;  %v3821_v20 = vor.u32 1.1754944e-38, %v3820_v22  ;;  %v4113_v47 = vadd.f32 0.05243302, %v4112_v11  ;;  %v1325_v26 = vpop.f32.mrf.mxu2  ;;  %v1398_v51 = vpop.f32.mrf.mxu3 }
 0x158   : > { %v4124_v32 = vadd.f32 0.112945676, %v4123_v30  ;;  %v3811_v46 = vsub.f32 1.0, %v3810_v29  ;;  %v9321_v62 = vmul.f32 %v3957_v60, %v9194_v24  ;;  %v9323_v50 = vmin.f32 %v4266_v63, 16.0  ;;  %v7361_v22 = vld [vmem:[%s8269_s29 + $0x1e8] sm:$0xf] }
 0x159   : > { %v6634_v49 = vmul.f32 %v6534_v53, %v9234_v28  ;;  %v3978_v36 = vand.u32 2147483647, %v9298_v8  ;;  %v4114_v48 = vmul.f32 %v4113_v47, %v9251_v41  ;;  %v9328_v2 = vadd.f32 %v1396_v43, %v1324_v23 }
 0x15a   : > { %v4125_v42 = vmul.f32 %v4124_v32, %v9251_v41  ;;  %v7919_v10 = vpop.eup %7918  ;;  %v3812_v33 = vmul.f32 %v7917_v34, %v3811_v46  ;;  %vm3815_vm2 = vweird.f32 %v7917_v34  ;;  %v3980_v28 = vand.u32 2147483648, %v9298_v8 }
 0x15b   : > { %6734 = vst [vmem:[%s8982_s18 + $0xe0] sm:$0xff] %v6634_v49  ;;  %v1253_v24 = vadd.f32 %v1252_v61, %v1180_v21  ;;  %v3970_v25 = vmul.f32 %v7919_v10, %v9298_v8  ;;  %vm3975_vm3 = vweird.f32 %v7919_v10  ;;  %v4115_v60 = vadd.f32 0.18741608, %v4114_v48  ;;  %1594 = vmatmul.bf16.gmra.mxu2 %v8463_v38  ;;  %vm3816_vm4 = vmor %vm3814_vm0, %vm3815_vm2  ;;  %v1255_v48 = vpop.f32.mrf.mxu1 }
 0x15c   : > { %v4126_v11 = vadd.f32 0.4994258, %v4125_v42  ;;  %v3813_v43 = vadd.f32 %v7917_v34, %v3812_v33  ;;  %v7362_v30 = vor.u32 %v7791_v40, %v7361_v22  ;;  %v4268_v23 = vmul.f32 2.1237322e-06, %v9323_v50  ;;  %1667 = vmatmul.bf16.gmra.mxu3 %v8465_v39 }
 0x15d   : > { %v4279_v53 = vmul.f32 3.8918573e-05, %v9323_v50  ;;  %v3971_v61 = vsub.f32 1.0, %v3970_v25  ;;  %v4116_v21 = vmul.f32 %v4115_v60, %v9251_v41  ;;  %v9346_v63 = vmul.f32 0.70710677, %v9328_v2 }
 0x15e   : > { %1458 = vmatmul.bf16.gmra.mxu0 %v8539_v16  ;;  %v4127_v29 = vmul.f32 %v4126_v11, %v9251_v41  ;;  %v3817_v47 = vsel %vm3816_vm4, %v7917_v34, %v3813_v43  ;;  %1795 = vmatpush.bf16.msra.mxu1 %v7362_v30  ;;  %v4269_v32 = vadd.f32 0.00028619796, %v4268_v23  ;;  %v1326_v46 = vadd.f32 %v1325_v26, %v1253_v24  ;;  %v1184_v13 = vpop.f32.mrf.mxu0  ;;  %v14024_v16 = vld [vmem:[#allocation32_spill] sm:$0xff] }
 0x15f   : > { %v4280_v49 = vadd.f32 0.001143296, %v4279_v53  ;;  %v3822_v42 = vsel %vm9315_vm1, %v3821_v20, %v3817_v47  ;;  %v3972_v33 = vmul.f32 %v7919_v10, %v3971_v61  ;;  %v4117_v9 = vadd.f32 1.1283791, %v4116_v21  ;;  %v1401_v21 = vpop.f32.mrf.mxu3 }
 0x160   : > { %v9350_v22 = vadd.f32 1.0, %v4127_v29  ;;  %v3823_v40 = vmul.f32 %v3822_v42, %v9304_v5  ;;  %v4270_v41 = vmul.f32 %v4269_v32, %v9323_v50  ;;  %v4426_v34 = vmul.f32 %v9346_v63, %v9346_v63 }
 0x161   : > { %v4281_v25 = vmul.f32 %v4280_v49, %v9323_v50  ;;  %v3973_v60 = vadd.f32 %v7919_v10, %v3972_v33  ;;  %vm3974_vm5 = vweird.f32 %v9298_v8  ;;  %vm3979_vm6 = vcmp.eq.f32.partialorder %v3978_v36, 8.507059e+37  ;;  %v1328_v36 = vpop.f32.mrf.mxu2 }
 0x162   : > { %7920 = vrcp.f32 %v9350_v22  ;;  %v7655_v20 = vclamps-f32 %v3823_v40, 1.0  ;;  %vm3976_vm7 = vmor %vm3974_vm5, %vm3975_vm3  ;;  %v3981_v24 = vor.u32 1.1754944e-38, %v3980_v28  ;;  %v4271_v26 = vadd.f32 0.0036580483, %v4270_v41 }
 0x163   : > { %v1183_v5 = vadd.f32 %v1182_v7, %v8685_v31  ;;  %v3977_v11 = vsel %vm3976_vm7, %v7919_v10, %v3973_v60  ;;  %v4282_v43 = vadd.f32 0.014752088, %v4281_v25  ;;  %v9361_v30 = vmin.f32 %v4426_v34, 16.0  ;;  %v1257_v25 = vpop.f32.mrf.mxu1 }
 0x164   : > { %v9363_v23 = vadd.f32 %v1398_v51, %v1326_v46  ;;  %v6538_v53 = vadd.f32 1.0, %v7655_v20  ;;  %v3982_v61 = vsel %vm3979_vm6, %v3981_v24, %v3977_v11  ;;  %v9366_v8 = vmul.f32 %v4117_v9, %v9229_v59 }
 0x165   : > { %v9369_v29 = vadd.f32 %v1184_v13, %v8685_v31  ;;  %v3983_v28 = vmul.f32 %v3982_v61, %v9321_v62  ;;  %v4272_v7 = vmul.f32 %v4271_v26, %v9323_v50  ;;  %v4283_v10 = vmul.f32 %v4282_v43, %v9323_v50 }
 0x166   : > { %v4428_v51 = vmul.f32 2.1237322e-06, %v9361_v30  ;;  %v6638_v47 = vmul.f32 %v6538_v53, %v9238_v12  ;;  %v4138_v32 = vand.u32 2147483647, %v9350_v22  ;;  %v4439_v59 = vmul.f32 3.8918573e-05, %v9361_v30 }
 0x167   : > { %v9379_v49 = vmul.f32 0.70710677, %v9363_v23  ;;  %1526 = vmatmul.bf16.gmra.mxu1 %v8499_v55  ;;  %v7659_v42 = vclamps-f32 %v3983_v28, 1.0  ;;  %v4273_v62 = vadd.f32 0.05243302, %v4272_v7  ;;  %v1256_v9 = vadd.f32 %v1255_v48, %v1183_v5 }
 0x168   : > { %v7921_v46 = vpop.eup %7920  ;;  %v4284_v33 = vadd.f32 0.112945676, %v4283_v10  ;;  %6738 = vst [vmem:[%s8982_s18 + $0x100] sm:$0xff] %v6638_v47  ;;  %vm4134_vm8 = vweird.f32 %v9350_v22  ;;  %v4429_v12 = vadd.f32 0.00028619796, %v4428_v51  ;;  %v4140_v60 = vand.u32 2147483648, %v9350_v22 }
 0x169   : > { %v4130_v40 = vmul.f32 %v7921_v46, %v9350_v22  ;;  %v4440_v41 = vadd.f32 0.001143296, %v4439_v59  ;;  %v6542_v34 = vadd.f32 1.0, %v7659_v42  ;;  %v4586_v20 = vmul.f32 %v9379_v49, %v9379_v49 }
 0x16a   : > { %v4285_v13 = vmul.f32 %v4284_v33, %v9323_v50  ;;  %v4274_v48 = vmul.f32 %v4273_v62, %v9323_v50  ;;  %v4430_v26 = vmul.f32 %v4429_v12, %v9361_v30  ;;  %v1329_v61 = vadd.f32 %v1328_v36, %v1256_v9  ;;  %v1330_v9 = vpop.f32.mrf.mxu2 }
 0x16b   : > { %v4131_v24 = vsub.f32 1.0, %v4130_v40  ;;  %v4441_v5 = vmul.f32 %v4440_v41, %v9361_v30  ;;  %v6642_v11 = vmul.f32 %v6542_v34, %v9249_v27  ;;  %v9393_v53 = vmin.f32 %v4586_v20, 16.0  ;;  %1599 = vmatmul.bf16.gmra.mxu2 %v8501_v56  ;;  %v1403_v40 = vpop.f32.mrf.mxu3 }
 0x16c   : > { %v4286_v43 = vadd.f32 0.4994258, %v4285_v13  ;;  %vm4135_vm9 = vweird.f32 %v7921_v46  ;;  %v4431_v7 = vadd.f32 0.0036580483, %v4430_v26  ;;  %1672 = vmatmul.bf16.gmra.mxu3 %v8503_v58  ;;  %vm9399_vm10 = vcmp.eq.f32.partialorder %v4138_v32, 8.507059e+37 }
 0x16d   : > { %v4132_v28 = vmul.f32 %v7921_v46, %v4131_v24  ;;  %v4442_v10 = vadd.f32 0.014752088, %v4441_v5  ;;  %6742 = vst [vmem:[%s8982_s18 + $0x120] sm:$0xff] %v6642_v11  ;;  %v4588_v47 = vmul.f32 2.1237322e-06, %v9393_v53  ;;  %vm4136_vm11 = vmor %vm4134_vm8, %vm4135_vm9  ;;  %v4141_v32 = vor.u32 1.1754944e-38, %v4140_v60  ;;  %v1187_v11 = vpop.f32.mrf.mxu0 }
 0x16e   : > { %1463 = vmatmul.bf16.gmra.mxu0 %v8583_v44  ;;  %v4287_v27 = vmul.f32 %v4286_v43, %v9323_v50  ;;  %v4599_v36 = vmul.f32 3.8918573e-05, %v9393_v53  ;;  %v4275_v42 = vadd.f32 0.18741608, %v4274_v48  ;;  %v4432_v62 = vmul.f32 %v4431_v7, %v9361_v30 }
 0x16f   : > { %v4133_v59 = vadd.f32 %v7921_v46, %v4132_v28  ;;  %v4443_v33 = vmul.f32 %v4442_v10, %v9361_v30  ;;  %v4589_v41 = vadd.f32 0.00028619796, %v4588_v47  ;;  %v9413_v34 = vadd.f32 %v1401_v21, %v1329_v61 }
 0x170   : > { %v9411_v12 = vadd.f32 1.0, %v4287_v27  ;;  %v4433_v20 = vadd.f32 0.05243302, %v4432_v62  ;;  %v4600_v48 = vadd.f32 0.001143296, %v4599_v36  ;;  %v4276_v22 = vmul.f32 %v4275_v42, %v9323_v50 }
 0x171   : > { %v4137_v13 = vsel %vm4136_vm11, %v7921_v46, %v4133_v59  ;;  %v4444_v24 = vadd.f32 0.112945676, %v4443_v33  ;;  %v1258_v21 = vadd.f32 %v1257_v25, %v9369_v29  ;;  %v9422_v46 = vpop.f32.mrf.mxu1  ;;  %v4590_v61 = vmul.f32 %v4589_v41, %v9393_v53  ;;  %v7473_v25 = vld [vmem:[%s8269_s29 + $0x2c8] sm:$0xf]  ;;  %v7819_v27 = vld [vmem:[%s8269_s29 + $0x2d4] sm:$0xf0] }
 0x172   : > { %v4142_v26 = vsel %vm9399_vm10, %v4141_v32, %v4137_v13  ;;  %7922 = vrcp.f32 %v9411_v12  ;;  %v4434_v60 = vmul.f32 %v4433_v20, %v9361_v30  ;;  %v4601_v28 = vmul.f32 %v4600_v48, %v9393_v53 }
 0x173   : > { %v4143_v5 = vmul.f32 %v4142_v26, %v9366_v8  ;;  %v4445_v43 = vmul.f32 %v4444_v24, %v9361_v30  ;;  %v9428_v7 = vmul.f32 0.70710677, %v9413_v34  ;;  %v2346_v8 = vmul.f32 0.5, %v9218_v1  ;;  %v1333_v26 = vpop.f32.mrf.mxu2 }
 0x174   : > { %v9432_v50 = vmul.f32 0.5, %v9283_v4  ;;  %v4435_v51 = vadd.f32 0.18741608, %v4434_v60  ;;  %v1331_v36 = vadd.f32 %v1330_v9, %v1258_v21  ;;  %v4277_v42 = vadd.f32 1.1283791, %v4276_v22 }
 0x175   : > { %v7663_v10 = vclamps-f32 %v4143_v5, 1.0  ;;  %v4446_v29 = vadd.f32 0.4994258, %v4445_v43  ;;  %v4746_v47 = vmul.f32 %v9428_v7, %v9428_v7  ;;  %v7474_v62 = vor.u32 %v7819_v27, %v7473_v25  ;;  %v9447_v5 = vpop.f32.mrf.mxu3 }
 0x176   : > { %v4591_v33 = vadd.f32 0.0036580483, %v4590_v61  ;;  %v4436_v1 = vmul.f32 %v4435_v51, %v9361_v30  ;;  %v4602_v41 = vadd.f32 0.014752088, %v4601_v28  ;;  %v4298_v9 = vand.u32 2147483647, %v9411_v12 }
 0x177   : > { %v6546_v59 = vadd.f32 1.0, %v7663_v10  ;;  %1531 = vmatmul.bf16.gmra.mxu1 %v8541_v17  ;;  %v4447_v4 = vmul.f32 %v4446_v29, %v9361_v30  ;;  %v9441_v13 = vmin.f32 %v4746_v47, 16.0  ;;  %1869 = vmatpush.bf16.msra.mxu2 %v7474_v62  ;;  %v9445_v48 = vadd.f32 %v1403_v40, %v1331_v36  ;;  %v1189_v47 = vpop.f32.mrf.mxu0 }
 0x178   : > { %v7923_v32 = vpop.eup %7922  ;;  %v4592_v60 = vmul.f32 %v4591_v33, %v9393_v53  ;;  %v4603_v30 = vmul.f32 %v4602_v41, %v9393_v53  ;;  %v4300_v61 = vand.u32 2147483648, %v9411_v12  ;;  %v9457_v28 = vmul.f32 0.5, %v9328_v2 }
 0x179   : > { %v6646_v20 = vmul.f32 %v6546_v59, %v2346_v8  ;;  %v4290_v24 = vmul.f32 %v7923_v32, %v9411_v12  ;;  %v9449_v22 = vadd.f32 1.0, %v4447_v4  ;;  %v4748_v21 = vmul.f32 2.1237322e-06, %v9441_v13  ;;  %v9463_v36 = vpop.f32.mrf.mxu1 }
 0x17a   : > { %v4759_v40 = vmul.f32 3.8918573e-05, %v9441_v13  ;;  %vm4295_vm12 = vweird.f32 %v7923_v32  ;;  %v4437_v8 = vadd.f32 1.1283791, %v4436_v1  ;;  %v1188_v10 = vadd.f32 %v1187_v11, %v8685_v31 }
 0x17b   : > { %6746 = vst [vmem:[%s8982_s18 + $0x140] sm:$0xff] %v6646_v20  ;;  %v4291_v43 = vsub.f32 1.0, %v4290_v24  ;;  %7924 = vrcp.f32 %v9449_v22  ;;  %1604 = vmatmul.bf16.gmra.mxu2 %v8543_v18  ;;  %v4593_v29 = vadd.f32 0.05243302, %v4592_v60  ;;  %v4604_v25 = vadd.f32 0.112945676, %v4603_v30 }
 0x17c   : > { %v4749_v27 = vadd.f32 0.00028619796, %v4748_v21  ;;  %1677 = vmatmul.bf16.gmra.mxu3 %v8545_v19  ;;  %v4278_v2 = vmul.f32 %v4277_v42, %v9301_v35  ;;  %vm4294_vm13 = vweird.f32 %v9411_v12  ;;  %v4760_v59 = vadd.f32 0.001143296, %v4759_v40 }
 0x17d   : > { %v4292_v51 = vmul.f32 %v7923_v32, %v4291_v43  ;;  %v9470_v11 = vmul.f32 0.70710677, %v9445_v48  ;;  %vm4299_vm14 = vcmp.eq.f32.partialorder %v4298_v9, 8.507059e+37  ;;  %v4594_v33 = vmul.f32 %v4593_v29, %v9393_v53  ;;  %vm4296_vm15 = vmor %vm4294_vm13, %vm4295_vm12  ;;  %v7217_v9 = vld [vmem:[%s8269_s29 + $0xc8] sm:$0xf] }
 0x17e   : > { %1468 = vmatmul.bf16.gmra.mxu0 %v8619_v0  ;;  %v4605_v1 = vmul.f32 %v4604_v25, %v9393_v53  ;;  %v4301_v4 = vor.u32 1.1754944e-38, %v4300_v61  ;;  %v9476_v35 = vmul.f32 %v4437_v8, %v9346_v63  ;;  %v4458_v12 = vand.u32 2147483647, %v9449_v22  ;;  %v7755_v43 = vld [vmem:[%s8269_s29 + $0xd4] sm:$0xf0] }
 0x17f   : > { %v4293_v62 = vadd.f32 %v7923_v32, %v4292_v51  ;;  %v1261_v42 = vadd.f32 %v9422_v46, %v1188_v10  ;;  %v4595_v20 = vadd.f32 0.18741608, %v4594_v33  ;;  %v4750_v60 = vmul.f32 %v4749_v27, %v9441_v13  ;;  %v7601_v61 = vld [vmem:[%s8269_s29 + $0x3c8] sm:$0xf]  ;;  %v7851_v63 = vld [vmem:[%s8269_s29 + $0x3d4] sm:$0xf0]  ;;  %v9493_v27 = vpop.f32.mrf.mxu2 }
 0x180   : > { %v4606_v24 = vadd.f32 0.4994258, %v4605_v1  ;;  %vm4454_vm0 = vweird.f32 %v9449_v22  ;;  %v4761_v40 = vmul.f32 %v4760_v59, %v9441_v13  ;;  %v4906_v46 = vmul.f32 %v9470_v11, %v9470_v11  ;;  %v7345_v51 = vld [vmem:[%s8269_s29 + $0x1c8] sm:$0xf]  ;;  %v7787_v29 = vld [vmem:[%s8269_s29 + $0x1d4] sm:$0xf0] }
 0x181   : > { %v4297_v41 = vsel %vm4296_vm15, %v7923_v32, %v4293_v62  ;;  %v7925_v30 = vpop.eup %7924  ;;  %v4596_v10 = vmul.f32 %v4595_v20, %v9393_v53  ;;  %v1334_v25 = vadd.f32 %v1333_v26, %v1261_v42  ;;  %v9495_v62 = vpop.f32.mrf.mxu3  ;;  %v7218_v1 = vor.u32 %v7755_v43, %v7217_v9 }
 0x182   : > { %v4302_v21 = vsel %vm4299_vm14, %v4301_v4, %v4297_v41  ;;  %v4450_v8 = vmul.f32 %v7925_v30, %v9449_v22  ;;  %v4607_v33 = vmul.f32 %v4606_v24, %v9393_v53  ;;  %v7602_v4 = vor.u32 %v7851_v63, %v7601_v61  ;;  %v1192_v24 = vpop.f32.mrf.mxu0  ;;  %v1265_v9 = vpop.f32.mrf.mxu1 }
 0x183   : > { %v4303_v32 = vmul.f32 %v4302_v21, %v4278_v2  ;;  %v7346_v59 = vor.u32 %v7787_v29, %v7345_v51  ;;  %v4460_v2 = vand.u32 2147483648, %v9449_v22  ;;  %v4751_v21 = vadd.f32 0.0036580483, %v4750_v60  ;;  %1723 = vmatpush.bf16.msra.mxu0 %v7218_v1 }
 0x184   : > { %v4451_v0 = vsub.f32 1.0, %v4450_v8  ;;  %v9499_v44 = vadd.f32 1.0, %v4607_v33  ;;  %1942 = vmatpush.bf16.msra.mxu3 %v7602_v4  ;;  %v4762_v20 = vadd.f32 0.014752088, %v4761_v40  ;;  %v9501_v26 = vmin.f32 %v4906_v46, 16.0 }
 0x185   : > { %v7667_v41 = vclamps-f32 %v4303_v32, 1.0  ;;  %v1190_v42 = vadd.f32 %v1189_v47, %v8685_v31  ;;  %vm4455_vm1 = vweird.f32 %v7925_v30  ;;  %1796 = vmatpush.bf16.msra.mxu1 %v7346_v59  ;;  %v4752_v53 = vmul.f32 %v4751_v21, %v9441_v13  ;;  %v14014_v59 = vld [vmem:[#allocation26_spill] sm:$0xff] }
 0x186   : > { %v4452_v19 = vmul.f32 %v7925_v30, %v4451_v0  ;;  %vm9505_vm2 = vcmp.eq.f32.partialorder %v4458_v12, 8.507059e+37  ;;  %v4597_v43 = vadd.f32 1.1283791, %v4596_v10  ;;  %7926 = vrcp.f32 %v9499_v44  ;;  %vm4456_vm3 = vmor %vm4454_vm0, %vm4455_vm1 }
 0x187   : > { %v6550_v17 = vadd.f32 1.0, %v7667_v41  ;;  %v9511_v61 = vadd.f32 %v9447_v5, %v1334_v25  ;;  %1536 = vmatmul.bf16.gmra.mxu1 %v8585_v45  ;;  %v4753_v63 = vadd.f32 0.05243302, %v4752_v53  ;;  %v4763_v40 = vmul.f32 %v4762_v20, %v9441_v13  ;;  %v14013_v25 = vld [vmem:[#allocation25_spill] sm:$0xff]  ;;  %v1338_v4 = vpop.f32.mrf.mxu2  ;;  %v14015_v41 = vld [vmem:[#allocation31_spill] sm:$0xff] }
 0x188   : > { %v4453_v47 = vadd.f32 %v7925_v30, %v4452_v19  ;;  %v4461_v12 = vor.u32 1.1754944e-38, %v4460_v2  ;;  %v4908_v46 = vmul.f32 2.1237322e-06, %v9501_v26  ;;  %v4919_v32 = vmul.f32 3.8918573e-05, %v9501_v26 }
 0x189   : > { %v6650_v0 = vmul.f32 %v6550_v17, %v9432_v50  ;;  %v1193_v8 = vadd.f32 %v1192_v24, %v8685_v31  ;;  %v4754_v10 = vmul.f32 %v4753_v63, %v9441_v13  ;;  %v4764_v51 = vadd.f32 0.112945676, %v4763_v40 }
 0x18a   : > { %v4457_v5 = vsel %vm4456_vm3, %v7925_v30, %v4453_v47  ;;  %v1263_v17 = vadd.f32 %v9463_v36, %v1190_v42  ;;  %v4909_v50 = vadd.f32 0.00028619796, %v4908_v46  ;;  %v4920_v22 = vadd.f32 0.001143296, %v4919_v32  ;;  %v1411_v36 = vpop.f32.mrf.mxu3 }
 0x18b   : > { %6750 = vst [vmem:[%s8982_s18 + $0x160] sm:$0xff] %v6650_v0  ;;  %v4462_v19 = vsel %vm9505_vm2, %v4461_v12, %v4457_v5  ;;  %v9527_v29 = vmul.f32 0.70710677, %v9511_v61  ;;  %1609 = vmatmul.bf16.gmra.mxu2 %v14013_v25  ;;  %v4598_v1 = vmul.f32 %v4597_v43, %v9379_v49  ;;  %vm4614_vm4 = vweird.f32 %v9499_v44  ;;  %v1194_v5 = vpop.f32.mrf.mxu0 }
 0x18c   : > { %v4463_v33 = vmul.f32 %v4462_v19, %v9476_v35  ;;  %v4765_v30 = vmul.f32 %v4764_v51, %v9441_v13  ;;  %1682 = vmatmul.bf16.gmra.mxu3 %v14014_v59  ;;  %v7927_v2 = vpop.eup %7926  ;;  %v4755_v21 = vadd.f32 0.18741608, %v4754_v10  ;;  %v4910_v20 = vmul.f32 %v4909_v50, %v9501_v26  ;;  %v9546_v10 = vpop.f32.mrf.mxu1  ;;  %v7329_v59 = vld [vmem:[%s8269_s29 + $0x1a8] sm:$0xf] }
 0x18d   : > { %v4921_v42 = vmul.f32 %v4920_v22, %v9501_v26  ;;  %v5066_v35 = vmul.f32 %v9527_v29, %v9527_v29  ;;  %v4610_v53 = vmul.f32 %v7927_v2, %v9499_v44  ;;  %v4618_v24 = vand.u32 2147483647, %v9499_v44 }
 0x18e   : > { %1473 = vmatmul.bf16.gmra.mxu0 %v14015_v41  ;;  %v7671_v49 = vclamps-f32 %v4463_v33, 1.0  ;;  %v4620_v60 = vand.u32 2147483648, %v9499_v44  ;;  %v4766_v43 = vadd.f32 0.4994258, %v4765_v30  ;;  %v4911_v0 = vadd.f32 0.0036580483, %v4910_v20 }
 0x18f   : > { %v4922_v47 = vadd.f32 0.014752088, %v4921_v42  ;;  %v1336_v63 = vadd.f32 %v9493_v27, %v1263_v17  ;;  %v4611_v12 = vsub.f32 1.0, %v4610_v53  ;;  %v9544_v46 = vmin.f32 %v5066_v35, 16.0 }
 0x190   : > { %v6554_v40 = vadd.f32 1.0, %v7671_v49  ;;  %v1266_v32 = vadd.f32 %v1265_v9, %v1193_v8  ;;  %v4756_v51 = vmul.f32 %v4755_v21, %v9441_v13  ;;  %v4767_v19 = vmul.f32 %v4766_v43, %v9441_v13 }
 0x191   : > { %v4912_v50 = vmul.f32 %v4911_v0, %v9501_v26  ;;  %v4923_v22 = vmul.f32 %v4922_v47, %v9501_v26  ;;  %v4612_v27 = vmul.f32 %v7927_v2, %v4611_v12  ;;  %vm4615_vm5 = vweird.f32 %v7927_v2  ;;  %v9571_v47 = vpop.f32.mrf.mxu2 }
 0x192   : > { %v6654_v33 = vmul.f32 %v6554_v40, %v9457_v28  ;;  %v5068_v17 = vmul.f32 2.1237322e-06, %v9544_v46  ;;  %vm9554_vm6 = vcmp.eq.f32.partialorder %v4618_v24, 8.507059e+37  ;;  %v9558_v9 = vadd.f32 1.0, %v4767_v19  ;;  %vm4616_vm7 = vmor %vm4614_vm4, %vm4615_vm5  ;;  %v9573_v40 = vpop.f32.mrf.mxu3 }
 0x193   : > { %v4913_v8 = vadd.f32 0.05243302, %v4912_v50  ;;  %v4924_v21 = vadd.f32 0.112945676, %v4923_v22  ;;  %v4613_v13 = vadd.f32 %v7927_v2, %v4612_v27  ;;  %v4621_v20 = vor.u32 1.1754944e-38, %v4620_v60  ;;  %v9594_v30 = vpop.f32.mrf.mxu0 }
 0x194   : > { %6754 = vst [vmem:[%s8982_s18 + $0x180] sm:$0xff] %v6654_v33  ;;  %v5069_v42 = vadd.f32 0.00028619796, %v5068_v17  ;;  %v5079_v35 = vmul.f32 3.8918573e-05, %v9544_v46  ;;  %7928 = vrcp.f32 %v9558_v9  ;;  %v9566_v49 = vadd.f32 %v9495_v62, %v1336_v63 }
 0x195   : > { %v4757_v28 = vadd.f32 1.1283791, %v4756_v51  ;;  %v1339_v53 = vadd.f32 %v1338_v4, %v1266_v32  ;;  %v4617_v24 = vsel %vm4616_vm7, %v7927_v2, %v4613_v13  ;;  %v4914_v43 = vmul.f32 %v4913_v8, %v9501_v26  ;;  %v14018_v2 = vld [vmem:[#allocation28_spill] sm:$0xff]  ;;  %v9596_v8 = vpop.f32.mrf.mxu1 }
 0x196   : > { %v4925_v0 = vmul.f32 %v4924_v21, %v9501_v26  ;;  %v5070_v60 = vmul.f32 %v5069_v42, %v9544_v46  ;;  %v2358_v44 = vmul.f32 0.5, %v9363_v23  ;;  %v4622_v12 = vsel %vm9554_vm6, %v4621_v20, %v4617_v24  ;;  %v14019_v42 = vld [vmem:[#allocation29_spill] sm:$0xff]  ;;  %v14020_v24 = vld [vmem:[#allocation30_spill] sm:$0xff] }
 0x197   : > { %v9579_v62 = vmul.f32 0.5, %v9413_v34  ;;  %v5080_v4 = vadd.f32 0.001143296, %v5079_v35  ;;  %1541 = vmatmul.bf16.gmra.mxu1 %v14018_v2  ;;  %v4623_v63 = vmul.f32 %v4622_v12, %v4598_v1  ;;  %v4915_v32 = vadd.f32 0.18741608, %v4914_v43 }
 0x198   : > { %v4926_v51 = vadd.f32 0.4994258, %v4925_v0  ;;  %v5071_v19 = vadd.f32 0.0036580483, %v5070_v60  ;;  %v9583_v50 = vmul.f32 %v4757_v28, %v9428_v7  ;;  %v9587_v23 = vmul.f32 0.70710677, %v9566_v49 }
 0x199   : > { %v5081_v22 = vmul.f32 %v5080_v4, %v9544_v46  ;;  %v9589_v33 = vadd.f32 %v1411_v36, %v1339_v53  ;;  %v7675_v27 = vclamps-f32 %v4623_v63, 1.0  ;;  %v4778_v34 = vand.u32 2147483647, %v9558_v9 }
 0x19a   : > { %v4927_v17 = vmul.f32 %v4926_v51, %v9501_v26  ;;  %v5072_v1 = vmul.f32 %v5071_v19, %v9544_v46  ;;  %v7929_v7 = vpop.eup %7928  ;;  %v4916_v21 = vmul.f32 %v4915_v32, %v9501_v26  ;;  %v5226_v20 = vmul.f32 %v9587_v23, %v9587_v23  ;;  %v14021_v26 = vld [vmem:[#allocation35_spill] sm:$0xff] }
 0x19b   : > { %v5082_v13 = vadd.f32 0.014752088, %v5081_v22  ;;  %v9602_v36 = vmul.f32 0.70710677, %v9589_v33  ;;  %1614 = vmatmul.bf16.gmra.mxu2 %v14019_v42  ;;  %v6558_v35 = vadd.f32 1.0, %v7675_v27  ;;  %v4770_v28 = vmul.f32 %v7929_v7, %v9558_v9 }
 0x19c   : > { %vm4774_vm8 = vweird.f32 %v9558_v9  ;;  %v1195_v53 = vadd.f32 %v1194_v5, %v8685_v31  ;;  %1687 = vmatmul.bf16.gmra.mxu3 %v14020_v24  ;;  %v9610_v43 = vadd.f32 1.0, %v4927_v17  ;;  %v5073_v0 = vadd.f32 0.05243302, %v5072_v1  ;;  %v9628_v1 = vpop.f32.mrf.mxu2 }
 0x19d   : > { %v5083_v60 = vmul.f32 %v5082_v13, %v9544_v46  ;;  %v9613_v12 = vmin.f32 %v5226_v20, 16.0  ;;  %v6658_v4 = vmul.f32 %v6558_v35, %v2358_v44  ;;  %v4771_v63 = vsub.f32 1.0, %v4770_v28  ;;  %v9630_v13 = vpop.f32.mrf.mxu3 }
 0x19e   : > { %1478 = vmatmul.bf16.gmra.mxu0 %v14021_v26  ;;  %v4780_v32 = vand.u32 2147483648, %v9558_v9  ;;  %v5386_v51 = vmul.f32 %v9602_v36, %v9602_v36  ;;  %vm4775_vm9 = vweird.f32 %v7929_v7  ;;  %vm9618_vm10 = vcmp.eq.f32.partialorder %v4778_v34, 8.507059e+37 }
 0x19f   : > { %v9622_v19 = vadd.f32 1.1283791, %v4916_v21  ;;  %7930 = vrcp.f32 %v9610_v43  ;;  %6758 = vst [vmem:[%s8982_s18 + $0x1a0] sm:$0xff] %v6658_v4  ;;  %v4772_v22 = vmul.f32 %v7929_v7, %v4771_v63  ;;  %v5074_v27 = vmul.f32 %v5073_v0, %v9544_v46  ;;  %vm4776_vm11 = vmor %vm4774_vm8, %vm4775_vm9 }
 0x1a0   : > { %v5084_v44 = vadd.f32 0.112945676, %v5083_v60  ;;  %v5228_v17 = vmul.f32 2.1237322e-06, %v9613_v12  ;;  %v4938_v34 = vand.u32 2147483647, %v9610_v43  ;;  %v1268_v35 = vadd.f32 %v9546_v10, %v1195_v53 }
 0x1a1   : > { %v5239_v21 = vmul.f32 3.8918573e-05, %v9613_v12  ;;  %v9634_v20 = vmin.f32 %v5386_v51, 16.0  ;;  %v4773_v28 = vadd.f32 %v7929_v7, %v4772_v22  ;;  %v5075_v4 = vadd.f32 0.18741608, %v5074_v27 }
 0x1a2   : > { %v5085_v0 = vmul.f32 %v5084_v44, %v9544_v46  ;;  %v5229_v60 = vadd.f32 0.00028619796, %v5228_v17  ;;  %v4781_v63 = vor.u32 1.1754944e-38, %v4780_v32  ;;  %v4940_v26 = vand.u32 2147483648, %v9610_v43  ;;  %v7457_v53 = vld [vmem:[%s8269_s29 + $0x2a8] sm:$0xf]  ;;  %v9647_v44 = vpop.f32.mrf.mxu0  ;;  %v9649_v32 = vpop.f32.mrf.mxu1 }
 0x1a3   : > { %v5240_v41 = vadd.f32 0.001143296, %v5239_v21  ;;  %v5388_v51 = vmul.f32 2.1237322e-06, %v9634_v20  ;;  %v4777_v2 = vsel %vm4776_vm11, %v7929_v7, %v4773_v28  ;;  %v7815_v22 = vld [vmem:[%s8269_s29 + $0x2b4] sm:$0xf0]  ;;  %v1341_v9 = vadd.f32 %v9571_v47, %v1268_v35 }
 0x1a4   : > { %v5086_v10 = vadd.f32 0.4994258, %v5085_v0  ;;  %v5230_v27 = vmul.f32 %v5229_v60, %v9613_v12  ;;  %v4782_v21 = vsel %vm9618_vm10, %v4781_v63, %v4777_v2  ;;  %v7458_v24 = vor.u32 %v7815_v22, %v7457_v53  ;;  %v7201_v7 = vld [vmem:[%s8269_s29 + $0xa8] sm:$0xf]  ;;  %v7751_v28 = vld [vmem:[%s8269_s29 + $0xb4] sm:$0xf0] }
 0x1a5   : > { %v7931_v17 = vpop.eup %7930  ;;  %v7585_v0 = vld [vmem:[%s8269_s29 + $0x3a8] sm:$0xf]  ;;  %v5241_v45 = vmul.f32 %v5240_v41, %v9613_v12  ;;  %v4783_v42 = vmul.f32 %v4782_v21, %v9583_v50  ;;  %v5076_v47 = vmul.f32 %v5075_v4, %v9544_v46  ;;  %v7847_v35 = vld [vmem:[%s8269_s29 + $0x3b4] sm:$0xf0]  ;;  %v5399_v25 = vmul.f32 3.8918573e-05, %v9634_v20 }
 0x1a6   : > { %v4930_v60 = vmul.f32 %v7931_v17, %v9610_v43  ;;  %v5087_v5 = vmul.f32 %v5086_v10, %v9544_v46  ;;  %1870 = vmatpush.bf16.msra.mxu2 %v7458_v24  ;;  %v7202_v2 = vor.u32 %v7751_v28, %v7201_v7  ;;  %v7586_v63 = vor.u32 %v7847_v35, %v7585_v0  ;;  %v7783_v53 = vld [vmem:[%s8269_s29 + $0x1b4] sm:$0xf0]  ;;  %v9672_v28 = vpop.f32.mrf.mxu2  ;;  %v14028_v0 = vld [vmem:[#allocation34_spill] sm:$0xff] }
 0x1a7   : > { %v5231_v22 = vadd.f32 0.0036580483, %v5230_v27  ;;  %1546 = vmatmul.bf16.gmra.mxu1 %v14024_v16  ;;  %v7679_v41 = vclamps-f32 %v4783_v42, 1.0  ;;  %v7330_v50 = vor.u32 %v7783_v53, %v7329_v59  ;;  %v9667_v21 = vadd.f32 %v9573_v40, %v1341_v9  ;;  %v9674_v42 = vpop.f32.mrf.mxu3 }
 0x1a8   : > { %v4931_v55 = vsub.f32 1.0, %v4930_v60  ;;  %v9669_v4 = vadd.f32 1.0, %v5087_v5  ;;  %1724 = vmatpush.bf16.msra.mxu0 %v7202_v2  ;;  %1943 = vmatpush.bf16.msra.mxu3 %v7586_v63  ;;  %v5242_v46 = vadd.f32 0.014752088, %v5241_v45  ;;  %v5389_v24 = vadd.f32 0.00028619796, %v5388_v51 }
 0x1a9   : > { %v5232_v18 = vmul.f32 %v5231_v22, %v9613_v12  ;;  %v6562_v10 = vadd.f32 1.0, %v7679_v41  ;;  %vm4935_vm12 = vweird.f32 %v7931_v17  ;;  %1797 = vmatpush.bf16.msra.mxu1 %v7330_v50  ;;  %v5400_v27 = vadd.f32 0.001143296, %v5399_v25 }
 0x1aa   : > { %v4932_v7 = vmul.f32 %v7931_v17, %v4931_v55  ;;  %v4918_v59 = vmul.f32 %v9622_v19, %v9470_v11  ;;  %vm4934_vm13 = vweird.f32 %v9610_v43  ;;  %vm9679_vm14 = vcmp.eq.f32.partialorder %v4938_v34, 8.507059e+37  ;;  %v14027_v55 = vld [vmem:[#allocation33_spill] sm:$0xff]  ;;  %v14029_v11 = vld [vmem:[#allocation39_spill] sm:$0xff]  ;;  %v9697_v2 = vpop.f32.mrf.mxu0  ;;  %v9699_v63 = vpop.f32.mrf.mxu1 }
 0x1ab   : > { %7932 = vrcp.f32 %v9669_v4  ;;  %1619 = vmatmul.bf16.gmra.mxu2 %v14027_v55  ;;  %v6662_v45 = vmul.f32 %v6562_v10, %v9579_v62  ;;  %v5233_v51 = vadd.f32 0.05243302, %v5232_v18  ;;  %v5243_v9 = vmul.f32 %v5242_v46, %v9613_v12  ;;  %vm4936_vm15 = vmor %vm4934_vm13, %vm4935_vm12 }
 0x1ac   : > { %v4933_v25 = vadd.f32 %v7931_v17, %v4932_v7  ;;  %1692 = vmatmul.bf16.gmra.mxu3 %v14028_v0  ;;  %v4941_v43 = vor.u32 1.1754944e-38, %v4940_v26  ;;  %v5077_v19 = vadd.f32 1.1283791, %v5076_v47  ;;  %v5390_v34 = vmul.f32 %v5389_v24, %v9634_v20 }
 0x1ad   : > { %v5401_v60 = vmul.f32 %v5400_v27, %v9634_v20  ;;  %6762 = vst [vmem:[%s8982_s18 + $0x1c0] sm:$0xff] %v6662_v45  ;;  %v5234_v62 = vmul.f32 %v5233_v51, %v9613_v12  ;;  %v5244_v5 = vadd.f32 0.112945676, %v5243_v9  ;;  %v9695_v18 = vmul.f32 0.70710677, %v9667_v21 }
 0x1ae   : > { %1483 = vmatmul.bf16.gmra.mxu0 %v14029_v11  ;;  %v4937_v35 = vsel %vm4936_vm15, %v7931_v17, %v4933_v25  ;;  %v5391_v47 = vadd.f32 0.0036580483, %v5390_v34  ;;  %v1198_v22 = vadd.f32 %v9594_v30, %v8685_v31  ;;  %v2366_v10 = vmul.f32 0.5, %v9445_v48  ;;  %v14038_v11 = vld [vmem:[#allocation40_spill] sm:$0xff] }
 0x1af   : > { %v4942_v26 = vsel %vm9679_vm14, %v4941_v43, %v4937_v35  ;;  %v5402_v53 = vadd.f32 0.014752088, %v5401_v60  ;;  %v5235_v17 = vadd.f32 0.18741608, %v5234_v62  ;;  %v5245_v50 = vmul.f32 %v5244_v5, %v9613_v12  ;;  %v9721_v5 = vpop.f32.mrf.mxu3 }
 0x1b0   : > { %v4943_v41 = vmul.f32 %v4942_v26, %v4918_v59  ;;  %v5546_v46 = vmul.f32 %v9695_v18, %v9695_v18  ;;  %v5392_v7 = vmul.f32 %v5391_v47, %v9634_v20  ;;  %v1271_v40 = vadd.f32 %v9596_v8, %v1198_v22  ;;  %v9719_v8 = vpop.f32.mrf.mxu2 }
 0x1b1   : > { %v7933_v24 = vpop.eup %7932  ;;  %v5403_v27 = vmul.f32 %v5402_v53, %v9634_v20  ;;  %v5098_v30 = vand.u32 2147483647, %v9669_v4  ;;  %v5100_v59 = vand.u32 2147483648, %v9669_v4  ;;  %v5078_v51 = vmul.f32 %v5077_v19, %v9527_v29 }
 0x1b2   : > { %v7683_v45 = vclamps-f32 %v4943_v41, 1.0  ;;  %v5090_v25 = vmul.f32 %v7933_v24, %v9669_v4  ;;  %v5246_v9 = vadd.f32 0.4994258, %v5245_v50  ;;  %v5393_v43 = vadd.f32 0.05243302, %v5392_v7  ;;  %v14030_v7 = vld [vmem:[#allocation36_spill] sm:$0xff] }
 0x1b3   : > { %v5404_v34 = vadd.f32 0.112945676, %v5403_v27  ;;  %v5236_v35 = vmul.f32 %v5235_v17, %v9613_v12  ;;  %v9717_v62 = vmin.f32 %v5546_v46, 16.0  ;;  %v1344_v19 = vadd.f32 %v9628_v1, %v1271_v40  ;;  %v9734_v1 = vpop.f32.mrf.mxu0 }
 0x1b4   : > { %v6566_v60 = vadd.f32 1.0, %v7683_v45  ;;  %v5091_v48 = vsub.f32 1.0, %v5090_v25  ;;  %v5247_v26 = vmul.f32 %v5246_v9, %v9613_v12  ;;  %v5394_v47 = vmul.f32 %v5393_v43, %v9634_v20 }
 0x1b5   : > { %v5405_v29 = vmul.f32 %v5404_v34, %v9634_v20  ;;  %vm5095_vm0 = vweird.f32 %v7933_v24  ;;  %v5548_v41 = vmul.f32 2.1237322e-06, %v9717_v62  ;;  %vm5094_vm1 = vweird.f32 %v9669_v4 }
 0x1b6   : > { %v6666_v53 = vmul.f32 %v6566_v60, %v2366_v10  ;;  %v5092_v22 = vmul.f32 %v7933_v24, %v5091_v48  ;;  %v9729_v17 = vadd.f32 1.0, %v5247_v26  ;;  %v5395_v50 = vadd.f32 0.18741608, %v5394_v47  ;;  %v9736_v10 = vpop.f32.mrf.mxu1  ;;  %vm5096_vm3 = vmor %vm5094_vm1, %vm5095_vm0 }
 0x1b7   : > { %v5406_v46 = vadd.f32 0.4994258, %v5405_v29  ;;  %1551 = vmatmul.bf16.gmra.mxu1 %v14030_v7  ;;  %vm5099_vm2 = vcmp.eq.f32.partialorder %v5098_v30, 8.507059e+37  ;;  %v5549_v27 = vadd.f32 0.00028619796, %v5548_v41  ;;  %v5101_v40 = vor.u32 1.1754944e-38, %v5100_v59 }
 0x1b8   : > { %6766 = vst [vmem:[%s8982_s18 + $0x1e0] sm:$0xff] %v6666_v53  ;;  %v5093_v12 = vadd.f32 %v7933_v24, %v5092_v22  ;;  %v5559_v45 = vmul.f32 3.8918573e-05, %v9717_v62  ;;  %v5237_v25 = vadd.f32 1.1283791, %v5236_v35  ;;  %7934 = vrcp.f32 %v9729_v17  ;;  %v14031_v35 = vld [vmem:[#allocation37_spill] sm:$0xff] }
 0x1b9   : > { %v9740_v4 = vadd.f32 %v9630_v13, %v1344_v19  ;;  %v5396_v43 = vmul.f32 %v5395_v50, %v9634_v20  ;;  %v5407_v30 = vmul.f32 %v5406_v46, %v9634_v20  ;;  %v5550_v34 = vmul.f32 %v5549_v27, %v9717_v62  ;;  %v14032_v19 = vld [vmem:[#allocation38_spill] sm:$0xff]  ;;  %v14033_v20 = vld [vmem:[#allocation43_spill] sm:$0xff]  ;;  %v9766_v46 = vpop.f32.mrf.mxu2  ;;  %v7779_v7 = vld [vmem:[%s8269_s29 + $0x194] sm:$0xf0] }
 0x1ba   : > { %v5097_v9 = vsel %vm5096_vm3, %v7933_v24, %v5093_v12  ;;  %v2370_v60 = vmul.f32 0.5, %v9511_v61  ;;  %v5560_v26 = vadd.f32 0.001143296, %v5559_v45  ;;  %v1200_v59 = vadd.f32 %v9647_v44, %v8685_v31  ;;  %v9768_v12 = vpop.f32.mrf.mxu3 }
 0x1bb   : > { %v5102_v48 = vsel %vm5099_vm2, %v5101_v40, %v5097_v9  ;;  %1624 = vmatmul.bf16.gmra.mxu2 %v14031_v35  ;;  %v5258_v13 = vand.u32 2147483647, %v9729_v17  ;;  %v9750_v29 = vadd.f32 1.0, %v5407_v30  ;;  %v5551_v24 = vadd.f32 0.0036580483, %v5550_v34 }
 0x1bc   : > { %v5103_v47 = vmul.f32 %v5102_v48, %v5078_v51  ;;  %1697 = vmatmul.bf16.gmra.mxu3 %v14032_v19  ;;  %v9755_v53 = vmul.f32 0.5, %v9566_v49  ;;  %v5260_v61 = vand.u32 2147483648, %v9729_v17  ;;  %v5561_v22 = vmul.f32 %v5560_v26, %v9717_v62 }
 0x1bd   : > { %v9760_v44 = vmul.f32 0.70710677, %v9740_v4  ;;  %v9763_v41 = vmul.f32 %v5237_v25, %v9587_v23  ;;  %v5397_v50 = vadd.f32 1.1283791, %v5396_v43  ;;  %7936 = vrcp.f32 %v9750_v29 }
 0x1be   : > { %1488 = vmatmul.bf16.gmra.mxu0 %v14033_v20  ;;  %v7687_v51 = vclamps-f32 %v5103_v47, 1.0  ;;  %v7935_v49 = vpop.eup %7934  ;;  %vm5254_vm4 = vweird.f32 %v9729_v17  ;;  %v5552_v27 = vmul.f32 %v5551_v24, %v9717_v62  ;;  %v5562_v45 = vadd.f32 0.014752088, %v5561_v22  ;;  %v9789_v22 = vpop.f32.mrf.mxu0 }
 0x1bf   : > { %v1273_v40 = vadd.f32 %v9649_v32, %v1200_v59  ;;  %v5250_v30 = vmul.f32 %v7935_v49, %v9729_v17  ;;  %vm9774_vm5 = vcmp.eq.f32.partialorder %v5258_v13, 8.507059e+37  ;;  %v5706_v25 = vmul.f32 %v9760_v44, %v9760_v44  ;;  %v7747_v17 = vld [vmem:[%s8269_s29 + $0x94] sm:$0xf0] }
 0x1c0   : > { %v6570_v9 = vadd.f32 1.0, %v7687_v51  ;;  %v1203_v43 = vadd.f32 %v9697_v2, %v8685_v31  ;;  %v5261_v34 = vor.u32 1.1754944e-38, %v5260_v61  ;;  %v5553_v48 = vadd.f32 0.05243302, %v5552_v27  ;;  %v9791_v51 = vpop.f32.mrf.mxu1 }
 0x1c1   : > { %v5563_v26 = vmul.f32 %v5562_v45, %v9717_v62  ;;  %v1346_v32 = vadd.f32 %v9672_v28, %v1273_v40  ;;  %v5251_v47 = vsub.f32 1.0, %v5250_v30  ;;  %v9785_v13 = vmul.f32 %v5397_v50, %v9602_v36 }
 0x1c2   : > { %v6670_v59 = vmul.f32 %v6570_v9, %v2370_v60  ;;  %v9787_v24 = vmin.f32 %v5706_v25, 16.0  ;;  %v5420_v61 = vand.u32 2147483648, %v9750_v29  ;;  %v5554_v27 = vmul.f32 %v5553_v48, %v9717_v62 }
 0x1c3   : > { %v5564_v28 = vadd.f32 0.112945676, %v5563_v26  ;;  %v9796_v60 = vpop.eup %7936  ;;  %v5252_v36 = vmul.f32 %v7935_v49, %v5251_v47  ;;  %vm5255_vm6 = vweird.f32 %v7935_v49  ;;  %v1276_v45 = vadd.f32 %v9699_v63, %v1203_v43  ;;  %v7441_v26 = vld [vmem:[%s8269_s29 + $0x288] sm:$0xf] }
 0x1c4   : > { %6770 = vst [vmem:[%s8982_s18 + $0x200] sm:$0xff] %v6670_v59  ;;  %v5708_v50 = vmul.f32 2.1237322e-06, %v9787_v24  ;;  %v5410_v40 = vmul.f32 %v9796_v60, %v9750_v29  ;;  %v5555_v9 = vadd.f32 0.18741608, %v5554_v27  ;;  %vm5414_vm7 = vweird.f32 %v9750_v29  ;;  %vm9813_vm8 = vmor %vm5254_vm4, %vm5255_vm6 }
 0x1c5   : > { %v5565_v30 = vmul.f32 %v5564_v28, %v9717_v62  ;;  %v5719_v25 = vmul.f32 3.8918573e-05, %v9787_v24  ;;  %v5253_v48 = vadd.f32 %v7935_v49, %v5252_v36  ;;  %v7811_v59 = vld [vmem:[%s8269_s29 + $0x294] sm:$0xf0]  ;;  %v9809_v2 = vadd.f32 %v9674_v42, %v1346_v32  ;;  %v7185_v36 = vld [vmem:[%s8269_s29 + $0x88] sm:$0xf] }
 0x1c6   : > { %v5709_v47 = vadd.f32 0.00028619796, %v5708_v50  ;;  %v5411_v43 = vsub.f32 1.0, %v5410_v40  ;;  %v7442_v28 = vor.u32 %v7811_v59, %v7441_v26  ;;  %v1205_v20 = vadd.f32 %v9734_v1, %v8685_v31  ;;  %v7569_v32 = vld [vmem:[%s8269_s29 + $0x388] sm:$0xf]  ;;  %v9829_v26 = vpop.f32.mrf.mxu2  ;;  %v9831_v59 = vpop.f32.mrf.mxu3 }
 0x1c7   : > { %v5566_v27 = vadd.f32 0.4994258, %v5565_v30  ;;  %1556 = vmatmul.bf16.gmra.mxu1 %v14038_v11  ;;  %v5257_v42 = vsel %vm9813_vm8, %v7935_v49, %v5253_v48  ;;  %vm5415_vm9 = vweird.f32 %v9796_v60  ;;  %v7843_v50 = vld [vmem:[%s8269_s29 + $0x394] sm:$0xf0]  ;;  %v1349_v30 = vadd.f32 %v9719_v8, %v1276_v45  ;;  %v7313_v11 = vld [vmem:[%s8269_s29 + $0x188] sm:$0xf]  ;;  %v1209_v16 = vpop.f32.mrf.mxu0 }
 0x1c8   : > { %v5710_v40 = vmul.f32 %v5709_v47, %v9787_v24  ;;  %v5262_v1 = vsel %vm9774_vm5, %v5261_v34, %v5257_v42  ;;  %v5412_v63 = vmul.f32 %v9796_v60, %v5411_v43  ;;  %v5556_v49 = vmul.f32 %v5555_v9, %v9717_v62  ;;  %1871 = vmatpush.bf16.msra.mxu2 %v7442_v28  ;;  %v1282_v35 = vpop.f32.mrf.mxu1  ;;  %v14039_v42 = vld [vmem:[#allocation41_spill] sm:$0xff]  ;;  %vm5416_vm10 = vmor %vm5414_vm7, %vm5415_vm9 }
 0x1c9   : > { %v5567_v48 = vmul.f32 %v5566_v27, %v9717_v62  ;;  %v5263_v47 = vmul.f32 %v5262_v1, %v9763_v41  ;;  %v7186_v19 = vor.u32 %v7747_v17, %v7185_v36  ;;  %v7570_v8 = vor.u32 %v7843_v50, %v7569_v32 }
 0x1ca   : > { %v7314_v45 = vor.u32 %v7779_v7, %v7313_v11  ;;  %v5413_v0 = vadd.f32 %v9796_v60, %v5412_v63  ;;  %v5421_v23 = vor.u32 1.1754944e-38, %v5420_v61  ;;  %v5711_v43 = vadd.f32 0.0036580483, %v5710_v40  ;;  %v14041_v61 = vld [vmem:[#allocation42_spill] sm:$0xff] }
 0x1cb   : > { %v9842_v34 = vadd.f32 1.0, %v5567_v48  ;;  %1629 = vmatmul.bf16.gmra.mxu2 %v14039_v42  ;;  %v7691_v9 = vclamps-f32 %v5263_v47, 1.0  ;;  %1725 = vmatpush.bf16.msra.mxu0 %v7186_v19  ;;  %v5720_v62 = vadd.f32 0.001143296, %v5719_v25  ;;  %v9850_v16 = vmul.f32 0.70710677, %v9809_v2 }
 0x1cc   : > { %1944 = vmatpush.bf16.msra.mxu3 %v7570_v8  ;;  %v9853_v11 = vadd.f32 %v9721_v5, %v1349_v30  ;;  %v5417_v7 = vsel %vm5416_vm10, %v9796_v60, %v5413_v0  ;;  %v14040_v35 = vand.u32 2147483647, %v9750_v29  ;;  %1798 = vmatpush.bf16.msra.mxu1 %v7314_v45  ;;  %v1278_v41 = vadd.f32 %v9736_v10, %v1205_v20  ;;  %v14042_v5 = vld [vmem:[#allocation47_spill] sm:$0xff] }
 0x1cd   : > { %7938 = vrcp.f32 %v9842_v34  ;;  %1702 = vmatmul.bf16.gmra.mxu3 %v14041_v61  ;;  %v6574_v19 = vadd.f32 1.0, %v7691_v9  ;;  %v5557_v27 = vadd.f32 1.1283791, %v5556_v49  ;;  %v5712_v28 = vmul.f32 %v5711_v43, %v9787_v24 }
 0x1ce   : > { %vm5419_vm11 = vcmp.eq.f32.partialorder %v14040_v35, 8.507059e+37  ;;  %1493 = vmatmul.bf16.gmra.mxu0 %v14042_v5  ;;  %v5578_v29 = vand.u32 2147483647, %v9842_v34  ;;  %v5721_v60 = vmul.f32 %v5720_v62, %v9787_v24  ;;  %v5866_v36 = vmul.f32 %v9850_v16, %v9850_v16  ;;  %v1355_v50 = vpop.f32.mrf.mxu2  ;;  %v1428_v40 = vpop.f32.mrf.mxu3 }
 0x1cf   : > { %v5422_v25 = vsel %vm5419_vm11, %v5421_v23, %v5417_v7  ;;  %v6674_v10 = vmul.f32 %v6574_v19, %v9755_v53  ;;  %v5580_v20 = vand.u32 2147483648, %v9842_v34  ;;  %v5713_v17 = vadd.f32 0.05243302, %v5712_v28 }
 0x1d0   : > { %v5423_v0 = vmul.f32 %v5422_v25, %v9785_v13  ;;  %v9871_v32 = vmul.f32 0.70710677, %v9853_v11  ;;  %v5722_v1 = vadd.f32 0.014752088, %v5721_v60  ;;  %v9873_v13 = vmin.f32 %v5866_v36, 16.0 }
 0x1d1   : > { %6774 = vst [vmem:[%s8982_s18 + $0x220] sm:$0xff] %v6674_v10  ;;  %v2378_v63 = vmul.f32 0.5, %v9589_v33  ;;  %v5558_v49 = vmul.f32 %v5557_v27, %v9695_v18  ;;  %v1351_v48 = vadd.f32 %v9766_v46, %v1278_v41  ;;  %vm9885_vm12 = vcmp.eq.f32.partialorder %v5578_v29, 8.507059e+37  ;;  %v14045_v10 = vld [vmem:[#allocation45_spill] sm:$0xff] }
 0x1d2   : > { %v7695_v30 = vclamps-f32 %v5423_v0, 1.0  ;;  %v6026_v53 = vmul.f32 %v9871_v32, %v9871_v32  ;;  %v5723_v45 = vmul.f32 %v5722_v1, %v9787_v24  ;;  %v5868_v23 = vmul.f32 2.1237322e-06, %v9873_v13 }
 0x1d3   : > { %v7939_v47 = vpop.eup %7938  ;;  %v5879_v43 = vmul.f32 3.8918573e-05, %v9873_v13  ;;  %v5581_v18 = vor.u32 1.1754944e-38, %v5580_v20  ;;  %v5714_v62 = vmul.f32 %v5713_v17, %v9787_v24  ;;  %v9895_v0 = vadd.f32 %v9768_v12, %v1351_v48 }
 0x1d4   : > { %v6578_v8 = vadd.f32 1.0, %v7695_v30  ;;  %v5570_v9 = vmul.f32 %v7939_v47, %v9842_v34  ;;  %v9890_v7 = vmin.f32 %v6026_v53, 16.0  ;;  %v5724_v35 = vadd.f32 0.112945676, %v5723_v45 }
 0x1d5   : > { %v5869_v41 = vadd.f32 0.00028619796, %v5868_v23  ;;  %v5880_v19 = vadd.f32 0.001143296, %v5879_v43  ;;  %vm5575_vm13 = vweird.f32 %v7939_v47  ;;  %v5715_v17 = vadd.f32 0.18741608, %v5714_v62 }
 0x1d6   : > { %v6678_v46 = vmul.f32 %v6578_v8, %v2378_v63  ;;  %v5571_v25 = vsub.f32 1.0, %v5570_v9  ;;  %v6028_v27 = vmul.f32 2.1237322e-06, %v9890_v7  ;;  %v6039_v28 = vmul.f32 3.8918573e-05, %v9890_v7  ;;  %v9903_v63 = vpop.f32.mrf.mxu0  ;;  %v14046_v62 = vld [vmem:[#allocation44_spill] sm:$0xff] }
 0x1d7   : > { %v5725_v29 = vmul.f32 %v5724_v35, %v9787_v24  ;;  %v5870_v60 = vmul.f32 %v5869_v41, %v9873_v13  ;;  %v5881_v36 = vmul.f32 %v5880_v19, %v9873_v13  ;;  %1561 = vmatmul.bf16.gmra.mxu1 %v14045_v10  ;;  %vm5574_vm14 = vweird.f32 %v9842_v34 }
 0x1d8   : > { %6778 = vst [vmem:[%s8982_s18 + $0x240] sm:$0xff] %v6678_v46  ;;  %v5572_v20 = vmul.f32 %v7939_v47, %v5571_v25  ;;  %v6029_v50 = vadd.f32 0.00028619796, %v6028_v27  ;;  %v6040_v40 = vadd.f32 0.001143296, %v6039_v28  ;;  %v1208_v45 = vadd.f32 %v9789_v22, %v8685_v31  ;;  %vm5576_vm15 = vmor %vm5574_vm14, %vm5575_vm13  ;;  %v14047_v28 = vld [vmem:[#allocation46_spill] sm:$0xff] }
 0x1d9   : > { %v5726_v30 = vadd.f32 0.4994258, %v5725_v29  ;;  %v5871_v1 = vadd.f32 0.0036580483, %v5870_v60  ;;  %v5882_v12 = vadd.f32 0.014752088, %v5881_v36  ;;  %v5716_v35 = vmul.f32 %v5715_v17, %v9787_v24 }
 0x1da   : > { %v5573_v53 = vadd.f32 %v7939_v47, %v5572_v20  ;;  %v6030_v48 = vmul.f32 %v6029_v50, %v9890_v7  ;;  %v6041_v8 = vmul.f32 %v6040_v40, %v9890_v7  ;;  %v9914_v9 = vmul.f32 0.70710677, %v9895_v0 }
 0x1db   : > { %v5727_v23 = vmul.f32 %v5726_v30, %v9787_v24  ;;  %v5872_v43 = vmul.f32 %v5871_v1, %v9873_v13  ;;  %v5883_v34 = vmul.f32 %v5882_v12, %v9873_v13  ;;  %1634 = vmatmul.bf16.gmra.mxu2 %v14046_v62  ;;  %v2382_v24 = vmul.f32 0.5, %v9667_v21  ;;  %v14048_v12 = vld [vmem:[#allocation51_spill] sm:$0xff] }
 0x1dc   : > { %v5577_v46 = vsel %vm5576_vm15, %v7939_v47, %v5573_v53  ;;  %v6031_v41 = vadd.f32 0.0036580483, %v6030_v48  ;;  %v6042_v19 = vadd.f32 0.014752088, %v6041_v8  ;;  %v6186_v47 = vmul.f32 %v9914_v9, %v9914_v9 }
 0x1dd   : > { %v5582_v31 = vsel %vm9885_vm12, %v5581_v18, %v5577_v46  ;;  %v9920_v22 = vadd.f32 1.0, %v5727_v23  ;;  %v5873_v25 = vadd.f32 0.05243302, %v5872_v43  ;;  %v5884_v27 = vadd.f32 0.112945676, %v5883_v34  ;;  %1707 = vmatmul.bf16.gmra.mxu3 %v14047_v28 }
 0x1de   : > { %v5583_v29 = vmul.f32 %v5582_v31, %v5558_v49  ;;  %v6032_v60 = vmul.f32 %v6031_v41, %v9890_v7  ;;  %v6043_v36 = vmul.f32 %v6042_v19, %v9890_v7  ;;  %v9929_v20 = vmul.f32 0.5, %v9740_v4  ;;  %v9940_v4 = vpop.f32.mrf.mxu0  ;;  %1498 = vmatmul.bf16.gmra.mxu0 %v14048_v12  ;;  %v7425_v19 = vld [vmem:[%s8269_s29 + $0x268] sm:$0xf]  ;;  %v7807_v31 = vld [vmem:[%s8269_s29 + $0x274] sm:$0xf0] }
 0x1df   : > { %7940 = vrcp.f32 %v9920_v22  ;;  %v1281_v33 = vadd.f32 %v9791_v51, %v1208_v45  ;;  %v5874_v17 = vmul.f32 %v5873_v25, %v9873_v13  ;;  %v5885_v49 = vmul.f32 %v5884_v27, %v9873_v13 }
 0x1e0   : > { %v7699_v18 = vclamps-f32 %v5583_v29, 1.0  ;;  %v6033_v50 = vadd.f32 0.05243302, %v6032_v60  ;;  %v5717_v40 = vadd.f32 1.1283791, %v5716_v35  ;;  %v9936_v30 = vmul.f32 0.5, %v9809_v2 }
 0x1e1   : > { %v6044_v1 = vadd.f32 0.112945676, %v6043_v36  ;;  %v9938_v21 = vmin.f32 %v6186_v47, 16.0  ;;  %v5875_v53 = vadd.f32 0.18741608, %v5874_v17  ;;  %v1354_v43 = vadd.f32 %v9829_v26, %v1281_v33 }
 0x1e2   : > { %v6582_v51 = vadd.f32 1.0, %v7699_v18  ;;  %v5886_v48 = vadd.f32 0.4994258, %v5885_v49  ;;  %v6034_v8 = vmul.f32 %v6033_v50, %v9890_v7  ;;  %v5738_v2 = vand.u32 2147483647, %v9920_v22 }
 0x1e3   : > { %v6045_v45 = vmul.f32 %v6044_v1, %v9890_v7  ;;  %v6188_v23 = vmul.f32 2.1237322e-06, %v9938_v21  ;;  %v5876_v46 = vmul.f32 %v5875_v53, %v9873_v13  ;;  %v7426_v29 = vor.u32 %v7807_v31, %v7425_v19  ;;  %v7169_v60 = vld [vmem:[%s8269_s29 + $0x68] sm:$0xf]  ;;  %v7743_v36 = vld [vmem:[%s8269_s29 + $0x74] sm:$0xf0] }
 0x1e4   : > { %v6682_v34 = vmul.f32 %v6582_v51, %v2382_v24  ;;  %v5887_v35 = vmul.f32 %v5886_v48, %v9873_v13  ;;  %v6035_v41 = vadd.f32 0.18741608, %v6034_v8  ;;  %v5740_v26 = vand.u32 2147483648, %v9920_v22  ;;  %v7553_v49 = vld [vmem:[%s8269_s29 + $0x368] sm:$0xf]  ;;  %v9964_v51 = vpop.f32.mrf.mxu1  ;;  %v14049_v53 = vld [vmem:[#allocation48_spill] sm:$0xff] }
 0x1e5   : > { %v7941_v25 = vpop.eup %7940  ;;  %v6046_v27 = vadd.f32 0.4994258, %v6045_v45  ;;  %v6199_v33 = vmul.f32 3.8918573e-05, %v9938_v21  ;;  %1872 = vmatpush.bf16.msra.mxu2 %v7426_v29  ;;  %v7170_v17 = vor.u32 %v7743_v36, %v7169_v60  ;;  %v7839_v50 = vld [vmem:[%s8269_s29 + $0x374] sm:$0xf0]  ;;  %v9969_v45 = vadd.f32 %v9831_v59, %v1354_v43 }
 0x1e6   : > { %6782 = vst [vmem:[%s8982_s18 + $0x260] sm:$0xff] %v6682_v34  ;;  %v5730_v47 = vmul.f32 %v7941_v25, %v9920_v22  ;;  %v9957_v24 = vadd.f32 1.0, %v5887_v35  ;;  %v6036_v13 = vmul.f32 %v6035_v41, %v9890_v7  ;;  %v6189_v1 = vadd.f32 0.00028619796, %v6188_v23  ;;  %v9971_v34 = vpop.f32.mrf.mxu2  ;;  %v14050_v43 = vld [vmem:[#allocation49_spill] sm:$0xff] }
 0x1e7   : > { %v6047_v18 = vmul.f32 %v6046_v27, %v9890_v7  ;;  %1566 = vmatmul.bf16.gmra.mxu1 %v14049_v53  ;;  %v5877_v8 = vadd.f32 1.1283791, %v5876_v46  ;;  %vm5735_vm0 = vweird.f32 %v7941_v25  ;;  %1726 = vmatpush.bf16.msra.mxu0 %v7170_v17  ;;  %v7554_v19 = vor.u32 %v7839_v50, %v7553_v49  ;;  %v8100_v17 = vld [vmem:[%s8673_s27] sm:$0xf] }
 0x1e8   : > { %v5731_v48 = vsub.f32 1.0, %v5730_v47  ;;  %7942 = vrcp.f32 %v9957_v24  ;;  %v5900_v7 = vand.u32 2147483648, %v9957_v24  ;;  %v6037_v35 = vadd.f32 1.1283791, %v6036_v13 }
 0x1e9   : > { %v9974_v41 = vadd.f32 1.0, %v6047_v18  ;;  %v6190_v31 = vmul.f32 %v6189_v1, %v9938_v21  ;;  %v6200_v27 = vadd.f32 0.001143296, %v6199_v33  ;;  %v5718_v46 = vmul.f32 %v5717_v40, %v9760_v44  ;;  %1945 = vmatpush.bf16.msra.mxu3 %v7554_v19 }
 0x1ea   : > { %v5732_v23 = vmul.f32 %v7941_v25, %v5731_v48  ;;  %vm5734_vm1 = vweird.f32 %v9920_v22  ;;  %v5898_v59 = vand.u32 2147483647, %v9957_v24  ;;  %vm9982_vm2 = vcmp.eq.f32.partialorder %v5738_v2, 8.507059e+37  ;;  %v14053_v2 = vld [vmem:[#allocation50_spill] sm:$0xff] }
 0x1eb   : > { %7944 = vrcp.f32 %v9974_v41  ;;  %1639 = vmatmul.bf16.gmra.mxu2 %v14050_v43  ;;  %v5741_v36 = vor.u32 1.1754944e-38, %v5740_v26  ;;  %v9987_v47 = vmul.f32 %v5877_v8, %v9850_v16  ;;  %vm5736_vm3 = vmor %vm5734_vm1, %vm5735_vm0  ;;  %vm5894_vm4 = vweird.f32 %v9957_v24 }
 0x1ec   : > { %v5733_v29 = vadd.f32 %v7941_v25, %v5732_v23  ;;  %v5901_v44 = vor.u32 1.1754944e-38, %v5900_v7  ;;  %v6191_v22 = vadd.f32 0.0036580483, %v6190_v31  ;;  %v6201_v40 = vmul.f32 %v6200_v27, %v9938_v21  ;;  %v1514_v60 = vpop.f32.mrf.mxu1 }
 0x1ed   : > { %v9993_v33 = vmul.f32 0.70710677, %v9969_v45  ;;  %1712 = vmatmul.bf16.gmra.mxu3 %v14053_v2  ;;  %v9997_v26 = vmul.f32 %v6037_v35, %v9871_v32  ;;  %v6058_v16 = vand.u32 2147483647, %v9974_v41  ;;  %v10001_v49 = vperm.slane %v8100_v17, 1  ;;  %v1658_v32 = vpop.f32.mrf.mxu3 }
 0x1ee   : > { %v7943_v13 = vpop.eup %7942  ;;  %v5737_v18 = vsel %vm5736_vm3, %v7941_v25, %v5733_v29  ;;  %vm10006_vm5 = vcmp.eq.f32.partialorder %v5898_v59, 8.507059e+37  ;;  %v6060_v8 = vand.u32 2147483648, %v9974_v41  ;;  %v6192_v25 = vmul.f32 %v6191_v22, %v9938_v21 }
 0x1ef   : > { %v5742_v50 = vsel %vm9982_vm2, %v5741_v36, %v5737_v18  ;;  %v5890_v1 = vmul.f32 %v7943_v13, %v9957_v24  ;;  %v6202_v35 = vadd.f32 0.014752088, %v6201_v40  ;;  %v6346_v23 = vmul.f32 %v9993_v33, %v9993_v33  ;;  %v1587_v40 = vpop.f32.mrf.mxu2 }
 0x1f0   : > { %v5743_v7 = vmul.f32 %v5742_v50, %v5718_v46  ;;  %v1440_v19 = vadd.f32 %v9903_v63, %v10001_v49  ;;  %vm5895_vm6 = vweird.f32 %v7943_v13  ;;  %v6193_v59 = vadd.f32 0.05243302, %v6192_v25 }
 0x1f1   : > { %v7945_v31 = vpop.eup %7944  ;;  %v5891_v27 = vsub.f32 1.0, %v5890_v1  ;;  %v1442_v29 = vadd.f32 %v9940_v4, %v10001_v49  ;;  %v6203_v46 = vmul.f32 %v6202_v35, %v9938_v21  ;;  %v10021_v50 = vmin.f32 %v6346_v23, 16.0  ;;  %vm5896_vm8 = vmor %vm5894_vm4, %vm5895_vm6 }
 0x1f2   : > { %v7703_v36 = vclamps-f32 %v5743_v7, 1.0  ;;  %v6050_v22 = vmul.f32 %v7945_v31, %v9974_v41  ;;  %vm6055_vm7 = vweird.f32 %v7945_v31  ;;  %v6194_v17 = vmul.f32 %v6193_v59, %v9938_v21 }
 0x1f3   : > { %v5892_v18 = vmul.f32 %v7943_v13, %v5891_v27  ;;  %v1513_v63 = vadd.f32 %v9964_v51, %v1440_v19  ;;  %v6204_v4 = vadd.f32 0.112945676, %v6203_v46  ;;  %v1515_v12 = vadd.f32 %v1514_v60, %v1442_v29  ;;  %v1444_v27 = vpop.f32.mrf.mxu0  ;;  %v7297_v60 = vld [vmem:[%s8269_s29 + $0x168] sm:$0xf] }
 0x1f4   : > { %v6586_v1 = vadd.f32 1.0, %v7703_v36  ;;  %v6051_v25 = vsub.f32 1.0, %v6050_v22  ;;  %v6195_v53 = vadd.f32 0.18741608, %v6194_v17  ;;  %v6348_v2 = vmul.f32 2.1237322e-06, %v10021_v50 }
 0x1f5   : > { %v5893_v7 = vadd.f32 %v7943_v13, %v5892_v18  ;;  %v6359_v35 = vmul.f32 3.8918573e-05, %v10021_v50  ;;  %v6205_v23 = vmul.f32 %v6204_v4, %v9938_v21  ;;  %v1586_v19 = vadd.f32 %v9971_v34, %v1513_v63  ;;  %v7775_v36 = vld [vmem:[%s8269_s29 + $0x174] sm:$0xf0]  ;;  %v1660_v63 = vpop.f32.mrf.mxu3 }
 0x1f6   : > { %v6686_v59 = vmul.f32 %v6586_v1, %v9929_v20  ;;  %v6052_v51 = vmul.f32 %v7945_v31, %v6051_v25  ;;  %vm6054_vm9 = vweird.f32 %v9974_v41  ;;  %v6349_v22 = vadd.f32 0.00028619796, %v6348_v2 }
 0x1f7   : > { %v5897_v29 = vsel %vm5896_vm8, %v7943_v13, %v5893_v7  ;;  %v1588_v46 = vadd.f32 %v1587_v40, %v1515_v12  ;;  %1571 = vmatmul.bf16.gmra.mxu1 %v9112_v6  ;;  %v6206_v18 = vadd.f32 0.4994258, %v6205_v23  ;;  %v7298_v17 = vor.u32 %v7775_v36, %v7297_v60  ;;  %vm6056_vm10 = vmor %vm6054_vm9, %vm6055_vm7  ;;  %v1517_v7 = vpop.f32.mrf.mxu1 }
 0x1f8   : > { %6786 = vst [vmem:[%s8982_s18 + $0x280] sm:$0xff] %v6686_v59  ;;  %v5902_v20 = vsel %vm10006_vm5, %v5901_v44, %v5897_v29  ;;  %v6053_v24 = vadd.f32 %v7945_v31, %v6052_v51  ;;  %v6061_v34 = vor.u32 1.1754944e-38, %v6060_v8  ;;  %v6350_v41 = vmul.f32 %v6349_v22, %v10021_v50 }
 0x1f9   : > { %v5903_v1 = vmul.f32 %v5902_v20, %v9987_v47  ;;  %v6360_v13 = vadd.f32 0.001143296, %v6359_v35  ;;  %vm6059_vm11 = vcmp.eq.f32.partialorder %v6058_v16, 8.507059e+37  ;;  %v6207_v12 = vmul.f32 %v6206_v18, %v9938_v21  ;;  %1799 = vmatpush.bf16.msra.mxu1 %v7298_v17  ;;  %v1590_v16 = vpop.f32.mrf.mxu2 }
 0x1fa   : > { %v6057_v2 = vsel %vm6056_vm10, %v7945_v31, %v6053_v24  ;;  %v1659_v40 = vadd.f32 %v1658_v32, %v1586_v19  ;;  %v6196_v25 = vmul.f32 %v6195_v53, %v9938_v21  ;;  %v6351_v4 = vadd.f32 0.0036580483, %v6350_v41  ;;  %v14056_v53 = vld [vmem:[#allocation53_spill] sm:$0xff] }
 0x1fb   : > { %v7707_v48 = vclamps-f32 %v5903_v1, 1.0  ;;  %v6062_v44 = vsel %vm6059_vm11, %v6061_v34, %v6057_v2  ;;  %1644 = vmatmul.bf16.gmra.mxu2 %v9140_v3  ;;  %v10046_v8 = vadd.f32 1.0, %v6207_v12  ;;  %v6361_v35 = vmul.f32 %v6360_v13, %v10021_v50 }
 0x1fc   : > { %v6063_v47 = vmul.f32 %v6062_v44, %v9997_v26  ;;  %v10049_v31 = vadd.f32 %v1660_v63, %v1588_v46  ;;  %v6352_v32 = vmul.f32 %v6351_v4, %v10021_v50  ;;  %v10052_v51 = vmul.f32 0.70710677, %v1659_v40  ;;  %v1446_v46 = vpop.f32.mrf.mxu0 }
 0x1fd   : > { %v6590_v59 = vadd.f32 1.0, %v7707_v48  ;;  %v1445_v21 = vadd.f32 %v1444_v27, %v10001_v49  ;;  %1717 = vmatmul.bf16.gmra.mxu3 %v14056_v53  ;;  %v2394_v23 = vmul.f32 0.5, %v9853_v11  ;;  %v10058_v19 = vmul.f32 0.5, %v9895_v0  ;;  %v1663_v48 = vpop.f32.mrf.mxu3 }
 0x1fe   : > { %v7711_v26 = vclamps-f32 %v6063_v47, 1.0  ;;  %7946 = vrcp.f32 %v10046_v8  ;;  %v10063_v60 = vmul.f32 0.5, %v9969_v45  ;;  %v6353_v36 = vadd.f32 0.05243302, %v6352_v32 }
 0x1ff   : > { %v6690_v29 = vmul.f32 %v6590_v59, %v9936_v30  ;;  %v6362_v22 = vadd.f32 0.014752088, %v6361_v35  ;;  %v6197_v27 = vadd.f32 1.1283791, %v6196_v25  ;;  %v2546_v24 = vmul.f32 %v10052_v51, %v10052_v51 }
 0x200   : > { %v6594_v20 = vadd.f32 1.0, %v7711_v26  ;;  %v10068_v11 = vmul.f32 0.70710677, %v10049_v31  ;;  %v6220_v0 = vand.u32 2147483648, %v10046_v8  ;;  %v6354_v30 = vmul.f32 %v6353_v36, %v10021_v50 }
 0x201   : > { %6790 = vst [vmem:[%s8982_s18 + $0x2a0] sm:$0xff] %v6690_v29  ;;  %v6363_v45 = vmul.f32 %v6362_v22, %v10021_v50  ;;  %v1518_v18 = vadd.f32 %v1517_v7, %v1445_v21  ;;  %v10074_v1 = vmin.f32 %v2546_v24, 16.0  ;;  %v1447_v41 = vadd.f32 %v1446_v46, %v10001_v49  ;;  %v1519_v21 = vpop.f32.mrf.mxu1  ;;  %v1592_v36 = vpop.f32.mrf.mxu2 }
 0x202   : > { %v6694_v17 = vmul.f32 %v6594_v20, %v2394_v23  ;;  %v2706_v34 = vmul.f32 %v10068_v11, %v10068_v11  ;;  %v6218_v13 = vand.u32 2147483647, %v10046_v8  ;;  %v10080_v2 = vmul.f32 0.5, %v1659_v40  ;;  %v7803_v23 = vld [vmem:[%s8269_s29 + $0x254] sm:$0xf0] }
 0x203   : > { %v6364_v63 = vadd.f32 0.112945676, %v6363_v45  ;;  %v1591_v12 = vadd.f32 %v1590_v16, %v1518_v18  ;;  %v2548_v25 = vmul.f32 2.1237322e-06, %v10074_v1  ;;  %v2559_v4 = vmul.f32 3.8918573e-05, %v10074_v1 }
 0x204   : > { %v7947_v44 = vpop.eup %7946  ;;  %6794 = vst [vmem:[%s8982_s18 + $0x2c0] sm:$0xff] %v6694_v17  ;;  %v10085_v7 = vmin.f32 %v2706_v34, 16.0  ;;  %v6221_v35 = vor.u32 1.1754944e-38, %v6220_v0  ;;  %v6355_v59 = vadd.f32 0.18741608, %v6354_v30  ;;  %v6198_v40 = vmul.f32 %v6197_v27, %v9914_v9 }
 0x205   : > { %v6210_v47 = vmul.f32 %v7947_v44, %v10046_v8  ;;  %v6365_v32 = vmul.f32 %v6364_v63, %v10021_v50  ;;  %vm6214_vm12 = vweird.f32 %v10046_v8  ;;  %v7409_v16 = vld [vmem:[%s8269_s29 + $0x248] sm:$0xf]  ;;  %v2549_v26 = vadd.f32 0.00028619796, %v2548_v25 }
 0x206   : > { %v1520_v29 = vadd.f32 %v1519_v21, %v1447_v41  ;;  %v7410_v20 = vor.u32 %v7803_v23, %v7409_v16  ;;  %v1664_v24 = vadd.f32 %v1663_v48, %v1591_v12  ;;  %v2560_v0 = vadd.f32 0.001143296, %v2559_v4 }
 0x207   : > { %v6211_v22 = vsub.f32 1.0, %v6210_v47  ;;  %v6366_v46 = vadd.f32 0.4994258, %v6365_v32  ;;  %v2550_v45 = vmul.f32 %v2549_v26, %v10074_v1  ;;  %v2708_v30 = vmul.f32 2.1237322e-06, %v10085_v7 }
 0x208   : > { %v2719_v18 = vmul.f32 3.8918573e-05, %v10085_v7  ;;  %vm6215_vm13 = vweird.f32 %v7947_v44  ;;  %1873 = vmatpush.bf16.msra.mxu2 %v7410_v20  ;;  %v1593_v27 = vadd.f32 %v1592_v36, %v1520_v29  ;;  %v2561_v41 = vmul.f32 %v2560_v0, %v10074_v1 }
 0x209   : > { %v6212_v17 = vmul.f32 %v7947_v44, %v6211_v22  ;;  %v6367_v9 = vmul.f32 %v6366_v46, %v10021_v50  ;;  %v2551_v34 = vadd.f32 0.0036580483, %v2550_v45  ;;  %v2709_v63 = vadd.f32 0.00028619796, %v2708_v30  ;;  %vm6216_vm14 = vmor %vm6214_vm12, %vm6215_vm13  ;;  %v1449_v46 = vpop.f32.mrf.mxu0 }
 0x20a   : > { %v2720_v25 = vadd.f32 0.001143296, %v2719_v18  ;;  %v6356_v12 = vmul.f32 %v6355_v59, %v10021_v50  ;;  %v10101_v4 = vmul.f32 0.70710677, %v1664_v24  ;;  %v2562_v21 = vadd.f32 0.014752088, %v2561_v41  ;;  %v1665_v59 = vpop.f32.mrf.mxu3 }
 0x20b   : > { %v6213_v47 = vadd.f32 %v7947_v44, %v6212_v17  ;;  %v10099_v48 = vadd.f32 1.0, %v6367_v9  ;;  %v2552_v32 = vmul.f32 %v2551_v34, %v10074_v1  ;;  %v2710_v16 = vmul.f32 %v2709_v63, %v10085_v7 }
 0x20c   : > { %v2721_v23 = vmul.f32 %v2720_v25, %v10085_v7  ;;  %vm6219_vm15 = vcmp.eq.f32.partialorder %v6218_v13, 8.507059e+37  ;;  %v10110_v50 = vmul.f32 0.5, %v10049_v31  ;;  %v2563_v8 = vmul.f32 %v2562_v21, %v10074_v1 }
 0x20d   : > { %v6217_v26 = vsel %vm6216_vm14, %v7947_v44, %v6213_v47  ;;  %7948 = vrcp.f32 %v10099_v48  ;;  %v2553_v36 = vadd.f32 0.05243302, %v2552_v32  ;;  %v10113_v22 = vadd.f32 %v1665_v59, %v1593_v27  ;;  %v7739_v32 = vld [vmem:[%s8269_s29 + $0x54] sm:$0xf0] }
 0x20e   : > { %v6222_v29 = vsel %vm6219_vm15, %v6221_v35, %v6217_v26  ;;  %v2711_v45 = vadd.f32 0.0036580483, %v2710_v16  ;;  %v2722_v0 = vadd.f32 0.014752088, %v2721_v23  ;;  %v1450_v44 = vadd.f32 %v1449_v46, %v10001_v49 }
 0x20f   : > { %v6223_v20 = vmul.f32 %v6222_v29, %v6198_v40  ;;  %v6357_v13 = vadd.f32 1.1283791, %v6356_v12  ;;  %v2554_v30 = vmul.f32 %v2553_v36, %v10074_v1  ;;  %v2564_v31 = vadd.f32 0.112945676, %v2563_v8  ;;  %v7153_v12 = vld [vmem:[%s8269_s29 + $0x48] sm:$0xf] }
 0x210   : > { %v2866_v35 = vmul.f32 %v10101_v4, %v10101_v4  ;;  %v6378_v17 = vand.u32 2147483647, %v10099_v48  ;;  %v2712_v9 = vmul.f32 %v2711_v45, %v10085_v7  ;;  %v10121_v40 = vmul.f32 0.5, %v1664_v24  ;;  %v1522_v24 = vpop.f32.mrf.mxu1  ;;  %v7537_v29 = vld [vmem:[%s8269_s29 + $0x348] sm:$0xf] }
 0x211   : > { %v7715_v18 = vclamps-f32 %v6223_v20, 1.0  ;;  %v6380_v27 = vand.u32 2147483648, %v10099_v48  ;;  %v2555_v34 = vadd.f32 0.18741608, %v2554_v30  ;;  %v2565_v41 = vmul.f32 %v2564_v31, %v10074_v1  ;;  %v7835_v36 = vld [vmem:[%s8269_s29 + $0x354] sm:$0xf0] }
 0x212   : > { %v10126_v63 = vmul.f32 0.70710677, %v10113_v22  ;;  %v2723_v21 = vmul.f32 %v2722_v0, %v10085_v7  ;;  %v10131_v16 = vmin.f32 %v2866_v35, 16.0  ;;  %v6358_v23 = vmul.f32 %v6357_v13, %v9993_v33  ;;  %v7281_v30 = vld [vmem:[%s8269_s29 + $0x148] sm:$0xf] }
 0x213   : > { %v7949_v25 = vpop.eup %7948  ;;  %v6598_v47 = vadd.f32 1.0, %v7715_v18  ;;  %v2566_v59 = vadd.f32 0.4994258, %v2565_v41  ;;  %v1523_v8 = vadd.f32 %v1522_v24, %v1450_v44  ;;  %v7154_v20 = vor.u32 %v7739_v32, %v7153_v12  ;;  %v7771_v31 = vld [vmem:[%s8269_s29 + $0x154] sm:$0xf0]  ;;  %v1595_v32 = vpop.f32.mrf.mxu2 }
 0x214   : > { %v6370_v26 = vmul.f32 %v7949_v25, %v10099_v48  ;;  %v7538_v45 = vor.u32 %v7835_v36, %v7537_v29  ;;  %v2713_v18 = vadd.f32 0.05243302, %v2712_v9  ;;  %vm6375_vm0 = vweird.f32 %v7949_v25 }
 0x215   : > { %v6698_v46 = vmul.f32 %v6598_v47, %v10058_v19  ;;  %v2567_v35 = vmul.f32 %v2566_v59, %v10074_v1  ;;  %v7282_v6 = vor.u32 %v7771_v31, %v7281_v30  ;;  %1727 = vmatpush.bf16.msra.mxu0 %v7154_v20  ;;  %v2724_v13 = vadd.f32 0.112945676, %v2723_v21  ;;  %v1451_v31 = vpop.f32.mrf.mxu0 }
 0x216   : > { %v6371_v0 = vsub.f32 1.0, %v6370_v26  ;;  %1946 = vmatpush.bf16.msra.mxu3 %v7538_v45  ;;  %v2714_v33 = vmul.f32 %v2713_v18, %v10085_v7  ;;  %v2868_v44 = vmul.f32 2.1237322e-06, %v10131_v16  ;;  %v3026_v19 = vmul.f32 %v10126_v63, %v10126_v63 }
 0x217   : > { %6798 = vst [vmem:[%s8982_s18 + $0x2e0] sm:$0xff] %v6698_v46  ;;  %v2556_v47 = vmul.f32 %v2555_v34, %v10074_v1  ;;  %v10147_v9 = vadd.f32 1.0, %v2567_v35  ;;  %1800 = vmatpush.bf16.msra.mxu1 %v7282_v6  ;;  %v2879_v12 = vmul.f32 3.8918573e-05, %v10131_v16  ;;  %v2725_v26 = vmul.f32 %v2724_v13, %v10085_v7 }
 0x218   : > { %v6372_v41 = vmul.f32 %v7949_v25, %v6371_v0  ;;  %v2715_v24 = vadd.f32 0.18741608, %v2714_v33  ;;  %v2869_v59 = vadd.f32 0.00028619796, %v2868_v44  ;;  %v10151_v29 = vmin.f32 %v3026_v19, 16.0 }
 0x219   : > { %vm6374_vm1 = vweird.f32 %v10099_v48  ;;  %vm6379_vm2 = vcmp.eq.f32.partialorder %v6378_v17, 8.507059e+37  ;;  %7950 = vrcp.f32 %v10147_v9  ;;  %v6381_v1 = vor.u32 1.1754944e-38, %v6380_v27 }
 0x21a   : > { %v6373_v21 = vadd.f32 %v7949_v25, %v6372_v41  ;;  %vm6376_vm3 = vmor %vm6374_vm1, %vm6375_vm0  ;;  %v2726_v34 = vadd.f32 0.4994258, %v2725_v26  ;;  %v2870_v6 = vmul.f32 %v2869_v59, %v10131_v16  ;;  %v1596_v36 = vadd.f32 %v1595_v32, %v1523_v8 }
 0x21b   : > { %v2557_v20 = vadd.f32 1.1283791, %v2556_v47  ;;  %v2880_v45 = vadd.f32 0.001143296, %v2879_v12  ;;  %v3028_v30 = vmul.f32 2.1237322e-06, %v10151_v29  ;;  %v2716_v48 = vmul.f32 %v2715_v24, %v10085_v7 }
 0x21c   : > { %v6377_v46 = vsel %vm6376_vm3, %v7949_v25, %v6373_v21  ;;  %v2578_v0 = vand.u32 2147483647, %v10147_v9  ;;  %v2727_v17 = vmul.f32 %v2726_v34, %v10085_v7  ;;  %v2871_v33 = vadd.f32 0.0036580483, %v2870_v6 }
 0x21d   : > { %v6382_v18 = vsel %vm6379_vm2, %v6381_v1, %v6377_v46  ;;  %v2881_v27 = vmul.f32 %v2880_v45, %v10131_v16  ;;  %v3029_v13 = vadd.f32 0.00028619796, %v3028_v30  ;;  %v2580_v8 = vand.u32 2147483648, %v10147_v9  ;;  %v1454_v59 = vpop.f32.mrf.mxu0 }
 0x21e   : > { %v6383_v35 = vmul.f32 %v6382_v18, %v6358_v23  ;;  %v10163_v25 = vadd.f32 1.0, %v2727_v17  ;;  %v3039_v44 = vmul.f32 3.8918573e-05, %v10151_v29  ;;  %v10167_v19 = vadd.f32 %v1451_v31, %v10001_v49  ;;  %v7393_v31 = vld [vmem:[%s8269_s29 + $0x228] sm:$0xf] }
 0x21f   : > { %v7951_v41 = vpop.eup %7950  ;;  %v2872_v12 = vmul.f32 %v2871_v33, %v10131_v16  ;;  %v2882_v32 = vadd.f32 0.014752088, %v2881_v27  ;;  %v3030_v7 = vmul.f32 %v3029_v13, %v10151_v29  ;;  %v2558_v23 = vmul.f32 %v2557_v20, %v10052_v51  ;;  %v7799_v18 = vld [vmem:[%s8269_s29 + $0x234] sm:$0xf0]  ;;  %v7137_v27 = vld [vmem:[%s8269_s29 + $0x28] sm:$0xf] }
 0x220   : > { %v7719_v47 = vclamps-f32 %v6383_v35, 1.0  ;;  %v2570_v24 = vmul.f32 %v7951_v41, %v10147_v9  ;;  %vm2574_vm4 = vweird.f32 %v10147_v9  ;;  %7952 = vrcp.f32 %v10163_v25  ;;  %v7735_v13 = vld [vmem:[%s8269_s29 + $0x34] sm:$0xf0] }
 0x221   : > { %vm10175_vm5 = vcmp.eq.f32.partialorder %v2578_v0, 8.507059e+37  ;;  %v2717_v21 = vadd.f32 1.1283791, %v2716_v48  ;;  %v2873_v1 = vadd.f32 0.05243302, %v2872_v12  ;;  %v2883_v51 = vmul.f32 %v2882_v32, %v10131_v16  ;;  %v1668_v0 = vpop.f32.mrf.mxu3 }
 0x222   : > { %v6602_v26 = vadd.f32 1.0, %v7719_v47  ;;  %v2571_v34 = vsub.f32 1.0, %v2570_v24  ;;  %v3031_v6 = vadd.f32 0.0036580483, %v3030_v7  ;;  %v3040_v46 = vadd.f32 0.001143296, %v3039_v44 }
 0x223   : > { %vm2575_vm6 = vweird.f32 %v7951_v41  ;;  %v2581_v45 = vor.u32 1.1754944e-38, %v2580_v8  ;;  %v2874_v30 = vmul.f32 %v2873_v1, %v10131_v16  ;;  %v2884_v17 = vadd.f32 0.112945676, %v2883_v51  ;;  %v7521_v47 = vld [vmem:[%s8269_s29 + $0x328] sm:$0xf] }
 0x224   : > { %v6702_v20 = vmul.f32 %v6602_v26, %v10063_v60  ;;  %v2572_v48 = vmul.f32 %v7951_v41, %v2571_v34  ;;  %v3032_v35 = vmul.f32 %v3031_v6, %v10151_v29  ;;  %v3041_v33 = vmul.f32 %v3040_v46, %v10151_v29  ;;  %v7831_v34 = vld [vmem:[%s8269_s29 + $0x334] sm:$0xf0]  ;;  %vm10200_vm7 = vmor %vm2574_vm4, %vm2575_vm6  ;;  %v7265_v6 = vld [vmem:[%s8269_s29 + $0x128] sm:$0xf] }
 0x225   : > { %v10190_v60 = vmul.f32 %v2717_v21, %v10068_v11  ;;  %v7394_v44 = vor.u32 %v7799_v18, %v7393_v31  ;;  %v7138_v8 = vor.u32 %v7735_v13, %v7137_v27  ;;  %v10193_v12 = vadd.f32 %v1668_v0, %v1596_v36  ;;  %v7767_v46 = vld [vmem:[%s8269_s29 + $0x134] sm:$0xf0]  ;;  %v1597_v31 = vpop.f32.mrf.mxu2 }
 0x226   : > { %6802 = vst [vmem:[%s8982_s18 + $0x300] sm:$0xf] %v6702_v20  ;;  %v7953_v32 = vpop.eup %7952  ;;  %v2573_v7 = vadd.f32 %v7951_v41, %v2572_v48  ;;  %v2885_v24 = vmul.f32 %v2884_v17, %v10131_v16  ;;  %v3033_v26 = vadd.f32 0.05243302, %v3032_v35  ;;  %v3042_v1 = vadd.f32 0.014752088, %v3041_v33  ;;  %v1524_v20 = vpop.f32.mrf.mxu1 }
 0x227   : > { %v2730_v21 = vmul.f32 %v7953_v32, %v10163_v25  ;;  %vm2734_vm8 = vweird.f32 %v10163_v25  ;;  %v2875_v36 = vadd.f32 0.18741608, %v2874_v30  ;;  %1874 = vmatpush.bf16.msra.mxu2 %v7394_v44  ;;  %1728 = vmatpush.bf16.msra.mxu0 %v7138_v8  ;;  %v7522_v51 = vor.u32 %v7831_v34, %v7521_v47 }
 0x228   : > { %v2577_v18 = vsel %vm10200_vm7, %v7951_v41, %v2573_v7  ;;  %v2886_v9 = vadd.f32 0.4994258, %v2885_v24  ;;  %v3034_v0 = vmul.f32 %v3033_v26, %v10151_v29  ;;  %v3043_v48 = vmul.f32 %v3042_v1, %v10151_v29 }
 0x229   : > { %v2582_v17 = vsel %vm10175_vm5, %v2581_v45, %v2577_v18  ;;  %v2731_v35 = vsub.f32 1.0, %v2730_v21  ;;  %v2740_v30 = vand.u32 2147483648, %v10163_v25  ;;  %1947 = vmatpush.bf16.msra.mxu3 %v7522_v51  ;;  %v7266_v33 = vor.u32 %v7767_v46, %v7265_v6  ;;  %v1670_v51 = vpop.f32.mrf.mxu3 }
 0x22a   : > { %v2583_v27 = vmul.f32 %v2582_v17, %v2558_v23  ;;  %v2887_v13 = vmul.f32 %v2886_v9, %v10131_v16  ;;  %v3035_v44 = vadd.f32 0.18741608, %v3034_v0  ;;  %v3044_v8 = vadd.f32 0.112945676, %v3043_v48 }
 0x22b   : > { %v2732_v47 = vmul.f32 %v7953_v32, %v2731_v35  ;;  %vm2735_vm9 = vweird.f32 %v7953_v32  ;;  %v2738_v41 = vand.u32 2147483647, %v10163_v25  ;;  %1801 = vmatpush.bf16.msra.mxu1 %v7266_v33  ;;  %v10218_v7 = vmul.f32 0.70710677, %v10193_v12 }
 0x22c   : > { %v7624_v45 = vclamps-f32 %v2583_v27, 1.0  ;;  %v2876_v24 = vmul.f32 %v2875_v36, %v10131_v16  ;;  %v10221_v26 = vadd.f32 1.0, %v2887_v13  ;;  %v3045_v23 = vmul.f32 %v3044_v8, %v10151_v29  ;;  %vm2736_vm10 = vmor %vm2734_vm8, %vm2735_vm9 }
 0x22d   : > { %v2733_v1 = vadd.f32 %v7953_v32, %v2732_v47  ;;  %v3036_v34 = vmul.f32 %v3035_v44, %v10151_v29  ;;  %v3186_v11 = vmul.f32 %v10218_v7, %v10218_v7  ;;  %v1525_v21 = vadd.f32 %v1524_v20, %v10167_v19  ;;  %v1600_v27 = vpop.f32.mrf.mxu2 }
 0x22e   : > { %v6507_v6 = vadd.f32 1.0, %v7624_v45  ;;  %v2741_v46 = vor.u32 1.1754944e-38, %v2740_v30  ;;  %7954 = vrcp.f32 %v10221_v26  ;;  %v1455_v16 = vadd.f32 %v1454_v59, %v10001_v49  ;;  %v1527_v33 = vpop.f32.mrf.mxu1 }
 0x22f   : > { %v2737_v36 = vsel %vm2736_vm10, %v7953_v32, %v2733_v1  ;;  %vm2739_vm11 = vcmp.eq.f32.partialorder %v2738_v41, 8.507059e+37  ;;  %v3046_v18 = vadd.f32 0.4994258, %v3045_v23  ;;  %v1598_v9 = vadd.f32 %v1597_v31, %v1525_v21 }
 0x230   : > { %v6607_v0 = vmul.f32 %v6507_v6, %v10080_v2  ;;  %v2742_v48 = vsel %vm2739_vm11, %v2741_v46, %v2737_v36  ;;  %v2877_v19 = vadd.f32 1.1283791, %v2876_v24  ;;  %v10234_v20 = vmin.f32 %v3186_v11, 16.0  ;;  %v7795_v6 = vld [vmem:[%s8269_s29 + $0x214] sm:$0xf0] }
 0x231   : > { %v2743_v17 = vmul.f32 %v2742_v48, %v10190_v60  ;;  %v2898_v25 = vand.u32 2147483647, %v10221_v26  ;;  %v3037_v35 = vadd.f32 1.1283791, %v3036_v34  ;;  %v3047_v30 = vmul.f32 %v3046_v18, %v10151_v29 }
 0x232   : > { %6707 = vst [vmem:[%s8982_s18 + $0x8] sm:$0xff] %v6607_v0  ;;  %v2900_v32 = vand.u32 2147483648, %v10221_v26  ;;  %v3188_v31 = vmul.f32 2.1237322e-06, %v10234_v20  ;;  %v3199_v2 = vmul.f32 3.8918573e-05, %v10234_v20  ;;  %v1528_v13 = vadd.f32 %v1527_v33, %v1455_v16 }
 0x233   : > { %v7628_v44 = vclamps-f32 %v2743_v17, 1.0  ;;  %v10244_v8 = vmul.f32 0.5, %v10113_v22  ;;  %v10246_v60 = vadd.f32 1.0, %v3047_v30  ;;  %v10248_v47 = vadd.f32 %v1670_v51, %v1598_v9  ;;  %v1456_v22 = vpop.f32.mrf.mxu0  ;;  %v7377_v51 = vld [vmem:[%s8269_s29 + $0x208] sm:$0xf]  ;;  %v1673_v9 = vpop.f32.mrf.mxu3 }
 0x234   : > { %v7955_v29 = vpop.eup %7954  ;;  %v2878_v41 = vmul.f32 %v2877_v19, %v10101_v4  ;;  %v3189_v59 = vadd.f32 0.00028619796, %v3188_v31  ;;  %v3200_v45 = vadd.f32 0.001143296, %v3199_v2  ;;  %v1601_v24 = vadd.f32 %v1600_v27, %v1528_v13  ;;  %v7121_v0 = vld [vmem:[%s8269_s29 + $0x8] sm:$0xf] }
 0x235   : > { %v6511_v23 = vadd.f32 1.0, %v7628_v44  ;;  %v2890_v1 = vmul.f32 %v7955_v29, %v10221_v26  ;;  %vm2894_vm12 = vweird.f32 %v10221_v26  ;;  %7956 = vrcp.f32 %v10246_v60 }
 0x236   : > { %vm10254_vm13 = vcmp.eq.f32.partialorder %v2898_v25, 8.507059e+37  ;;  %v2901_v11 = vor.u32 1.1754944e-38, %v2900_v32  ;;  %v10259_v4 = vmul.f32 %v3037_v35, %v10126_v63  ;;  %v3190_v21 = vmul.f32 %v3189_v59, %v10234_v20  ;;  %v7731_v25 = vld [vmem:[%s8269_s29 + $0x14] sm:$0xf0] }
 0x237   : > { %v6611_v46 = vmul.f32 %v6511_v23, %v10110_v50  ;;  %v2891_v16 = vsub.f32 1.0, %v2890_v1  ;;  %v3201_v36 = vmul.f32 %v3200_v45, %v10234_v20  ;;  %v10267_v18 = vmul.f32 0.70710677, %v10248_v47  ;;  %v7763_v23 = vld [vmem:[%s8269_s29 + $0x114] sm:$0xf0] }
 0x238   : > { %v3058_v48 = vand.u32 2147483647, %v10246_v60  ;;  %v3191_v19 = vadd.f32 0.0036580483, %v3190_v21  ;;  %v10271_v17 = vadd.f32 %v1673_v9, %v1601_v24  ;;  %v10274_v63 = vadd.f32 %v1456_v22, %v10001_v49  ;;  %v1529_v9 = vpop.f32.mrf.mxu1 }
 0x239   : > { %6711 = vst [vmem:[%s8982_s18 + $0x28] sm:$0xff] %v6611_v46  ;;  %v2892_v35 = vmul.f32 %v7955_v29, %v2891_v16  ;;  %vm2895_vm14 = vweird.f32 %v7955_v29  ;;  %v3202_v50 = vadd.f32 0.014752088, %v3201_v36  ;;  %v3346_v30 = vmul.f32 %v10267_v18, %v10267_v18 }
 0x23a   : > { %vm3054_vm15 = vweird.f32 %v10246_v60  ;;  %v3060_v33 = vand.u32 2147483648, %v10246_v60  ;;  %v3192_v27 = vmul.f32 %v3191_v19, %v10234_v20  ;;  %v10284_v32 = vmul.f32 0.70710677, %v10271_v17  ;;  %vm2896_vm0 = vmor %vm2894_vm12, %vm2895_vm14 }
 0x23b   : > { %v7378_v31 = vor.u32 %v7795_v6, %v7377_v51  ;;  %v7957_v2 = vpop.eup %7956  ;;  %v2893_v13 = vadd.f32 %v7955_v29, %v2892_v35  ;;  %v3203_v44 = vmul.f32 %v3202_v50, %v10234_v20  ;;  %v10287_v59 = vmin.f32 %v3346_v30, 16.0  ;;  %v14065_v30 = vld [vmem:[#allocation6_spill] sm:$0xff] }
 0x23c   : > { %v7122_v45 = vor.u32 %v7731_v25, %v7121_v0  ;;  %v3050_v24 = vmul.f32 %v7957_v2, %v10246_v60  ;;  %vm10292_vm1 = vcmp.eq.f32.partialorder %v3058_v48, 8.507059e+37  ;;  %v3193_v1 = vadd.f32 0.05243302, %v3192_v27 }
 0x23d   : > { %v3506_v22 = vmul.f32 %v10284_v32, %v10284_v32  ;;  %1875 = vmatpush.bf16.msra.mxu2 %v7378_v31  ;;  %v2897_v21 = vsel %vm2896_vm0, %v7955_v29, %v2893_v13  ;;  %v3204_v51 = vadd.f32 0.112945676, %v3203_v44  ;;  %v3348_v6 = vmul.f32 2.1237322e-06, %v10287_v59 }
 0x23e   : > { %v3359_v46 = vmul.f32 3.8918573e-05, %v10287_v59  ;;  %1729 = vmatpush.bf16.msra.mxu0 %v7122_v45  ;;  %v2902_v26 = vsel %vm10254_vm13, %v2901_v11, %v2897_v21  ;;  %v3051_v16 = vsub.f32 1.0, %v3050_v24  ;;  %vm3055_vm2 = vweird.f32 %v7957_v2  ;;  %v1602_v11 = vpop.f32.mrf.mxu2 }
 0x23f   : > { %v10302_v36 = vmin.f32 %v3506_v22, 16.0  ;;  %v2903_v0 = vmul.f32 %v2902_v26, %v2878_v41  ;;  %v3205_v48 = vmul.f32 %v3204_v51, %v10234_v20  ;;  %v3349_v19 = vadd.f32 0.00028619796, %v3348_v6  ;;  %vm3056_vm3 = vmor %vm3054_vm15, %vm3055_vm2 }
 0x240   : > { %v3360_v25 = vadd.f32 0.001143296, %v3359_v46  ;;  %1876 = vmatmul.bf16.vlgmr.msra.gmra.mxu2 %v8377_v54  ;;  %v3052_v29 = vmul.f32 %v7957_v2, %v3051_v16  ;;  %v3194_v35 = vmul.f32 %v3193_v1, %v10234_v20  ;;  %v3061_v45 = vor.u32 1.1754944e-38, %v3060_v33 }
 0x241   : > { %v3508_v50 = vmul.f32 2.1237322e-06, %v10302_v36  ;;  %v3519_v34 = vmul.f32 3.8918573e-05, %v10302_v36  ;;  %1730 = vmatmul.bf16.vlgmr.msra.gmra.mxu0 %v14065_v30  ;;  %v7632_v27 = vclamps-f32 %v2903_v0, 1.0  ;;  %v3350_v41 = vmul.f32 %v3349_v19, %v10287_v59  ;;  %v1675_v0 = vpop.f32.mrf.mxu3 }
 0x242   : > { %v3206_v31 = vadd.f32 0.4994258, %v3205_v48  ;;  %v3361_v13 = vmul.f32 %v3360_v25, %v10287_v59  ;;  %v3053_v44 = vadd.f32 %v7957_v2, %v3052_v29  ;;  %v3195_v26 = vadd.f32 0.18741608, %v3194_v35 }
 0x243   : > { %v3509_v24 = vadd.f32 0.00028619796, %v3508_v50  ;;  %v3520_v22 = vadd.f32 0.001143296, %v3519_v34  ;;  %v6515_v21 = vadd.f32 1.0, %v7632_v27  ;;  %v1459_v27 = vpop.f32.mrf.mxu0 }
 0x244   : > { %v3207_v1 = vmul.f32 %v3206_v31, %v10234_v20  ;;  %v3351_v51 = vadd.f32 0.0036580483, %v3350_v41  ;;  %v3362_v6 = vadd.f32 0.014752088, %v3361_v13  ;;  %v3057_v46 = vsel %vm3056_vm3, %v7957_v2, %v3053_v44  ;;  %v7505_v50 = vld [vmem:[%s8269_s29 + $0x308] sm:$0xf] }
 0x245   : > { %v3510_v16 = vmul.f32 %v3509_v24, %v10302_v36  ;;  %v3521_v33 = vmul.f32 %v3520_v22, %v10302_v36  ;;  %v6615_v48 = vmul.f32 %v6515_v21, %v10121_v40  ;;  %v3062_v60 = vsel %vm10292_vm1, %v3061_v45, %v3057_v46  ;;  %v7827_v34 = vld [vmem:[%s8269_s29 + $0x314] sm:$0xf0]  ;;  %v7249_v40 = vld [vmem:[%s8269_s29 + $0x108] sm:$0xf]  ;;  %v1532_v24 = vpop.f32.mrf.mxu1 }
 0x246   : > { %v10321_v19 = vadd.f32 1.0, %v3207_v1  ;;  %v3352_v25 = vmul.f32 %v3351_v51, %v10287_v59  ;;  %v3063_v29 = vmul.f32 %v3062_v60, %v10259_v4  ;;  %v3363_v2 = vmul.f32 %v3362_v6, %v10287_v59 }
 0x247   : > { %v3511_v35 = vadd.f32 0.0036580483, %v3510_v16  ;;  %6715 = vst [vmem:[%s8982_s18 + $0x48] sm:$0xff] %v6615_v48  ;;  %v10330_v31 = vmul.f32 0.5, %v10193_v12  ;;  %v1460_v41 = vadd.f32 %v1459_v27, %v10001_v49  ;;  %v3196_v22 = vmul.f32 %v3195_v26, %v10234_v20  ;;  %v1605_v48 = vpop.f32.mrf.mxu2 }
 0x248   : > { %7958 = vrcp.f32 %v10321_v19  ;;  %v7636_v13 = vclamps-f32 %v3063_v29, 1.0  ;;  %v3353_v44 = vadd.f32 0.05243302, %v3352_v25  ;;  %v3364_v45 = vadd.f32 0.112945676, %v3363_v2 }
 0x249   : > { %v3512_v4 = vmul.f32 %v3511_v35, %v10302_v36  ;;  %v3522_v21 = vadd.f32 0.014752088, %v3521_v33  ;;  %v1530_v1 = vadd.f32 %v1529_v9, %v10274_v63  ;;  %v7506_v51 = vor.u32 %v7827_v34, %v7505_v50 }
 0x24a   : > { %v6519_v12 = vadd.f32 1.0, %v7636_v13  ;;  %v3354_v6 = vmul.f32 %v3353_v44, %v10287_v59  ;;  %v3365_v46 = vmul.f32 %v3364_v45, %v10287_v59  ;;  %v7250_v25 = vor.u32 %v7763_v23, %v7249_v40  ;;  %v1678_v23 = vpop.f32.mrf.mxu3 }
 0x24b   : > { %v3513_v16 = vadd.f32 0.05243302, %v3512_v4  ;;  %v3523_v60 = vmul.f32 %v3522_v21, %v10302_v36  ;;  %1948 = vmatpush.bf16.msra.mxu3 %v7506_v51  ;;  %v1603_v29 = vadd.f32 %v1602_v11, %v1530_v1  ;;  %v1533_v2 = vadd.f32 %v1532_v24, %v1460_v41  ;;  %v1461_v21 = vpop.f32.mrf.mxu0  ;;  %v14066_v1 = vld [vmem:[#allocation7_spill] sm:$0xff]  ;;  %v14067_v51 = vld [vmem:[#allocation8_spill] sm:$0xff] }
 0x24c   : > { %v6619_v20 = vmul.f32 %v6519_v12, %v10244_v8  ;;  %v3355_v26 = vadd.f32 0.18741608, %v3354_v6  ;;  %v3366_v33 = vadd.f32 0.4994258, %v3365_v46  ;;  %v3197_v35 = vadd.f32 1.1283791, %v3196_v22  ;;  %1802 = vmatpush.bf16.msra.mxu1 %v7250_v25 }
 0x24d   : > { %v3514_v63 = vmul.f32 %v3513_v16, %v10302_v36  ;;  %v3524_v50 = vadd.f32 0.112945676, %v3523_v60  ;;  %v10344_v34 = vadd.f32 %v1675_v0, %v1603_v29  ;;  %v1606_v27 = vadd.f32 %v1605_v48, %v1533_v2  ;;  %v1534_v48 = vpop.f32.mrf.mxu1 }
 0x24e   : > { %v7959_v9 = vpop.eup %7958  ;;  %6719 = vst [vmem:[%s8982_s18 + $0x68] sm:$0xff] %v6619_v20  ;;  %v3218_v40 = vand.u32 2147483647, %v10321_v19  ;;  %v10350_v11 = vmul.f32 0.5, %v10248_v47  ;;  %v3367_v8 = vmul.f32 %v3366_v33, %v10287_v59  ;;  %1949 = vmatmul.bf16.vlgmr.msra.gmra.mxu3 %v8381_v57  ;;  %v3356_v41 = vmul.f32 %v3355_v26, %v10287_v59 }
 0x24f   : > { %v3210_v13 = vmul.f32 %v7959_v9, %v10321_v19  ;;  %v3515_v44 = vadd.f32 0.18741608, %v3514_v63  ;;  %v3525_v0 = vmul.f32 %v3524_v50, %v10302_v36  ;;  %v10357_v45 = vmul.f32 0.70710677, %v10344_v34  ;;  %1803 = vmatmul.bf16.vlgmr.msra.gmra.mxu1 %v14066_v1 }
 0x250   : > { %1881 = vmatmul.bf16.gmra.mxu2 %v8419_v14  ;;  %v3220_v24 = vand.u32 2147483648, %v10321_v19  ;;  %v10361_v47 = vadd.f32 1.0, %v3367_v8  ;;  %v10363_v22 = vadd.f32 %v1678_v23, %v1606_v27  ;;  %v3198_v59 = vmul.f32 %v3197_v35, %v10218_v7 }
 0x251   : > { %v3211_v4 = vsub.f32 1.0, %v3210_v13  ;;  %1735 = vmatmul.bf16.gmra.mxu0 %v14067_v51  ;;  %v3516_v12 = vmul.f32 %v3515_v44, %v10302_v36  ;;  %v3526_v6 = vadd.f32 0.4994258, %v3525_v0  ;;  %v3666_v46 = vmul.f32 %v10357_v45, %v10357_v45  ;;  %v1607_v44 = vpop.f32.mrf.mxu2 }
 0x252   : > { %vm3214_vm4 = vweird.f32 %v10321_v19  ;;  %vm3215_vm5 = vweird.f32 %v7959_v9  ;;  %7960 = vrcp.f32 %v10361_v47  ;;  %vm10373_vm6 = vcmp.eq.f32.partialorder %v3218_v40, 8.507059e+37 }
 0x253   : > { %v3212_v16 = vmul.f32 %v7959_v9, %v3211_v4  ;;  %v3357_v25 = vadd.f32 1.1283791, %v3356_v41  ;;  %v3527_v7 = vmul.f32 %v3526_v6, %v10302_v36  ;;  %v1462_v29 = vadd.f32 %v1461_v21, %v10001_v49  ;;  %vm3216_vm7 = vmor %vm3214_vm4, %vm3215_vm5  ;;  %v1680_v21 = vpop.f32.mrf.mxu3 }
 0x254   : > { %v3221_v20 = vor.u32 1.1754944e-38, %v3220_v24  ;;  %v10379_v26 = vmin.f32 %v3666_v46, 16.0  ;;  %v10382_v33 = vmul.f32 0.70710677, %v10363_v22  ;;  %v3378_v19 = vand.u32 2147483647, %v10361_v47 }
 0x255   : > { %v3213_v2 = vadd.f32 %v7959_v9, %v3212_v16  ;;  %v3380_v63 = vand.u32 2147483648, %v10361_v47  ;;  %v3517_v35 = vadd.f32 1.1283791, %v3516_v12  ;;  %v10386_v50 = vadd.f32 1.0, %v3527_v7 }
 0x256   : > { %v3668_v36 = vmul.f32 2.1237322e-06, %v10379_v26  ;;  %v3679_v13 = vmul.f32 3.8918573e-05, %v10379_v26  ;;  %v3826_v40 = vmul.f32 %v10382_v33, %v10382_v33  ;;  %v10395_v23 = vmul.f32 %v3357_v25, %v10267_v18 }
 0x257   : > { %v3217_v27 = vsel %vm3216_vm7, %v7959_v9, %v3213_v2  ;;  %7962 = vrcp.f32 %v10386_v50  ;;  %v1535_v41 = vadd.f32 %v1534_v48, %v1462_v29  ;;  %vm3374_vm8 = vweird.f32 %v10361_v47 }
 0x258   : > { %v3222_v8 = vsel %vm10373_vm6, %v3221_v20, %v3217_v27  ;;  %v7961_v0 = vpop.eup %7960  ;;  %v3669_v9 = vadd.f32 0.00028619796, %v3668_v36  ;;  %v3680_v24 = vadd.f32 0.001143296, %v3679_v13  ;;  %vm10400_vm9 = vcmp.eq.f32.partialorder %v3378_v19, 8.507059e+37  ;;  %v1464_v27 = vpop.f32.mrf.mxu0 }
 0x259   : > { %v3223_v4 = vmul.f32 %v3222_v8, %v3198_v59  ;;  %v3370_v12 = vmul.f32 %v7961_v0, %v10361_v47  ;;  %v3381_v46 = vor.u32 1.1754944e-38, %v3380_v63  ;;  %v10405_v18 = vmul.f32 %v3517_v35, %v10284_v32  ;;  %v1537_v36 = vpop.f32.mrf.mxu1 }
 0x25a   : > { %v10407_v16 = vmin.f32 %v3826_v40, 16.0  ;;  %v3538_v59 = vand.u32 2147483647, %v10386_v50  ;;  %v3670_v60 = vmul.f32 %v3669_v9, %v10379_v26  ;;  %v3681_v25 = vmul.f32 %v3680_v24, %v10379_v26 }
 0x25b   : > { %v7640_v48 = vclamps-f32 %v3223_v4, 1.0  ;;  %v3371_v7 = vsub.f32 1.0, %v3370_v12  ;;  %v1608_v20 = vadd.f32 %v1607_v44, %v1535_v41  ;;  %vm3534_vm10 = vweird.f32 %v10386_v50 }
 0x25c   : > { %v3828_v29 = vmul.f32 2.1237322e-06, %v10407_v16  ;;  %v3839_v2 = vmul.f32 3.8918573e-05, %v10407_v16  ;;  %v3540_v32 = vand.u32 2147483648, %v10386_v50  ;;  %vm3375_vm11 = vweird.f32 %v7961_v0 }
 0x25d   : > { %v6523_v19 = vadd.f32 1.0, %v7640_v48  ;;  %v3671_v63 = vadd.f32 0.0036580483, %v3670_v60  ;;  %v3682_v35 = vadd.f32 0.014752088, %v3681_v25  ;;  %v7963_v13 = vpop.eup %7962  ;;  %v3372_v40 = vmul.f32 %v7961_v0, %v3371_v7  ;;  %vm3376_vm12 = vmor %vm3374_vm8, %vm3375_vm11 }
 0x25e   : > { %v3829_v8 = vadd.f32 0.00028619796, %v3828_v29  ;;  %v3840_v4 = vadd.f32 0.001143296, %v3839_v2  ;;  %v3530_v24 = vmul.f32 %v7963_v13, %v10386_v50  ;;  %v10419_v44 = vadd.f32 %v1680_v21, %v1608_v20  ;;  %1954 = vmatmul.bf16.gmra.mxu3 %v8421_v15  ;;  %v14072_v29 = vld [vmem:[#allocation9_spill] sm:$0xff]  ;;  %v14073_v2 = vld [vmem:[#allocation12_spill] sm:$0xff] }
 0x25f   : > { %v6623_v9 = vmul.f32 %v6523_v19, %v10330_v31  ;;  %v3672_v41 = vmul.f32 %v3671_v63, %v10379_v26  ;;  %v3373_v12 = vadd.f32 %v7961_v0, %v3372_v40  ;;  %v3683_v48 = vmul.f32 %v3682_v35, %v10379_v26  ;;  %1808 = vmatmul.bf16.gmra.mxu1 %v14072_v29  ;;  %v1610_v40 = vpop.f32.mrf.mxu2 }
 0x260   : > { %v3830_v60 = vmul.f32 %v3829_v8, %v10407_v16  ;;  %v3841_v25 = vmul.f32 %v3840_v4, %v10407_v16  ;;  %1886 = vmatmul.bf16.gmra.mxu2 %v8463_v38  ;;  %v3531_v31 = vsub.f32 1.0, %v3530_v24  ;;  %vm3535_vm13 = vweird.f32 %v7963_v13  ;;  %v1683_v24 = vpop.f32.mrf.mxu3 }
 0x261   : > { %6723 = vst [vmem:[%s8982_s18 + $0x88] sm:$0xff] %v6623_v9  ;;  %v3673_v7 = vadd.f32 0.05243302, %v3672_v41  ;;  %v1465_v21 = vadd.f32 %v1464_v27, %v10001_v49  ;;  %1740 = vmatmul.bf16.gmra.mxu0 %v14073_v2  ;;  %v3377_v20 = vsel %vm3376_vm12, %v7961_v0, %v3373_v12  ;;  %v3684_v19 = vadd.f32 0.112945676, %v3683_v48  ;;  %vm3536_vm14 = vmor %vm3534_vm10, %vm3535_vm13 }
 0x262   : > { %v3831_v63 = vadd.f32 0.0036580483, %v3830_v60  ;;  %v3842_v35 = vadd.f32 0.014752088, %v3841_v25  ;;  %v3382_v8 = vsel %vm10400_vm9, %v3381_v46, %v3377_v20  ;;  %v3532_v4 = vmul.f32 %v7963_v13, %v3531_v31  ;;  %v7619_v2 = vld [vmem:[%s8269_s29 + $0x3f8] sm:$0xf0] }
 0x263   : > { %v3674_v47 = vmul.f32 %v3673_v7, %v10379_v26  ;;  %v10436_v9 = vmul.f32 0.70710677, %v10419_v44  ;;  %v3383_v27 = vmul.f32 %v3382_v8, %v10395_v23  ;;  %v3685_v41 = vmul.f32 %v3684_v19, %v10379_v26  ;;  %v1539_v8 = vpop.f32.mrf.mxu1 }
 0x264   : > { %v3832_v0 = vmul.f32 %v3831_v63, %v10407_v16  ;;  %v3843_v12 = vmul.f32 %v3842_v35, %v10407_v16  ;;  %v3533_v48 = vadd.f32 %v7963_v13, %v3532_v4  ;;  %v3541_v60 = vor.u32 1.1754944e-38, %v3540_v32  ;;  %v1466_v35 = vpop.f32.mrf.mxu0 }
 0x265   : > { %v3675_v25 = vadd.f32 0.18741608, %v3674_v47  ;;  %v3986_v6 = vmul.f32 %v10436_v9, %v10436_v9  ;;  %v7644_v46 = vclamps-f32 %v3383_v27, 1.0  ;;  %v3686_v31 = vadd.f32 0.4994258, %v3685_v41 }
 0x266   : > { %v3833_v7 = vadd.f32 0.05243302, %v3832_v0  ;;  %v1538_v23 = vadd.f32 %v1537_v36, %v1465_v21  ;;  %v3537_v20 = vsel %vm3536_vm14, %v7963_v13, %v3533_v48  ;;  %vm3539_vm15 = vcmp.eq.f32.partialorder %v3538_v59, 8.507059e+37 }
 0x267   : > { %v3844_v19 = vadd.f32 0.112945676, %v3843_v12  ;;  %v10447_v63 = vmin.f32 %v3986_v6, 16.0  ;;  %v6527_v32 = vadd.f32 1.0, %v7644_v46  ;;  %v3542_v4 = vsel %vm3539_vm15, %v3541_v60, %v3537_v20  ;;  %v1612_v46 = vpop.f32.mrf.mxu2 }
 0x268   : > { %v3676_v47 = vmul.f32 %v3675_v25, %v10379_v26  ;;  %v3687_v27 = vmul.f32 %v3686_v31, %v10379_v26  ;;  %v3543_v50 = vmul.f32 %v3542_v4, %v10405_v18  ;;  %v3834_v41 = vmul.f32 %v3833_v7, %v10407_v16 }
 0x269   : > { %v3845_v36 = vmul.f32 %v3844_v19, %v10407_v16  ;;  %v3988_v59 = vmul.f32 2.1237322e-06, %v10447_v63  ;;  %v6627_v13 = vmul.f32 %v6527_v32, %v10350_v11  ;;  %v3999_v0 = vmul.f32 3.8918573e-05, %v10447_v63 }
 0x26a   : > { %v10456_v21 = vadd.f32 1.0, %v3687_v27  ;;  %v1611_v12 = vadd.f32 %v1610_v40, %v1538_v23  ;;  %v7648_v48 = vclamps-f32 %v3543_v50, 1.0  ;;  %v2331_v26 = vmul.f32 0.5, %v10271_v17  ;;  %v1685_v40 = vpop.f32.mrf.mxu3 }
 0x26b   : > { %v3846_v60 = vadd.f32 0.4994258, %v3845_v36  ;;  %v3989_v25 = vadd.f32 0.00028619796, %v3988_v59  ;;  %6727 = vst [vmem:[%s8982_s18 + $0xa8] sm:$0xff] %v6627_v13  ;;  %v1467_v6 = vadd.f32 %v1466_v35, %v10001_v49  ;;  %v10466_v23 = vmul.f32 0.5, %v10344_v34  ;;  %v1542_v13 = vpop.f32.mrf.mxu1 }
 0x26c   : > { %v3677_v18 = vadd.f32 1.1283791, %v3676_v47  ;;  %7964 = vrcp.f32 %v10456_v21  ;;  %v6531_v31 = vadd.f32 1.0, %v7648_v48  ;;  %v3835_v7 = vadd.f32 0.18741608, %v3834_v41 }
 0x26d   : > { %v3847_v11 = vmul.f32 %v3846_v60, %v10407_v16  ;;  %v3990_v20 = vmul.f32 %v3989_v25, %v10447_v63  ;;  %v4000_v19 = vadd.f32 0.001143296, %v3999_v0  ;;  %v10468_v32 = vadd.f32 %v1683_v24, %v1611_v12 }
 0x26e   : > { %v6631_v17 = vmul.f32 %v6531_v31, %v2331_v26  ;;  %v3698_v4 = vand.u32 2147483647, %v10456_v21  ;;  %1959 = vmatmul.bf16.gmra.mxu3 %v8465_v39  ;;  %v10475_v27 = vmul.f32 %v3677_v18, %v10357_v45  ;;  %v3700_v50 = vand.u32 2147483648, %v10456_v21  ;;  %v1469_v45 = vpop.f32.mrf.mxu0 }
 0x26f   : > { %v10471_v47 = vadd.f32 1.0, %v3847_v11  ;;  %v3991_v35 = vadd.f32 0.0036580483, %v3990_v20  ;;  %v4001_v41 = vmul.f32 %v4000_v19, %v10447_v63  ;;  %v10480_v34 = vmul.f32 0.70710677, %v10468_v32  ;;  %1813 = vmatmul.bf16.gmra.mxu1 %v8461_v37 }
 0x270   : > { %1891 = vmatmul.bf16.gmra.mxu2 %v8501_v56  ;;  %6731 = vst [vmem:[%s8982_s18 + $0xc8] sm:$0xff] %v6631_v17  ;;  %v10485_v24 = vmul.f32 0.5, %v10363_v22  ;;  %v3836_v36 = vmul.f32 %v3835_v7, %v10407_v16  ;;  %v1540_v59 = vadd.f32 %v1539_v8, %v1467_v6  ;;  %vm3694_vm0 = vweird.f32 %v10456_v21  ;;  %v7757_v37 = vld [vmem:[%s8269_s29 + $0xec] sm:$0xf] }
 0x271   : > { %7966 = vrcp.f32 %v10471_v47  ;;  %1745 = vmatmul.bf16.gmra.mxu0 %v8497_v52  ;;  %v3992_v12 = vmul.f32 %v3991_v35, %v10447_v63  ;;  %v4002_v48 = vadd.f32 0.014752088, %v4001_v41  ;;  %v4146_v22 = vmul.f32 %v10480_v34, %v10480_v34 }
 0x272   : > { %v7965_v0 = vpop.eup %7964  ;;  %vm10496_vm1 = vcmp.eq.f32.partialorder %v3698_v4, 8.507059e+37  ;;  %v3860_v8 = vand.u32 2147483648, %v10471_v47  ;;  %v1613_v25 = vadd.f32 %v1612_v46, %v1540_v59  ;;  %v3701_v26 = vor.u32 1.1754944e-38, %v3700_v50  ;;  %v1615_v50 = vpop.f32.mrf.mxu2 }
 0x273   : > { %v3690_v16 = vmul.f32 %v7965_v0, %v10456_v21  ;;  %v3993_v18 = vadd.f32 0.05243302, %v3992_v12  ;;  %v4003_v6 = vmul.f32 %v4002_v48, %v10447_v63  ;;  %v10502_v31 = vmin.f32 %v4146_v22, 16.0  ;;  %v1544_v29 = vpop.f32.mrf.mxu1 }
 0x274   : > { %v3837_v11 = vadd.f32 1.1283791, %v3836_v36  ;;  %v3858_v20 = vand.u32 2147483647, %v10471_v47  ;;  %v10505_v19 = vadd.f32 %v1685_v40, %v1613_v25  ;;  %v1470_v46 = vadd.f32 %v1469_v45, %v10001_v49  ;;  %v10513_v40 = vpop.f32.mrf.mxu3 }
 0x275   : > { %v3691_v7 = vsub.f32 1.0, %v3690_v16  ;;  %v3994_v17 = vmul.f32 %v3993_v18, %v10447_v63  ;;  %v4004_v4 = vadd.f32 0.112945676, %v4003_v6  ;;  %v4148_v35 = vmul.f32 2.1237322e-06, %v10502_v31 }
 0x276   : > { %vm3695_vm2 = vweird.f32 %v7965_v0  ;;  %v3861_v12 = vor.u32 1.1754944e-38, %v3860_v8  ;;  %v10511_v36 = vmul.f32 0.70710677, %v10505_v19  ;;  %v4159_v45 = vmul.f32 3.8918573e-05, %v10502_v31  ;;  %v1471_v38 = vpop.f32.mrf.mxu0 }
 0x277   : > { %v7967_v41 = vpop.eup %7966  ;;  %v3692_v59 = vmul.f32 %v7965_v0, %v3691_v7  ;;  %v3995_v22 = vadd.f32 0.18741608, %v3994_v17  ;;  %v4005_v16 = vmul.f32 %v4004_v4, %v10447_v63  ;;  %v3838_v18 = vmul.f32 %v3837_v11, %v10382_v33  ;;  %v7821_v8 = vld [vmem:[%s8269_s29 + $0x2ec] sm:$0xf]  ;;  %v7491_v6 = vld [vmem:[%s8269_s29 + $0x2f8] sm:$0xf0]  ;;  %vm10524_vm4 = vmor %vm3694_vm0, %vm3695_vm2 }
 0x278   : > { %v3850_v48 = vmul.f32 %v7967_v41, %v10471_v47  ;;  %vm3854_vm3 = vweird.f32 %v10471_v47  ;;  %v4149_v7 = vadd.f32 0.00028619796, %v4148_v35  ;;  %v7494_v56 = vor.u32 %v7821_v8, %v7491_v6  ;;  %v7235_v33 = vld [vmem:[%s8269_s29 + $0xf8] sm:$0xf0]  ;;  %v7853_v11 = vld [vmem:[%s8269_s29 + $0x3ec] sm:$0xf] }
 0x279   : > { %v3693_v25 = vadd.f32 %v7965_v0, %v3692_v59  ;;  %v4006_v4 = vadd.f32 0.4994258, %v4005_v16  ;;  %v1543_v39 = vadd.f32 %v1542_v13, %v1470_v46  ;;  %vm3855_vm5 = vweird.f32 %v7967_v41 }
 0x27a   : > { %v3851_v17 = vsub.f32 1.0, %v3850_v48  ;;  %v4150_v35 = vmul.f32 %v4149_v7, %v10502_v31  ;;  %v4306_v21 = vmul.f32 %v10511_v36, %v10511_v36  ;;  %v3996_v13 = vmul.f32 %v3995_v22, %v10447_v63  ;;  %2160 = vmatpush.bf16.msrb.mxu2 %v7494_v56  ;;  %vm3856_vm6 = vmor %vm3854_vm3, %vm3855_vm5  ;;  %v1617_v60 = vpop.f32.mrf.mxu2 }
 0x27b   : > { %v3697_v59 = vsel %vm10524_vm4, %v7965_v0, %v3693_v25  ;;  %v4007_v52 = vmul.f32 %v4006_v4, %v10447_v63  ;;  %v7238_v46 = vor.u32 %v7757_v37, %v7235_v33  ;;  %v7622_v25 = vor.u32 %v7853_v11, %v7619_v2 }
 0x27c   : > { %v3702_v48 = vsel %vm10496_vm1, %v3701_v26, %v3697_v59  ;;  %v3852_v16 = vmul.f32 %v7967_v41, %v3851_v17  ;;  %v4151_v8 = vadd.f32 0.0036580483, %v4150_v35  ;;  %v4160_v15 = vadd.f32 0.001143296, %v4159_v45  ;;  %v1690_v45 = vpop.f32.mrf.mxu3  ;;  %v14079_v17 = vld [vmem:[#allocation17_spill] sm:$0xff] }
 0x27d   : > { %v3703_v0 = vmul.f32 %v3702_v48, %v10475_v27  ;;  %v10542_v7 = vadd.f32 1.0, %v4007_v52  ;;  %v1616_v51 = vadd.f32 %v1615_v50, %v1543_v39  ;;  %2014 = vmatpush.bf16.msrb.mxu0 %v7238_v46  ;;  %2233 = vmatpush.bf16.msrb.mxu3 %v7622_v25  ;;  %v10548_v56 = vmin.f32 %v4306_v21, 16.0  ;;  %v14078_v39 = vld [vmem:[#allocation21_spill] sm:$0xff]  ;;  %v14086_v25 = vld [vmem:[#allocation23_spill] sm:$0xff] }
 0x27e   : > { %v3853_v6 = vadd.f32 %v7967_v41, %v3852_v16  ;;  %v4152_v63 = vmul.f32 %v4151_v8, %v10502_v31  ;;  %v1472_v37 = vadd.f32 %v1471_v38, %v10001_v49  ;;  %vm3859_vm7 = vcmp.eq.f32.partialorder %v3858_v20, 8.507059e+37  ;;  %1964 = vmatmul.bf16.gmra.mxu3 %v8503_v58  ;;  %v14080_v38 = vld [vmem:[#allocation19_spill] sm:$0xff]  ;;  %v1474_v16 = vpop.f32.mrf.mxu0 }
 0x27f   : > { %v7652_v14 = vclamps-f32 %v3703_v0, 1.0  ;;  %v3997_v27 = vadd.f32 1.1283791, %v3996_v13  ;;  %7968 = vrcp.f32 %v10542_v7  ;;  %v10555_v50 = vmul.f32 0.5, %v10419_v44  ;;  %1818 = vmatmul.bf16.gmra.mxu1 %v14079_v17 }
 0x280   : > { %v3857_v2 = vsel %vm3856_vm6, %v7967_v41, %v3853_v6  ;;  %1896 = vmatmul.bf16.gmra.mxu2 %v14078_v39  ;;  %v4153_v22 = vadd.f32 0.05243302, %v4152_v63  ;;  %v4161_v41 = vmul.f32 %v4160_v15, %v10502_v31  ;;  %v4308_v4 = vmul.f32 2.1237322e-06, %v10548_v56 }
 0x281   : > { %v6535_v47 = vadd.f32 1.0, %v7652_v14  ;;  %v3862_v26 = vsel %vm3859_vm7, %v3861_v12, %v3857_v2  ;;  %1750 = vmatmul.bf16.gmra.mxu0 %v14080_v38  ;;  %v10562_v59 = vadd.f32 %v10513_v40, %v1616_v51  ;;  %v4018_v44 = vand.u32 2147483647, %v10542_v7 }
 0x282   : > { %v3863_v20 = vmul.f32 %v3862_v26, %v3838_v18  ;;  %v4319_v12 = vmul.f32 3.8918573e-05, %v10548_v56  ;;  %v1545_v33 = vadd.f32 %v1544_v29, %v1472_v37  ;;  %v10568_v35 = vmul.f32 %v3997_v27, %v10436_v9 }
 0x283   : > { %v6635_v14 = vmul.f32 %v6535_v47, %v10466_v23  ;;  %v4162_v21 = vadd.f32 0.014752088, %v4161_v41  ;;  %v4309_v18 = vadd.f32 0.00028619796, %v4308_v4  ;;  %v4020_v15 = vand.u32 2147483648, %v10542_v7  ;;  %v10573_v23 = vpop.f32.mrf.mxu1 }
 0x284   : > { %v7656_v11 = vclamps-f32 %v3863_v20, 1.0  ;;  %v4154_v48 = vmul.f32 %v4153_v22, %v10502_v31  ;;  %v4320_v51 = vadd.f32 0.001143296, %v4319_v12  ;;  %v1618_v40 = vadd.f32 %v1617_v60, %v1545_v33  ;;  %v7363_v12 = vld [vmem:[%s8269_s29 + $0x1f8] sm:$0xf0] }
 0x285   : > { %6735 = vst [vmem:[%s8982_s18 + $0xe8] sm:$0xff] %v6635_v14  ;;  %v7969_v13 = vpop.eup %7968  ;;  %v4163_v29 = vmul.f32 %v4162_v21, %v10502_v31  ;;  %v4310_v9 = vmul.f32 %v4309_v18, %v10548_v56  ;;  %v10578_v0 = vmul.f32 0.70710677, %v10562_v59  ;;  %vm4014_vm8 = vweird.f32 %v10542_v7 }
 0x286   : > { %v6539_v52 = vadd.f32 1.0, %v7656_v11  ;;  %v4010_v46 = vmul.f32 %v7969_v13, %v10542_v7  ;;  %vm10582_vm9 = vcmp.eq.f32.partialorder %v4018_v44, 8.507059e+37  ;;  %v4321_v8 = vmul.f32 %v4320_v51, %v10548_v56  ;;  %v7789_v44 = vld [vmem:[%s8269_s29 + $0x1ec] sm:$0xf] }
 0x287   : > { %v4164_v63 = vadd.f32 0.112945676, %v4163_v29  ;;  %v4311_v37 = vadd.f32 0.0036580483, %v4310_v9  ;;  %v4466_v2 = vmul.f32 %v10578_v0, %v10578_v0  ;;  %v4021_v60 = vor.u32 1.1754944e-38, %v4020_v15 }
 0x288   : > { %v6639_v6 = vmul.f32 %v6539_v52, %v10485_v24  ;;  %v4011_v27 = vsub.f32 1.0, %v4010_v46  ;;  %v4322_v47 = vadd.f32 0.014752088, %v4321_v8  ;;  %v10590_v26 = vadd.f32 %v1690_v45, %v1618_v40  ;;  %v10597_v24 = vpop.f32.mrf.mxu2  ;;  %v10603_v45 = vpop.f32.mrf.mxu3 }
 0x289   : > { %v4155_v22 = vadd.f32 0.18741608, %v4154_v48  ;;  %v4165_v20 = vmul.f32 %v4164_v63, %v10502_v31  ;;  %v4312_v41 = vmul.f32 %v4311_v37, %v10548_v56  ;;  %v10595_v4 = vmin.f32 %v4466_v2, 16.0 }
 0x28a   : > { %6739 = vst [vmem:[%s8982_s18 + $0x108] sm:$0xff] %v6639_v6  ;;  %v4012_v14 = vmul.f32 %v7969_v13, %v4011_v27  ;;  %vm4015_vm10 = vweird.f32 %v7969_v13  ;;  %v4323_v33 = vmul.f32 %v4322_v47, %v10548_v56  ;;  %v1475_v11 = vadd.f32 %v1474_v16, %v10001_v49  ;;  %v1476_v27 = vpop.f32.mrf.mxu0 }
 0x28b   : > { %v4166_v21 = vadd.f32 0.4994258, %v4165_v20  ;;  %v7366_v18 = vor.u32 %v7789_v44, %v7363_v12  ;;  %v4313_v15 = vadd.f32 0.05243302, %v4312_v41  ;;  %v4468_v48 = vmul.f32 2.1237322e-06, %v10595_v4  ;;  %vm4016_vm11 = vmor %vm4014_vm8, %vm4015_vm10  ;;  %v10618_v47 = vpop.f32.mrf.mxu1 }
 0x28c   : > { %v4013_v51 = vadd.f32 %v7969_v13, %v4012_v14  ;;  %v4324_v40 = vadd.f32 0.112945676, %v4323_v33  ;;  %v4479_v52 = vmul.f32 3.8918573e-05, %v10595_v4  ;;  %v10608_v29 = vmul.f32 0.70710677, %v10590_v26 }
 0x28d   : > { %v4156_v9 = vmul.f32 %v4155_v22, %v10502_v31  ;;  %v4167_v16 = vmul.f32 %v4166_v21, %v10502_v31  ;;  %2087 = vmatpush.bf16.msrb.mxu1 %v7366_v18  ;;  %v4314_v46 = vmul.f32 %v4313_v15, %v10548_v56  ;;  %v4469_v8 = vadd.f32 0.00028619796, %v4468_v48  ;;  %v14083_v41 = vld [vmem:[#allocation22_spill] sm:$0xff]  ;;  %v14085_v21 = vld [vmem:[#allocation20_spill] sm:$0xff] }
 0x28e   : > { %v4017_v6 = vsel %vm4016_vm11, %v7969_v13, %v4013_v51  ;;  %v4325_v63 = vmul.f32 %v4324_v40, %v10548_v56  ;;  %v4480_v37 = vadd.f32 0.001143296, %v4479_v52  ;;  %v4626_v2 = vmul.f32 %v10608_v29, %v10608_v29  ;;  %1969 = vmatmul.bf16.gmra.mxu3 %v14083_v41  ;;  %v14084_v13 = vld [vmem:[#allocation25_spill] sm:$0xff] }
 0x28f   : > { %v4022_v7 = vsel %vm10582_vm9, %v4021_v60, %v4017_v6  ;;  %v10622_v22 = vadd.f32 1.0, %v4167_v16  ;;  %v4315_v31 = vadd.f32 0.18741608, %v4314_v46  ;;  %v4470_v20 = vmul.f32 %v4469_v8, %v10595_v4  ;;  %1823 = vmatmul.bf16.gmra.mxu1 %v14085_v21 }
 0x290   : > { %1901 = vmatmul.bf16.gmra.mxu2 %v14084_v13  ;;  %v4023_v14 = vmul.f32 %v4022_v7, %v10568_v35  ;;  %v4326_v44 = vadd.f32 0.4994258, %v4325_v63  ;;  %v4481_v12 = vmul.f32 %v4480_v37, %v10595_v4  ;;  %v10629_v33 = vmin.f32 %v4626_v2, 16.0  ;;  %v10647_v8 = vpop.f32.mrf.mxu2  ;;  %v10653_v37 = vpop.f32.mrf.mxu3 }
 0x291   : > { %1755 = vmatmul.bf16.gmra.mxu0 %v14086_v25  ;;  %v10634_v60 = vmul.f32 0.5, %v10468_v32  ;;  %7970 = vrcp.f32 %v10622_v22  ;;  %v10638_v18 = vmul.f32 0.5, %v10505_v19  ;;  %v10641_v15 = vmul.f32 0.5, %v10562_v59 }
 0x292   : > { %v7660_v35 = vclamps-f32 %v4023_v14, 1.0  ;;  %v4327_v48 = vmul.f32 %v4326_v44, %v10548_v56  ;;  %v4471_v51 = vadd.f32 0.0036580483, %v4470_v20  ;;  %v1548_v40 = vadd.f32 %v10573_v23, %v1475_v11 }
 0x293   : > { %v4157_v52 = vadd.f32 1.1283791, %v4156_v9  ;;  %v4316_v16 = vmul.f32 %v4315_v31, %v10548_v56  ;;  %v4482_v46 = vadd.f32 0.014752088, %v4481_v12  ;;  %v4628_v32 = vmul.f32 2.1237322e-06, %v10629_v33 }
 0x294   : > { %v6543_v6 = vadd.f32 1.0, %v7660_v35  ;;  %v4178_v19 = vand.u32 2147483647, %v10622_v22  ;;  %v10650_v63 = vadd.f32 1.0, %v4327_v48  ;;  %v4472_v59 = vmul.f32 %v4471_v51, %v10595_v4 }
 0x295   : > { %v4180_v23 = vand.u32 2147483648, %v10622_v22  ;;  %v4483_v11 = vmul.f32 %v4482_v46, %v10595_v4  ;;  %v4629_v56 = vadd.f32 0.00028619796, %v4628_v32  ;;  %v4639_v9 = vmul.f32 3.8918573e-05, %v10629_v33 }
 0x296   : > { %v6643_v2 = vmul.f32 %v6543_v6, %v10555_v50  ;;  %7972 = vrcp.f32 %v10650_v63  ;;  %v1621_v7 = vadd.f32 %v10597_v24, %v1548_v40  ;;  %v10662_v31 = vadd.f32 %v1476_v27, %v10001_v49  ;;  %v1479_v24 = vpop.f32.mrf.mxu0  ;;  %v10669_v40 = vpop.f32.mrf.mxu1 }
 0x297   : > { %v7971_v20 = vpop.eup %7970  ;;  %v4158_v14 = vmul.f32 %v4157_v52, %v10480_v34  ;;  %v4317_v44 = vadd.f32 1.1283791, %v4316_v16  ;;  %v4473_v12 = vadd.f32 0.05243302, %v4472_v59  ;;  %v4630_v35 = vmul.f32 %v4629_v56, %v10629_v33  ;;  %v7817_v56 = vld [vmem:[%s8269_s29 + $0x2cc] sm:$0xf] }
 0x298   : > { %6743 = vst [vmem:[%s8982_s18 + $0x128] sm:$0xff] %v6643_v2  ;;  %v4170_v48 = vmul.f32 %v7971_v20, %v10622_v22  ;;  %vm4174_vm12 = vweird.f32 %v10622_v22  ;;  %v4484_v50 = vadd.f32 0.112945676, %v4483_v11  ;;  %v4640_v51 = vadd.f32 0.001143296, %v4639_v9  ;;  %v14092_v22 = vld [vmem:[#allocation27_spill] sm:$0xff] }
 0x299   : > { %vm10671_vm13 = vcmp.eq.f32.partialorder %v4178_v19, 8.507059e+37  ;;  %v4181_v34 = vor.u32 1.1754944e-38, %v4180_v23  ;;  %v4474_v52 = vmul.f32 %v4473_v12, %v10595_v4  ;;  %v4631_v16 = vadd.f32 0.0036580483, %v4630_v35  ;;  %v7475_v9 = vld [vmem:[%s8269_s29 + $0x2d8] sm:$0xf0] }
 0x29a   : > { %v4171_v46 = vsub.f32 1.0, %v4170_v48  ;;  %v4485_v32 = vmul.f32 %v4484_v50, %v10595_v4  ;;  %v4641_v6 = vmul.f32 %v4640_v51, %v10629_v33  ;;  %v10679_v59 = vadd.f32 %v10603_v45, %v1621_v7  ;;  %v10690_v51 = vpop.f32.mrf.mxu2 }
 0x29b   : > { %vm4175_vm14 = vweird.f32 %v7971_v20  ;;  %v10682_v11 = vmul.f32 %v4317_v44, %v10511_v36  ;;  %v4475_v19 = vadd.f32 0.18741608, %v4474_v52  ;;  %v4632_v23 = vmul.f32 %v4631_v16, %v10629_v33 }
 0x29c   : > { %v7973_v2 = vpop.eup %7972  ;;  %v4172_v12 = vmul.f32 %v7971_v20, %v4171_v46  ;;  %v4486_v35 = vadd.f32 0.4994258, %v4485_v32  ;;  %v7478_v48 = vor.u32 %v7817_v56, %v7475_v9  ;;  %v4642_v25 = vadd.f32 0.014752088, %v4641_v6  ;;  %v10697_v46 = vpop.f32.mrf.mxu3  ;;  %vm4176_vm0 = vmor %vm4174_vm12, %vm4175_vm14  ;;  %v14090_v9 = vld [vmem:[#allocation29_spill] sm:$0xff] }
 0x29d   : > { %v4330_v50 = vmul.f32 %v7973_v2, %v10650_v63  ;;  %vm4334_vm15 = vweird.f32 %v10650_v63  ;;  %v4476_v45 = vmul.f32 %v4475_v19, %v10595_v4  ;;  %v4633_v7 = vadd.f32 0.05243302, %v4632_v23 }
 0x29e   : > { %v4173_v36 = vadd.f32 %v7971_v20, %v4172_v12  ;;  %v4487_v44 = vmul.f32 %v4486_v35, %v10595_v4  ;;  %2161 = vmatpush.bf16.msrb.mxu2 %v7478_v48  ;;  %v4643_v52 = vmul.f32 %v4642_v25, %v10629_v33  ;;  %v10695_v16 = vmul.f32 0.70710677, %v10679_v59  ;;  %v14089_v4 = vld [vmem:[#allocation26_spill] sm:$0xff]  ;;  %v14091_v48 = vld [vmem:[#allocation24_spill] sm:$0xff] }
 0x29f   : > { %v4331_v32 = vsub.f32 1.0, %v4330_v50  ;;  %v4338_v6 = vand.u32 2147483647, %v10650_v63  ;;  %v4340_v19 = vand.u32 2147483648, %v10650_v63  ;;  %v4634_v56 = vmul.f32 %v4633_v7, %v10629_v33  ;;  %1974 = vmatmul.bf16.gmra.mxu3 %v14089_v4  ;;  %1828 = vmatmul.bf16.gmra.mxu1 %v14091_v48 }
 0x2a0   : > { %1906 = vmatmul.bf16.gmra.mxu2 %v14090_v9  ;;  %v4177_v25 = vsel %vm4176_vm0, %v7971_v20, %v4173_v36  ;;  %v4477_v23 = vadd.f32 1.1283791, %v4476_v45  ;;  %v10707_v12 = vadd.f32 1.0, %v4487_v44  ;;  %v4644_v35 = vadd.f32 0.112945676, %v4643_v52  ;;  %v10719_v36 = vpop.f32.mrf.mxu0  ;;  %v10721_v44 = vpop.f32.mrf.mxu1 }
 0x2a1   : > { %1760 = vmatmul.bf16.gmra.mxu0 %v14092_v22  ;;  %v4182_v50 = vsel %vm10671_vm13, %v4181_v34, %v4177_v25  ;;  %v4332_v13 = vmul.f32 %v7973_v2, %v4331_v32  ;;  %vm4335_vm1 = vweird.f32 %v7973_v2  ;;  %v1480_v7 = vadd.f32 %v1479_v24, %v10001_v49  ;;  %v7849_v22 = vld [vmem:[%s8269_s29 + $0x3cc] sm:$0xf] }
 0x2a2   : > { %v4183_v4 = vmul.f32 %v4182_v50, %v4158_v14  ;;  %7974 = vrcp.f32 %v10707_v12  ;;  %v4786_v20 = vmul.f32 %v10695_v16, %v10695_v16  ;;  %v1550_v45 = vadd.f32 %v10618_v47, %v10662_v31  ;;  %vm4336_vm3 = vmor %vm4334_vm15, %vm4335_vm1  ;;  %v7753_v47 = vld [vmem:[%s8269_s29 + $0xcc] sm:$0xf]  ;;  %v7219_v31 = vld [vmem:[%s8269_s29 + $0xd8] sm:$0xf0] }
 0x2a3   : > { %v4333_v27 = vadd.f32 %v7973_v2, %v4332_v13  ;;  %vm4339_vm2 = vcmp.eq.f32.partialorder %v4338_v6, 8.507059e+37  ;;  %v4635_v34 = vadd.f32 0.18741608, %v4634_v56  ;;  %v4645_v24 = vmul.f32 %v4644_v35, %v10629_v33 }
 0x2a4   : > { %v7664_v14 = vclamps-f32 %v4183_v4, 1.0  ;;  %v4341_v52 = vor.u32 1.1754944e-38, %v4340_v19  ;;  %v10727_v32 = vmul.f32 %v4477_v23, %v10578_v0  ;;  %v1623_v25 = vadd.f32 %v10647_v8, %v1550_v45  ;;  %v7603_v19 = vld [vmem:[%s8269_s29 + $0x3d8] sm:$0xf0] }
 0x2a5   : > { %v4337_v13 = vsel %vm4336_vm3, %v7973_v2, %v4333_v27  ;;  %v4498_v6 = vand.u32 2147483647, %v10707_v12  ;;  %v4646_v56 = vadd.f32 0.4994258, %v4645_v24  ;;  %v1553_v35 = vadd.f32 %v10669_v40, %v1480_v7  ;;  %v7785_v2 = vld [vmem:[%s8269_s29 + $0x1cc] sm:$0xf]  ;;  %v10743_v24 = vpop.f32.mrf.mxu2 }
 0x2a6   : > { %v6547_v4 = vadd.f32 1.0, %v7664_v14  ;;  %v4342_v50 = vsel %vm4339_vm2, %v4341_v52, %v4337_v13  ;;  %v7222_v63 = vor.u32 %v7753_v47, %v7219_v31  ;;  %v10736_v9 = vmin.f32 %v4786_v20, 16.0  ;;  %v7347_v27 = vld [vmem:[%s8269_s29 + $0x1d8] sm:$0xf0] }
 0x2a7   : > { %v4343_v0 = vmul.f32 %v4342_v50, %v10682_v11  ;;  %v4636_v23 = vmul.f32 %v4635_v34, %v10629_v33  ;;  %v4647_v8 = vmul.f32 %v4646_v56, %v10629_v33  ;;  %v7606_v45 = vor.u32 %v7849_v22, %v7603_v19  ;;  %v10748_v11 = vpop.f32.mrf.mxu3 }
 0x2a8   : > { %v7975_v40 = vpop.eup %7974  ;;  %v6647_v7 = vmul.f32 %v6547_v4, %v10634_v60  ;;  %2015 = vmatpush.bf16.msrb.mxu0 %v7222_v63  ;;  %v7350_v14 = vor.u32 %v7785_v2, %v7347_v27  ;;  %v4788_v20 = vmul.f32 2.1237322e-06, %v10736_v9  ;;  %v4799_v52 = vmul.f32 3.8918573e-05, %v10736_v9 }
 0x2a9   : > { %v7668_v34 = vclamps-f32 %v4343_v0, 1.0  ;;  %v4490_v33 = vmul.f32 %v7975_v40, %v10707_v12  ;;  %v10751_v22 = vadd.f32 1.0, %v4647_v8  ;;  %2234 = vmatpush.bf16.msrb.mxu3 %v7606_v45  ;;  %v10754_v47 = vadd.f32 %v10653_v37, %v1623_v25  ;;  %v10763_v0 = vpop.f32.mrf.mxu0  ;;  %v10765_v8 = vpop.f32.mrf.mxu1 }
 0x2aa   : > { %6747 = vst [vmem:[%s8982_s18 + $0x148] sm:$0xff] %v6647_v7  ;;  %v4500_v60 = vand.u32 2147483648, %v10707_v12  ;;  %2088 = vmatpush.bf16.msrb.mxu1 %v7350_v14  ;;  %v4789_v31 = vadd.f32 0.00028619796, %v4788_v20  ;;  %v4800_v13 = vadd.f32 0.001143296, %v4799_v52  ;;  %v1626_v56 = vadd.f32 %v10690_v51, %v1553_v35 }
 0x2ab   : > { %v6551_v4 = vadd.f32 1.0, %v7668_v34  ;;  %v4491_v50 = vsub.f32 1.0, %v4490_v33  ;;  %v4637_v63 = vadd.f32 1.1283791, %v4636_v23  ;;  %7976 = vrcp.f32 %v10751_v22 }
 0x2ac   : > { %vm4495_vm4 = vweird.f32 %v7975_v40  ;;  %v4658_v19 = vand.u32 2147483647, %v10751_v22  ;;  %v4790_v37 = vmul.f32 %v4789_v31, %v10736_v9  ;;  %v4801_v25 = vmul.f32 %v4800_v13, %v10736_v9  ;;  %v14096_v31 = vld [vmem:[#allocation28_spill] sm:$0xff] }
 0x2ad   : > { %v6651_v45 = vmul.f32 %v6551_v4, %v10638_v18  ;;  %v4492_v51 = vmul.f32 %v7975_v40, %v4491_v50  ;;  %v10769_v35 = vmul.f32 0.70710677, %v10754_v47  ;;  %v10772_v23 = vadd.f32 %v10697_v46, %v1626_v56  ;;  %v14095_v46 = vld [vmem:[#allocation30_spill] sm:$0xff] }
 0x2ae   : > { %vm4494_vm5 = vweird.f32 %v10707_v12  ;;  %v4660_v2 = vand.u32 2147483648, %v10751_v22  ;;  %v4791_v27 = vadd.f32 0.0036580483, %v4790_v37  ;;  %v4802_v7 = vadd.f32 0.014752088, %v4801_v25  ;;  %v10798_v37 = vpop.f32.mrf.mxu2 }
 0x2af   : > { %6751 = vst [vmem:[%s8982_s18 + $0x168] sm:$0xff] %v6651_v45  ;;  %v4493_v14 = vadd.f32 %v7975_v40, %v4492_v51  ;;  %vm10777_vm6 = vcmp.eq.f32.partialorder %v4498_v6, 8.507059e+37  ;;  %v4946_v18 = vmul.f32 %v10769_v35, %v10769_v35  ;;  %v10784_v52 = vmul.f32 0.70710677, %v10772_v23  ;;  %1979 = vmatmul.bf16.gmra.mxu3 %v14095_v46  ;;  %vm4496_vm7 = vmor %vm4494_vm5, %vm4495_vm4  ;;  %1833 = vmatmul.bf16.gmra.mxu1 %v14096_v31  ;;  %v10808_v51 = vpop.f32.mrf.mxu3 }
 0x2b0   : > { %1911 = vmatmul.bf16.gmra.mxu2 %v14027_v55  ;;  %v4501_v12 = vor.u32 1.1754944e-38, %v4500_v60  ;;  %v4638_v34 = vmul.f32 %v4637_v63, %v10608_v29  ;;  %v4792_v6 = vmul.f32 %v4791_v27, %v10736_v9  ;;  %v4803_v33 = vmul.f32 %v4802_v7, %v10736_v9  ;;  %v14097_v60 = vld [vmem:[#allocation31_spill] sm:$0xff] }
 0x2b1   : > { %v7977_v13 = vpop.eup %7976  ;;  %v4497_v56 = vsel %vm4496_vm7, %v7975_v40, %v4493_v14  ;;  %vm4654_vm8 = vweird.f32 %v10751_v22  ;;  %v10794_v4 = vmin.f32 %v4946_v18, 16.0  ;;  %v5106_v50 = vmul.f32 %v10784_v52, %v10784_v52  ;;  %1765 = vmatmul.bf16.gmra.mxu0 %v14097_v60  ;;  %v10821_v46 = vpop.f32.mrf.mxu1 }
 0x2b2   : > { %v4502_v29 = vsel %vm10777_vm6, %v4501_v12, %v4497_v56  ;;  %v4650_v63 = vmul.f32 %v7977_v13, %v10751_v22  ;;  %vm10804_vm9 = vcmp.eq.f32.partialorder %v4658_v19, 8.507059e+37  ;;  %v4661_v40 = vor.u32 1.1754944e-38, %v4660_v2 }
 0x2b3   : > { %v4793_v45 = vadd.f32 0.05243302, %v4792_v6  ;;  %v4503_v27 = vmul.f32 %v4502_v29, %v10727_v32  ;;  %v4804_v7 = vadd.f32 0.112945676, %v4803_v33  ;;  %v4948_v14 = vmul.f32 2.1237322e-06, %v10794_v4  ;;  %v10819_v29 = vpop.f32.mrf.mxu0 }
 0x2b4   : > { %v4959_v18 = vmul.f32 3.8918573e-05, %v10794_v4  ;;  %v4651_v60 = vsub.f32 1.0, %v4650_v63  ;;  %vm4655_vm10 = vweird.f32 %v7977_v13  ;;  %v10814_v12 = vmin.f32 %v5106_v50, 16.0 }
 0x2b5   : > { %v4794_v20 = vmul.f32 %v4793_v45, %v10736_v9  ;;  %v7672_v19 = vclamps-f32 %v4503_v27, 1.0  ;;  %v4805_v56 = vmul.f32 %v4804_v7, %v10736_v9  ;;  %v4949_v2 = vadd.f32 0.00028619796, %v4948_v14  ;;  %vm4656_vm11 = vmor %vm4654_vm8, %vm4655_vm10 }
 0x2b6   : > { %v4960_v6 = vadd.f32 0.001143296, %v4959_v18  ;;  %v4652_v55 = vmul.f32 %v7977_v13, %v4651_v60  ;;  %v5108_v32 = vmul.f32 2.1237322e-06, %v10814_v12  ;;  %v5119_v33 = vmul.f32 3.8918573e-05, %v10814_v12 }
 0x2b7   : > { %v4795_v31 = vadd.f32 0.18741608, %v4794_v20  ;;  %v6555_v63 = vadd.f32 1.0, %v7672_v19  ;;  %v4806_v48 = vadd.f32 0.4994258, %v4805_v56  ;;  %v4950_v50 = vmul.f32 %v4949_v2, %v10794_v4 }
 0x2b8   : > { %v4961_v45 = vmul.f32 %v4960_v6, %v10794_v4  ;;  %v4653_v27 = vadd.f32 %v7977_v13, %v4652_v55  ;;  %v5109_v7 = vadd.f32 0.00028619796, %v5108_v32  ;;  %v5120_v14 = vadd.f32 0.001143296, %v5119_v33 }
 0x2b9   : > { %v1482_v60 = vadd.f32 %v10719_v36, %v10001_v49  ;;  %v6655_v18 = vmul.f32 %v6555_v63, %v10641_v15  ;;  %v4807_v20 = vmul.f32 %v4806_v48, %v10736_v9  ;;  %v4951_v19 = vadd.f32 0.0036580483, %v4950_v50  ;;  %v10842_v48 = vpop.f32.mrf.mxu2  ;;  %v10845_v63 = vpop.f32.mrf.mxu3 }
 0x2ba   : > { %v4962_v56 = vadd.f32 0.014752088, %v4961_v45  ;;  %v4657_v21 = vsel %vm4656_vm11, %v7977_v13, %v4653_v27  ;;  %v4796_v2 = vmul.f32 %v4795_v31, %v10736_v9  ;;  %v5110_v55 = vmul.f32 %v5109_v7, %v10814_v12 }
 0x2bb   : > { %v5121_v6 = vmul.f32 %v5120_v14, %v10814_v12  ;;  %6755 = vst [vmem:[%s8982_s18 + $0x188] sm:$0xff] %v6655_v18  ;;  %v4662_v36 = vsel %vm10804_vm9, %v4661_v40, %v4657_v21  ;;  %v10838_v15 = vadd.f32 1.0, %v4807_v20  ;;  %v4952_v22 = vmul.f32 %v4951_v19, %v10794_v4  ;;  %v14100_v18 = vld [vmem:[#allocation34_spill] sm:$0xff]  ;;  %v14101_v20 = vld [vmem:[#allocation37_spill] sm:$0xff] }
 0x2bc   : > { %v4963_v32 = vmul.f32 %v4962_v56, %v10794_v4  ;;  %v2359_v13 = vmul.f32 0.5, %v10590_v26  ;;  %v4663_v33 = vmul.f32 %v4662_v36, %v4638_v34  ;;  %v5111_v9 = vadd.f32 0.0036580483, %v5110_v55  ;;  %v10864_v56 = vpop.f32.mrf.mxu0 }
 0x2bd   : > { %v5122_v31 = vadd.f32 0.014752088, %v5121_v6  ;;  %v10848_v50 = vmul.f32 0.5, %v10679_v59  ;;  %7978 = vrcp.f32 %v10838_v15  ;;  %v1555_v21 = vadd.f32 %v10721_v44, %v1482_v60 }
 0x2be   : > { %v1485_v25 = vadd.f32 %v10763_v0, %v10001_v49  ;;  %v7676_v40 = vclamps-f32 %v4663_v33, 1.0  ;;  %v4953_v45 = vadd.f32 0.05243302, %v4952_v22  ;;  %v4964_v27 = vadd.f32 0.112945676, %v4963_v32  ;;  %v14103_v22 = vld [vmem:[#allocation35_spill] sm:$0xff] }
 0x2bf   : > { %v5112_v26 = vmul.f32 %v5111_v9, %v10814_v12  ;;  %v4797_v34 = vadd.f32 1.1283791, %v4796_v2  ;;  %v10856_v7 = vmul.f32 0.5, %v10754_v47  ;;  %v5123_v14 = vmul.f32 %v5122_v31, %v10814_v12  ;;  %1984 = vmatmul.bf16.gmra.mxu3 %v14100_v18  ;;  %v10866_v2 = vpop.f32.mrf.mxu1  ;;  %v14102_v47 = vld [vmem:[#allocation32_spill] sm:$0xff] }
 0x2c0   : > { %v1628_v59 = vadd.f32 %v10743_v24, %v1555_v21  ;;  %1916 = vmatmul.bf16.gmra.mxu2 %v14101_v20  ;;  %v6559_v44 = vadd.f32 1.0, %v7676_v40  ;;  %v4954_v0 = vmul.f32 %v4953_v45, %v10794_v4  ;;  %v4965_v60 = vmul.f32 %v4964_v27, %v10794_v4  ;;  %1838 = vmatmul.bf16.gmra.mxu1 %v14102_v47 }
 0x2c1   : > { %v5113_v19 = vadd.f32 0.05243302, %v5112_v26  ;;  %v4818_v55 = vand.u32 2147483647, %v10838_v15  ;;  %v5124_v24 = vadd.f32 0.112945676, %v5123_v14  ;;  %v1558_v36 = vadd.f32 %v10765_v8, %v1485_v25  ;;  %1770 = vmatmul.bf16.gmra.mxu0 %v14103_v22 }
 0x2c2   : > { %v10871_v6 = vadd.f32 %v10748_v11, %v1628_v59  ;;  %v6659_v32 = vmul.f32 %v6559_v44, %v2359_v13  ;;  %v4955_v33 = vadd.f32 0.18741608, %v4954_v0  ;;  %v4966_v9 = vadd.f32 0.4994258, %v4965_v60  ;;  %v7749_v0 = vld [vmem:[%s8269_s29 + $0xac] sm:$0xf]  ;;  %v10894_v60 = vpop.f32.mrf.mxu2 }
 0x2c3   : > { %v5114_v31 = vmul.f32 %v5113_v19, %v10814_v12  ;;  %v7979_v21 = vpop.eup %7978  ;;  %v10877_v40 = vmul.f32 %v4797_v34, %v10695_v16  ;;  %v5125_v45 = vmul.f32 %v5124_v24, %v10814_v12  ;;  %v1487_v8 = vadd.f32 %v10819_v29, %v10001_v49  ;;  %v7813_v16 = vld [vmem:[%s8269_s29 + $0x2ac] sm:$0xf]  ;;  %v7459_v34 = vld [vmem:[%s8269_s29 + $0x2b8] sm:$0xf0] }
 0x2c4   : > { %v10881_v11 = vmul.f32 0.70710677, %v10871_v6  ;;  %6759 = vst [vmem:[%s8982_s18 + $0x1a8] sm:$0xff] %v6659_v32  ;;  %v4810_v13 = vmul.f32 %v7979_v21, %v10838_v15  ;;  %v4820_v25 = vand.u32 2147483648, %v10838_v15  ;;  %v4956_v27 = vmul.f32 %v4955_v33, %v10794_v4 }
 0x2c5   : > { %v4967_v26 = vmul.f32 %v4966_v9, %v10794_v4  ;;  %v5115_v14 = vadd.f32 0.18741608, %v5114_v31  ;;  %v5126_v59 = vadd.f32 0.4994258, %v5125_v45  ;;  %v7462_v44 = vor.u32 %v7813_v16, %v7459_v34  ;;  %v7203_v4 = vld [vmem:[%s8269_s29 + $0xb8] sm:$0xf0]  ;;  %v10905_v9 = vpop.f32.mrf.mxu3 }
 0x2c6   : > { %v1631_v29 = vadd.f32 %v10798_v37, %v1558_v36  ;;  %v4811_v19 = vsub.f32 1.0, %v4810_v13  ;;  %vm10896_vm12 = vcmp.eq.f32.partialorder %v4818_v55, 8.507059e+37  ;;  %v5266_v33 = vmul.f32 %v10881_v11, %v10881_v11  ;;  %v7845_v31 = vld [vmem:[%s8269_s29 + $0x3ac] sm:$0xf]  ;;  %v7587_v45 = vld [vmem:[%s8269_s29 + $0x3b8] sm:$0xf0] }
 0x2c7   : > { %v10900_v32 = vadd.f32 1.0, %v4967_v26  ;;  %vm4814_vm13 = vweird.f32 %v10838_v15  ;;  %v5116_v37 = vmul.f32 %v5115_v14, %v10814_v12  ;;  %v5127_v36 = vmul.f32 %v5126_v59, %v10814_v12  ;;  %2162 = vmatpush.bf16.msrb.mxu2 %v7462_v44  ;;  %v7781_v13 = vld [vmem:[%s8269_s29 + $0x1ac] sm:$0xf]  ;;  %v7331_v34 = vld [vmem:[%s8269_s29 + $0x1b8] sm:$0xf0] }
 0x2c8   : > { %v7206_v55 = vor.u32 %v7749_v0, %v7203_v4  ;;  %v4812_v26 = vmul.f32 %v7979_v21, %v4811_v19  ;;  %vm4815_vm14 = vweird.f32 %v7979_v21  ;;  %v4957_v16 = vadd.f32 1.1283791, %v4956_v27  ;;  %v10924_v19 = vpop.f32.mrf.mxu0  ;;  %v10926_v27 = vpop.f32.mrf.mxu1 }
 0x2c9   : > { %7980 = vrcp.f32 %v10900_v32  ;;  %v4980_v22 = vand.u32 2147483648, %v10900_v32  ;;  %v10916_v20 = vadd.f32 1.0, %v5127_v36  ;;  %v10919_v14 = vadd.f32 %v10808_v51, %v1631_v29  ;;  %vm4816_vm15 = vmor %vm4814_vm13, %vm4815_vm14 }
 0x2ca   : > { %2016 = vmatpush.bf16.msrb.mxu0 %v7206_v55  ;;  %v1560_v12 = vadd.f32 %v10821_v46, %v1487_v8  ;;  %v4813_v59 = vadd.f32 %v7979_v21, %v4812_v26  ;;  %v7590_v44 = vor.u32 %v7845_v31, %v7587_v45  ;;  %v7334_v0 = vor.u32 %v7781_v13, %v7331_v34 }
 0x2cb   : > { %v10922_v4 = vmin.f32 %v5266_v33, 16.0  ;;  %v4821_v36 = vor.u32 1.1754944e-38, %v4820_v25  ;;  %v4978_v55 = vand.u32 2147483647, %v10900_v32  ;;  %v5117_v51 = vadd.f32 1.1283791, %v5116_v37 }
 0x2cc   : > { %7982 = vrcp.f32 %v10916_v20  ;;  %v4817_v46 = vsel %vm4816_vm15, %v7979_v21, %v4813_v59  ;;  %v10934_v8 = vmul.f32 %v4957_v16, %v10769_v35  ;;  %v5140_v29 = vand.u32 2147483648, %v10916_v20  ;;  %2235 = vmatpush.bf16.msrb.mxu3 %v7590_v44  ;;  %2089 = vmatpush.bf16.msrb.mxu1 %v7334_v0 }
 0x2cd   : > { %v1633_v33 = vadd.f32 %v10842_v48, %v1560_v12  ;;  %v4822_v15 = vsel %vm10896_vm12, %v4821_v36, %v4817_v46  ;;  %vm4974_vm0 = vweird.f32 %v10900_v32  ;;  %v5268_v25 = vmul.f32 2.1237322e-06, %v10922_v4  ;;  %v10956_v12 = vpop.f32.mrf.mxu2  ;;  %v10963_v0 = vpop.f32.mrf.mxu3 }
 0x2ce   : > { %v5279_v37 = vmul.f32 3.8918573e-05, %v10922_v4  ;;  %v4823_v21 = vmul.f32 %v4822_v15, %v10877_v40  ;;  %v4981_v35 = vor.u32 1.1754944e-38, %v4980_v22  ;;  %v5138_v45 = vand.u32 2147483647, %v10916_v20  ;;  %v14108_v40 = vld [vmem:[#allocation38_spill] sm:$0xff] }
 0x2cf   : > { %v7981_v31 = vpop.eup %7980  ;;  %v10946_v13 = vmul.f32 0.70710677, %v10919_v14  ;;  %vm10949_vm1 = vcmp.eq.f32.partialorder %v4978_v55, 8.507059e+37  ;;  %v10954_v26 = vmul.f32 %v5117_v51, %v10784_v52  ;;  %v5269_v16 = vadd.f32 0.00028619796, %v5268_v25  ;;  %1989 = vmatmul.bf16.gmra.mxu3 %v14108_v40  ;;  %v14109_v52 = vld [vmem:[#allocation36_spill] sm:$0xff] }
 0x2d0   : > { %v4970_v48 = vmul.f32 %v7981_v31, %v10900_v32  ;;  %v5280_v34 = vadd.f32 0.001143296, %v5279_v37  ;;  %1921 = vmatmul.bf16.gmra.mxu2 %v14039_v42  ;;  %v7680_v22 = vclamps-f32 %v4823_v21, 1.0  ;;  %vm4975_vm2 = vweird.f32 %v7981_v31  ;;  %1843 = vmatmul.bf16.gmra.mxu1 %v14109_v52  ;;  %v14110_v25 = vld [vmem:[#allocation39_spill] sm:$0xff]  ;;  %v10984_v52 = vpop.f32.mrf.mxu0  ;;  %v10986_v40 = vpop.f32.mrf.mxu1 }
 0x2d1   : > { %vm5134_vm3 = vweird.f32 %v10916_v20  ;;  %v5141_v59 = vor.u32 1.1754944e-38, %v5140_v29  ;;  %v5426_v44 = vmul.f32 %v10946_v13, %v10946_v13  ;;  %v5270_v51 = vmul.f32 %v5269_v16, %v10922_v4  ;;  %1775 = vmatmul.bf16.gmra.mxu0 %v14110_v25  ;;  %vm4976_vm6 = vmor %vm4974_vm0, %vm4975_vm2 }
 0x2d2   : > { %v7983_v36 = vpop.eup %7982  ;;  %v4971_v55 = vsub.f32 1.0, %v4970_v48  ;;  %v5281_v46 = vmul.f32 %v5280_v34, %v10922_v4  ;;  %v10969_v15 = vadd.f32 %v10845_v63, %v1633_v33  ;;  %v6563_v37 = vadd.f32 1.0, %v7680_v22 }
 0x2d3   : > { %v5130_v29 = vmul.f32 %v7983_v36, %v10916_v20  ;;  %vm10973_vm4 = vcmp.eq.f32.partialorder %v5138_v45, 8.507059e+37  ;;  %v10977_v42 = vmin.f32 %v5426_v44, 16.0  ;;  %v1490_v48 = vadd.f32 %v10864_v56, %v10001_v49 }
 0x2d4   : > { %v4972_v16 = vmul.f32 %v7981_v31, %v4971_v55  ;;  %vm5135_vm5 = vweird.f32 %v7983_v36  ;;  %v5271_v34 = vadd.f32 0.0036580483, %v5270_v51  ;;  %v5282_v63 = vadd.f32 0.014752088, %v5281_v46 }
 0x2d5   : > { %v6663_v33 = vmul.f32 %v6563_v37, %v10848_v50  ;;  %v5131_v25 = vsub.f32 1.0, %v5130_v29  ;;  %v5428_v22 = vmul.f32 2.1237322e-06, %v10977_v42  ;;  %v5439_v45 = vmul.f32 3.8918573e-05, %v10977_v42  ;;  %vm5136_vm7 = vmor %vm5134_vm3, %vm5135_vm5 }
 0x2d6   : > { %v4973_v44 = vadd.f32 %v7981_v31, %v4972_v16  ;;  %v5272_v47 = vmul.f32 %v5271_v34, %v10922_v4  ;;  %v5283_v56 = vmul.f32 %v5282_v63, %v10922_v4  ;;  %v10991_v55 = vmul.f32 0.70710677, %v10969_v15 }
 0x2d7   : > { %6763 = vst [vmem:[%s8982_s18 + $0x1c8] sm:$0xff] %v6663_v33  ;;  %v5132_v50 = vmul.f32 %v7983_v36, %v5131_v25  ;;  %v5429_v51 = vadd.f32 0.00028619796, %v5428_v22  ;;  %v5440_v46 = vadd.f32 0.001143296, %v5439_v45  ;;  %v1563_v37 = vadd.f32 %v10866_v2, %v1490_v48  ;;  %v11012_v48 = vpop.f32.mrf.mxu2 }
 0x2d8   : > { %v4977_v29 = vsel %vm4976_vm6, %v7981_v31, %v4973_v44  ;;  %v5273_v18 = vadd.f32 0.05243302, %v5272_v47  ;;  %v5284_v16 = vadd.f32 0.112945676, %v5283_v56  ;;  %v5586_v34 = vmul.f32 %v10991_v55, %v10991_v55  ;;  %v11015_v44 = vpop.f32.mrf.mxu3 }
 0x2d9   : > { %v4982_v63 = vsel %vm10949_vm1, %v4981_v35, %v4977_v29  ;;  %v5133_v41 = vadd.f32 %v7983_v36, %v5132_v50  ;;  %v5430_v33 = vmul.f32 %v5429_v51, %v10977_v42  ;;  %v5441_v32 = vmul.f32 %v5440_v46, %v10977_v42 }
 0x2da   : > { %v4983_v25 = vmul.f32 %v4982_v63, %v10934_v8  ;;  %v5274_v2 = vmul.f32 %v5273_v18, %v10922_v4  ;;  %v5285_v47 = vmul.f32 %v5284_v16, %v10922_v4  ;;  %v11010_v31 = vmin.f32 %v5586_v34, 16.0  ;;  %v11029_v63 = vpop.f32.mrf.mxu1 }
 0x2db   : > { %v5137_v35 = vsel %vm5136_vm7, %v7983_v36, %v5133_v41  ;;  %v5431_v24 = vadd.f32 0.0036580483, %v5430_v33  ;;  %v5442_v22 = vadd.f32 0.014752088, %v5441_v32  ;;  %v1636_v45 = vadd.f32 %v10894_v60, %v1563_v37 }
 0x2dc   : > { %v7684_v8 = vclamps-f32 %v4983_v25, 1.0  ;;  %v5142_v20 = vsel %vm10973_vm4, %v5141_v59, %v5137_v35  ;;  %v5275_v56 = vadd.f32 0.18741608, %v5274_v2  ;;  %v5286_v50 = vadd.f32 0.4994258, %v5285_v47 }
 0x2dd   : > { %v5143_v18 = vmul.f32 %v5142_v20, %v10954_v26  ;;  %v5432_v51 = vmul.f32 %v5431_v24, %v10977_v42  ;;  %v5443_v46 = vmul.f32 %v5442_v22, %v10977_v42  ;;  %v5588_v41 = vmul.f32 2.1237322e-06, %v11010_v31  ;;  %v11027_v26 = vpop.f32.mrf.mxu0  ;;  %v14113_v24 = vld [vmem:[#allocation40_spill] sm:$0xff] }
 0x2de   : > { %v6567_v36 = vadd.f32 1.0, %v7684_v8  ;;  %v2371_v29 = vmul.f32 0.5, %v10772_v23  ;;  %v5287_v60 = vmul.f32 %v5286_v50, %v10922_v4  ;;  %v5599_v37 = vmul.f32 3.8918573e-05, %v11010_v31 }
 0x2df   : > { %v7688_v16 = vclamps-f32 %v5143_v18, 1.0  ;;  %v5276_v59 = vmul.f32 %v5275_v56, %v10922_v4  ;;  %v5433_v21 = vadd.f32 0.05243302, %v5432_v51  ;;  %v5444_v34 = vadd.f32 0.112945676, %v5443_v46  ;;  %1994 = vmatmul.bf16.gmra.mxu3 %v14041_v61 }
 0x2e0   : > { %v6667_v33 = vmul.f32 %v6567_v36, %v10856_v7  ;;  %v11032_v32 = vadd.f32 1.0, %v5287_v60  ;;  %v5589_v25 = vadd.f32 0.00028619796, %v5588_v41  ;;  %v11035_v23 = vadd.f32 %v10905_v9, %v1636_v45  ;;  %1848 = vmatmul.bf16.gmra.mxu1 %v14113_v24  ;;  %v14114_v7 = vld [vmem:[#allocation43_spill] sm:$0xff]  ;;  %v11044_v45 = vpop.f32.mrf.mxu2  ;;  %1926 = vmatmul.bf16.gmra.mxu2 %v14046_v62  ;;  %v11057_v36 = vpop.f32.mrf.mxu3  ;;  %v7315_v61 = vld [vmem:[%s8269_s29 + $0x198] sm:$0xf0] }
 0x2e1   : > { %v6571_v2 = vadd.f32 1.0, %v7688_v16  ;;  %v5434_v4 = vmul.f32 %v5433_v21, %v10977_v42  ;;  %v5445_v47 = vmul.f32 %v5444_v34, %v10977_v42  ;;  %v5600_v35 = vadd.f32 0.001143296, %v5599_v37  ;;  %1780 = vmatmul.bf16.gmra.mxu0 %v14114_v7  ;;  %v7777_v7 = vld [vmem:[%s8269_s29 + $0x18c] sm:$0xf] }
 0x2e2   : > { %6767 = vst [vmem:[%s8982_s18 + $0x1e8] sm:$0xff] %v6667_v33  ;;  %7984 = vrcp.f32 %v11032_v32  ;;  %v5277_v20 = vadd.f32 1.1283791, %v5276_v59  ;;  %v5590_v56 = vmul.f32 %v5589_v25, %v11010_v31  ;;  %v5298_v18 = vand.u32 2147483647, %v11032_v32 }
 0x2e3   : > { %v6671_v22 = vmul.f32 %v6571_v2, %v2371_v29  ;;  %v5435_v8 = vadd.f32 0.18741608, %v5434_v4  ;;  %v5446_v9 = vadd.f32 0.4994258, %v5445_v47  ;;  %v5601_v50 = vmul.f32 %v5600_v35, %v11010_v31 }
 0x2e4   : > { %v11053_v46 = vmul.f32 0.70710677, %v11035_v23  ;;  %v1492_v41 = vadd.f32 %v10924_v19, %v10001_v49  ;;  %v5300_v29 = vand.u32 2147483648, %v11032_v32  ;;  %v5591_v37 = vadd.f32 0.0036580483, %v5590_v56 }
 0x2e5   : > { %6771 = vst [vmem:[%s8982_s18 + $0x208] sm:$0xff] %v6671_v22  ;;  %v5447_v51 = vmul.f32 %v5446_v9, %v10977_v42  ;;  %v5436_v60 = vmul.f32 %v5435_v8, %v10977_v42  ;;  %v5602_v16 = vadd.f32 0.014752088, %v5601_v50  ;;  %v11062_v59 = vmul.f32 0.5, %v10871_v6  ;;  %v11079_v35 = vpop.f32.mrf.mxu0  ;;  %v11081_v22 = vpop.f32.mrf.mxu1 }
 0x2e6   : > { %v5746_v34 = vmul.f32 %v11053_v46, %v11053_v46  ;;  %v11069_v25 = vmul.f32 0.5, %v10919_v14  ;;  %v5592_v19 = vmul.f32 %v5591_v37, %v11010_v31  ;;  %v1495_v42 = vadd.f32 %v10984_v52, %v10001_v49 }
 0x2e7   : > { %v11064_v21 = vadd.f32 1.0, %v5447_v51  ;;  %v5603_v2 = vmul.f32 %v5602_v16, %v11010_v31  ;;  %v5278_v4 = vmul.f32 %v5277_v20, %v10881_v11  ;;  %v1565_v47 = vadd.f32 %v10926_v27, %v1492_v41 }
 0x2e8   : > { %v7985_v33 = vpop.eup %7984  ;;  %vm11083_vm8 = vcmp.eq.f32.partialorder %v5298_v18, 8.507059e+37  ;;  %v5301_v8 = vor.u32 1.1754944e-38, %v5300_v29  ;;  %v5437_v9 = vadd.f32 1.1283791, %v5436_v60  ;;  %v5593_v56 = vadd.f32 0.05243302, %v5592_v19 }
 0x2e9   : > { %v5290_v6 = vmul.f32 %v7985_v33, %v11032_v32  ;;  %7986 = vrcp.f32 %v11064_v21  ;;  %v5604_v11 = vadd.f32 0.112945676, %v5603_v2  ;;  %v11087_v20 = vmin.f32 %v5746_v34, 16.0  ;;  %v7809_v34 = vld [vmem:[%s8269_s29 + $0x28c] sm:$0xf] }
 0x2ea   : > { %v1638_v50 = vadd.f32 %v10956_v12, %v1565_v47  ;;  %vm5295_vm9 = vweird.f32 %v7985_v33  ;;  %v5458_v27 = vand.u32 2147483647, %v11064_v21  ;;  %v5594_v51 = vmul.f32 %v5593_v56, %v11010_v31  ;;  %v7443_v19 = vld [vmem:[%s8269_s29 + $0x298] sm:$0xf0]  ;;  %v7745_v47 = vld [vmem:[%s8269_s29 + $0x8c] sm:$0xf]  ;;  %v11114_v56 = vpop.f32.mrf.mxu2 }
 0x2eb   : > { %v5291_v52 = vsub.f32 1.0, %v5290_v6  ;;  %v1568_v18 = vadd.f32 %v10986_v40, %v1495_v42  ;;  %v5605_v29 = vmul.f32 %v5604_v11, %v11010_v31  ;;  %v5748_v60 = vmul.f32 2.1237322e-06, %v11087_v20 }
 0x2ec   : > { %v5759_v37 = vmul.f32 3.8918573e-05, %v11087_v20  ;;  %vm5294_vm10 = vweird.f32 %v11032_v32  ;;  %v11098_v12 = vmul.f32 %v5437_v9, %v10946_v13  ;;  %v5595_v16 = vadd.f32 0.18741608, %v5594_v51  ;;  %v7187_v9 = vld [vmem:[%s8269_s29 + $0x98] sm:$0xf0] }
 0x2ed   : > { %v5292_v41 = vmul.f32 %v7985_v33, %v5291_v52  ;;  %v1497_v40 = vadd.f32 %v11027_v26, %v10001_v49  ;;  %vm11107_vm11 = vmor %vm5294_vm10, %vm5295_vm9  ;;  %vm5454_vm12 = vweird.f32 %v11064_v21  ;;  %v5606_v13 = vadd.f32 0.4994258, %v5605_v29  ;;  %v11116_v52 = vpop.f32.mrf.mxu3  ;;  %v7841_v51 = vld [vmem:[%s8269_s29 + $0x38c] sm:$0xf] }
 0x2ee   : > { %v7446_v32 = vor.u32 %v7809_v34, %v7443_v19  ;;  %v7190_v11 = vor.u32 %v7745_v47, %v7187_v9  ;;  %v11124_v62 = vadd.f32 %v10963_v0, %v1638_v50  ;;  %v1641_v29 = vadd.f32 %v11012_v48, %v1568_v18  ;;  %v1501_v47 = vpop.f32.mrf.mxu0  ;;  %v1574_v9 = vpop.f32.mrf.mxu1 }
 0x2ef   : > { %v11104_v2 = vpop.eup %7986  ;;  %v5293_v42 = vadd.f32 %v7985_v33, %v5292_v41  ;;  %v7571_v41 = vld [vmem:[%s8269_s29 + $0x398] sm:$0xf0]  ;;  %1999 = vmatmul.bf16.gmra.mxu3 %v14047_v28  ;;  %v5607_v19 = vmul.f32 %v5606_v13, %v11010_v31  ;;  %v5749_v38 = vadd.f32 0.00028619796, %v5748_v60  ;;  %v5460_v48 = vand.u32 2147483648, %v11064_v21 }
 0x2f0   : > { %v5450_v26 = vmul.f32 %v11104_v2, %v11064_v21  ;;  %2163 = vmatpush.bf16.msrb.mxu2 %v7446_v32  ;;  %v7574_v24 = vor.u32 %v7841_v51, %v7571_v41  ;;  %1853 = vmatmul.bf16.gmra.mxu1 %v14045_v10  ;;  %v7318_v18 = vor.u32 %v7777_v7, %v7315_v61  ;;  %v5760_v13 = vadd.f32 0.001143296, %v5759_v37 }
 0x2f1   : > { %v5297_v34 = vsel %vm11107_vm11, %v7985_v33, %v5293_v42  ;;  %2017 = vmatpush.bf16.msrb.mxu0 %v7190_v11  ;;  %v11136_v33 = vadd.f32 1.0, %v5607_v19  ;;  %v5750_v42 = vmul.f32 %v5749_v38, %v11087_v20  ;;  %vm5455_vm13 = vweird.f32 %v11104_v2 }
 0x2f2   : > { %v5302_v0 = vsel %vm11083_vm8, %v5301_v8, %v5297_v34  ;;  %v5451_v50 = vsub.f32 1.0, %v5450_v26  ;;  %2236 = vmatpush.bf16.msrb.mxu3 %v7574_v24  ;;  %1785 = vmatmul.bf16.gmra.mxu0 %v14042_v5  ;;  %v5596_v14 = vmul.f32 %v5595_v16, %v11010_v31  ;;  %v11144_v8 = vmul.f32 0.70710677, %v11124_v62  ;;  %vm5456_vm15 = vmor %vm5454_vm12, %vm5455_vm13 }
 0x2f3   : > { %v5303_v6 = vmul.f32 %v5302_v0, %v5278_v4  ;;  %2090 = vmatpush.bf16.msrb.mxu1 %v7318_v18  ;;  %vm11146_vm14 = vcmp.eq.f32.partialorder %v5458_v27, 8.507059e+37  ;;  %7988 = vrcp.f32 %v11136_v33  ;;  %v11152_v38 = vadd.f32 %v11015_v44, %v1641_v29  ;;  %v1647_v44 = vpop.f32.mrf.mxu2  ;;  %1931 = vmatmul.bf16.gmra.mxu2 %v14050_v43 }
 0x2f4   : > { %v5452_v60 = vmul.f32 %v11104_v2, %v5451_v50  ;;  %v5461_v4 = vor.u32 1.1754944e-38, %v5460_v48  ;;  %v5751_v37 = vadd.f32 0.0036580483, %v5750_v42  ;;  %v5761_v31 = vmul.f32 %v5760_v13, %v11087_v20 }
 0x2f5   : > { %v7692_v61 = vclamps-f32 %v5303_v6, 1.0  ;;  %v5906_v27 = vmul.f32 %v11144_v8, %v11144_v8  ;;  %v1570_v32 = vadd.f32 %v11029_v63, %v1497_v40  ;;  %v11163_v26 = vadd.f32 %v11079_v35, %v10001_v49  ;;  %v1720_v11 = vpop.f32.mrf.mxu3 }
 0x2f6   : > { %v5453_v24 = vadd.f32 %v11104_v2, %v5452_v60  ;;  %v5597_v41 = vadd.f32 1.1283791, %v5596_v14  ;;  %v5752_v21 = vmul.f32 %v5751_v37, %v11087_v20  ;;  %v5762_v29 = vadd.f32 0.014752088, %v5761_v31  ;;  %v11191_v37 = vpop.f32.mrf.mxu0 }
 0x2f7   : > { %v6575_v16 = vadd.f32 1.0, %v7692_v61  ;;  %v11171_v40 = vmin.f32 %v5906_v27, 16.0  ;;  %v11174_v49 = vmul.f32 0.70710677, %v11152_v38  ;;  %v5618_v19 = vand.u32 2147483647, %v11136_v33 }
 0x2f8   : > { %v5457_v51 = vsel %vm5456_vm15, %v11104_v2, %v5453_v24  ;;  %v5753_v47 = vadd.f32 0.05243302, %v5752_v21  ;;  %v5763_v2 = vmul.f32 %v5762_v29, %v11087_v20  ;;  %v1643_v48 = vadd.f32 %v11044_v45, %v1570_v32 }
 0x2f9   : > { %v6675_v34 = vmul.f32 %v6575_v16, %v11062_v59  ;;  %v5462_v63 = vsel %vm11146_vm14, %v5461_v4, %v5457_v51  ;;  %v7989_v9 = vpop.eup %7988  ;;  %v5908_v0 = vmul.f32 2.1237322e-06, %v11171_v40  ;;  %v5919_v59 = vmul.f32 3.8918573e-05, %v11171_v40  ;;  %v14121_v51 = vld [vmem:[#allocation50_spill] sm:$0xff] }
 0x2fa   : > { %v5463_v35 = vmul.f32 %v5462_v63, %v11098_v12  ;;  %v6066_v50 = vmul.f32 %v11174_v49, %v11174_v49  ;;  %v5610_v6 = vmul.f32 %v7989_v9, %v11136_v33  ;;  %v5620_v12 = vand.u32 2147483648, %v11136_v33 }
 0x2fb   : > { %6775 = vst [vmem:[%s8982_s18 + $0x228] sm:$0xff] %v6675_v34  ;;  %v5754_v42 = vmul.f32 %v5753_v47, %v11087_v20  ;;  %v5598_v13 = vmul.f32 %v5597_v41, %v10991_v55  ;;  %v5764_v60 = vadd.f32 0.112945676, %v5763_v2  ;;  %v5909_v14 = vadd.f32 0.00028619796, %v5908_v0  ;;  %v14122_v34 = vld [vmem:[#allocation48_spill] sm:$0xff] }
 0x2fc   : > { %v7696_v18 = vclamps-f32 %v5463_v35, 1.0  ;;  %v5920_v61 = vadd.f32 0.001143296, %v5919_v59  ;;  %v5611_v24 = vsub.f32 1.0, %v5610_v6  ;;  %vm5615_vm0 = vweird.f32 %v7989_v9 }
 0x2fd   : > { %v11189_v4 = vmin.f32 %v6066_v50, 16.0  ;;  %v5765_v45 = vmul.f32 %v5764_v60, %v11087_v20  ;;  %v5910_v31 = vmul.f32 %v5909_v14, %v11171_v40  ;;  %v11197_v27 = vadd.f32 %v11057_v36, %v1643_v48 }
 0x2fe   : > { %v6579_v7 = vadd.f32 1.0, %v7696_v18  ;;  %v5921_v16 = vmul.f32 %v5920_v61, %v11171_v40  ;;  %v5612_v32 = vmul.f32 %v7989_v9, %v5611_v24  ;;  %v5755_v44 = vadd.f32 0.18741608, %v5754_v42  ;;  %v14123_v24 = vld [vmem:[#allocation51_spill] sm:$0xff] }
 0x2ff   : > { %v6068_v11 = vmul.f32 2.1237322e-06, %v11189_v4  ;;  %2004 = vmatmul.bf16.gmra.mxu3 %v14121_v51  ;;  %vm5614_vm1 = vweird.f32 %v11136_v33  ;;  %v5766_v41 = vadd.f32 0.4994258, %v5765_v45  ;;  %v5911_v21 = vadd.f32 0.0036580483, %v5910_v31 }
 0x300   : > { %v6679_v55 = vmul.f32 %v6579_v7, %v11069_v25  ;;  %v5922_v29 = vadd.f32 0.014752088, %v5921_v16  ;;  %1858 = vmatmul.bf16.gmra.mxu1 %v14122_v34  ;;  %v5613_v63 = vadd.f32 %v7989_v9, %v5612_v32  ;;  %vm5619_vm2 = vcmp.eq.f32.partialorder %v5618_v19, 8.507059e+37  ;;  %vm5616_vm3 = vmor %vm5614_vm1, %vm5615_vm0  ;;  %v11215_v19 = vpop.f32.mrf.mxu2  ;;  %v11221_v7 = vpop.f32.mrf.mxu3 }
 0x301   : > { %v5621_v36 = vor.u32 1.1754944e-38, %v5620_v12  ;;  %v6069_v35 = vadd.f32 0.00028619796, %v6068_v11  ;;  %v5767_v25 = vmul.f32 %v5766_v41, %v11087_v20  ;;  %v5912_v47 = vmul.f32 %v5911_v21, %v11171_v40  ;;  %v11233_v16 = vpop.f32.mrf.mxu1 }
 0x302   : > { %6779 = vst [vmem:[%s8982_s18 + $0x248] sm:$0xff] %v6679_v55  ;;  %v5923_v2 = vmul.f32 %v5922_v29, %v11171_v40  ;;  %v6079_v33 = vmul.f32 3.8918573e-05, %v11189_v4  ;;  %v5617_v0 = vsel %vm5616_vm3, %v7989_v9, %v5613_v63  ;;  %v5756_v59 = vmul.f32 %v5755_v44, %v11087_v20  ;;  %v11223_v20 = vpop.f32.mrf.mxu0  ;;  %1790 = vmatmul.bf16.gmra.mxu0 %v14123_v24 }
 0x303   : > { %v6070_v50 = vmul.f32 %v6069_v35, %v11189_v4  ;;  %v11213_v48 = vmul.f32 0.70710677, %v11197_v27  ;;  %v5622_v18 = vsel %vm5619_vm2, %v5621_v36, %v5617_v0  ;;  %v11217_v6 = vadd.f32 1.0, %v5767_v25 }
 0x304   : > { %v5913_v12 = vadd.f32 0.05243302, %v5912_v47  ;;  %v5924_v42 = vadd.f32 0.112945676, %v5923_v2  ;;  %v5623_v60 = vmul.f32 %v5622_v18, %v5598_v13  ;;  %v6080_v61 = vadd.f32 0.001143296, %v6079_v33 }
 0x305   : > { %v6071_v14 = vadd.f32 0.0036580483, %v6070_v50  ;;  %v6226_v9 = vmul.f32 %v11213_v48, %v11213_v48  ;;  %v2383_v45 = vmul.f32 0.5, %v10969_v15  ;;  %v11228_v31 = vmul.f32 0.5, %v11035_v23 }
 0x306   : > { %7990 = vrcp.f32 %v11217_v6  ;;  %v1573_v13 = vadd.f32 %v11081_v22, %v11163_v26  ;;  %v7700_v55 = vclamps-f32 %v5623_v60, 1.0  ;;  %v5914_v32 = vmul.f32 %v5913_v12, %v11171_v40 }
 0x307   : > { %v5925_v44 = vmul.f32 %v5924_v42, %v11171_v40  ;;  %v6072_v11 = vmul.f32 %v6071_v14, %v11189_v4  ;;  %v5757_v41 = vadd.f32 1.1283791, %v5756_v59  ;;  %v5778_v15 = vand.u32 2147483647, %v11217_v6  ;;  %v8101_v42 = vld [vmem:[%s8673_s27] sm:$0xf] }
 0x308   : > { %v6081_v23 = vmul.f32 %v6080_v61, %v11189_v4  ;;  %v11240_v21 = vmin.f32 %v6226_v9, 16.0  ;;  %v6583_v29 = vadd.f32 1.0, %v7700_v55  ;;  %v11243_v63 = vmul.f32 0.5, %v11124_v62  ;;  %v11249_v59 = vpop.f32.mrf.mxu2  ;;  %1936 = vmatmul.bf16.gmra.mxu2 %v9140_v3 }
 0x309   : > { %v5915_v22 = vadd.f32 0.18741608, %v5914_v32  ;;  %v5926_v26 = vadd.f32 0.4994258, %v5925_v44  ;;  %v6073_v36 = vadd.f32 0.05243302, %v6072_v11  ;;  %v1646_v12 = vadd.f32 %v11114_v56, %v1573_v13 }
 0x30a   : > { %v6082_v35 = vadd.f32 0.014752088, %v6081_v23  ;;  %v6228_v25 = vmul.f32 2.1237322e-06, %v11240_v21  ;;  %v6683_v47 = vmul.f32 %v6583_v29, %v2383_v45  ;;  %v6239_v0 = vmul.f32 3.8918573e-05, %v11240_v21 }
 0x30b   : > { %v5916_v2 = vmul.f32 %v5915_v22, %v11171_v40  ;;  %v5927_v33 = vmul.f32 %v5926_v26, %v11171_v40  ;;  %v6074_v50 = vmul.f32 %v6073_v36, %v11189_v4  ;;  %v11256_v60 = vperm.slane %v8101_v42, 2  ;;  %v14126_v22 = vld [vmem:[#allocation52_spill] sm:$0xff]  ;;  %v7805_v36 = vld [vmem:[%s8269_s29 + $0x26c] sm:$0xf]  ;;  %v7171_v42 = vld [vmem:[%s8269_s29 + $0x78] sm:$0xf0] }
 0x30c   : > { %v7991_v62 = vpop.eup %7990  ;;  %v6083_v18 = vmul.f32 %v6082_v35, %v11189_v4  ;;  %6783 = vst [vmem:[%s8982_s18 + $0x268] sm:$0xff] %v6683_v47  ;;  %v11263_v61 = vmul.f32 0.5, %v11152_v38  ;;  %v6229_v9 = vadd.f32 0.00028619796, %v6228_v25  ;;  %v5758_v45 = vmul.f32 %v5757_v41, %v11053_v46  ;;  %v11272_v38 = vpop.f32.mrf.mxu3  ;;  %v7427_v35 = vld [vmem:[%s8269_s29 + $0x278] sm:$0xf0] }
 0x30d   : > { %v5770_v14 = vmul.f32 %v7991_v62, %v11217_v6  ;;  %v11260_v40 = vadd.f32 1.0, %v5927_v33  ;;  %v5780_v55 = vand.u32 2147483648, %v11217_v6  ;;  %v6240_v44 = vadd.f32 0.001143296, %v6239_v0  ;;  %v7741_v25 = vld [vmem:[%s8269_s29 + $0x6c] sm:$0xf] }
 0x30e   : > { %v6084_v32 = vadd.f32 0.112945676, %v6083_v18  ;;  %vm11267_vm4 = vcmp.eq.f32.partialorder %v5778_v15, 8.507059e+37  ;;  %v5917_v11 = vadd.f32 1.1283791, %v5916_v2  ;;  %v11277_v23 = vadd.f32 %v11116_v52, %v1646_v12  ;;  %v1806_v15 = vpop.f32.mrf.mxu1 }
 0x30f   : > { %v5771_v56 = vsub.f32 1.0, %v5770_v14  ;;  %7992 = vrcp.f32 %v11260_v40  ;;  %2009 = vmatmul.bf16.gmra.mxu3 %v14056_v53  ;;  %v6075_v46 = vadd.f32 0.18741608, %v6074_v50  ;;  %v1732_v29 = vadd.f32 %v11191_v37, %v11256_v60  ;;  %v7837_v14 = vld [vmem:[%s8269_s29 + $0x36c] sm:$0xf] }
 0x310   : > { %v6085_v41 = vmul.f32 %v6084_v32, %v11189_v4  ;;  %1863 = vmatmul.bf16.gmra.mxu1 %v14126_v22  ;;  %vm5775_vm5 = vweird.f32 %v7991_v62  ;;  %v6230_v47 = vmul.f32 %v6229_v9, %v11240_v21  ;;  %v6241_v2 = vmul.f32 %v6240_v44, %v11240_v21  ;;  %v7555_v32 = vld [vmem:[%s8269_s29 + $0x378] sm:$0xf0] }
 0x311   : > { %v5772_v26 = vmul.f32 %v7991_v62, %v5771_v56  ;;  %v5781_v52 = vor.u32 1.1754944e-38, %v5780_v55  ;;  %v5938_v33 = vand.u32 2147483647, %v11260_v40  ;;  %v5940_v37 = vand.u32 2147483648, %v11260_v40 }
 0x312   : > { %v6086_v0 = vadd.f32 0.4994258, %v6085_v41  ;;  %vm5774_vm6 = vweird.f32 %v11217_v6  ;;  %v11291_v18 = vmul.f32 %v5917_v11, %v11144_v8  ;;  %v7430_v12 = vor.u32 %v7805_v36, %v7427_v35 }
 0x313   : > { %v5773_v50 = vadd.f32 %v7991_v62, %v5772_v26  ;;  %vm5776_vm7 = vmor %vm5774_vm6, %vm5775_vm5  ;;  %vm5934_vm8 = vweird.f32 %v11260_v40  ;;  %v7174_v55 = vor.u32 %v7741_v25, %v7171_v42  ;;  %v7558_v44 = vor.u32 %v7837_v14, %v7555_v32 }
 0x314   : > { %v6087_v9 = vmul.f32 %v6086_v0, %v11189_v4  ;;  %v1805_v56 = vadd.f32 %v11233_v16, %v1732_v29  ;;  %2164 = vmatpush.bf16.msrb.mxu2 %v7430_v12  ;;  %v6231_v6 = vadd.f32 0.0036580483, %v6230_v47  ;;  %v6242_v8 = vadd.f32 0.014752088, %v6241_v2 }
 0x315   : > { %v7993_v41 = vpop.eup %7992  ;;  %v5777_v26 = vsel %vm5776_vm7, %v7991_v62, %v5773_v50  ;;  %v11301_v11 = vmul.f32 0.70710677, %v11277_v23  ;;  %v6076_v22 = vmul.f32 %v6075_v46, %v11189_v4  ;;  %2018 = vmatpush.bf16.msrb.mxu0 %v7174_v55  ;;  %2237 = vmatpush.bf16.msrb.mxu3 %v7558_v44  ;;  %vm11313_vm9 = vcmp.eq.f32.partialorder %v5938_v33, 8.507059e+37 }
 0x316   : > { %v5782_v36 = vsel %vm11267_vm4, %v5781_v52, %v5777_v26  ;;  %v5930_v35 = vmul.f32 %v7993_v41, %v11260_v40  ;;  %v11307_v0 = vadd.f32 1.0, %v6087_v9  ;;  %v6232_v62 = vmul.f32 %v6231_v6, %v11240_v21 }
 0x317   : > { %v5783_v16 = vmul.f32 %v5782_v36, %v5758_v45  ;;  %v6243_v29 = vmul.f32 %v6242_v8, %v11240_v21  ;;  %v6386_v25 = vmul.f32 %v11301_v11, %v11301_v11  ;;  %v1734_v4 = vadd.f32 %v11223_v20, %v11256_v60 }
 0x318   : > { %v5931_v47 = vsub.f32 1.0, %v5930_v35  ;;  %7994 = vrcp.f32 %v11307_v0  ;;  %v6233_v2 = vadd.f32 0.05243302, %v6232_v62  ;;  %v1878_v52 = vadd.f32 %v11215_v19, %v1805_v56 }
 0x319   : > { %v7704_v46 = vclamps-f32 %v5783_v16, 1.0  ;;  %v6244_v45 = vadd.f32 0.112945676, %v6243_v29  ;;  %vm5935_vm10 = vweird.f32 %v7993_v41  ;;  %v6077_v12 = vadd.f32 1.1283791, %v6076_v22 }
 0x31a   : > { %v5932_v50 = vmul.f32 %v7993_v41, %v5931_v47  ;;  %v11321_v42 = vmin.f32 %v6386_v25, 16.0  ;;  %v5941_v14 = vor.u32 1.1754944e-38, %v5940_v37  ;;  %v6234_v32 = vmul.f32 %v6233_v2, %v11240_v21  ;;  %vm5936_vm11 = vmor %vm5934_vm8, %vm5935_vm10  ;;  %v7773_v37 = vld [vmem:[%s8269_s29 + $0x16c] sm:$0xf]  ;;  %v7299_v16 = vld [vmem:[%s8269_s29 + $0x178] sm:$0xf0] }
 0x31b   : > { %v6587_v33 = vadd.f32 1.0, %v7704_v46  ;;  %v6245_v9 = vmul.f32 %v6244_v45, %v11240_v21  ;;  %v1807_v19 = vadd.f32 %v1806_v15, %v1734_v4  ;;  %v11332_v6 = vadd.f32 %v11221_v7, %v1878_v52 }
 0x31c   : > { %v5933_v55 = vadd.f32 %v7993_v41, %v5932_v50  ;;  %v6388_v20 = vmul.f32 2.1237322e-06, %v11321_v42  ;;  %v6399_v44 = vmul.f32 3.8918573e-05, %v11321_v42  ;;  %v6235_v22 = vadd.f32 0.18741608, %v6234_v32  ;;  %v1736_v32 = vpop.f32.mrf.mxu0 }
 0x31d   : > { %v6687_v56 = vmul.f32 %v6587_v33, %v11228_v31  ;;  %v6246_v26 = vadd.f32 0.4994258, %v6245_v9  ;;  %v6078_v35 = vmul.f32 %v6077_v12, %v11174_v49  ;;  %v6098_v15 = vand.u32 2147483647, %v11307_v0 }
 0x31e   : > { %v7995_v8 = vpop.eup %7994  ;;  %v5937_v36 = vsel %vm5936_vm11, %v7993_v41, %v5933_v55  ;;  %v6389_v62 = vadd.f32 0.00028619796, %v6388_v20  ;;  %v6400_v29 = vadd.f32 0.001143296, %v6399_v44  ;;  %v6100_v25 = vand.u32 2147483648, %v11307_v0 }
 0x31f   : > { %6787 = vst [vmem:[%s8982_s18 + $0x288] sm:$0xff] %v6687_v56  ;;  %v5942_v31 = vsel %vm11313_vm9, %v5941_v14, %v5937_v36  ;;  %v6090_v40 = vmul.f32 %v7995_v8, %v11307_v0  ;;  %v6247_v47 = vmul.f32 %v6246_v26, %v11240_v21  ;;  %v7302_v41 = vor.u32 %v7773_v37, %v7299_v16  ;;  %v1809_v16 = vpop.f32.mrf.mxu1 }
 0x320   : > { %v5943_v7 = vmul.f32 %v5942_v31, %v11291_v18  ;;  %v6390_v49 = vmul.f32 %v6389_v62, %v11321_v42  ;;  %v6401_v46 = vmul.f32 %v6400_v29, %v11321_v42  ;;  %v11347_v2 = vmul.f32 0.70710677, %v11332_v6 }
 0x321   : > { %v6091_v4 = vsub.f32 1.0, %v6090_v40  ;;  %v1880_v13 = vadd.f32 %v11249_v59, %v1807_v19  ;;  %v6236_v52 = vmul.f32 %v6235_v22, %v11240_v21  ;;  %v11351_v50 = vadd.f32 1.0, %v6247_v47  ;;  %2091 = vmatpush.bf16.msrb.mxu1 %v7302_v41  ;;  %v1882_v40 = vpop.f32.mrf.mxu2 }
 0x322   : > { %v7708_v45 = vclamps-f32 %v5943_v7, 1.0  ;;  %v6391_v18 = vadd.f32 0.0036580483, %v6390_v49  ;;  %vm6095_vm12 = vweird.f32 %v7995_v8  ;;  %v6402_v33 = vadd.f32 0.014752088, %v6401_v46 }
 0x323   : > { %v6092_v12 = vmul.f32 %v7995_v8, %v6091_v4  ;;  %v2586_v14 = vmul.f32 %v11347_v2, %v11347_v2  ;;  %vm6094_vm13 = vweird.f32 %v11307_v0  ;;  %7996 = vrcp.f32 %v11351_v50 }
 0x324   : > { %v6591_v9 = vadd.f32 1.0, %v7708_v45  ;;  %v1737_v59 = vadd.f32 %v1736_v32, %v11256_v60  ;;  %v6392_v55 = vmul.f32 %v6391_v18, %v11321_v42  ;;  %v6403_v20 = vmul.f32 %v6402_v33, %v11321_v42  ;;  %vm6096_vm14 = vmor %vm6094_vm13, %vm6095_vm12 }
 0x325   : > { %v6093_v21 = vadd.f32 %v7995_v8, %v6092_v12  ;;  %v11361_v44 = vadd.f32 %v11272_v38, %v1880_v13  ;;  %v6101_v56 = vor.u32 1.1754944e-38, %v6100_v25  ;;  %v6237_v22 = vadd.f32 1.1283791, %v6236_v52  ;;  %v7411_v12 = vld [vmem:[%s8269_s29 + $0x258] sm:$0xf0] }
 0x326   : > { %v6691_v19 = vmul.f32 %v6591_v9, %v11243_v63  ;;  %v11364_v26 = vmin.f32 %v2586_v14, 16.0  ;;  %vm6099_vm15 = vcmp.eq.f32.partialorder %v6098_v15, 8.507059e+37  ;;  %v6393_v37 = vadd.f32 0.05243302, %v6392_v55  ;;  %v1738_v55 = vpop.f32.mrf.mxu0 }
 0x327   : > { %v6097_v0 = vsel %vm6096_vm14, %v7995_v8, %v6093_v21  ;;  %v6404_v36 = vadd.f32 0.112945676, %v6403_v20  ;;  %v1810_v31 = vadd.f32 %v1809_v16, %v1737_v59  ;;  %v11372_v8 = vmul.f32 0.70710677, %v11361_v44 }
 0x328   : > { %6791 = vst [vmem:[%s8982_s18 + $0x2a8] sm:$0xff] %v6691_v19  ;;  %v6102_v62 = vsel %vm6099_vm15, %v6101_v56, %v6097_v0  ;;  %v2588_v29 = vmul.f32 2.1237322e-06, %v11364_v26  ;;  %v2599_v38 = vmul.f32 3.8918573e-05, %v11364_v26  ;;  %v6394_v25 = vmul.f32 %v6393_v37, %v11321_v42 }
 0x329   : > { %v6103_v63 = vmul.f32 %v6102_v62, %v6078_v35  ;;  %v6405_v7 = vmul.f32 %v6404_v36, %v11321_v42  ;;  %v7997_v15 = vpop.eup %7996  ;;  %v6238_v47 = vmul.f32 %v6237_v22, %v11213_v48  ;;  %v6258_v41 = vand.u32 2147483647, %v11351_v50  ;;  %v7801_v35 = vld [vmem:[%s8269_s29 + $0x24c] sm:$0xf] }
 0x32a   : > { %v2589_v49 = vadd.f32 0.00028619796, %v2588_v29  ;;  %v2600_v4 = vadd.f32 0.001143296, %v2599_v38  ;;  %v6250_v13 = vmul.f32 %v7997_v15, %v11351_v50  ;;  %v6260_v45 = vand.u32 2147483648, %v11351_v50 }
 0x32b   : > { %v7712_v46 = vclamps-f32 %v6103_v63, 1.0  ;;  %v1883_v52 = vadd.f32 %v1882_v40, %v1810_v31  ;;  %v6406_v18 = vadd.f32 0.4994258, %v6405_v7  ;;  %v2746_v48 = vmul.f32 %v11372_v8, %v11372_v8 }
 0x32c   : > { %v2590_v33 = vmul.f32 %v2589_v49, %v11364_v26  ;;  %v2601_v14 = vmul.f32 %v2600_v4, %v11364_v26  ;;  %v6251_v9 = vsub.f32 1.0, %v6250_v13  ;;  %v6395_v59 = vadd.f32 0.18741608, %v6394_v25 }
 0x32d   : > { %v6595_v32 = vadd.f32 1.0, %v7712_v46  ;;  %v7414_v21 = vor.u32 %v7801_v35, %v7411_v12  ;;  %v6407_v20 = vmul.f32 %v6406_v18, %v11321_v42  ;;  %v11385_v22 = vmin.f32 %v2746_v48, 16.0  ;;  %v1811_v12 = vpop.f32.mrf.mxu1 }
 0x32e   : > { %v2591_v19 = vadd.f32 0.0036580483, %v2590_v33  ;;  %v2602_v56 = vadd.f32 0.014752088, %v2601_v14  ;;  %v6252_v37 = vmul.f32 %v7997_v15, %v6251_v9  ;;  %vm6254_vm0 = vweird.f32 %v11351_v50  ;;  %v1884_v33 = vpop.f32.mrf.mxu2 }
 0x32f   : > { %v6695_v0 = vmul.f32 %v6595_v32, %v11263_v61  ;;  %vm6255_vm1 = vweird.f32 %v7997_v15  ;;  %2165 = vmatpush.bf16.msrb.mxu2 %v7414_v21  ;;  %v11389_v36 = vadd.f32 1.0, %v6407_v20  ;;  %v2748_v29 = vmul.f32 2.1237322e-06, %v11385_v22  ;;  %v1955_v61 = vpop.f32.mrf.mxu3  ;;  %v7155_v20 = vld [vmem:[%s8269_s29 + $0x58] sm:$0xf0] }
 0x330   : > { %v2592_v16 = vmul.f32 %v2591_v19, %v11364_v26  ;;  %v2603_v62 = vmul.f32 %v2602_v56, %v11364_v26  ;;  %v6253_v38 = vadd.f32 %v7997_v15, %v6252_v37  ;;  %vm6259_vm2 = vcmp.eq.f32.partialorder %v6258_v41, 8.507059e+37  ;;  %vm6256_vm3 = vmor %vm6254_vm0, %vm6255_vm1  ;;  %v7833_v19 = vld [vmem:[%s8269_s29 + $0x34c] sm:$0xf] }
 0x331   : > { %6795 = vst [vmem:[%s8982_s18 + $0x2c8] sm:$0xff] %v6695_v0  ;;  %v6261_v31 = vor.u32 1.1754944e-38, %v6260_v45  ;;  %v2759_v40 = vmul.f32 3.8918573e-05, %v11385_v22  ;;  %v6396_v50 = vmul.f32 %v6395_v59, %v11321_v42  ;;  %7998 = vrcp.f32 %v11389_v36  ;;  %v1741_v59 = vpop.f32.mrf.mxu0 }
 0x332   : > { %v11398_v63 = vadd.f32 %v1955_v61, %v1883_v52  ;;  %v1739_v25 = vadd.f32 %v1738_v55, %v11256_v60  ;;  %v6257_v7 = vsel %vm6256_vm3, %v7997_v15, %v6253_v38  ;;  %v2593_v49 = vadd.f32 0.05243302, %v2592_v16  ;;  %v7737_v55 = vld [vmem:[%s8269_s29 + $0x4c] sm:$0xf] }
 0x333   : > { %v2604_v4 = vadd.f32 0.112945676, %v2603_v62  ;;  %v2749_v46 = vadd.f32 0.00028619796, %v2748_v29  ;;  %v2399_v13 = vmul.f32 0.5, %v11197_v27  ;;  %v6262_v41 = vsel %vm6259_vm2, %v6261_v31, %v6257_v7 }
 0x334   : > { %v11403_v45 = vmul.f32 0.5, %v11277_v23  ;;  %v2760_v35 = vadd.f32 0.001143296, %v2759_v40  ;;  %v6263_v18 = vmul.f32 %v6262_v41, %v6238_v47  ;;  %v11406_v42 = vmul.f32 0.5, %v11332_v6  ;;  %v7539_v62 = vld [vmem:[%s8269_s29 + $0x358] sm:$0xf0] }
 0x335   : > { %v2594_v52 = vmul.f32 %v2593_v49, %v11364_v26  ;;  %v2605_v15 = vmul.f32 %v2604_v4, %v11364_v26  ;;  %v6397_v14 = vadd.f32 1.1283791, %v6396_v50  ;;  %v6418_v27 = vand.u32 2147483647, %v11389_v36  ;;  %v7769_v29 = vld [vmem:[%s8269_s29 + $0x14c] sm:$0xf] }
 0x336   : > { %v2750_v23 = vmul.f32 %v2749_v46, %v11385_v22  ;;  %v11413_v47 = vmul.f32 0.70710677, %v11398_v63  ;;  %v7716_v6 = vclamps-f32 %v6263_v18, 1.0  ;;  %v1812_v9 = vadd.f32 %v1811_v12, %v1739_v25  ;;  %v7283_v25 = vld [vmem:[%s8269_s29 + $0x158] sm:$0xf0] }
 0x337   : > { %v2595_v48 = vadd.f32 0.18741608, %v2594_v52  ;;  %v2606_v32 = vadd.f32 0.4994258, %v2605_v15  ;;  %v7999_v21 = vpop.eup %7998  ;;  %v2761_v56 = vmul.f32 %v2760_v35, %v11385_v22  ;;  %v11425_v38 = vmul.f32 0.5, %v11361_v44  ;;  %v1957_v35 = vpop.f32.mrf.mxu3 }
 0x338   : > { %v2906_v0 = vmul.f32 %v11413_v47, %v11413_v47  ;;  %v6599_v37 = vadd.f32 1.0, %v7716_v6  ;;  %v6410_v16 = vmul.f32 %v7999_v21, %v11389_v36  ;;  %v1885_v31 = vadd.f32 %v1884_v33, %v1812_v9 }
 0x339   : > { %v2607_v40 = vmul.f32 %v2606_v32, %v11364_v26  ;;  %v7158_v61 = vor.u32 %v7737_v55, %v7155_v20  ;;  %v7542_v50 = vor.u32 %v7833_v19, %v7539_v62  ;;  %v2751_v7 = vadd.f32 0.0036580483, %v2750_v23 }
 0x33a   : > { %v6699_v49 = vmul.f32 %v6599_v37, %v2399_v13  ;;  %v6411_v4 = vsub.f32 1.0, %v6410_v16  ;;  %v6420_v46 = vand.u32 2147483648, %v11389_v36  ;;  %v7286_v41 = vor.u32 %v7769_v29, %v7283_v25  ;;  %v1743_v37 = vpop.f32.mrf.mxu0 }
 0x33b   : > { %v11430_v18 = vadd.f32 1.0, %v2607_v40  ;;  %2019 = vmatpush.bf16.msrb.mxu0 %v7158_v61  ;;  %2238 = vmatpush.bf16.msrb.mxu3 %v7542_v50  ;;  %v2752_v44 = vmul.f32 %v2751_v7, %v11385_v22  ;;  %v2762_v52 = vadd.f32 0.014752088, %v2761_v56  ;;  %v11433_v15 = vmin.f32 %v2906_v0, 16.0 }
 0x33c   : > { %6799 = vst [vmem:[%s8982_s18 + $0x2e8] sm:$0xff] %v6699_v49  ;;  %v6398_v12 = vmul.f32 %v6397_v14, %v11301_v11  ;;  %v6412_v33 = vmul.f32 %v7999_v21, %v6411_v4  ;;  %vm6414_vm4 = vweird.f32 %v11389_v36  ;;  %vm6415_vm5 = vweird.f32 %v7999_v21  ;;  %2092 = vmatpush.bf16.msrb.mxu1 %v7286_v41  ;;  %v1814_v11 = vpop.f32.mrf.mxu1  ;;  %v1887_v14 = vpop.f32.mrf.mxu2 }
 0x33d   : > { %v2596_v13 = vmul.f32 %v2595_v48, %v11364_v26  ;;  %8000 = vrcp.f32 %v11430_v18  ;;  %v11440_v23 = vadd.f32 %v1957_v35, %v1885_v31  ;;  %v1742_v6 = vadd.f32 %v1741_v59, %v11256_v60  ;;  %vm6416_vm6 = vmor %vm6414_vm4, %vm6415_vm5 }
 0x33e   : > { %v6413_v32 = vadd.f32 %v7999_v21, %v6412_v33  ;;  %v2753_v9 = vadd.f32 0.05243302, %v2752_v44  ;;  %v2763_v55 = vmul.f32 %v2762_v52, %v11385_v22  ;;  %v2908_v20 = vmul.f32 2.1237322e-06, %v11433_v15 }
 0x33f   : > { %vm6419_vm7 = vcmp.eq.f32.partialorder %v6418_v27, 8.507059e+37  ;;  %v6421_v36 = vor.u32 1.1754944e-38, %v6420_v46  ;;  %v2618_v19 = vand.u32 2147483647, %v11430_v18  ;;  %v2919_v26 = vmul.f32 3.8918573e-05, %v11433_v15  ;;  %v1960_v52 = vpop.f32.mrf.mxu3 }
 0x340   : > { %v6417_v48 = vsel %vm6416_vm6, %v7999_v21, %v6413_v32  ;;  %v2754_v56 = vmul.f32 %v2753_v9, %v11385_v22  ;;  %v2764_v0 = vadd.f32 0.112945676, %v2763_v55  ;;  %v2909_v59 = vadd.f32 0.00028619796, %v2908_v20 }
 0x341   : > { %v6422_v16 = vsel %vm6419_vm7, %v6421_v36, %v6417_v48  ;;  %v2597_v62 = vadd.f32 1.1283791, %v2596_v13  ;;  %v2920_v29 = vadd.f32 0.001143296, %v2919_v26  ;;  %v11449_v31 = vmul.f32 0.70710677, %v11440_v23 }
 0x342   : > { %v6423_v40 = vmul.f32 %v6422_v16, %v6398_v12  ;;  %v2765_v27 = vmul.f32 %v2764_v0, %v11385_v22  ;;  %v2910_v61 = vmul.f32 %v2909_v59, %v11433_v15  ;;  %v1815_v50 = vadd.f32 %v1814_v11, %v1742_v6 }
 0x343   : > { %v8001_v25 = vpop.eup %8000  ;;  %v2755_v7 = vadd.f32 0.18741608, %v2754_v56  ;;  %v2921_v21 = vmul.f32 %v2920_v29, %v11433_v15  ;;  %v3066_v49 = vmul.f32 %v11449_v31, %v11449_v31  ;;  %v1744_v4 = vadd.f32 %v1743_v37, %v11256_v60 }
 0x344   : > { %v7720_v46 = vclamps-f32 %v6423_v40, 1.0  ;;  %v2610_v41 = vmul.f32 %v8001_v25, %v11430_v18  ;;  %vm11458_vm8 = vcmp.eq.f32.partialorder %v2618_v19, 8.507059e+37  ;;  %v2620_v44 = vand.u32 2147483648, %v11430_v18  ;;  %v1816_v0 = vpop.f32.mrf.mxu1  ;;  %v1889_v59 = vpop.f32.mrf.mxu2 }
 0x345   : > { %v2598_v12 = vmul.f32 %v2597_v62, %v11347_v2  ;;  %v2766_v33 = vadd.f32 0.4994258, %v2765_v27  ;;  %v2911_v13 = vadd.f32 0.0036580483, %v2910_v61  ;;  %v2922_v6 = vadd.f32 0.014752088, %v2921_v21 }
 0x346   : > { %v6603_v32 = vadd.f32 1.0, %v7720_v46  ;;  %v2611_v9 = vsub.f32 1.0, %v2610_v41  ;;  %v11464_v55 = vmin.f32 %v3066_v49, 16.0  ;;  %v1888_v20 = vadd.f32 %v1887_v14, %v1815_v50 }
 0x347   : > { %v2756_v11 = vmul.f32 %v2755_v7, %v11385_v22  ;;  %v2767_v36 = vmul.f32 %v2766_v33, %v11385_v22  ;;  %v2912_v19 = vmul.f32 %v2911_v13, %v11433_v15  ;;  %v2923_v26 = vmul.f32 %v2922_v6, %v11433_v15 }
 0x348   : > { %v6703_v48 = vmul.f32 %v6603_v32, %v11403_v45  ;;  %v2612_v2 = vmul.f32 %v8001_v25, %v2611_v9  ;;  %vm2615_vm9 = vweird.f32 %v8001_v25  ;;  %v3068_v56 = vmul.f32 2.1237322e-06, %v11464_v55  ;;  %v1962_v9 = vpop.f32.mrf.mxu3 }
 0x349   : > { %v11472_v37 = vadd.f32 1.0, %v2767_v36  ;;  %v2913_v16 = vadd.f32 0.05243302, %v2912_v19  ;;  %v2924_v14 = vadd.f32 0.112945676, %v2923_v26  ;;  %v1817_v62 = vadd.f32 %v1816_v0, %v1744_v4 }
 0x34a   : > { %6803 = vst [vmem:[%s8982_s18 + $0x308] sm:$0xf] %v6703_v48  ;;  %v2613_v29 = vadd.f32 %v8001_v25, %v2612_v2  ;;  %vm2614_vm10 = vweird.f32 %v11430_v18  ;;  %v3069_v22 = vadd.f32 0.00028619796, %v3068_v56  ;;  %v3079_v40 = vmul.f32 3.8918573e-05, %v11464_v55  ;;  %v1746_v18 = vpop.f32.mrf.mxu0 }
 0x34b   : > { %vm2616_vm11 = vmor %vm2614_vm10, %vm2615_vm9  ;;  %v2621_v45 = vor.u32 1.1754944e-38, %v2620_v44  ;;  %v2757_v27 = vadd.f32 1.1283791, %v2756_v11  ;;  %8002 = vrcp.f32 %v11472_v37  ;;  %v1890_v61 = vadd.f32 %v1889_v59, %v1817_v62  ;;  %v7797_v44 = vld [vmem:[%s8269_s29 + $0x22c] sm:$0xf] }
 0x34c   : > { %v2617_v50 = vsel %vm2616_vm11, %v8001_v25, %v2613_v29  ;;  %v2914_v7 = vmul.f32 %v2913_v16, %v11433_v15  ;;  %v2925_v21 = vmul.f32 %v2924_v14, %v11433_v15  ;;  %v3070_v49 = vmul.f32 %v3069_v22, %v11464_v55  ;;  %v7395_v36 = vld [vmem:[%s8269_s29 + $0x238] sm:$0xf0]  ;;  %v7765_v29 = vld [vmem:[%s8269_s29 + $0x12c] sm:$0xf] }
 0x34d   : > { %v2622_v4 = vsel %vm11458_vm8, %v2621_v45, %v2617_v50  ;;  %v11484_v46 = vmul.f32 0.5, %v11398_v63  ;;  %v3080_v41 = vadd.f32 0.001143296, %v3079_v40  ;;  %v11487_v33 = vadd.f32 %v1960_v52, %v1888_v20  ;;  %v7733_v63 = vld [vmem:[%s8269_s29 + $0x2c] sm:$0xf] }
 0x34e   : > { %v2623_v25 = vmul.f32 %v2622_v4, %v2598_v12  ;;  %v2915_v13 = vadd.f32 0.18741608, %v2914_v7  ;;  %v2926_v6 = vadd.f32 0.4994258, %v2925_v21  ;;  %v3071_v32 = vadd.f32 0.0036580483, %v3070_v49 }
 0x34f   : > { %v11490_v11 = vmul.f32 %v2757_v27, %v11372_v8  ;;  %v3081_v35 = vmul.f32 %v3080_v41, %v11464_v55  ;;  %v7139_v19 = vld [vmem:[%s8269_s29 + $0x38] sm:$0xf0]  ;;  %v11496_v26 = vadd.f32 %v1962_v9, %v1890_v61  ;;  %v1747_v52 = vadd.f32 %v1746_v18, %v11256_v60  ;;  %v7829_v8 = vld [vmem:[%s8269_s29 + $0x32c] sm:$0xf]  ;;  %v1819_v41 = vpop.f32.mrf.mxu1  ;;  %v1892_v9 = vpop.f32.mrf.mxu2 }
 0x350   : > { %v7625_v12 = vclamps-f32 %v2623_v25, 1.0  ;;  %v2916_v20 = vmul.f32 %v2915_v13, %v11433_v15  ;;  %v2927_v48 = vmul.f32 %v2926_v6, %v11433_v15  ;;  %v3072_v2 = vmul.f32 %v3071_v32, %v11464_v55  ;;  %v7523_v56 = vld [vmem:[%s8269_s29 + $0x338] sm:$0xf0] }
 0x351   : > { %v8003_v0 = vpop.eup %8002  ;;  %v3082_v59 = vadd.f32 0.014752088, %v3081_v35  ;;  %v7398_v16 = vor.u32 %v7797_v44, %v7395_v36  ;;  %v7142_v14 = vor.u32 %v7733_v63, %v7139_v19  ;;  %v7526_v62 = vor.u32 %v7829_v8, %v7523_v56  ;;  %v7267_v22 = vld [vmem:[%s8269_s29 + $0x138] sm:$0xf0] }
 0x352   : > { %v6508_v40 = vadd.f32 1.0, %v7625_v12  ;;  %v2770_v45 = vmul.f32 %v8003_v0, %v11472_v37  ;;  %v2778_v27 = vand.u32 2147483647, %v11472_v37  ;;  %v2780_v61 = vand.u32 2147483648, %v11472_v37  ;;  %v1748_v35 = vpop.f32.mrf.mxu0 }
 0x353   : > { %v11509_v50 = vadd.f32 1.0, %v2927_v48  ;;  %v3073_v15 = vadd.f32 0.05243302, %v3072_v2  ;;  %v3083_v7 = vmul.f32 %v3082_v59, %v11464_v55  ;;  %2166 = vmatpush.bf16.msrb.mxu2 %v7398_v16  ;;  %2020 = vmatpush.bf16.msrb.mxu0 %v7142_v14  ;;  %v7270_v21 = vor.u32 %v7765_v29, %v7267_v22 }
 0x354   : > { %v6608_v49 = vmul.f32 %v6508_v40, %v11406_v42  ;;  %v2771_v18 = vsub.f32 1.0, %v2770_v45  ;;  %vm2774_vm12 = vweird.f32 %v11472_v37  ;;  %2239 = vmatpush.bf16.msrb.mxu3 %v7526_v62  ;;  %v11515_v4 = vmul.f32 0.70710677, %v11487_v33 }
 0x355   : > { %vm2775_vm13 = vweird.f32 %v8003_v0  ;;  %v2917_v44 = vadd.f32 1.1283791, %v2916_v20  ;;  %8004 = vrcp.f32 %v11509_v50  ;;  %2093 = vmatpush.bf16.msrb.mxu1 %v7270_v21  ;;  %v1820_v25 = vadd.f32 %v1819_v41, %v1747_v52  ;;  %v1965_v21 = vpop.f32.mrf.mxu3 }
 0x356   : > { %6708 = vst [vmem:[%s8982_s18 + $0x10] sm:$0xff] %v6608_v49  ;;  %v2772_v13 = vmul.f32 %v8003_v0, %v2771_v18  ;;  %v3074_v6 = vmul.f32 %v3073_v15, %v11464_v55  ;;  %v3084_v32 = vadd.f32 0.112945676, %v3083_v7  ;;  %v3226_v42 = vmul.f32 %v11515_v4, %v11515_v4  ;;  %vm2776_vm15 = vmor %vm2774_vm12, %vm2775_vm13 }
 0x357   : > { %vm11522_vm14 = vcmp.eq.f32.partialorder %v2778_v27, 8.507059e+37  ;;  %v2781_v63 = vor.u32 1.1754944e-38, %v2780_v61  ;;  %v2938_v19 = vand.u32 2147483647, %v11509_v50  ;;  %v11528_v12 = vmul.f32 0.70710677, %v11496_v26 }
 0x358   : > { %v2773_v52 = vadd.f32 %v8003_v0, %v2772_v13  ;;  %v3075_v20 = vadd.f32 0.18741608, %v3074_v6  ;;  %v3085_v48 = vmul.f32 %v3084_v32, %v11464_v55  ;;  %v11531_v2 = vmin.f32 %v3226_v42, 16.0 }
 0x359   : > { %v11537_v8 = vmul.f32 %v2917_v44, %v11413_v47  ;;  %v3386_v56 = vmul.f32 %v11528_v12, %v11528_v12  ;;  %v1893_v59 = vadd.f32 %v1892_v9, %v1820_v25  ;;  %v1749_v16 = vadd.f32 %v1748_v35, %v11256_v60 }
 0x35a   : > { %v2777_v14 = vsel %vm2776_vm15, %v8003_v0, %v2773_v52  ;;  %vm2934_vm0 = vweird.f32 %v11509_v50  ;;  %v3076_v62 = vmul.f32 %v3075_v20, %v11464_v55  ;;  %v3086_v29 = vadd.f32 0.4994258, %v3085_v48 }
 0x35b   : > { %v3228_v22 = vmul.f32 2.1237322e-06, %v11531_v2  ;;  %v8005_v40 = vpop.eup %8004  ;;  %v2782_v37 = vsel %vm11522_vm14, %v2781_v63, %v2777_v14  ;;  %v2940_v47 = vand.u32 2147483648, %v11509_v50  ;;  %v3239_v45 = vmul.f32 3.8918573e-05, %v11531_v2 }
 0x35c   : > { %v11549_v27 = vmin.f32 %v3386_v56, 16.0  ;;  %v2783_v61 = vmul.f32 %v2782_v37, %v11490_v11  ;;  %v2930_v0 = vmul.f32 %v8005_v40, %v11509_v50  ;;  %vm11553_vm1 = vcmp.eq.f32.partialorder %v2938_v19, 8.507059e+37  ;;  %v1821_v19 = vpop.f32.mrf.mxu1  ;;  %v7793_v56 = vld [vmem:[%s8269_s29 + $0x20c] sm:$0xf]  ;;  %v7507_v50 = vld [vmem:[%s8269_s29 + $0x318] sm:$0xf0] }
 0x35d   : > { %v3077_v7 = vadd.f32 1.1283791, %v3076_v62  ;;  %v3087_v49 = vmul.f32 %v3086_v29, %v11464_v55  ;;  %v3229_v18 = vadd.f32 0.00028619796, %v3228_v22  ;;  %v3240_v41 = vadd.f32 0.001143296, %v3239_v45 }
 0x35e   : > { %v3388_v44 = vmul.f32 2.1237322e-06, %v11549_v27  ;;  %v7629_v25 = vclamps-f32 %v2783_v61, 1.0  ;;  %v2931_v13 = vsub.f32 1.0, %v2930_v0  ;;  %v3399_v6 = vmul.f32 3.8918573e-05, %v11549_v27 }
 0x35f   : > { %v11560_v11 = vadd.f32 %v1965_v21, %v1893_v59  ;;  %v11562_v32 = vadd.f32 1.0, %v3087_v49  ;;  %v3230_v42 = vmul.f32 %v3229_v18, %v11531_v2  ;;  %v3241_v9 = vmul.f32 %v3240_v41, %v11531_v2  ;;  %v7379_v59 = vld [vmem:[%s8269_s29 + $0x218] sm:$0xf0]  ;;  %v7729_v37 = vld [vmem:[%s8269_s29 + $0xc] sm:$0xf] }
 0x360   : > { %v3389_v35 = vadd.f32 0.00028619796, %v3388_v44  ;;  %v6512_v55 = vadd.f32 1.0, %v7629_v25  ;;  %v2932_v36 = vmul.f32 %v8005_v40, %v2931_v13  ;;  %vm2935_vm2 = vweird.f32 %v8005_v40  ;;  %v7123_v45 = vld [vmem:[%s8269_s29 + $0x18] sm:$0xf0] }
 0x361   : > { %v3400_v63 = vadd.f32 0.001143296, %v3399_v6  ;;  %v2941_v52 = vor.u32 1.1754944e-38, %v2940_v47  ;;  %v11567_v20 = vmul.f32 %v3077_v7, %v11449_v31  ;;  %8006 = vrcp.f32 %v11562_v32  ;;  %v11577_v47 = vpop.f32.mrf.mxu0  ;;  %vm2936_vm3 = vmor %vm2934_vm0, %vm2935_vm2  ;;  %v7825_v0 = vld [vmem:[%s8269_s29 + $0x30c] sm:$0xf] }
 0x362   : > { %v11570_v48 = vadd.f32 %v1821_v19, %v1749_v16  ;;  %v6612_v14 = vmul.f32 %v6512_v55, %v11425_v38  ;;  %v2933_v62 = vadd.f32 %v8005_v40, %v2932_v36  ;;  %v3231_v29 = vadd.f32 0.0036580483, %v3230_v42  ;;  %v11599_v55 = vpop.f32.mrf.mxu3 }
 0x363   : > { %v3242_v22 = vadd.f32 0.014752088, %v3241_v9  ;;  %v3098_v31 = vand.u32 2147483647, %v11562_v32  ;;  %v3100_v16 = vand.u32 2147483648, %v11562_v32  ;;  %v3390_v61 = vmul.f32 %v3389_v35, %v11549_v27  ;;  %v1894_v35 = vpop.f32.mrf.mxu2 }
 0x364   : > { %v3401_v38 = vmul.f32 %v3400_v63, %v11549_v27  ;;  %6712 = vst [vmem:[%s8982_s18 + $0x30] sm:$0xff] %v6612_v14  ;;  %v2937_v7 = vsel %vm2936_vm3, %v8005_v40, %v2933_v62  ;;  %v3232_v21 = vmul.f32 %v3231_v29, %v11531_v2  ;;  %v11591_v18 = vmul.f32 0.70710677, %v11560_v11  ;;  %v7761_v14 = vld [vmem:[%s8269_s29 + $0x10c] sm:$0xf] }
 0x365   : > { %v3243_v49 = vmul.f32 %v3242_v22, %v11531_v2  ;;  %v2942_v41 = vsel %vm11553_vm1, %v2941_v52, %v2937_v7  ;;  %v3391_v44 = vadd.f32 0.0036580483, %v3390_v61  ;;  %v7382_v13 = vor.u32 %v7793_v56, %v7379_v59  ;;  %v7251_v56 = vld [vmem:[%s8269_s29 + $0x118] sm:$0xf0]  ;;  %s7856_s29 = sshll.u32 (%p8237_p9), %s8211_s16, 5 }
 0x366   : > { %v3402_v25 = vadd.f32 0.014752088, %v3401_v38  ;;  %v2943_v6 = vmul.f32 %v2942_v41, %v11537_v8  ;;  %v3233_v42 = vadd.f32 0.05243302, %v3232_v21  ;;  %v3546_v9 = vmul.f32 %v11591_v18, %v11591_v18  ;;  %s13629_s22 = scalar_lea.vmem (%p8237_p9), %s13845_s3, %s7856_s29 }
 0x367   : > { %v3244_v40 = vadd.f32 0.112945676, %v3243_v49  ;;  %v8007_v36 = vpop.eup %8006  ;;  %v3392_v63 = vmul.f32 %v3391_v44, %v11549_v27  ;;  %2167 = vmatpush.bf16.msrb.mxu2 %v7382_v13  ;;  %v7126_v19 = vor.u32 %v7729_v37, %v7123_v45  ;;  %v7510_v52 = vor.u32 %v7825_v0, %v7507_v50  ;;  %v11610_v0 = vpop.f32.mrf.mxu1 }
 0x368   : > { %v3403_v15 = vmul.f32 %v3402_v25, %v11549_v27  ;;  %v7633_v59 = vclamps-f32 %v2943_v6, 1.0  ;;  %v3090_v8 = vmul.f32 %v8007_v36, %v11562_v32  ;;  %vm3095_vm4 = vweird.f32 %v8007_v36 }
 0x369   : > { %v3234_v62 = vmul.f32 %v3233_v42, %v11531_v2  ;;  %v3245_v29 = vmul.f32 %v3244_v40, %v11531_v2  ;;  %v3393_v22 = vadd.f32 0.05243302, %v3392_v63  ;;  %v11608_v38 = vmin.f32 %v3546_v9, 16.0  ;;  %2021 = vmatpush.bf16.msrb.mxu0 %v7126_v19  ;;  %2240 = vmatpush.bf16.msrb.mxu3 %v7510_v52  ;;  %v1753_v40 = vpop.f32.mrf.mxu0 }
 0x36a   : > { %v3404_v61 = vadd.f32 0.112945676, %v3403_v15  ;;  %v6516_v7 = vadd.f32 1.0, %v7633_v59  ;;  %v3091_v21 = vsub.f32 1.0, %v3090_v8  ;;  %v7254_v45 = vor.u32 %v7761_v14, %v7251_v56  ;;  %2168 = vmatmul.bf16.vlgmr.msrb.gmra.mxu2 %v8377_v54  ;;  %v11637_v8 = vpop.f32.mrf.mxu3 }
 0x36b   : > { %v3235_v37 = vadd.f32 0.18741608, %v3234_v62  ;;  %v3246_v49 = vadd.f32 0.4994258, %v3245_v29  ;;  %v3394_v50 = vmul.f32 %v3393_v22, %v11549_v27  ;;  %v3548_v44 = vmul.f32 2.1237322e-06, %v11608_v38 }
 0x36c   : > { %v3405_v41 = vmul.f32 %v3404_v61, %v11549_v27  ;;  %v6616_v25 = vmul.f32 %v6516_v7, %v11484_v46  ;;  %v3092_v13 = vmul.f32 %v8007_v36, %v3091_v21  ;;  %v3559_v42 = vmul.f32 3.8918573e-05, %v11608_v38  ;;  %2094 = vmatpush.bf16.msrb.mxu1 %v7254_v45  ;;  %2022 = vmatmul.bf16.vlgmr.msrb.gmra.mxu0 %v14065_v30 }
 0x36d   : > { %v3236_v6 = vmul.f32 %v3235_v37, %v11531_v2  ;;  %v3247_v54 = vmul.f32 %v3246_v49, %v11531_v2  ;;  %v3395_v9 = vadd.f32 0.18741608, %v3394_v50  ;;  %v3549_v15 = vadd.f32 0.00028619796, %v3548_v44  ;;  %2241 = vmatmul.bf16.vlgmr.msrb.gmra.mxu3 %v8381_v57 }
 0x36e   : > { %v3406_v63 = vadd.f32 0.4994258, %v3405_v41  ;;  %6716 = vst [vmem:[%s8982_s18 + $0x50] sm:$0xff] %v6616_v25  ;;  %v3093_v19 = vadd.f32 %v8007_v36, %v3092_v13  ;;  %vm3094_vm5 = vweird.f32 %v11562_v32  ;;  %v3560_v46 = vadd.f32 0.001143296, %v3559_v42 }
 0x36f   : > { %v1895_v52 = vadd.f32 %v1894_v35, %v11570_v48  ;;  %vm3096_vm6 = vmor %vm3094_vm5, %vm3095_vm4  ;;  %v3101_v14 = vor.u32 1.1754944e-38, %v3100_v16  ;;  %v11628_v30 = vadd.f32 1.0, %v3247_v54  ;;  %v3550_v56 = vmul.f32 %v3549_v15, %v11608_v38  ;;  %2095 = vmatmul.bf16.vlgmr.msrb.gmra.mxu1 %v14066_v1  ;;  %v1897_v35 = vpop.f32.mrf.mxu2  ;;  %v1826_v37 = vpop.f32.mrf.mxu1 }
 0x370   : > { %v3407_v2 = vmul.f32 %v3406_v63, %v11549_v27  ;;  %v3097_v57 = vsel %vm3096_vm6, %v8007_v36, %v3093_v19  ;;  %vm3099_vm7 = vcmp.eq.f32.partialorder %v3098_v31, 8.507059e+37  ;;  %v3396_v59 = vmul.f32 %v3395_v9, %v11549_v27 }
 0x371   : > { %v3561_v48 = vmul.f32 %v3560_v46, %v11608_v38  ;;  %v3102_v16 = vsel %vm3099_vm7, %v3101_v14, %v3097_v57  ;;  %v3237_v62 = vadd.f32 1.1283791, %v3236_v6  ;;  %8008 = vrcp.f32 %v11628_v30  ;;  %v1756_v25 = vpop.f32.mrf.mxu0  ;;  %v14137_v57 = vld [vmem:[#allocation10_spill] sm:$0xff] }
 0x372   : > { %v3103_v29 = vmul.f32 %v3102_v16, %v11567_v20  ;;  %v11641_v22 = vadd.f32 1.0, %v3407_v2  ;;  %v11644_v1 = vadd.f32 %v11599_v55, %v1895_v52  ;;  %v2320_v32 = vmul.f32 0.5, %v11440_v23 }
 0x373   : > { %v3260_v27 = vand.u32 2147483648, %v11628_v30  ;;  %v3551_v31 = vadd.f32 0.0036580483, %v3550_v56  ;;  %v3562_v36 = vadd.f32 0.014752088, %v3561_v48  ;;  %v11651_v20 = vmul.f32 0.5, %v11487_v33  ;;  %v1972_v56 = vpop.f32.mrf.mxu3 }
 0x374   : > { %v7637_v61 = vclamps-f32 %v3103_v29, 1.0  ;;  %v3258_v7 = vand.u32 2147483647, %v11628_v30  ;;  %v3397_v21 = vadd.f32 1.1283791, %v3396_v59  ;;  %8010 = vrcp.f32 %v11641_v22 }
 0x375   : > { %v11654_v45 = vmul.f32 %v3237_v62, %v11515_v4  ;;  %v11657_v55 = vmul.f32 0.5, %v11496_v26  ;;  %v3552_v23 = vmul.f32 %v3551_v31, %v11608_v38  ;;  %v3563_v50 = vmul.f32 %v3562_v36, %v11608_v38 }
 0x376   : > { %v6520_v49 = vadd.f32 1.0, %v7637_v61  ;;  %v11662_v41 = vmul.f32 0.70710677, %v11644_v1  ;;  %v1752_v44 = vadd.f32 %v11577_v47, %v11256_v60  ;;  %vm3254_vm8 = vweird.f32 %v11628_v30 }
 0x377   : > { %v8009_v33 = vpop.eup %8008  ;;  %v3261_v4 = vor.u32 1.1754944e-38, %v3260_v27  ;;  %v3553_v13 = vadd.f32 0.05243302, %v3552_v23  ;;  %v1754_v26 = vadd.f32 %v1753_v40, %v11256_v60  ;;  %vm11669_vm9 = vcmp.eq.f32.partialorder %v3258_v7, 8.507059e+37  ;;  %v1899_v2 = vpop.f32.mrf.mxu2  ;;  %v14138_v27 = vld [vmem:[#allocation8_spill] sm:$0xff] }
 0x378   : > { %v6620_v6 = vmul.f32 %v6520_v49, %v2320_v32  ;;  %v3250_v42 = vmul.f32 %v8009_v33, %v11628_v30  ;;  %v11674_v9 = vmul.f32 %v3397_v21, %v11528_v12  ;;  %v3564_v47 = vadd.f32 0.112945676, %v3563_v50  ;;  %v14141_v21 = vld [vmem:[#allocation11_spill] sm:$0xff]  ;;  %v1829_v50 = vpop.f32.mrf.mxu1 }
 0x379   : > { %v3418_v63 = vand.u32 2147483647, %v11641_v22  ;;  %v3554_v15 = vmul.f32 %v3553_v13, %v11608_v38  ;;  %v3706_v19 = vmul.f32 %v11662_v41, %v11662_v41  ;;  %v1825_v40 = vadd.f32 %v11610_v0, %v1752_v44 }
 0x37a   : > { %v8011_v46 = vpop.eup %8010  ;;  %6720 = vst [vmem:[%s8982_s18 + $0x70] sm:$0xff] %v6620_v6  ;;  %v3251_v52 = vsub.f32 1.0, %v3250_v42  ;;  %vm3414_vm10 = vweird.f32 %v11641_v22  ;;  %v3420_v14 = vand.u32 2147483648, %v11641_v22  ;;  %v3565_v12 = vmul.f32 %v3564_v47, %v11608_v38  ;;  %2173 = vmatmul.bf16.gmra.mxu2 %v14137_v57  ;;  %v14142_v6 = vld [vmem:[#allocation9_spill] sm:$0xff] }
 0x37b   : > { %vm3255_vm11 = vweird.f32 %v8009_v33  ;;  %v3410_v59 = vmul.f32 %v8011_v46, %v11641_v22  ;;  %v11687_v48 = vmin.f32 %v3706_v19, 16.0  ;;  %v1827_v16 = vadd.f32 %v1826_v37, %v1754_v26 }
 0x37c   : > { %v3252_v0 = vmul.f32 %v8009_v33, %v3251_v52  ;;  %v3555_v62 = vadd.f32 0.18741608, %v3554_v15  ;;  %v3566_v29 = vadd.f32 0.4994258, %v3565_v12  ;;  %v1898_v32 = vadd.f32 %v1897_v35, %v1825_v40  ;;  %2027 = vmatmul.bf16.gmra.mxu0 %v14138_v27  ;;  %vm3256_vm13 = vmor %vm3254_vm8, %vm3255_vm11  ;;  %v1758_v15 = vpop.f32.mrf.mxu0 }
 0x37d   : > { %v3411_v31 = vsub.f32 1.0, %v3410_v59  ;;  %vm11690_vm12 = vcmp.eq.f32.partialorder %v3418_v63, 8.507059e+37  ;;  %v3708_v61 = vmul.f32 2.1237322e-06, %v11687_v48  ;;  %v3719_v7 = vmul.f32 3.8918573e-05, %v11687_v48  ;;  %2246 = vmatmul.bf16.gmra.mxu3 %v14141_v21 }
 0x37e   : > { %v3253_v23 = vadd.f32 %v8009_v33, %v3252_v0  ;;  %v3567_v37 = vmul.f32 %v3566_v29, %v11608_v38  ;;  %v11699_v49 = vadd.f32 %v11637_v8, %v1898_v32  ;;  %v1900_v35 = vadd.f32 %v1899_v2, %v1827_v16 }
 0x37f   : > { %v3412_v44 = vmul.f32 %v8011_v46, %v3411_v31  ;;  %vm3415_vm14 = vweird.f32 %v8011_v46  ;;  %v3709_v13 = vadd.f32 0.00028619796, %v3708_v61  ;;  %v3720_v26 = vadd.f32 0.001143296, %v3719_v7  ;;  %2100 = vmatmul.bf16.gmra.mxu1 %v14142_v6  ;;  %v1902_v16 = vpop.f32.mrf.mxu2 }
 0x380   : > { %v3257_v42 = vsel %vm3256_vm13, %v8009_v33, %v3253_v23  ;;  %v3556_v47 = vmul.f32 %v3555_v62, %v11608_v38  ;;  %v11706_v63 = vadd.f32 1.0, %v3567_v37  ;;  %v11709_v8 = vmul.f32 0.70710677, %v11699_v49  ;;  %vm3416_vm15 = vmor %vm3414_vm10, %vm3415_vm14 }
 0x381   : > { %v3262_v19 = vsel %vm11669_vm9, %v3261_v4, %v3257_v42  ;;  %v3413_v30 = vadd.f32 %v8011_v46, %v3412_v44  ;;  %v3421_v40 = vor.u32 1.1754944e-38, %v3420_v14  ;;  %v3710_v52 = vmul.f32 %v3709_v13, %v11687_v48  ;;  %v11744_v13 = vpop.f32.mrf.mxu1 }
 0x382   : > { %v3263_v12 = vmul.f32 %v3262_v19, %v11654_v45  ;;  %8012 = vrcp.f32 %v11706_v63  ;;  %v11718_v38 = vadd.f32 %v1972_v56, %v1900_v35  ;;  %v1757_v33 = vadd.f32 %v1756_v25, %v11256_v60  ;;  %v1975_v56 = vpop.f32.mrf.mxu3 }
 0x383   : > { %v3417_v2 = vsel %vm3416_vm15, %v8011_v46, %v3413_v30  ;;  %v3711_v57 = vadd.f32 0.0036580483, %v3710_v52  ;;  %v3721_v54 = vmul.f32 %v3720_v26, %v11687_v48  ;;  %v11723_v4 = vadd.f32 %v1758_v15, %v11256_v60  ;;  %v14145_v30 = vld [vmem:[#allocation14_spill] sm:$0xff] }
 0x384   : > { %v7641_v14 = vclamps-f32 %v3263_v12, 1.0  ;;  %v3422_v45 = vsel %vm11690_vm12, %v3421_v40, %v3417_v2  ;;  %v3557_v59 = vadd.f32 1.1283791, %v3556_v47  ;;  %v3866_v22 = vmul.f32 %v11709_v8, %v11709_v8 }
 0x385   : > { %v3423_v0 = vmul.f32 %v3422_v45, %v11674_v9  ;;  %v3578_v25 = vand.u32 2147483647, %v11706_v63  ;;  %v3712_v46 = vmul.f32 %v3711_v57, %v11687_v48  ;;  %v3722_v62 = vadd.f32 0.014752088, %v3721_v54 }
 0x386   : > { %v6524_v29 = vadd.f32 1.0, %v7641_v14  ;;  %v3580_v32 = vand.u32 2147483648, %v11706_v63  ;;  %v11733_v27 = vmin.f32 %v3866_v22, 16.0  ;;  %v11736_v31 = vmul.f32 0.70710677, %v11718_v38 }
 0x387   : > { %v7645_v36 = vclamps-f32 %v3423_v0, 1.0  ;;  %v3713_v61 = vadd.f32 0.05243302, %v3712_v46  ;;  %v3723_v7 = vmul.f32 %v3722_v62, %v11687_v48  ;;  %v1830_v21 = vadd.f32 %v1829_v50, %v1757_v33  ;;  %v14147_v62 = vld [vmem:[#allocation15_spill] sm:$0xff] }
 0x388   : > { %v8013_v9 = vpop.eup %8012  ;;  %v6624_v23 = vmul.f32 %v6524_v29, %v11651_v20  ;;  %v3868_v37 = vmul.f32 2.1237322e-06, %v11733_v27  ;;  %v3879_v35 = vmul.f32 3.8918573e-05, %v11733_v27  ;;  %v4026_v44 = vmul.f32 %v11736_v31, %v11736_v31 }
 0x389   : > { %v6528_v26 = vadd.f32 1.0, %v7645_v36  ;;  %v3570_v6 = vmul.f32 %v8013_v9, %v11706_v63  ;;  %vm11747_vm0 = vcmp.eq.f32.partialorder %v3578_v25, 8.507059e+37  ;;  %v3714_v50 = vmul.f32 %v3713_v61, %v11687_v48  ;;  %v1904_v25 = vpop.f32.mrf.mxu2 }
 0x38a   : > { %6724 = vst [vmem:[%s8982_s18 + $0x90] sm:$0xff] %v6624_v23  ;;  %v3558_v20 = vmul.f32 %v3557_v59, %v11591_v18  ;;  %v3724_v47 = vadd.f32 0.112945676, %v3723_v7  ;;  %v3869_v15 = vadd.f32 0.00028619796, %v3868_v37  ;;  %v11754_v19 = vmin.f32 %v4026_v44, 16.0  ;;  %2178 = vmatmul.bf16.gmra.mxu2 %v14145_v30  ;;  %v11766_v46 = vpop.f32.mrf.mxu3  ;;  %v1761_v30 = vpop.f32.mrf.mxu0 }
 0x38b   : > { %v6628_v40 = vmul.f32 %v6528_v26, %v11657_v55  ;;  %v3571_v52 = vsub.f32 1.0, %v3570_v6  ;;  %v3880_v12 = vadd.f32 0.001143296, %v3879_v35  ;;  %v1903_v33 = vadd.f32 %v1902_v16, %v1830_v21  ;;  %v14146_v18 = vld [vmem:[#allocation12_spill] sm:$0xff]  ;;  %v14148_v21 = vld [vmem:[#allocation13_spill] sm:$0xff] }
 0x38c   : > { %v3725_v2 = vmul.f32 %v3724_v47, %v11687_v48  ;;  %v3870_v57 = vmul.f32 %v3869_v15, %v11733_v27  ;;  %v4028_v54 = vmul.f32 2.1237322e-06, %v11754_v19  ;;  %v4039_v14 = vmul.f32 3.8918573e-05, %v11754_v19  ;;  %2032 = vmatmul.bf16.gmra.mxu0 %v14146_v18 }
 0x38d   : > { %6728 = vst [vmem:[%s8982_s18 + $0xb0] sm:$0xff] %v6628_v40  ;;  %v3572_v45 = vmul.f32 %v8013_v9, %v3571_v52  ;;  %vm3575_vm1 = vweird.f32 %v8013_v9  ;;  %v3715_v59 = vadd.f32 0.18741608, %v3714_v50  ;;  %v3881_v22 = vmul.f32 %v3880_v12, %v11733_v27  ;;  %2251 = vmatmul.bf16.gmra.mxu3 %v14147_v62  ;;  %v11783_v40 = vpop.f32.mrf.mxu1 }
 0x38e   : > { %vm3574_vm2 = vweird.f32 %v11706_v63  ;;  %v3726_v55 = vadd.f32 0.4994258, %v3725_v2  ;;  %v3871_v16 = vadd.f32 0.0036580483, %v3870_v57  ;;  %v4029_v0 = vadd.f32 0.00028619796, %v4028_v54 }
 0x38f   : > { %v3573_v29 = vadd.f32 %v8013_v9, %v3572_v45  ;;  %v3882_v36 = vadd.f32 0.014752088, %v3881_v22  ;;  %v4040_v61 = vadd.f32 0.001143296, %v4039_v14  ;;  %v11769_v7 = vadd.f32 %v1975_v56, %v1903_v33  ;;  %2105 = vmatmul.bf16.gmra.mxu1 %v14148_v21  ;;  %vm3576_vm3 = vmor %vm3574_vm2, %vm3575_vm1 }
 0x390   : > { %v3581_v23 = vor.u32 1.1754944e-38, %v3580_v32  ;;  %v3727_v63 = vmul.f32 %v3726_v55, %v11687_v48  ;;  %v3872_v37 = vmul.f32 %v3871_v16, %v11733_v27  ;;  %v4030_v35 = vmul.f32 %v4029_v0, %v11754_v19 }
 0x391   : > { %v3577_v44 = vsel %vm3576_vm3, %v8013_v9, %v3573_v29  ;;  %v3716_v26 = vmul.f32 %v3715_v59, %v11687_v48  ;;  %v3883_v6 = vmul.f32 %v3882_v36, %v11733_v27  ;;  %v4041_v50 = vmul.f32 %v4040_v61, %v11754_v19  ;;  %v11806_v29 = vpop.f32.mrf.mxu2 }
 0x392   : > { %v3582_v56 = vsel %vm11747_vm0, %v3581_v23, %v3577_v44  ;;  %v11781_v47 = vadd.f32 1.0, %v3727_v63  ;;  %v3873_v15 = vadd.f32 0.05243302, %v3872_v37  ;;  %v4031_v32 = vadd.f32 0.0036580483, %v4030_v35  ;;  %v11808_v36 = vpop.f32.mrf.mxu3  ;;  %v14149_v44 = vld [vmem:[#allocation18_spill] sm:$0xff] }
 0x393   : > { %v3583_v52 = vmul.f32 %v3582_v56, %v3558_v20  ;;  %v3884_v12 = vadd.f32 0.112945676, %v3883_v6  ;;  %v4042_v33 = vadd.f32 0.014752088, %v4041_v50  ;;  %v11786_v9 = vmul.f32 0.70710677, %v11769_v7 }
 0x394   : > { %v2332_v48 = vmul.f32 0.5, %v11560_v11  ;;  %8014 = vrcp.f32 %v11781_v47  ;;  %v3874_v42 = vmul.f32 %v3873_v15, %v11733_v27  ;;  %v4032_v54 = vmul.f32 %v4031_v32, %v11754_v19  ;;  %v1763_v32 = vpop.f32.mrf.mxu0 }
 0x395   : > { %v7649_v2 = vclamps-f32 %v3583_v52, 1.0  ;;  %v3885_v57 = vmul.f32 %v3884_v12, %v11733_v27  ;;  %v11794_v14 = vmul.f32 0.5, %v11644_v1  ;;  %v3717_v20 = vadd.f32 1.1283791, %v3716_v26  ;;  %v11825_v52 = vpop.f32.mrf.mxu1  ;;  %v14150_v12 = vld [vmem:[#allocation16_spill] sm:$0xff] }
 0x396   : > { %v4043_v18 = vmul.f32 %v4042_v33, %v11754_v19  ;;  %v4186_v45 = vmul.f32 %v11786_v9, %v11786_v9  ;;  %v3875_v11 = vadd.f32 0.18741608, %v3874_v42  ;;  %v1832_v55 = vadd.f32 %v11744_v13, %v11723_v4 }
 0x397   : > { %v6532_v59 = vadd.f32 1.0, %v7649_v2  ;;  %v3886_v22 = vadd.f32 0.4994258, %v3885_v57  ;;  %v11802_v16 = vmul.f32 0.5, %v11699_v49  ;;  %v4033_v0 = vadd.f32 0.05243302, %v4032_v54 }
 0x398   : > { %v4044_v62 = vadd.f32 0.112945676, %v4043_v18  ;;  %v11804_v1 = vmin.f32 %v4186_v45, 16.0  ;;  %v3738_v21 = vand.u32 2147483647, %v11781_v47  ;;  %v1905_v63 = vadd.f32 %v1904_v25, %v1832_v55 }
 0x399   : > { %v6632_v61 = vmul.f32 %v6532_v59, %v2332_v48  ;;  %v3887_v23 = vmul.f32 %v3886_v22, %v11733_v27  ;;  %v3876_v4 = vmul.f32 %v3875_v11, %v11733_v27  ;;  %v4034_v49 = vmul.f32 %v4033_v0, %v11754_v19 }
 0x39a   : > { %v8015_v37 = vpop.eup %8014  ;;  %v4045_v13 = vmul.f32 %v4044_v62, %v11754_v19  ;;  %v4188_v35 = vmul.f32 2.1237322e-06, %v11804_v1  ;;  %2183 = vmatmul.bf16.gmra.mxu2 %v14149_v44  ;;  %v3718_v26 = vmul.f32 %v3717_v20, %v11662_v41  ;;  %v4199_v25 = vmul.f32 3.8918573e-05, %v11804_v1 }
 0x39b   : > { %6732 = vst [vmem:[%s8982_s18 + $0xd0] sm:$0xff] %v6632_v61  ;;  %v3730_v6 = vmul.f32 %v8015_v37, %v11781_v47  ;;  %v11820_v50 = vadd.f32 1.0, %v3887_v23  ;;  %vm3734_vm4 = vweird.f32 %v11781_v47  ;;  %v3740_v27 = vand.u32 2147483648, %v11781_v47  ;;  %v11857_v23 = vpop.f32.mrf.mxu3 }
 0x39c   : > { %v4046_v56 = vadd.f32 0.4994258, %v4045_v13  ;;  %v4189_v15 = vadd.f32 0.00028619796, %v4188_v35  ;;  %2037 = vmatmul.bf16.gmra.mxu0 %v14150_v12  ;;  %vm11828_vm5 = vcmp.eq.f32.partialorder %v3738_v21, 8.507059e+37  ;;  %v11835_v57 = vadd.f32 %v11766_v46, %v1905_v63  ;;  %v11855_v21 = vpop.f32.mrf.mxu2 }
 0x39d   : > { %v3731_v33 = vsub.f32 1.0, %v3730_v6  ;;  %8016 = vrcp.f32 %v11820_v50  ;;  %v4035_v48 = vadd.f32 0.18741608, %v4034_v49  ;;  %v3877_v2 = vadd.f32 1.1283791, %v3876_v4  ;;  %2256 = vmatmul.bf16.gmra.mxu3 %v8503_v58  ;;  %v1839_v41 = vpop.f32.mrf.mxu1 }
 0x39e   : > { %v4047_v42 = vmul.f32 %v4046_v56, %v11754_v19  ;;  %v1762_v54 = vadd.f32 %v1761_v30, %v11256_v60  ;;  %vm3735_vm6 = vweird.f32 %v8015_v37  ;;  %v4190_v18 = vmul.f32 %v4189_v15, %v11804_v1 }
 0x39f   : > { %v3732_v20 = vmul.f32 %v8015_v37, %v3731_v33  ;;  %v4200_v45 = vadd.f32 0.001143296, %v4199_v25  ;;  %2110 = vmatmul.bf16.gmra.mxu1 %v14079_v17  ;;  %v3741_v59 = vor.u32 1.1754944e-38, %v3740_v27  ;;  %v3898_v11 = vand.u32 2147483647, %v11820_v50  ;;  %vm3736_vm7 = vmor %vm3734_vm4, %vm3735_vm6  ;;  %v1766_v33 = vpop.f32.mrf.mxu0 }
 0x3a0   : > { %v3900_v22 = vand.u32 2147483648, %v11820_v50  ;;  %v11843_v55 = vadd.f32 1.0, %v4047_v42  ;;  %v4036_v0 = vmul.f32 %v4035_v48, %v11754_v19  ;;  %v4191_v30 = vadd.f32 0.0036580483, %v4190_v18 }
 0x3a1   : > { %v3733_v46 = vadd.f32 %v8015_v37, %v3732_v20  ;;  %v4201_v58 = vmul.f32 %v4200_v45, %v11804_v1  ;;  %v3878_v62 = vmul.f32 %v3877_v2, %v11709_v8  ;;  %v11852_v17 = vmul.f32 0.70710677, %v11835_v57 }
 0x3a2   : > { %8018 = vrcp.f32 %v11843_v55  ;;  %v1835_v61 = vadd.f32 %v11783_v40, %v1762_v54  ;;  %vm3894_vm8 = vweird.f32 %v11820_v50  ;;  %v4192_v47 = vmul.f32 %v4191_v30, %v11804_v1 }
 0x3a3   : > { %v8017_v19 = vpop.eup %8016  ;;  %v3737_v63 = vsel %vm3736_vm7, %v8015_v37, %v3733_v46  ;;  %v4202_v4 = vadd.f32 0.014752088, %v4201_v58  ;;  %vm11864_vm9 = vcmp.eq.f32.partialorder %v3898_v11, 8.507059e+37  ;;  %v3901_v40 = vor.u32 1.1754944e-38, %v3900_v22 }
 0x3a4   : > { %v3742_v8 = vsel %vm11828_vm5, %v3741_v59, %v3737_v63  ;;  %v3890_v49 = vmul.f32 %v8017_v19, %v11820_v50  ;;  %v4060_v35 = vand.u32 2147483648, %v11843_v55  ;;  %v4037_v6 = vadd.f32 1.1283791, %v4036_v0 }
 0x3a5   : > { %v3743_v44 = vmul.f32 %v3742_v8, %v3718_v26  ;;  %v4193_v37 = vadd.f32 0.05243302, %v4192_v47  ;;  %v4203_v25 = vmul.f32 %v4202_v4, %v11804_v1  ;;  %v4058_v56 = vand.u32 2147483647, %v11843_v55 }
 0x3a6   : > { %v3891_v27 = vsub.f32 1.0, %v3890_v49  ;;  %v4346_v15 = vmul.f32 %v11852_v17, %v11852_v17  ;;  %v1908_v12 = vadd.f32 %v11806_v29, %v1835_v61  ;;  %vm4054_vm10 = vweird.f32 %v11843_v55 }
 0x3a7   : > { %v7653_v48 = vclamps-f32 %v3743_v44, 1.0  ;;  %v4194_v2 = vmul.f32 %v4193_v37, %v11804_v1  ;;  %v4204_v26 = vadd.f32 0.112945676, %v4203_v25  ;;  %v1764_v42 = vadd.f32 %v1763_v32, %v11256_v60  ;;  %v1985_v44 = vpop.f32.mrf.mxu3  ;;  %v14155_v37 = vld [vmem:[#allocation19_spill] sm:$0xff] }
 0x3a8   : > { %v8019_v54 = vpop.eup %8018  ;;  %v3892_v20 = vmul.f32 %v8017_v19, %v3891_v27  ;;  %vm3895_vm11 = vweird.f32 %v8017_v19  ;;  %v4061_v18 = vor.u32 1.1754944e-38, %v4060_v35  ;;  %v11877_v45 = vmin.f32 %v4346_v15, 16.0  ;;  %v1912_v35 = vpop.f32.mrf.mxu2  ;;  %v14156_v15 = vld [vmem:[#allocation22_spill] sm:$0xff] }
 0x3a9   : > { %v6536_v59 = vadd.f32 1.0, %v7653_v48  ;;  %v4050_v11 = vmul.f32 %v8019_v54, %v11843_v55  ;;  %v11881_v29 = vadd.f32 %v11808_v36, %v1908_v12  ;;  %v1767_v22 = vadd.f32 %v1766_v33, %v11256_v60  ;;  %vm3896_vm12 = vmor %vm3894_vm8, %vm3895_vm11  ;;  %v14157_v48 = vld [vmem:[#allocation20_spill] sm:$0xff] }
 0x3aa   : > { %v3893_v46 = vadd.f32 %v8017_v19, %v3892_v20  ;;  %v4205_v0 = vmul.f32 %v4204_v26, %v11804_v1  ;;  %v4348_v32 = vmul.f32 2.1237322e-06, %v11877_v45  ;;  %v4359_v30 = vmul.f32 3.8918573e-05, %v11877_v45  ;;  %2188 = vmatmul.bf16.gmra.mxu2 %v14078_v39  ;;  %v11912_v20 = vpop.f32.mrf.mxu0 }
 0x3ab   : > { %v6636_v58 = vmul.f32 %v6536_v59, %v11794_v14  ;;  %v4051_v61 = vsub.f32 1.0, %v4050_v11  ;;  %v4195_v36 = vadd.f32 0.18741608, %v4194_v2  ;;  %v1837_v63 = vadd.f32 %v11825_v52, %v1764_v42  ;;  %v11914_v59 = vpop.f32.mrf.mxu1 }
 0x3ac   : > { %v3897_v47 = vsel %vm3896_vm12, %v8017_v19, %v3893_v46  ;;  %v4206_v4 = vadd.f32 0.4994258, %v4205_v0  ;;  %v4349_v8 = vadd.f32 0.00028619796, %v4348_v32  ;;  %v4360_v49 = vadd.f32 0.001143296, %v4359_v30  ;;  %2042 = vmatmul.bf16.gmra.mxu0 %v14155_v37 }
 0x3ad   : > { %6736 = vst [vmem:[%s8982_s18 + $0xf0] sm:$0xff] %v6636_v58  ;;  %v3902_v39 = vsel %vm11864_vm9, %v3901_v40, %v3897_v47  ;;  %v4052_v14 = vmul.f32 %v8019_v54, %v4051_v61  ;;  %vm4055_vm13 = vweird.f32 %v8019_v54  ;;  %v11897_v50 = vmul.f32 0.70710677, %v11881_v29  ;;  %2261 = vmatmul.bf16.gmra.mxu3 %v14156_v15 }
 0x3ae   : > { %v3903_v25 = vmul.f32 %v3902_v39, %v3878_v62  ;;  %v4207_v52 = vmul.f32 %v4206_v4, %v11804_v1  ;;  %v4350_v19 = vmul.f32 %v4349_v8, %v11877_v45  ;;  %v4361_v27 = vmul.f32 %v4360_v49, %v11877_v45  ;;  %vm4056_vm14 = vmor %vm4054_vm10, %vm4055_vm13 }
 0x3af   : > { %v4053_v12 = vadd.f32 %v8019_v54, %v4052_v14  ;;  %v4196_v33 = vmul.f32 %v4195_v36, %v11804_v1  ;;  %v4506_v13 = vmul.f32 %v11897_v50, %v11897_v50  ;;  %v1910_v40 = vadd.f32 %v11855_v21, %v1837_v63  ;;  %2115 = vmatmul.bf16.gmra.mxu1 %v14157_v48 }
 0x3b0   : > { %v7657_v2 = vclamps-f32 %v3903_v25, 1.0  ;;  %v11910_v62 = vadd.f32 1.0, %v4207_v52  ;;  %v4351_v26 = vadd.f32 0.0036580483, %v4350_v19  ;;  %v4362_v42 = vadd.f32 0.014752088, %v4361_v27  ;;  %v11933_v4 = vpop.f32.mrf.mxu2 }
 0x3b1   : > { %v4038_v1 = vmul.f32 %v4037_v6, %v11736_v31  ;;  %v4057_v11 = vsel %vm4056_vm14, %v8019_v54, %v4053_v12  ;;  %vm4059_vm15 = vcmp.eq.f32.partialorder %v4058_v56, 8.507059e+37  ;;  %v11917_v46 = vmin.f32 %v4506_v13, 16.0 }
 0x3b2   : > { %v6540_v21 = vadd.f32 1.0, %v7657_v2  ;;  %v4062_v0 = vsel %vm4059_vm15, %v4061_v18, %v4057_v11  ;;  %8020 = vrcp.f32 %v11910_v62  ;;  %v1840_v55 = vadd.f32 %v1839_v41, %v1767_v22  ;;  %v14158_v2 = vld [vmem:[#allocation25_spill] sm:$0xff] }
 0x3b3   : > { %v4063_v32 = vmul.f32 %v4062_v0, %v4038_v1  ;;  %v4197_v30 = vadd.f32 1.1283791, %v4196_v33  ;;  %v4352_v58 = vmul.f32 %v4351_v26, %v11877_v45  ;;  %v11922_v61 = vadd.f32 %v11857_v23, %v1910_v40  ;;  %v11953_v48 = vpop.f32.mrf.mxu1 }
 0x3b4   : > { %v6640_v36 = vmul.f32 %v6540_v21, %v11802_v16  ;;  %v4363_v31 = vmul.f32 %v4362_v42, %v11877_v45  ;;  %v4508_v6 = vmul.f32 2.1237322e-06, %v11917_v46  ;;  %v4519_v56 = vmul.f32 3.8918573e-05, %v11917_v46  ;;  %v11935_v16 = vpop.f32.mrf.mxu3 }
 0x3b5   : > { %v2344_v54 = vmul.f32 0.5, %v11718_v38  ;;  %v7661_v18 = vclamps-f32 %v4063_v32, 1.0  ;;  %v4353_v63 = vadd.f32 0.05243302, %v4352_v58  ;;  %v11931_v41 = vmul.f32 0.5, %v11769_v7  ;;  %v14159_v32 = vld [vmem:[#allocation23_spill] sm:$0xff] }
 0x3b6   : > { %6740 = vst [vmem:[%s8982_s18 + $0x110] sm:$0xff] %v6640_v36  ;;  %v4364_v22 = vadd.f32 0.112945676, %v4363_v31  ;;  %v4509_v47 = vadd.f32 0.00028619796, %v4508_v6  ;;  %v1913_v23 = vadd.f32 %v1912_v35, %v1840_v55  ;;  %v4198_v14 = vmul.f32 %v4197_v30, %v11786_v9  ;;  %v11951_v9 = vpop.f32.mrf.mxu0 }
 0x3b7   : > { %v6544_v8 = vadd.f32 1.0, %v7661_v18  ;;  %v4354_v49 = vmul.f32 %v4353_v63, %v11877_v45  ;;  %v4520_v37 = vadd.f32 0.001143296, %v4519_v56  ;;  %v11939_v39 = vmul.f32 0.70710677, %v11922_v61  ;;  %v14160_v56 = vld [vmem:[#allocation26_spill] sm:$0xff] }
 0x3b8   : > { %v8021_v38 = vpop.eup %8020  ;;  %v4365_v7 = vmul.f32 %v4364_v22, %v11877_v45  ;;  %v4510_v25 = vmul.f32 %v4509_v47, %v11917_v46  ;;  %v11944_v35 = vadd.f32 %v1985_v44, %v1913_v23  ;;  %v4218_v27 = vand.u32 2147483647, %v11910_v62  ;;  %v14161_v63 = vld [vmem:[#allocation24_spill] sm:$0xff] }
 0x3b9   : > { %v6644_v52 = vmul.f32 %v6544_v8, %v2344_v54  ;;  %v4210_v19 = vmul.f32 %v8021_v38, %v11910_v62  ;;  %v4355_v15 = vadd.f32 0.18741608, %v4354_v49  ;;  %v4521_v13 = vmul.f32 %v4520_v37, %v11917_v46  ;;  %v11982_v8 = vpop.f32.mrf.mxu2 }
 0x3ba   : > { %v4366_v12 = vadd.f32 0.4994258, %v4365_v7  ;;  %v4511_v33 = vadd.f32 0.0036580483, %v4510_v25  ;;  %v4666_v40 = vmul.f32 %v11939_v39, %v11939_v39  ;;  %2193 = vmatmul.bf16.gmra.mxu2 %v14158_v2  ;;  %v4220_v26 = vand.u32 2147483648, %v11910_v62 }
 0x3bb   : > { %6744 = vst [vmem:[%s8982_s18 + $0x130] sm:$0xff] %v6644_v52  ;;  %v4211_v44 = vsub.f32 1.0, %v4210_v19  ;;  %v4356_v42 = vmul.f32 %v4355_v15, %v11877_v45  ;;  %v11960_v1 = vmul.f32 0.70710677, %v11944_v35  ;;  %v4522_v0 = vadd.f32 0.014752088, %v4521_v13 }
 0x3bc   : > { %v4367_v11 = vmul.f32 %v4366_v12, %v11877_v45  ;;  %v4512_v21 = vmul.f32 %v4511_v33, %v11917_v46  ;;  %v11964_v55 = vmin.f32 %v4666_v40, 16.0  ;;  %2047 = vmatmul.bf16.gmra.mxu0 %v14159_v32  ;;  %vm4214_vm0 = vweird.f32 %v11910_v62  ;;  %v11984_v49 = vpop.f32.mrf.mxu3 }
 0x3bd   : > { %v4212_v30 = vmul.f32 %v8021_v38, %v4211_v44  ;;  %vm4215_vm1 = vweird.f32 %v8021_v38  ;;  %v4826_v58 = vmul.f32 %v11960_v1, %v11960_v1  ;;  %v4523_v6 = vmul.f32 %v4522_v0, %v11917_v46  ;;  %2266 = vmatmul.bf16.gmra.mxu3 %v14160_v56 }
 0x3be   : > { %v11970_v36 = vadd.f32 1.0, %v4367_v11  ;;  %v4513_v31 = vadd.f32 0.05243302, %v4512_v21  ;;  %v4668_v45 = vmul.f32 2.1237322e-06, %v11964_v55  ;;  %vm4219_vm2 = vcmp.eq.f32.partialorder %v4218_v27, 8.507059e+37  ;;  %vm4216_vm3 = vmor %vm4214_vm0, %vm4215_vm1 }
 0x3bf   : > { %v4213_v54 = vadd.f32 %v8021_v38, %v4212_v30  ;;  %v4679_v18 = vmul.f32 3.8918573e-05, %v11964_v55  ;;  %v1769_v62 = vadd.f32 %v11912_v20, %v11256_v60  ;;  %2120 = vmatmul.bf16.gmra.mxu1 %v14161_v63  ;;  %v4221_v22 = vor.u32 1.1754944e-38, %v4220_v26 }
 0x3c0   : > { %v4357_v47 = vadd.f32 1.1283791, %v4356_v42  ;;  %8022 = vrcp.f32 %v11970_v36  ;;  %v11980_v23 = vmin.f32 %v4826_v58, 16.0  ;;  %v4514_v7 = vmul.f32 %v4513_v31, %v11917_v46  ;;  %v12001_v42 = vpop.f32.mrf.mxu1 }
 0x3c1   : > { %v4217_v37 = vsel %vm4216_vm3, %v8021_v38, %v4213_v54  ;;  %v4524_v25 = vadd.f32 0.112945676, %v4523_v6  ;;  %v4669_v52 = vadd.f32 0.00028619796, %v4668_v45  ;;  %v11988_v20 = vmul.f32 0.5, %v11835_v57  ;;  %v11999_v57 = vpop.f32.mrf.mxu0 }
 0x3c2   : > { %v4222_v19 = vsel %vm4219_vm2, %v4221_v22, %v4217_v37  ;;  %v11991_v27 = vmul.f32 0.5, %v11881_v29  ;;  %v4680_v15 = vadd.f32 0.001143296, %v4679_v18  ;;  %v1842_v40 = vadd.f32 %v11914_v59, %v1769_v62 }
 0x3c3   : > { %v4223_v12 = vmul.f32 %v4222_v19, %v4198_v14  ;;  %v4525_v33 = vmul.f32 %v4524_v25, %v11917_v46  ;;  %v4670_v13 = vmul.f32 %v4669_v52, %v11964_v55  ;;  %v4515_v38 = vadd.f32 0.18741608, %v4514_v7  ;;  %v12020_v19 = vpop.f32.mrf.mxu2 }
 0x3c4   : > { %v4681_v2 = vmul.f32 %v4680_v15, %v11964_v55  ;;  %v4828_v44 = vmul.f32 2.1237322e-06, %v11980_v23  ;;  %v4839_v26 = vmul.f32 3.8918573e-05, %v11980_v23  ;;  %v4358_v14 = vmul.f32 %v4357_v47, %v11852_v17  ;;  %v12022_v15 = vpop.f32.mrf.mxu3 }
 0x3c5   : > { %v7665_v29 = vclamps-f32 %v4223_v12, 1.0  ;;  %v4526_v11 = vadd.f32 0.4994258, %v4525_v33  ;;  %v4671_v21 = vadd.f32 0.0036580483, %v4670_v13  ;;  %v1915_v58 = vadd.f32 %v11933_v4, %v1842_v40  ;;  %v14162_v12 = vld [vmem:[#allocation29_spill] sm:$0xff] }
 0x3c6   : > { %v8023_v0 = vpop.eup %8022  ;;  %v4682_v32 = vadd.f32 0.014752088, %v4681_v2  ;;  %v4829_v30 = vadd.f32 0.00028619796, %v4828_v44  ;;  %v4840_v59 = vadd.f32 0.001143296, %v4839_v26  ;;  %v4516_v4 = vmul.f32 %v4515_v38, %v11917_v46 }
 0x3c7   : > { %v6548_v31 = vadd.f32 1.0, %v7665_v29  ;;  %v4370_v6 = vmul.f32 %v8023_v0, %v11970_v36  ;;  %v4378_v45 = vand.u32 2147483647, %v11970_v36  ;;  %v4380_v56 = vand.u32 2147483648, %v11970_v36  ;;  %v14165_v40 = vld [vmem:[#allocation27_spill] sm:$0xff] }
 0x3c8   : > { %v4527_v54 = vmul.f32 %v4526_v11, %v11917_v46  ;;  %v4672_v17 = vmul.f32 %v4671_v21, %v11964_v55  ;;  %v4683_v18 = vmul.f32 %v4682_v32, %v11964_v55  ;;  %v4830_v62 = vmul.f32 %v4829_v30, %v11980_v23  ;;  %v14166_v30 = vld [vmem:[#allocation30_spill] sm:$0xff] }
 0x3c9   : > { %v6648_v63 = vmul.f32 %v6548_v31, %v11931_v41  ;;  %v4371_v22 = vsub.f32 1.0, %v4370_v6  ;;  %v4841_v47 = vmul.f32 %v4840_v59, %v11980_v23  ;;  %v12018_v52 = vadd.f32 %v11935_v16, %v1915_v58  ;;  %v12042_v32 = vpop.f32.mrf.mxu0 }
 0x3ca   : > { %v12015_v37 = vadd.f32 1.0, %v4527_v54  ;;  %v4673_v7 = vadd.f32 0.05243302, %v4672_v17  ;;  %v4684_v25 = vadd.f32 0.112945676, %v4683_v18  ;;  %2198 = vmatmul.bf16.gmra.mxu2 %v14162_v12  ;;  %vm4375_vm4 = vweird.f32 %v8023_v0 }
 0x3cb   : > { %6748 = vst [vmem:[%s8982_s18 + $0x150] sm:$0xff] %v6648_v63  ;;  %v4372_v41 = vmul.f32 %v8023_v0, %v4371_v22  ;;  %v4831_v33 = vadd.f32 0.0036580483, %v4830_v62  ;;  %v4842_v46 = vadd.f32 0.014752088, %v4841_v47  ;;  %vm4374_vm5 = vweird.f32 %v11970_v36 }
 0x3cc   : > { %vm12027_vm6 = vcmp.eq.f32.partialorder %v4378_v45, 8.507059e+37  ;;  %8024 = vrcp.f32 %v12015_v37  ;;  %v1772_v16 = vadd.f32 %v11951_v9, %v11256_v60  ;;  %2052 = vmatmul.bf16.gmra.mxu0 %v14165_v40  ;;  %v4674_v2 = vmul.f32 %v4673_v7, %v11964_v55  ;;  %vm4376_vm7 = vmor %vm4374_vm5, %vm4375_vm4  ;;  %v12044_v9 = vpop.f32.mrf.mxu1  ;;  %v14167_v45 = vld [vmem:[#allocation28_spill] sm:$0xff] }
 0x3cd   : > { %v4373_v38 = vadd.f32 %v8023_v0, %v4372_v41  ;;  %v4685_v44 = vmul.f32 %v4684_v25, %v11964_v55  ;;  %v4832_v26 = vmul.f32 %v4831_v33, %v11980_v23  ;;  %v4381_v36 = vor.u32 1.1754944e-38, %v4380_v56  ;;  %2271 = vmatmul.bf16.gmra.mxu3 %v14166_v30 }
 0x3ce   : > { %v4517_v29 = vadd.f32 1.1283791, %v4516_v4  ;;  %v4843_v11 = vmul.f32 %v4842_v46, %v11980_v23  ;;  %v12040_v21 = vmul.f32 0.70710677, %v12018_v52  ;;  %v4675_v58 = vadd.f32 0.18741608, %v4674_v2 }
 0x3cf   : > { %v4377_v59 = vsel %vm4376_vm7, %v8023_v0, %v4373_v38  ;;  %v4686_v31 = vadd.f32 0.4994258, %v4685_v44  ;;  %v4833_v6 = vadd.f32 0.05243302, %v4832_v26  ;;  %2125 = vmatmul.bf16.gmra.mxu1 %v14167_v45  ;;  %v1845_v18 = vadd.f32 %v11953_v48, %v1772_v16  ;;  %v12071_v16 = vpop.f32.mrf.mxu3 }
 0x3d0   : > { %v4382_v56 = vsel %vm12027_vm6, %v4381_v36, %v4377_v59  ;;  %v4844_v54 = vadd.f32 0.112945676, %v4843_v11  ;;  %v4986_v17 = vmul.f32 %v12040_v21, %v12040_v21  ;;  %v12054_v63 = vmul.f32 0.5, %v11922_v61 }
 0x3d1   : > { %v4383_v62 = vmul.f32 %v4382_v56, %v4358_v14  ;;  %v4687_v0 = vmul.f32 %v4686_v31, %v11964_v55  ;;  %v4834_v22 = vmul.f32 %v4833_v6, %v11980_v23  ;;  %v4676_v47 = vmul.f32 %v4675_v58, %v11964_v55  ;;  %v12069_v55 = vpop.f32.mrf.mxu2  ;;  %v12084_v6 = vpop.f32.mrf.mxu0 }
 0x3d2   : > { %v8025_v4 = vpop.eup %8024  ;;  %v4845_v7 = vmul.f32 %v4844_v54, %v11980_v23  ;;  %v12060_v25 = vmin.f32 %v4986_v17, 16.0  ;;  %v1918_v12 = vadd.f32 %v11982_v8, %v1845_v18  ;;  %v4518_v48 = vmul.f32 %v4517_v29, %v11897_v50 }
 0x3d3   : > { %v7669_v41 = vclamps-f32 %v4383_v62, 1.0  ;;  %v4530_v14 = vmul.f32 %v8025_v4, %v12015_v37  ;;  %vm4534_vm8 = vweird.f32 %v12015_v37  ;;  %v4540_v61 = vand.u32 2147483648, %v12015_v37 }
 0x3d4   : > { %v12067_v33 = vadd.f32 1.0, %v4687_v0  ;;  %v4835_v46 = vadd.f32 0.18741608, %v4834_v22  ;;  %v4846_v13 = vadd.f32 0.4994258, %v4845_v7  ;;  %vm4535_vm9 = vweird.f32 %v8025_v4  ;;  %v12086_v45 = vpop.f32.mrf.mxu1  ;;  %v14168_v0 = vld [vmem:[#allocation33_spill] sm:$0xff] }
 0x3d5   : > { %v6552_v40 = vadd.f32 1.0, %v7669_v41  ;;  %v4531_v38 = vsub.f32 1.0, %v4530_v14  ;;  %v4538_v8 = vand.u32 2147483647, %v12015_v37  ;;  %v4988_v50 = vmul.f32 2.1237322e-06, %v12060_v25  ;;  %vm4536_vm10 = vmor %vm4534_vm8, %vm4535_vm9 }
 0x3d6   : > { %v4677_v2 = vadd.f32 1.1283791, %v4676_v47  ;;  %8026 = vrcp.f32 %v12067_v33  ;;  %v12077_v44 = vadd.f32 %v11984_v49, %v1918_v12  ;;  %v4836_v29 = vmul.f32 %v4835_v46, %v11980_v23  ;;  %v14169_v41 = vld [vmem:[#allocation31_spill] sm:$0xff] }
 0x3d7   : > { %v6652_v26 = vmul.f32 %v6552_v40, %v11988_v20  ;;  %v4532_v36 = vmul.f32 %v8025_v4, %v4531_v38  ;;  %v4847_v11 = vmul.f32 %v4846_v13, %v11980_v23  ;;  %v4541_v30 = vor.u32 1.1754944e-38, %v4540_v61 }
 0x3d8   : > { %v4700_v59 = vand.u32 2147483648, %v12067_v33  ;;  %v4989_v58 = vadd.f32 0.00028619796, %v4988_v50  ;;  %v4999_v31 = vmul.f32 3.8918573e-05, %v12060_v25  ;;  %v1774_v54 = vadd.f32 %v11999_v57, %v11256_v60  ;;  %v12122_v50 = vpop.f32.mrf.mxu3 }
 0x3d9   : > { %6752 = vst [vmem:[%s8982_s18 + $0x170] sm:$0xff] %v6652_v26  ;;  %v4533_v49 = vadd.f32 %v8025_v4, %v4532_v36  ;;  %v4698_v56 = vand.u32 2147483647, %v12067_v33  ;;  %v12090_v20 = vadd.f32 1.0, %v4847_v11  ;;  %v4837_v23 = vadd.f32 1.1283791, %v4836_v29 }
 0x3da   : > { %v4990_v17 = vmul.f32 %v4989_v58, %v12060_v25  ;;  %v5000_v18 = vadd.f32 0.001143296, %v4999_v31  ;;  %v12099_v62 = vmul.f32 0.70710677, %v12077_v44  ;;  %2203 = vmatmul.bf16.gmra.mxu2 %v14168_v0  ;;  %vm4539_vm11 = vcmp.eq.f32.partialorder %v4538_v8, 8.507059e+37  ;;  %v12120_v8 = vpop.f32.mrf.mxu2  ;;  %v12142_v0 = vpop.f32.mrf.mxu0 }
 0x3db   : > { %v4537_v22 = vsel %vm4536_vm10, %v8025_v4, %v4533_v49  ;;  %v4678_v47 = vmul.f32 %v4677_v2, %v11939_v39  ;;  %8028 = vrcp.f32 %v12090_v20  ;;  %vm4694_vm12 = vweird.f32 %v12067_v33  ;;  %v14172_v2 = vld [vmem:[#allocation34_spill] sm:$0xff] }
 0x3dc   : > { %v8027_v57 = vpop.eup %8026  ;;  %v4542_v7 = vsel %vm4539_vm11, %v4541_v30, %v4537_v22  ;;  %v4701_v37 = vor.u32 1.1754944e-38, %v4700_v59  ;;  %v4991_v12 = vadd.f32 0.0036580483, %v4990_v17  ;;  %2057 = vmatmul.bf16.gmra.mxu0 %v14169_v41  ;;  %vm12107_vm13 = vcmp.eq.f32.partialorder %v4698_v56, 8.507059e+37  ;;  %v12144_v22 = vpop.f32.mrf.mxu1 }
 0x3dd   : > { %v4543_v14 = vmul.f32 %v4542_v7, %v4518_v48  ;;  %v4690_v61 = vmul.f32 %v8027_v57, %v12067_v33  ;;  %v5001_v4 = vmul.f32 %v5000_v18, %v12060_v25  ;;  %v1847_v39 = vadd.f32 %v12001_v42, %v1774_v54  ;;  %2276 = vmatmul.bf16.gmra.mxu3 %v14172_v2 }
 0x3de   : > { %v12114_v13 = vmul.f32 %v4837_v23, %v11960_v1  ;;  %v4858_v40 = vand.u32 2147483647, %v12090_v20  ;;  %v4992_v38 = vmul.f32 %v4991_v12, %v12060_v25  ;;  %v5146_v48 = vmul.f32 %v12099_v62, %v12099_v62  ;;  %v14173_v1 = vld [vmem:[#allocation32_spill] sm:$0xff] }
 0x3df   : > { %v7673_v26 = vclamps-f32 %v4543_v14, 1.0  ;;  %v4691_v36 = vsub.f32 1.0, %v4690_v61  ;;  %v5002_v29 = vadd.f32 0.014752088, %v5001_v4  ;;  %v1920_v42 = vadd.f32 %v12020_v19, %v1847_v39  ;;  %2130 = vmatmul.bf16.gmra.mxu1 %v14173_v1 }
 0x3e0   : > { %vm4695_vm14 = vweird.f32 %v8027_v57  ;;  %vm4854_vm15 = vweird.f32 %v12090_v20  ;;  %v4860_v11 = vand.u32 2147483648, %v12090_v20  ;;  %v4993_v30 = vadd.f32 0.05243302, %v4992_v38  ;;  %v12167_v46 = vpop.f32.mrf.mxu3 }
 0x3e1   : > { %v12129_v59 = vmin.f32 %v5146_v48, 16.0  ;;  %v8029_v58 = vpop.eup %8028  ;;  %v6556_v31 = vadd.f32 1.0, %v7673_v26  ;;  %v4692_v49 = vmul.f32 %v8027_v57, %v4691_v36  ;;  %v5003_v56 = vmul.f32 %v5002_v29, %v12060_v25  ;;  %vm4696_vm1 = vmor %vm4694_vm12, %vm4695_vm14 }
 0x3e2   : > { %v12133_v54 = vadd.f32 %v12022_v15, %v1920_v42  ;;  %v4850_v19 = vmul.f32 %v8029_v58, %v12090_v20  ;;  %vm12136_vm0 = vcmp.eq.f32.partialorder %v4858_v40, 8.507059e+37  ;;  %v4994_v17 = vmul.f32 %v4993_v30, %v12060_v25 }
 0x3e3   : > { %v5148_v18 = vmul.f32 2.1237322e-06, %v12129_v59  ;;  %v6656_v7 = vmul.f32 %v6556_v31, %v11991_v27  ;;  %v4693_v12 = vadd.f32 %v8027_v57, %v4692_v49  ;;  %v5004_v15 = vadd.f32 0.112945676, %v5003_v56  ;;  %v12165_v49 = vpop.f32.mrf.mxu2 }
 0x3e4   : > { %v5159_v41 = vmul.f32 3.8918573e-05, %v12129_v59  ;;  %v4851_v14 = vsub.f32 1.0, %v4850_v19  ;;  %vm4855_vm2 = vweird.f32 %v8029_v58  ;;  %v1777_v4 = vadd.f32 %v12042_v32, %v11256_v60 }
 0x3e5   : > { %v5149_v61 = vadd.f32 0.00028619796, %v5148_v18  ;;  %6756 = vst [vmem:[%s8982_s18 + $0x190] sm:$0xff] %v6656_v7  ;;  %v4697_v39 = vsel %vm4696_vm1, %v8027_v57, %v4693_v12  ;;  %v5005_v40 = vmul.f32 %v5004_v15, %v12060_v25  ;;  %v12156_v27 = vmul.f32 0.70710677, %v12133_v54  ;;  %vm4856_vm3 = vmor %vm4854_vm15, %vm4855_vm2  ;;  %v14176_v7 = vld [vmem:[#allocation37_spill] sm:$0xff] }
 0x3e6   : > { %v5160_v38 = vadd.f32 0.001143296, %v5159_v41  ;;  %v4702_v48 = vsel %vm12107_vm13, %v4701_v37, %v4697_v39  ;;  %v4852_v2 = vmul.f32 %v8029_v58, %v4851_v14  ;;  %v4995_v33 = vadd.f32 0.18741608, %v4994_v17  ;;  %v14177_v39 = vld [vmem:[#allocation35_spill] sm:$0xff] }
 0x3e7   : > { %v5150_v26 = vmul.f32 %v5149_v61, %v12129_v59  ;;  %v4703_v36 = vmul.f32 %v4702_v48, %v4678_v47  ;;  %v5006_v29 = vadd.f32 0.4994258, %v5005_v40  ;;  %v5306_v32 = vmul.f32 %v12156_v27, %v12156_v27 }
 0x3e8   : > { %v5161_v42 = vmul.f32 %v5160_v38, %v12129_v59  ;;  %v4853_v57 = vadd.f32 %v8029_v58, %v4852_v2  ;;  %v4861_v1 = vor.u32 1.1754944e-38, %v4860_v11  ;;  %v1850_v31 = vadd.f32 %v12044_v9, %v1777_v4  ;;  %v12187_v4 = vpop.f32.mrf.mxu0  ;;  %v14178_v2 = vld [vmem:[#allocation38_spill] sm:$0xff] }
 0x3e9   : > { %v5151_v30 = vadd.f32 0.0036580483, %v5150_v26  ;;  %v7677_v37 = vclamps-f32 %v4703_v36, 1.0  ;;  %v5007_v47 = vmul.f32 %v5006_v29, %v12060_v25  ;;  %v12173_v19 = vmin.f32 %v5306_v32, 16.0 }
 0x3ea   : > { %v5162_v56 = vadd.f32 0.014752088, %v5161_v42  ;;  %v4857_v17 = vsel %vm4856_vm3, %v8029_v58, %v4853_v57  ;;  %v4996_v11 = vmul.f32 %v4995_v33, %v12060_v25  ;;  %v1923_v9 = vadd.f32 %v12069_v55, %v1850_v31  ;;  %2208 = vmatmul.bf16.gmra.mxu2 %v14176_v7  ;;  %v12189_v55 = vpop.f32.mrf.mxu1  ;;  %v14179_v42 = vld [vmem:[#allocation36_spill] sm:$0xff] }
 0x3eb   : > { %v5152_v18 = vmul.f32 %v5151_v30, %v12129_v59  ;;  %v6560_v12 = vadd.f32 1.0, %v7677_v37  ;;  %v4862_v15 = vsel %vm12136_vm0, %v4861_v1, %v4857_v17  ;;  %v12181_v20 = vadd.f32 1.0, %v5007_v47  ;;  %v12219_v17 = vpop.f32.mrf.mxu3 }
 0x3ec   : > { %v5163_v41 = vmul.f32 %v5162_v56, %v12129_v59  ;;  %v4863_v14 = vmul.f32 %v4862_v15, %v12114_v13  ;;  %v5308_v25 = vmul.f32 2.1237322e-06, %v12173_v19  ;;  %v5319_v61 = vmul.f32 3.8918573e-05, %v12173_v19  ;;  %2062 = vmatmul.bf16.gmra.mxu0 %v14177_v39 }
 0x3ed   : > { %v5153_v58 = vadd.f32 0.05243302, %v5152_v18  ;;  %v6660_v23 = vmul.f32 %v6560_v12, %v12054_v63  ;;  %8030 = vrcp.f32 %v12181_v20  ;;  %v4997_v38 = vadd.f32 1.1283791, %v4996_v11  ;;  %2281 = vmatmul.bf16.gmra.mxu3 %v14178_v2 }
 0x3ee   : > { %v7681_v40 = vclamps-f32 %v4863_v14, 1.0  ;;  %v5164_v13 = vadd.f32 0.112945676, %v5163_v41  ;;  %v5309_v33 = vadd.f32 0.00028619796, %v5308_v25  ;;  %v12198_v36 = vadd.f32 %v12071_v16, %v1923_v9 }
 0x3ef   : > { %v5154_v48 = vmul.f32 %v5153_v58, %v12129_v59  ;;  %6760 = vst [vmem:[%s8982_s18 + $0x1b0] sm:$0xff] %v6660_v23  ;;  %v5320_v26 = vadd.f32 0.001143296, %v5319_v61  ;;  %v1779_v29 = vadd.f32 %v12084_v6, %v11256_v60  ;;  %2135 = vmatmul.bf16.gmra.mxu1 %v14179_v42  ;;  %v2364_v63 = vmul.f32 0.5, %v11944_v35 }
 0x3f0   : > { %v6564_v32 = vadd.f32 1.0, %v7681_v40  ;;  %v12205_v57 = vmul.f32 0.5, %v12018_v52  ;;  %v5165_v1 = vmul.f32 %v5164_v13, %v12129_v59  ;;  %v12209_v30 = vmul.f32 0.5, %v12077_v44  ;;  %v12217_v52 = vpop.f32.mrf.mxu2  ;;  %v12239_v40 = vpop.f32.mrf.mxu0 }
 0x3f1   : > { %v5310_v16 = vmul.f32 %v5309_v33, %v12173_v19  ;;  %v5321_v31 = vmul.f32 %v5320_v26, %v12173_v19  ;;  %v12214_v6 = vmul.f32 0.70710677, %v12198_v36  ;;  %v4998_v35 = vmul.f32 %v4997_v38, %v12040_v21 }
 0x3f2   : > { %v6664_v37 = vmul.f32 %v6564_v32, %v2364_v63  ;;  %v5155_v47 = vadd.f32 0.18741608, %v5154_v48  ;;  %v5166_v56 = vadd.f32 0.4994258, %v5165_v1  ;;  %v1852_v7 = vadd.f32 %v12086_v45, %v1779_v29  ;;  %v12241_v38 = vpop.f32.mrf.mxu1 }
 0x3f3   : > { %v8031_v11 = vpop.eup %8030  ;;  %v5311_v18 = vadd.f32 0.0036580483, %v5310_v16  ;;  %v5322_v44 = vadd.f32 0.014752088, %v5321_v31  ;;  %v5466_v9 = vmul.f32 %v12214_v6, %v12214_v6  ;;  %vm5014_vm4 = vweird.f32 %v12181_v20  ;;  %v14182_v31 = vld [vmem:[#allocation41_spill] sm:$0xff] }
 0x3f4   : > { %6764 = vst [vmem:[%s8982_s18 + $0x1d0] sm:$0xff] %v6664_v37  ;;  %v5010_v12 = vmul.f32 %v8031_v11, %v12181_v20  ;;  %v5018_v21 = vand.u32 2147483647, %v12181_v20  ;;  %v5167_v15 = vmul.f32 %v5166_v56, %v12129_v59  ;;  %v1925_v25 = vadd.f32 %v12120_v8, %v1852_v7 }
 0x3f5   : > { %v5312_v41 = vmul.f32 %v5311_v18, %v12173_v19  ;;  %v5323_v14 = vmul.f32 %v5322_v44, %v12173_v19  ;;  %v12231_v58 = vmin.f32 %v5466_v9, 16.0  ;;  %v5020_v45 = vand.u32 2147483648, %v12181_v20 }
 0x3f6   : > { %v5011_v61 = vsub.f32 1.0, %v5010_v12  ;;  %v12235_v39 = vadd.f32 1.0, %v5167_v15  ;;  %v1782_v23 = vadd.f32 %v12142_v0, %v11256_v60  ;;  %v5156_v48 = vmul.f32 %v5155_v47, %v12129_v59 }
 0x3f7   : > { %v5313_v13 = vadd.f32 0.05243302, %v5312_v41  ;;  %v5324_v2 = vadd.f32 0.112945676, %v5323_v14  ;;  %v5468_v33 = vmul.f32 2.1237322e-06, %v12231_v58  ;;  %vm5015_vm5 = vweird.f32 %v8031_v11 }
 0x3f8   : > { %v5012_v26 = vmul.f32 %v8031_v11, %v5011_v61  ;;  %8032 = vrcp.f32 %v12235_v39  ;;  %v12247_v8 = vadd.f32 %v12122_v50, %v1925_v25  ;;  %vm12249_vm6 = vcmp.eq.f32.partialorder %v5018_v21, 8.507059e+37  ;;  %vm5016_vm7 = vmor %vm5014_vm4, %vm5015_vm5  ;;  %v12265_v12 = vpop.f32.mrf.mxu2  ;;  %v14183_v21 = vld [vmem:[#allocation39_spill] sm:$0xff] }
 0x3f9   : > { %v5314_v0 = vmul.f32 %v5313_v13, %v12173_v19  ;;  %v5325_v42 = vmul.f32 %v5324_v2, %v12173_v19  ;;  %v5469_v59 = vadd.f32 0.00028619796, %v5468_v33  ;;  %v5021_v32 = vor.u32 1.1754944e-38, %v5020_v45 }
 0x3fa   : > { %v5013_v63 = vadd.f32 %v8031_v11, %v5012_v26  ;;  %v5479_v1 = vmul.f32 3.8918573e-05, %v12231_v58  ;;  %v1855_v16 = vadd.f32 %v12144_v22, %v1782_v23  ;;  %2213 = vmatmul.bf16.gmra.mxu2 %v14182_v31  ;;  %v5157_v50 = vadd.f32 1.1283791, %v5156_v48  ;;  %v12267_v22 = vpop.f32.mrf.mxu3  ;;  %v14184_v48 = vld [vmem:[#allocation42_spill] sm:$0xff] }
 0x3fb   : > { %v5315_v37 = vadd.f32 0.18741608, %v5314_v0  ;;  %v5326_v47 = vadd.f32 0.4994258, %v5325_v42  ;;  %v5470_v56 = vmul.f32 %v5469_v59, %v12231_v58  ;;  %v5178_v44 = vand.u32 2147483647, %v12235_v39  ;;  %v12287_v59 = vpop.f32.mrf.mxu0 }
 0x3fc   : > { %v5017_v18 = vsel %vm5016_vm7, %v8031_v11, %v5013_v63  ;;  %v5480_v9 = vadd.f32 0.001143296, %v5479_v1  ;;  %v12263_v7 = vmul.f32 0.70710677, %v12247_v8  ;;  %2067 = vmatmul.bf16.gmra.mxu0 %v14183_v21  ;;  %v1928_v23 = vadd.f32 %v12165_v49, %v1855_v16  ;;  %v12289_v49 = vpop.f32.mrf.mxu1 }
 0x3fd   : > { %v5022_v20 = vsel %vm12249_vm6, %v5021_v32, %v5017_v18  ;;  %v5316_v15 = vmul.f32 %v5315_v37, %v12173_v19  ;;  %v5327_v41 = vmul.f32 %v5326_v47, %v12173_v19  ;;  %v5471_v11 = vadd.f32 0.0036580483, %v5470_v56  ;;  %2286 = vmatmul.bf16.gmra.mxu3 %v14184_v48  ;;  %v14185_v19 = vld [vmem:[#allocation40_spill] sm:$0xff] }
 0x3fe   : > { %v8033_v14 = vpop.eup %8032  ;;  %v5023_v25 = vmul.f32 %v5022_v20, %v4998_v35  ;;  %v5481_v61 = vmul.f32 %v5480_v9, %v12231_v58  ;;  %v5626_v45 = vmul.f32 %v12263_v7, %v12263_v7  ;;  %v5180_v2 = vand.u32 2147483648, %v12235_v39 }
 0x3ff   : > { %v5170_v13 = vmul.f32 %v8033_v14, %v12235_v39  ;;  %v5317_v33 = vadd.f32 1.1283791, %v5316_v15  ;;  %v12281_v26 = vadd.f32 1.0, %v5327_v41  ;;  %2140 = vmatmul.bf16.gmra.mxu1 %v14185_v19  ;;  %v5472_v35 = vmul.f32 %v5471_v11, %v12231_v58 }
 0x400   : > { %v7685_v29 = vclamps-f32 %v5023_v25, 1.0  ;;  %v5482_v0 = vadd.f32 0.014752088, %v5481_v61  ;;  %v12285_v42 = vmin.f32 %v5626_v45, 16.0  ;;  %v5158_v63 = vmul.f32 %v5157_v50, %v12099_v62  ;;  %v12319_v11 = vpop.f32.mrf.mxu2 }
 0x401   : > { %v5171_v32 = vsub.f32 1.0, %v5170_v13  ;;  %vm5174_vm8 = vweird.f32 %v12235_v39  ;;  %8034 = vrcp.f32 %v12281_v26  ;;  %vm5175_vm9 = vweird.f32 %v8033_v14 }
 0x402   : > { %v6568_v1 = vadd.f32 1.0, %v7685_v29  ;;  %v5473_v16 = vadd.f32 0.05243302, %v5472_v35  ;;  %v12295_v31 = vadd.f32 %v12167_v46, %v1928_v23  ;;  %v5483_v47 = vmul.f32 %v5482_v0, %v12231_v58  ;;  %vm5176_vm11 = vmor %vm5174_vm8, %vm5175_vm9  ;;  %v12321_v25 = vpop.f32.mrf.mxu3 }
 0x403   : > { %v5172_v37 = vmul.f32 %v8033_v14, %v5171_v32  ;;  %v5628_v56 = vmul.f32 2.1237322e-06, %v12285_v42  ;;  %v5639_v18 = vmul.f32 3.8918573e-05, %v12285_v42  ;;  %vm12301_vm10 = vcmp.eq.f32.partialorder %v5178_v44, 8.507059e+37 }
 0x404   : > { %v6668_v62 = vmul.f32 %v6568_v1, %v12205_v57  ;;  %v5181_v9 = vor.u32 1.1754944e-38, %v5180_v2  ;;  %v12306_v21 = vmul.f32 %v5317_v33, %v12156_v27  ;;  %v5484_v46 = vadd.f32 0.112945676, %v5483_v47  ;;  %v12336_v47 = vpop.f32.mrf.mxu1 }
 0x405   : > { %v5173_v20 = vadd.f32 %v8033_v14, %v5172_v37  ;;  %v5629_v15 = vadd.f32 0.00028619796, %v5628_v56  ;;  %v5640_v41 = vadd.f32 0.001143296, %v5639_v18  ;;  %vm5334_vm12 = vweird.f32 %v12281_v26  ;;  %v12334_v37 = vpop.f32.mrf.mxu0  ;;  %v14188_v56 = vld [vmem:[#allocation44_spill] sm:$0xff] }
 0x406   : > { %6768 = vst [vmem:[%s8982_s18 + $0x1f0] sm:$0xff] %v6668_v62  ;;  %v5474_v57 = vmul.f32 %v5473_v16, %v12231_v58  ;;  %v12315_v44 = vmul.f32 0.70710677, %v12295_v31  ;;  %v1784_v27 = vadd.f32 %v12187_v4, %v11256_v60  ;;  %v5485_v23 = vmul.f32 %v5484_v46, %v12231_v58 }
 0x407   : > { %v8035_v61 = vpop.eup %8034  ;;  %v5177_v45 = vsel %vm5176_vm11, %v8033_v14, %v5173_v20  ;;  %v5630_v39 = vmul.f32 %v5629_v15, %v12285_v42  ;;  %v5641_v48 = vmul.f32 %v5640_v41, %v12285_v42  ;;  %v5338_v33 = vand.u32 2147483647, %v12281_v26 }
 0x408   : > { %v5182_v13 = vsel %vm12301_vm10, %v5181_v9, %v5177_v45  ;;  %v5330_v2 = vmul.f32 %v8035_v61, %v12281_v26  ;;  %v5340_v4 = vand.u32 2147483648, %v12281_v26  ;;  %v5486_v29 = vadd.f32 0.4994258, %v5485_v23 }
 0x409   : > { %v5183_v19 = vmul.f32 %v5182_v13, %v5158_v63  ;;  %v5631_v35 = vadd.f32 0.0036580483, %v5630_v39  ;;  %v5642_v0 = vadd.f32 0.014752088, %v5641_v48  ;;  %v5475_v32 = vadd.f32 0.18741608, %v5474_v57 }
 0x40a   : > { %v5331_v14 = vsub.f32 1.0, %v5330_v2  ;;  %v5786_v1 = vmul.f32 %v12315_v44, %v12315_v44  ;;  %v1857_v16 = vadd.f32 %v12189_v55, %v1784_v27  ;;  %2218 = vmatmul.bf16.gmra.mxu2 %v14188_v56  ;;  %v5487_v62 = vmul.f32 %v5486_v29, %v12231_v58  ;;  %v14189_v55 = vld [vmem:[#allocation43_spill] sm:$0xff] }
 0x40b   : > { %v7689_v18 = vclamps-f32 %v5183_v19, 1.0  ;;  %v5632_v63 = vmul.f32 %v5631_v35, %v12285_v42  ;;  %v5643_v50 = vmul.f32 %v5642_v0, %v12285_v42  ;;  %vm5335_vm13 = vweird.f32 %v8035_v61  ;;  %v12366_v35 = vpop.f32.mrf.mxu2 }
 0x40c   : > { %v5332_v9 = vmul.f32 %v8035_v61, %v5331_v14  ;;  %v12342_v20 = vmin.f32 %v5786_v1, 16.0  ;;  %v1930_v46 = vadd.f32 %v12217_v52, %v1857_v16  ;;  %2072 = vmatmul.bf16.gmra.mxu0 %v14189_v55  ;;  %v12346_v41 = vadd.f32 1.0, %v5487_v62  ;;  %vm5336_vm15 = vmor %vm5334_vm12, %vm5335_vm13  ;;  %v1866_v1 = vpop.f32.mrf.mxu1 }
 0x40d   : > { %v6572_v15 = vadd.f32 1.0, %v7689_v18  ;;  %v5633_v57 = vadd.f32 0.05243302, %v5632_v63  ;;  %v5644_v27 = vadd.f32 0.112945676, %v5643_v50  ;;  %vm12348_vm14 = vcmp.eq.f32.partialorder %v5338_v33, 8.507059e+37  ;;  %2291 = vmatmul.bf16.gmra.mxu3 %v14047_v28 }
 0x40e   : > { %v5333_v45 = vadd.f32 %v8035_v61, %v5332_v9  ;;  %v5788_v39 = vmul.f32 2.1237322e-06, %v12342_v20  ;;  %v5799_v48 = vmul.f32 3.8918573e-05, %v12342_v20  ;;  %v5341_v13 = vor.u32 1.1754944e-38, %v5340_v4 }
 0x40f   : > { %v6672_v52 = vmul.f32 %v6572_v15, %v12209_v30  ;;  %8036 = vrcp.f32 %v12346_v41  ;;  %v12360_v2 = vadd.f32 %v12219_v17, %v1930_v46  ;;  %2145 = vmatmul.bf16.gmra.mxu1 %v14045_v10  ;;  %v5476_v19 = vmul.f32 %v5475_v32, %v12231_v58  ;;  %v12368_v30 = vpop.f32.mrf.mxu3  ;;  %v1793_v32 = vpop.f32.mrf.mxu0 }
 0x410   : > { %v5337_v33 = vsel %vm5336_vm15, %v8035_v61, %v5333_v45  ;;  %v5634_v29 = vmul.f32 %v5633_v57, %v12285_v42  ;;  %v5645_v28 = vmul.f32 %v5644_v27, %v12285_v42  ;;  %v2376_v26 = vmul.f32 0.5, %v12133_v54 }
 0x411   : > { %6772 = vst [vmem:[%s8982_s18 + $0x210] sm:$0xff] %v6672_v52  ;;  %v5342_v17 = vsel %vm12348_vm14, %v5341_v13, %v5337_v33  ;;  %v5789_v4 = vadd.f32 0.00028619796, %v5788_v39  ;;  %v5800_v0 = vadd.f32 0.001143296, %v5799_v48  ;;  %v12376_v58 = vmul.f32 0.5, %v12198_v36 }
 0x412   : > { %v5343_v10 = vmul.f32 %v5342_v17, %v12306_v21  ;;  %v5635_v61 = vadd.f32 0.18741608, %v5634_v29  ;;  %v5646_v14 = vadd.f32 0.4994258, %v5645_v28  ;;  %v12379_v16 = vmul.f32 0.5, %v12247_v8 }
 0x413   : > { %v5790_v56 = vmul.f32 %v5789_v4, %v12342_v20  ;;  %v5801_v54 = vmul.f32 %v5800_v0, %v12342_v20  ;;  %v12384_v18 = vmul.f32 0.70710677, %v12360_v2  ;;  %v5477_v63 = vadd.f32 1.1283791, %v5476_v19  ;;  %v1939_v19 = vpop.f32.mrf.mxu2 }
 0x414   : > { %v7693_v62 = vclamps-f32 %v5343_v10, 1.0  ;;  %v5647_v21 = vmul.f32 %v5646_v14, %v12285_v42  ;;  %v1787_v36 = vadd.f32 %v12239_v40, %v11256_v60  ;;  %v5636_v9 = vmul.f32 %v5635_v61, %v12285_v42 }
 0x415   : > { %v8037_v50 = vpop.eup %8036  ;;  %v5791_v46 = vadd.f32 0.0036580483, %v5790_v56  ;;  %v5802_v8 = vadd.f32 0.014752088, %v5801_v54  ;;  %v5946_v55 = vmul.f32 %v12384_v18, %v12384_v18  ;;  %v5498_v27 = vand.u32 2147483647, %v12346_v41 }
 0x416   : > { %v6576_v15 = vadd.f32 1.0, %v7693_v62  ;;  %v5490_v57 = vmul.f32 %v8037_v50, %v12346_v41  ;;  %v12395_v45 = vmul.f32 0.5, %v12295_v31  ;;  %v12397_v23 = vadd.f32 1.0, %v5647_v21 }
 0x417   : > { %v5792_v40 = vmul.f32 %v5791_v46, %v12342_v20  ;;  %v5803_v42 = vmul.f32 %v5802_v8, %v12342_v20  ;;  %v12401_v39 = vmin.f32 %v5946_v55, 16.0  ;;  %v5478_v52 = vmul.f32 %v5477_v63, %v12214_v6  ;;  %v2012_v29 = vpop.f32.mrf.mxu3 }
 0x418   : > { %v6676_v48 = vmul.f32 %v6576_v15, %v2376_v26  ;;  %v5491_v13 = vsub.f32 1.0, %v5490_v57  ;;  %v1860_v33 = vadd.f32 %v12241_v38, %v1787_v36  ;;  %vm5495_vm0 = vweird.f32 %v8037_v50 }
 0x419   : > { %v5500_v31 = vand.u32 2147483648, %v12346_v41  ;;  %v5637_v28 = vadd.f32 1.1283791, %v5636_v9  ;;  %8038 = vrcp.f32 %v12397_v23  ;;  %v5793_v4 = vadd.f32 0.05243302, %v5792_v40 }
 0x41a   : > { %6776 = vst [vmem:[%s8982_s18 + $0x230] sm:$0xff] %v6676_v48  ;;  %v5492_v17 = vmul.f32 %v8037_v50, %v5491_v13  ;;  %v5804_v0 = vadd.f32 0.112945676, %v5803_v42  ;;  %v1933_v10 = vadd.f32 %v12265_v12, %v1860_v33  ;;  %2223 = vmatmul.bf16.gmra.mxu2 %v14050_v43  ;;  %vm5494_vm1 = vweird.f32 %v12346_v41 }
 0x41b   : > { %vm12411_vm2 = vcmp.eq.f32.partialorder %v5498_v27, 8.507059e+37  ;;  %v5948_v38 = vmul.f32 2.1237322e-06, %v12401_v39  ;;  %v5959_v26 = vmul.f32 3.8918573e-05, %v12401_v39  ;;  %v1789_v12 = vadd.f32 %v12287_v59, %v11256_v60  ;;  %vm5496_vm3 = vmor %vm5494_vm1, %vm5495_vm0  ;;  %v12465_v6 = vpop.f32.mrf.mxu2 }
 0x41c   : > { %v5493_v61 = vadd.f32 %v8037_v50, %v5492_v17  ;;  %v5805_v14 = vmul.f32 %v5804_v0, %v12342_v20  ;;  %v12419_v32 = vadd.f32 %v12267_v22, %v1933_v10  ;;  %2077 = vmatmul.bf16.gmra.mxu0 %v14042_v5  ;;  %v5501_v43 = vor.u32 1.1754944e-38, %v5500_v31 }
 0x41d   : > { %v12426_v41 = vmul.f32 0.5, %v12360_v2  ;;  %v5949_v1 = vadd.f32 0.00028619796, %v5948_v38  ;;  %v5960_v56 = vadd.f32 0.001143296, %v5959_v26  ;;  %v5638_v62 = vmul.f32 %v5637_v28, %v12263_v7  ;;  %2296 = vmatmul.bf16.gmra.mxu3 %v14121_v51  ;;  %v12462_v28 = vpop.f32.mrf.mxu1 }
 0x41e   : > { %v5497_v54 = vsel %vm5496_vm3, %v8037_v50, %v5493_v61  ;;  %v5794_v63 = vmul.f32 %v5793_v4, %v12342_v20  ;;  %v5806_v22 = vadd.f32 0.4994258, %v5805_v14  ;;  %v12436_v2 = vmul.f32 0.70710677, %v12419_v32 }
 0x41f   : > { %v8039_v21 = vpop.eup %8038  ;;  %v5502_v5 = vsel %vm12411_vm2, %v5501_v43, %v5497_v54  ;;  %v5950_v59 = vmul.f32 %v5949_v1, %v12401_v39  ;;  %v5961_v36 = vmul.f32 %v5960_v56, %v12401_v39  ;;  %2150 = vmatmul.bf16.gmra.mxu1 %v14122_v34  ;;  %v5660_v9 = vand.u32 2147483648, %v12397_v23  ;;  %v12446_v34 = vpop.f32.mrf.mxu0 }
 0x420   : > { %v5503_v50 = vmul.f32 %v5502_v5, %v5478_v52  ;;  %v5650_v7 = vmul.f32 %v8039_v21, %v12397_v23  ;;  %v1862_v51 = vadd.f32 %v12289_v49, %v1789_v12  ;;  %v5807_v46 = vmul.f32 %v5806_v22, %v12342_v20  ;;  %v12467_v38 = vpop.f32.mrf.mxu3 }
 0x421   : > { %v5951_v8 = vadd.f32 0.0036580483, %v5950_v59  ;;  %v5962_v55 = vadd.f32 0.014752088, %v5961_v36  ;;  %v6106_v15 = vmul.f32 %v12436_v2, %v12436_v2  ;;  %v5795_v40 = vadd.f32 0.18741608, %v5794_v63 }
 0x422   : > { %v7697_v57 = vclamps-f32 %v5503_v50, 1.0  ;;  %v5651_v27 = vsub.f32 1.0, %v5650_v7  ;;  %v1935_v42 = vadd.f32 %v12319_v11, %v1862_v51  ;;  %v12448_v48 = vadd.f32 1.0, %v5807_v46 }
 0x423   : > { %v5952_v52 = vmul.f32 %v5951_v8, %v12401_v39  ;;  %v5963_v49 = vmul.f32 %v5962_v55, %v12401_v39  ;;  %v12452_v13 = vmin.f32 %v6106_v15, 16.0  ;;  %vm5655_vm4 = vweird.f32 %v8039_v21 }
 0x424   : > { %v6580_v33 = vadd.f32 1.0, %v7697_v57  ;;  %v5652_v19 = vmul.f32 %v8039_v21, %v5651_v27  ;;  %v5658_v29 = vand.u32 2147483647, %v12397_v23  ;;  %vm5654_vm5 = vweird.f32 %v12397_v23 }
 0x425   : > { %8040 = vrcp.f32 %v12448_v48  ;;  %v12458_v11 = vadd.f32 %v12321_v25, %v1935_v42  ;;  %v1792_v31 = vadd.f32 %v12334_v37, %v11256_v60  ;;  %v5953_v0 = vadd.f32 0.05243302, %v5952_v52  ;;  %vm5656_vm6 = vmor %vm5654_vm5, %vm5655_vm4  ;;  %v12494_v42 = vpop.f32.mrf.mxu2 }
 0x426   : > { %v6680_v17 = vmul.f32 %v6580_v33, %v12376_v58  ;;  %v5653_v4 = vadd.f32 %v8039_v21, %v5652_v19  ;;  %v5964_v10 = vadd.f32 0.112945676, %v5963_v49  ;;  %v5661_v23 = vor.u32 1.1754944e-38, %v5660_v9  ;;  %v12505_v19 = vpop.f32.mrf.mxu1 }
 0x427   : > { %v5796_v26 = vmul.f32 %v5795_v40, %v12342_v20  ;;  %v6108_v25 = vmul.f32 2.1237322e-06, %v12452_v13  ;;  %v6119_v61 = vmul.f32 3.8918573e-05, %v12452_v13  ;;  %vm5659_vm7 = vcmp.eq.f32.partialorder %v5658_v29, 8.507059e+37  ;;  %v12486_v51 = vpop.f32.mrf.mxu0 }
 0x428   : > { %6780 = vst [vmem:[%s8982_s18 + $0x250] sm:$0xff] %v6680_v17  ;;  %v5657_v60 = vsel %vm5656_vm6, %v8039_v21, %v5653_v4  ;;  %v5954_v37 = vmul.f32 %v5953_v0, %v12401_v39  ;;  %v5965_v58 = vmul.f32 %v5964_v10, %v12401_v39  ;;  %v12476_v1 = vmul.f32 0.70710677, %v12458_v11  ;;  %v12496_v52 = vpop.f32.mrf.mxu3 }
 0x429   : > { %v5662_v14 = vsel %vm5659_vm7, %v5661_v23, %v5657_v60  ;;  %v6109_v12 = vadd.f32 0.00028619796, %v6108_v25  ;;  %v6120_v43 = vadd.f32 0.001143296, %v6119_v61  ;;  %v1865_v63 = vadd.f32 %v12336_v47, %v1792_v31  ;;  %v8102_v61 = vld [vmem:[%s8673_s27] sm:$0xf] }
 0x42a   : > { %v5663_v56 = vmul.f32 %v5662_v14, %v5638_v62  ;;  %v5955_v54 = vadd.f32 0.18741608, %v5954_v37  ;;  %v5966_v20 = vadd.f32 0.4994258, %v5965_v58  ;;  %v5797_v5 = vadd.f32 1.1283791, %v5796_v26  ;;  %2228 = vmatmul.bf16.gmra.mxu2 %v9140_v3 }
 0x42b   : > { %v8041_v22 = vpop.eup %8040  ;;  %v6110_v21 = vmul.f32 %v6109_v12, %v12452_v13  ;;  %v6121_v59 = vmul.f32 %v6120_v43, %v12452_v13  ;;  %v6266_v36 = vmul.f32 %v12476_v1, %v12476_v1  ;;  %v5818_v9 = vand.u32 2147483647, %v12448_v48 }
 0x42c   : > { %v7701_v50 = vclamps-f32 %v5663_v56, 1.0  ;;  %v5810_v7 = vmul.f32 %v8041_v22, %v12448_v48  ;;  %v5956_v62 = vmul.f32 %v5955_v54, %v12401_v39  ;;  %2082 = vmatmul.bf16.gmra.mxu0 %v14123_v24  ;;  %v5967_v47 = vmul.f32 %v5966_v20, %v12401_v39 }
 0x42d   : > { %v6111_v46 = vadd.f32 0.0036580483, %v6110_v21  ;;  %v6122_v8 = vadd.f32 0.014752088, %v6121_v59  ;;  %v12490_v55 = vmin.f32 %v6266_v36, 16.0  ;;  %v5820_v27 = vand.u32 2147483648, %v12448_v48  ;;  %2301 = vmatmul.bf16.gmra.mxu3 %v14056_v53 }
 0x42e   : > { %v6584_v15 = vadd.f32 1.0, %v7701_v50  ;;  %v5811_v57 = vsub.f32 1.0, %v5810_v7  ;;  %v1938_v40 = vadd.f32 %v12366_v35, %v1865_v63  ;;  %v12500_v24 = vadd.f32 1.0, %v5967_v47  ;;  %v14194_v35 = vld [vmem:[#allocation52_spill] sm:$0xff] }
 0x42f   : > { %v6112_v39 = vmul.f32 %v6111_v46, %v12452_v13  ;;  %v6123_v49 = vmul.f32 %v6122_v8, %v12452_v13  ;;  %v6268_v33 = vmul.f32 2.1237322e-06, %v12490_v55  ;;  %2155 = vmatmul.bf16.gmra.mxu1 %v14194_v35  ;;  %vm5815_vm8 = vweird.f32 %v8041_v22 }
 0x430   : > { %v6684_v29 = vmul.f32 %v6584_v15, %v12379_v16  ;;  %v5812_v31 = vmul.f32 %v8041_v22, %v5811_v57  ;;  %v6279_v3 = vmul.f32 3.8918573e-05, %v12490_v55  ;;  %v5798_v53 = vmul.f32 %v5797_v5, %v12315_v44 }
 0x431   : > { %vm5814_vm9 = vweird.f32 %v12448_v48  ;;  %v5957_v17 = vadd.f32 1.1283791, %v5956_v62  ;;  %8042 = vrcp.f32 %v12500_v24  ;;  %v6113_v0 = vadd.f32 0.05243302, %v6112_v39 }
 0x432   : > { %6784 = vst [vmem:[%s8982_s18 + $0x270] sm:$0xff] %v6684_v29  ;;  %v5813_v4 = vadd.f32 %v8041_v22, %v5812_v31  ;;  %v6124_v10 = vadd.f32 0.112945676, %v6123_v49  ;;  %v12515_v23 = vadd.f32 %v12368_v30, %v1938_v40  ;;  %vm5816_vm10 = vmor %vm5814_vm9, %vm5815_vm8  ;;  %v5821_v16 = vor.u32 1.1754944e-38, %v5820_v27 }
 0x433   : > { %v6269_v26 = vadd.f32 0.00028619796, %v6268_v33  ;;  %v6280_v25 = vadd.f32 0.001143296, %v6279_v3  ;;  %v12518_v60 = vperm.slane %v8102_v61, 3  ;;  %vm5819_vm11 = vcmp.eq.f32.partialorder %v5818_v9, 8.507059e+37 }
 0x434   : > { %v5817_v44 = vsel %vm5816_vm10, %v8041_v22, %v5813_v4  ;;  %v6114_v48 = vmul.f32 %v6113_v0, %v12452_v13  ;;  %v6125_v37 = vmul.f32 %v6124_v10, %v12452_v13  ;;  %v12525_v30 = vmul.f32 0.70710677, %v12515_v23 }
 0x435   : > { %v5822_v58 = vsel %vm5819_vm11, %v5821_v16, %v5817_v44  ;;  %v6270_v14 = vmul.f32 %v6269_v26, %v12490_v55  ;;  %v6281_v12 = vmul.f32 %v6280_v25, %v12490_v55  ;;  %v5958_v56 = vmul.f32 %v5957_v17, %v12384_v18 }
 0x436   : > { %v5823_v43 = vmul.f32 %v5822_v58, %v5798_v53  ;;  %v12529_v54 = vmul.f32 0.5, %v12419_v32  ;;  %v6126_v20 = vadd.f32 0.4994258, %v6125_v37  ;;  %v6426_v21 = vmul.f32 %v12525_v30, %v12525_v30 }
 0x437   : > { %v8043_v63 = vpop.eup %8042  ;;  %v6271_v22 = vadd.f32 0.0036580483, %v6270_v14  ;;  %v6282_v5 = vadd.f32 0.014752088, %v6281_v12  ;;  %v2024_v59 = vadd.f32 %v12446_v34, %v12518_v60  ;;  %v5978_v7 = vand.u32 2147483647, %v12500_v24 }
 0x438   : > { %v7705_v36 = vclamps-f32 %v5823_v43, 1.0  ;;  %v5970_v50 = vmul.f32 %v8043_v63, %v12500_v24  ;;  %v6115_v9 = vadd.f32 0.18741608, %v6114_v48  ;;  %v6127_v18 = vmul.f32 %v6126_v20, %v12452_v13 }
 0x439   : > { %v6272_v32 = vmul.f32 %v6271_v22, %v12490_v55  ;;  %v6283_v62 = vmul.f32 %v6282_v5, %v12490_v55  ;;  %v12540_v47 = vmin.f32 %v6426_v21, 16.0  ;;  %v5980_v15 = vand.u32 2147483648, %v12500_v24 }
 0x43a   : > { %v6588_v46 = vadd.f32 1.0, %v7705_v36  ;;  %v5971_v8 = vsub.f32 1.0, %v5970_v50  ;;  %v2026_v34 = vadd.f32 %v12486_v51, %v12518_v60  ;;  %v12545_v57 = vadd.f32 1.0, %v6127_v18 }
 0x43b   : > { %v6273_v27 = vadd.f32 0.05243302, %v6272_v32  ;;  %v6284_v40 = vadd.f32 0.112945676, %v6283_v62  ;;  %v2097_v39 = vadd.f32 %v12462_v28, %v2024_v59  ;;  %vm5975_vm12 = vweird.f32 %v8043_v63 }
 0x43c   : > { %v6688_v49 = vmul.f32 %v6588_v46, %v12395_v45  ;;  %v5972_v33 = vmul.f32 %v8043_v63, %v5971_v8  ;;  %v6428_v35 = vmul.f32 2.1237322e-06, %v12540_v47  ;;  %vm5974_vm13 = vweird.f32 %v12500_v24  ;;  %v2028_v46 = vpop.f32.mrf.mxu0 }
 0x43d   : > { %vm12551_vm14 = vcmp.eq.f32.partialorder %v5978_v7, 8.507059e+37  ;;  %v6116_v51 = vmul.f32 %v6115_v9, %v12452_v13  ;;  %8044 = vrcp.f32 %v12545_v57  ;;  %v6274_v28 = vmul.f32 %v6273_v27, %v12490_v55  ;;  %vm5976_vm15 = vmor %vm5974_vm13, %vm5975_vm12  ;;  %v2247_v7 = vpop.f32.mrf.mxu3 }
 0x43e   : > { %6788 = vst [vmem:[%s8982_s18 + $0x290] sm:$0xff] %v6688_v49  ;;  %v5973_v31 = vadd.f32 %v8043_v63, %v5972_v33  ;;  %v6285_v45 = vmul.f32 %v6284_v40, %v12490_v55  ;;  %v6429_v3 = vadd.f32 0.00028619796, %v6428_v35  ;;  %v5981_v53 = vor.u32 1.1754944e-38, %v5980_v15 }
 0x43f   : > { %v6439_v17 = vmul.f32 3.8918573e-05, %v12540_v47  ;;  %v2170_v24 = vadd.f32 %v12465_v6, %v2097_v39  ;;  %v2099_v4 = vadd.f32 %v12505_v19, %v2026_v34  ;;  %v6275_v10 = vadd.f32 0.18741608, %v6274_v28 }
 0x440   : > { %v5977_v0 = vsel %vm5976_vm15, %v8043_v63, %v5973_v31  ;;  %v6286_v13 = vadd.f32 0.4994258, %v6285_v45  ;;  %v6430_v16 = vmul.f32 %v6429_v3, %v12540_v47  ;;  %v6117_v37 = vadd.f32 1.1283791, %v6116_v51 }
 0x441   : > { %v5982_v26 = vsel %vm12551_vm14, %v5981_v53, %v5977_v0  ;;  %v6440_v25 = vadd.f32 0.001143296, %v6439_v17  ;;  %v12567_v61 = vadd.f32 %v12467_v38, %v2170_v24  ;;  %v2172_v44 = vadd.f32 %v12494_v42, %v2099_v4  ;;  %v2101_v24 = vpop.f32.mrf.mxu1 }
 0x442   : > { %v5983_v48 = vmul.f32 %v5982_v26, %v5958_v56  ;;  %v6287_v6 = vmul.f32 %v6286_v13, %v12490_v55  ;;  %v6431_v58 = vadd.f32 0.0036580483, %v6430_v16  ;;  %v6138_v14 = vand.u32 2147483647, %v12545_v57  ;;  %v2174_v16 = vpop.f32.mrf.mxu2 }
 0x443   : > { %v8045_v19 = vpop.eup %8044  ;;  %v6276_v12 = vmul.f32 %v6275_v10, %v12490_v55  ;;  %v6441_v43 = vmul.f32 %v6440_v25, %v12540_v47  ;;  %v12575_v20 = vmul.f32 0.70710677, %v12567_v61  ;;  %v6140_v42 = vand.u32 2147483648, %v12545_v57 }
 0x444   : > { %v7709_v63 = vclamps-f32 %v5983_v48, 1.0  ;;  %v6130_v38 = vmul.f32 %v8045_v19, %v12545_v57  ;;  %v12580_v56 = vadd.f32 %v12496_v52, %v2172_v44  ;;  %v12582_v22 = vadd.f32 1.0, %v6287_v6 }
 0x445   : > { %v6432_v5 = vmul.f32 %v6431_v58, %v12540_v47  ;;  %v6442_v21 = vadd.f32 0.014752088, %v6441_v43  ;;  %v2626_v55 = vmul.f32 %v12575_v20, %v12575_v20  ;;  %v6118_v36 = vmul.f32 %v6117_v37, %v12436_v2 }
 0x446   : > { %v6592_v59 = vadd.f32 1.0, %v7709_v63  ;;  %v6131_v50 = vsub.f32 1.0, %v6130_v38  ;;  %vm6134_vm0 = vweird.f32 %v12545_v57  ;;  %vm6135_vm1 = vweird.f32 %v8045_v19 }
 0x447   : > { %vm12589_vm2 = vcmp.eq.f32.partialorder %v6138_v14, 8.507059e+37  ;;  %v6277_v52 = vadd.f32 1.1283791, %v6276_v12  ;;  %8046 = vrcp.f32 %v12582_v22  ;;  %v6433_v32 = vadd.f32 0.05243302, %v6432_v5  ;;  %vm6136_vm3 = vmor %vm6134_vm0, %vm6135_vm1 }
 0x448   : > { %v6692_v9 = vmul.f32 %v6592_v59, %v12426_v41  ;;  %v6132_v18 = vmul.f32 %v8045_v19, %v6131_v50  ;;  %v6443_v62 = vmul.f32 %v6442_v21, %v12540_v47  ;;  %v6141_v2 = vor.u32 1.1754944e-38, %v6140_v42  ;;  %v2030_v21 = vpop.f32.mrf.mxu0 }
 0x449   : > { %v6298_v8 = vand.u32 2147483647, %v12582_v22  ;;  %v12597_v15 = vmin.f32 %v2626_v55, 16.0  ;;  %v12600_v34 = vmul.f32 0.70710677, %v12580_v56  ;;  %v6434_v40 = vmul.f32 %v6433_v32, %v12540_v47 }
 0x44a   : > { %6792 = vst [vmem:[%s8982_s18 + $0x2b0] sm:$0xff] %v6692_v9  ;;  %v6133_v27 = vadd.f32 %v8045_v19, %v6132_v18  ;;  %v6444_v39 = vadd.f32 0.112945676, %v6443_v62  ;;  %v2029_v41 = vadd.f32 %v2028_v46, %v12518_v60  ;;  %v6278_v49 = vmul.f32 %v6277_v52, %v12476_v1 }
 0x44b   : > { %v2628_v33 = vmul.f32 2.1237322e-06, %v12597_v15  ;;  %v2639_v35 = vmul.f32 3.8918573e-05, %v12597_v15  ;;  %v2786_v29 = vmul.f32 %v12600_v34, %v12600_v34  ;;  %vm6294_vm4 = vweird.f32 %v12582_v22 }
 0x44c   : > { %v6137_v51 = vsel %vm6136_vm3, %v8045_v19, %v6133_v27  ;;  %v6300_v31 = vand.u32 2147483648, %v12582_v22  ;;  %v6435_v28 = vadd.f32 0.18741608, %v6434_v40  ;;  %v6445_v45 = vmul.f32 %v6444_v39, %v12540_v47 }
 0x44d   : > { %v8047_v3 = vpop.eup %8046  ;;  %v6142_v57 = vsel %vm12589_vm2, %v6141_v2, %v6137_v51  ;;  %v2629_v1 = vadd.f32 0.00028619796, %v2628_v33  ;;  %v2640_v53 = vadd.f32 0.001143296, %v2639_v35  ;;  %v12618_v17 = vmin.f32 %v2786_v29, 16.0 }
 0x44e   : > { %v6143_v4 = vmul.f32 %v6142_v57, %v6118_v36  ;;  %v6290_v0 = vmul.f32 %v8047_v3, %v12582_v22  ;;  %vm12621_vm5 = vcmp.eq.f32.partialorder %v6298_v8, 8.507059e+37  ;;  %v2102_v13 = vadd.f32 %v2101_v24, %v2029_v41 }
 0x44f   : > { %v6446_v26 = vadd.f32 0.4994258, %v6445_v45  ;;  %v2630_v25 = vmul.f32 %v2629_v1, %v12597_v15  ;;  %v2641_v44 = vmul.f32 %v2640_v53, %v12597_v15  ;;  %v2788_v48 = vmul.f32 2.1237322e-06, %v12618_v17 }
 0x450   : > { %v7713_v37 = vclamps-f32 %v6143_v4, 1.0  ;;  %v6291_v6 = vsub.f32 1.0, %v6290_v0  ;;  %v6436_v58 = vmul.f32 %v6435_v28, %v12540_v47  ;;  %v2799_v19 = vmul.f32 3.8918573e-05, %v12618_v17  ;;  %v2176_v28 = vpop.f32.mrf.mxu2 }
 0x451   : > { %v6447_v14 = vmul.f32 %v6446_v26, %v12540_v47  ;;  %v2631_v12 = vadd.f32 0.0036580483, %v2630_v25  ;;  %v2642_v43 = vadd.f32 0.014752088, %v2641_v44  ;;  %v2789_v63 = vadd.f32 0.00028619796, %v2788_v48 }
 0x452   : > { %v6596_v38 = vadd.f32 1.0, %v7713_v37  ;;  %v6292_v42 = vmul.f32 %v8047_v3, %v6291_v6  ;;  %vm6295_vm6 = vweird.f32 %v8047_v3  ;;  %v2800_v5 = vadd.f32 0.001143296, %v2799_v19  ;;  %v2249_v6 = vpop.f32.mrf.mxu3 }
 0x453   : > { %v12631_v55 = vadd.f32 1.0, %v6447_v14  ;;  %v2632_v59 = vmul.f32 %v2631_v12, %v12597_v15  ;;  %v2643_v36 = vmul.f32 %v2642_v43, %v12597_v15  ;;  %v2790_v50 = vmul.f32 %v2789_v63, %v12618_v17  ;;  %vm6296_vm7 = vmor %vm6294_vm4, %vm6295_vm6  ;;  %v2033_v43 = vpop.f32.mrf.mxu0 }
 0x454   : > { %v6696_v47 = vmul.f32 %v6596_v38, %v12529_v54  ;;  %v6293_v52 = vadd.f32 %v8047_v3, %v6292_v42  ;;  %v2801_v9 = vmul.f32 %v2800_v5, %v12618_v17  ;;  %v2175_v18 = vadd.f32 %v2174_v16, %v2102_v13 }
 0x455   : > { %v6301_v32 = vor.u32 1.1754944e-38, %v6300_v31  ;;  %v6437_v62 = vadd.f32 1.1283791, %v6436_v58  ;;  %8048 = vrcp.f32 %v12631_v55  ;;  %v2031_v46 = vadd.f32 %v2030_v21, %v12518_v60  ;;  %v2103_v31 = vpop.f32.mrf.mxu1 }
 0x456   : > { %6796 = vst [vmem:[%s8982_s18 + $0x2d0] sm:$0xff] %v6696_v47  ;;  %v6297_v2 = vsel %vm6296_vm7, %v8047_v3, %v6293_v52  ;;  %v2633_v8 = vadd.f32 0.05243302, %v2632_v59  ;;  %v2644_v27 = vadd.f32 0.112945676, %v2643_v36  ;;  %v12643_v40 = vadd.f32 %v2247_v7, %v2175_v18 }
 0x457   : > { %v2400_v54 = vmul.f32 0.5, %v12458_v11  ;;  %v6302_v39 = vsel %vm12621_vm5, %v6301_v32, %v6297_v2  ;;  %v12649_v22 = vmul.f32 0.5, %v12515_v23  ;;  %v2791_v41 = vadd.f32 0.0036580483, %v2790_v50 }
 0x458   : > { %v6303_v33 = vmul.f32 %v6302_v39, %v6278_v49  ;;  %v2634_v35 = vmul.f32 %v2633_v8, %v12597_v15  ;;  %v2645_v29 = vmul.f32 %v2644_v27, %v12597_v15  ;;  %v2802_v51 = vadd.f32 0.014752088, %v2801_v9 }
 0x459   : > { %v6438_v45 = vmul.f32 %v6437_v62, %v12525_v30  ;;  %v2792_v3 = vmul.f32 %v2791_v41, %v12618_v17  ;;  %v12656_v11 = vmul.f32 0.70710677, %v12643_v40  ;;  %v2104_v57 = vadd.f32 %v2103_v31, %v2031_v46 }
 0x45a   : > { %v7717_v1 = vclamps-f32 %v6303_v33, 1.0  ;;  %v2635_v23 = vadd.f32 0.18741608, %v2634_v35  ;;  %v2646_v53 = vadd.f32 0.4994258, %v2645_v29  ;;  %v2803_v49 = vmul.f32 %v2802_v51, %v12618_v17  ;;  %v2179_v51 = vpop.f32.mrf.mxu2 }
 0x45b   : > { %v8049_v24 = vpop.eup %8048  ;;  %vm6454_vm8 = vweird.f32 %v12631_v55  ;;  %v2793_v4 = vadd.f32 0.05243302, %v2792_v3  ;;  %v2946_v0 = vmul.f32 %v12656_v11, %v12656_v11  ;;  %v2177_v10 = vadd.f32 %v2176_v28, %v2104_v57 }
 0x45c   : > { %v6600_v30 = vadd.f32 1.0, %v7717_v1  ;;  %v6450_v13 = vmul.f32 %v8049_v24, %v12631_v55  ;;  %v6458_v16 = vand.u32 2147483647, %v12631_v55  ;;  %v2636_v26 = vmul.f32 %v2635_v23, %v12597_v15 }
 0x45d   : > { %v2647_v25 = vmul.f32 %v2646_v53, %v12597_v15  ;;  %v2794_v44 = vmul.f32 %v2793_v4, %v12618_v17  ;;  %v2804_v48 = vadd.f32 0.112945676, %v2803_v49  ;;  %v12667_v37 = vmin.f32 %v2946_v0, 16.0  ;;  %v2106_v41 = vpop.f32.mrf.mxu1 }
 0x45e   : > { %v6700_v58 = vmul.f32 %v6600_v30, %v2400_v54  ;;  %v6451_v19 = vsub.f32 1.0, %v6450_v13  ;;  %v6460_v14 = vand.u32 2147483648, %v12631_v55  ;;  %v12670_v12 = vadd.f32 %v2249_v6, %v2177_v10 }
 0x45f   : > { %v12672_v63 = vadd.f32 1.0, %v2647_v25  ;;  %v2795_v38 = vadd.f32 0.18741608, %v2794_v44  ;;  %v2805_v42 = vmul.f32 %v2804_v48, %v12618_v17  ;;  %v2948_v15 = vmul.f32 2.1237322e-06, %v12667_v37  ;;  %v2252_v25 = vpop.f32.mrf.mxu3 }
 0x460   : > { %6800 = vst [vmem:[%s8982_s18 + $0x2f0] sm:$0xff] %v6700_v58  ;;  %v6452_v5 = vmul.f32 %v8049_v24, %v6451_v19  ;;  %vm6455_vm9 = vweird.f32 %v8049_v24  ;;  %vm12677_vm10 = vcmp.eq.f32.partialorder %v6458_v16, 8.507059e+37  ;;  %v2959_v59 = vmul.f32 3.8918573e-05, %v12667_v37 }
 0x461   : > { %v2637_v36 = vadd.f32 1.1283791, %v2636_v26  ;;  %8050 = vrcp.f32 %v12672_v63  ;;  %v2658_v50 = vand.u32 2147483647, %v12672_v63  ;;  %v2034_v7 = vadd.f32 %v2033_v43, %v12518_v60  ;;  %vm6456_vm11 = vmor %vm6454_vm8, %vm6455_vm9 }
 0x462   : > { %v6453_v47 = vadd.f32 %v8049_v24, %v6452_v5  ;;  %v2796_v52 = vmul.f32 %v2795_v38, %v12618_v17  ;;  %v2806_v9 = vadd.f32 0.4994258, %v2805_v42  ;;  %v2949_v18 = vadd.f32 0.00028619796, %v2948_v15 }
 0x463   : > { %v6461_v32 = vor.u32 1.1754944e-38, %v6460_v14  ;;  %v2660_v62 = vand.u32 2147483648, %v12672_v63  ;;  %v2960_v46 = vadd.f32 0.001143296, %v2959_v59  ;;  %v12690_v2 = vmul.f32 0.70710677, %v12670_v12 }
 0x464   : > { %v6457_v8 = vsel %vm6456_vm11, %v8049_v24, %v6453_v47  ;;  %v2797_v27 = vadd.f32 1.1283791, %v2796_v52  ;;  %v2807_v54 = vmul.f32 %v2806_v9, %v12618_v17  ;;  %v2950_v39 = vmul.f32 %v2949_v18, %v12667_v37  ;;  %v2181_v9 = vpop.f32.mrf.mxu2 }
 0x465   : > { %v6462_v33 = vsel %vm12677_vm10, %v6461_v32, %v6457_v8  ;;  %v2961_v55 = vmul.f32 %v2960_v46, %v12667_v37  ;;  %v3106_v35 = vmul.f32 %v12690_v2, %v12690_v2  ;;  %v2107_v29 = vadd.f32 %v2106_v41, %v2034_v7 }
 0x466   : > { %v6463_v31 = vmul.f32 %v6462_v33, %v6438_v45  ;;  %v12700_v28 = vmul.f32 0.5, %v12567_v61  ;;  %v12702_v3 = vadd.f32 1.0, %v2807_v54  ;;  %v2951_v17 = vadd.f32 0.0036580483, %v2950_v39  ;;  %v2035_v61 = vpop.f32.mrf.mxu0 }
 0x467   : > { %v8051_v57 = vpop.eup %8050  ;;  %v2638_v1 = vmul.f32 %v2637_v36, %v12575_v20  ;;  %vm2654_vm12 = vweird.f32 %v12672_v63  ;;  %v2962_v23 = vadd.f32 0.014752088, %v2961_v55  ;;  %v12706_v53 = vmin.f32 %v3106_v35, 16.0 }
 0x468   : > { %v7721_v49 = vclamps-f32 %v6463_v31, 1.0  ;;  %v2650_v24 = vmul.f32 %v8051_v57, %v12672_v63  ;;  %vm12709_vm13 = vcmp.eq.f32.partialorder %v2658_v50, 8.507059e+37  ;;  %8052 = vrcp.f32 %v12702_v3 }
 0x469   : > { %v2661_v45 = vor.u32 1.1754944e-38, %v2660_v62  ;;  %v12715_v0 = vmul.f32 %v2797_v27, %v12600_v34  ;;  %v2952_v20 = vmul.f32 %v2951_v17, %v12667_v37  ;;  %v2180_v10 = vadd.f32 %v2179_v51, %v2107_v29 }
 0x46a   : > { %v6604_v30 = vadd.f32 1.0, %v7721_v49  ;;  %v2651_v13 = vsub.f32 1.0, %v2650_v24  ;;  %v2963_v16 = vmul.f32 %v2962_v23, %v12667_v37  ;;  %v3108_v26 = vmul.f32 2.1237322e-06, %v12706_v53  ;;  %v2254_v49 = vpop.f32.mrf.mxu3 }
 0x46b   : > { %vm2655_vm14 = vweird.f32 %v8051_v57  ;;  %v2953_v44 = vadd.f32 0.05243302, %v2952_v20  ;;  %v3119_v48 = vmul.f32 3.8918573e-05, %v12706_v53  ;;  %v2036_v6 = vadd.f32 %v2035_v61, %v12518_v60 }
 0x46c   : > { %v6704_v34 = vmul.f32 %v6604_v30, %v12649_v22  ;;  %v2652_v58 = vmul.f32 %v8051_v57, %v2651_v13  ;;  %v2964_v19 = vadd.f32 0.112945676, %v2963_v16  ;;  %v3109_v14 = vadd.f32 0.00028619796, %v3108_v26  ;;  %v2108_v22 = vpop.f32.mrf.mxu1  ;;  %vm2656_vm0 = vmor %vm2654_vm12, %vm2655_vm14 }
 0x46d   : > { %vm2814_vm15 = vweird.f32 %v12702_v3  ;;  %v2818_v43 = vand.u32 2147483647, %v12702_v3  ;;  %v2954_v38 = vmul.f32 %v2953_v44, %v12667_v37  ;;  %v3120_v42 = vadd.f32 0.001143296, %v3119_v48 }
 0x46e   : > { %v8053_v15 = vpop.eup %8052  ;;  %6804 = vst [vmem:[%s8982_s18 + $0x310] sm:$0xf] %v6704_v34  ;;  %v2653_v5 = vadd.f32 %v8051_v57, %v2652_v58  ;;  %v2965_v21 = vmul.f32 %v2964_v19, %v12667_v37  ;;  %v3110_v59 = vmul.f32 %v3109_v14, %v12706_v53  ;;  %v12729_v36 = vadd.f32 %v2252_v25, %v2180_v10  ;;  %v2038_v31 = vpop.f32.mrf.mxu0 }
 0x46f   : > { %v2810_v50 = vmul.f32 %v8053_v15, %v12702_v3  ;;  %v2820_v7 = vand.u32 2147483648, %v12702_v3  ;;  %v2955_v47 = vadd.f32 0.18741608, %v2954_v38  ;;  %v3121_v52 = vmul.f32 %v3120_v42, %v12706_v53  ;;  %v2184_v19 = vpop.f32.mrf.mxu2 }
 0x470   : > { %v2657_v18 = vsel %vm2656_vm0, %v8051_v57, %v2653_v5  ;;  %v2966_v32 = vadd.f32 0.4994258, %v2965_v21  ;;  %v3111_v62 = vadd.f32 0.0036580483, %v3110_v59  ;;  %v2109_v46 = vadd.f32 %v2108_v22, %v2036_v6 }
 0x471   : > { %v2662_v8 = vsel %vm12709_vm13, %v2661_v45, %v2657_v18  ;;  %v2811_v27 = vsub.f32 1.0, %v2810_v50  ;;  %v2956_v54 = vmul.f32 %v2955_v47, %v12667_v37  ;;  %v3122_v63 = vadd.f32 0.014752088, %v3121_v52 }
 0x472   : > { %v2663_v39 = vmul.f32 %v2662_v8, %v2638_v1  ;;  %v2967_v41 = vmul.f32 %v2966_v32, %v12667_v37  ;;  %v3112_v33 = vmul.f32 %v3111_v62, %v12706_v53  ;;  %v12743_v55 = vmul.f32 0.70710677, %v12729_v36 }
 0x473   : > { %v2812_v35 = vmul.f32 %v8053_v15, %v2811_v27  ;;  %vm2815_vm1 = vweird.f32 %v8053_v15  ;;  %v3123_v29 = vmul.f32 %v3122_v63, %v12706_v53  ;;  %v2182_v51 = vadd.f32 %v2181_v9, %v2109_v46  ;;  %v2257_v46 = vpop.f32.mrf.mxu3 }
 0x474   : > { %v7626_v17 = vclamps-f32 %v2663_v39, 1.0  ;;  %v12746_v57 = vadd.f32 1.0, %v2967_v41  ;;  %v3113_v23 = vadd.f32 0.05243302, %v3112_v33  ;;  %v3266_v1 = vmul.f32 %v12743_v55, %v12743_v55  ;;  %vm2816_vm3 = vmor %vm2814_vm15, %vm2815_vm1  ;;  %v2111_v3 = vpop.f32.mrf.mxu1 }
 0x475   : > { %v2813_v37 = vadd.f32 %v8053_v15, %v2812_v35  ;;  %vm2819_vm2 = vcmp.eq.f32.partialorder %v2818_v43, 8.507059e+37  ;;  %v2821_v24 = vor.u32 1.1754944e-38, %v2820_v7  ;;  %v3124_v4 = vadd.f32 0.112945676, %v3123_v29 }
 0x476   : > { %v6509_v61 = vadd.f32 1.0, %v7626_v17  ;;  %v2957_v45 = vadd.f32 1.1283791, %v2956_v54  ;;  %8054 = vrcp.f32 %v12746_v57  ;;  %v2039_v20 = vadd.f32 %v2038_v31, %v12518_v60 }
 0x477   : > { %v2817_v10 = vsel %vm2816_vm3, %v8053_v15, %v2813_v37  ;;  %v3114_v30 = vmul.f32 %v3113_v23, %v12706_v53  ;;  %v3125_v13 = vmul.f32 %v3124_v4, %v12706_v53  ;;  %v12756_v16 = vadd.f32 %v2254_v49, %v2182_v51 }
 0x478   : > { %v6609_v26 = vmul.f32 %v6509_v61, %v12700_v28  ;;  %v2822_v25 = vsel %vm2819_vm2, %v2821_v24, %v2817_v10  ;;  %v12759_v44 = vmin.f32 %v3266_v1, 16.0  ;;  %v2313_v48 = vmul.f32 0.5, %v12580_v56  ;;  %v2186_v10 = vpop.f32.mrf.mxu2 }
 0x479   : > { %v2823_v6 = vmul.f32 %v2822_v25, %v12715_v0  ;;  %v3115_v34 = vadd.f32 0.18741608, %v3114_v30  ;;  %v3126_v58 = vadd.f32 0.4994258, %v3125_v13  ;;  %v12765_v14 = vmul.f32 0.5, %v12643_v40 }
 0x47a   : > { %6709 = vst [vmem:[%s8982_s18 + $0x18] sm:$0xff] %v6609_v26  ;;  %v3268_v43 = vmul.f32 2.1237322e-06, %v12759_v44  ;;  %v3279_v38 = vmul.f32 3.8918573e-05, %v12759_v44  ;;  %v2112_v28 = vadd.f32 %v2111_v3, %v2039_v20  ;;  %v2958_v15 = vmul.f32 %v2957_v45, %v12656_v11  ;;  %v2040_v11 = vpop.f32.mrf.mxu0 }
 0x47b   : > { %v7630_v42 = vclamps-f32 %v2823_v6, 1.0  ;;  %v3127_v5 = vmul.f32 %v3126_v58, %v12706_v53  ;;  %v12772_v56 = vmul.f32 0.70710677, %v12756_v16  ;;  %v2978_v21 = vand.u32 2147483647, %v12746_v57 }
 0x47c   : > { %v8055_v0 = vpop.eup %8054  ;;  %v3269_v59 = vadd.f32 0.00028619796, %v3268_v43  ;;  %v3280_v22 = vadd.f32 0.001143296, %v3279_v38  ;;  %v2185_v40 = vadd.f32 %v2184_v19, %v2112_v28  ;;  %v2980_v47 = vand.u32 2147483648, %v12746_v57  ;;  %v2113_v23 = vpop.f32.mrf.mxu1 }
 0x47d   : > { %v6513_v50 = vadd.f32 1.0, %v7630_v42  ;;  %v2970_v7 = vmul.f32 %v8055_v0, %v12746_v57  ;;  %v3116_v52 = vmul.f32 %v3115_v34, %v12706_v53  ;;  %v12778_v9 = vadd.f32 1.0, %v3127_v5 }
 0x47e   : > { %v3270_v18 = vmul.f32 %v3269_v59, %v12759_v44  ;;  %v3281_v32 = vmul.f32 %v3280_v22, %v12759_v44  ;;  %v3426_v62 = vmul.f32 %v12772_v56, %v12772_v56  ;;  %vm2974_vm4 = vweird.f32 %v12746_v57 }
 0x47f   : > { %v6613_v8 = vmul.f32 %v6513_v50, %v2313_v48  ;;  %v2971_v27 = vsub.f32 1.0, %v2970_v7  ;;  %v12785_v54 = vadd.f32 %v2257_v46, %v2185_v40  ;;  %vm2975_vm5 = vweird.f32 %v8055_v0 }
 0x480   : > { %vm12787_vm6 = vcmp.eq.f32.partialorder %v2978_v21, 8.507059e+37  ;;  %8056 = vrcp.f32 %v12778_v9  ;;  %v2041_v63 = vadd.f32 %v2040_v11, %v12518_v60  ;;  %v3271_v41 = vadd.f32 0.0036580483, %v3270_v18  ;;  %vm2976_vm7 = vmor %vm2974_vm4, %vm2975_vm5  ;;  %v2259_v21 = vpop.f32.mrf.mxu3 }
 0x481   : > { %6713 = vst [vmem:[%s8982_s18 + $0x38] sm:$0xff] %v6613_v8  ;;  %v2972_v39 = vmul.f32 %v8055_v0, %v2971_v27  ;;  %v3282_v33 = vadd.f32 0.014752088, %v3281_v32  ;;  %v12794_v35 = vmin.f32 %v3426_v62, 16.0  ;;  %v2981_v29 = vor.u32 1.1754944e-38, %v2980_v47 }
 0x482   : > { %v3117_v51 = vadd.f32 1.1283791, %v3116_v52  ;;  %v3140_v31 = vand.u32 2147483648, %v12778_v9  ;;  %v12798_v17 = vmul.f32 0.70710677, %v12785_v54  ;;  %v3272_v49 = vmul.f32 %v3271_v41, %v12759_v44  ;;  %v2043_v53 = vpop.f32.mrf.mxu0 }
 0x483   : > { %v2973_v1 = vadd.f32 %v8055_v0, %v2972_v39  ;;  %v3283_v37 = vmul.f32 %v3282_v33, %v12759_v44  ;;  %v3428_v24 = vmul.f32 2.1237322e-06, %v12794_v35  ;;  %v3138_v4 = vand.u32 2147483647, %v12778_v9 }
 0x484   : > { %v3439_v61 = vmul.f32 3.8918573e-05, %v12794_v35  ;;  %v3586_v45 = vmul.f32 %v12798_v17, %v12798_v17  ;;  %v2114_v20 = vadd.f32 %v2113_v23, %v2041_v63  ;;  %vm3134_vm8 = vweird.f32 %v12778_v9  ;;  %v2116_v63 = vpop.f32.mrf.mxu1 }
 0x485   : > { %v2977_v30 = vsel %vm2976_vm7, %v8055_v0, %v2973_v1  ;;  %v3273_v13 = vadd.f32 0.05243302, %v3272_v49  ;;  %v3284_v26 = vadd.f32 0.112945676, %v3283_v37  ;;  %v3429_v25 = vadd.f32 0.00028619796, %v3428_v24 }
 0x486   : > { %v8057_v3 = vpop.eup %8056  ;;  %v2982_v57 = vsel %vm12787_vm6, %v2981_v29, %v2977_v30  ;;  %v3141_v48 = vor.u32 1.1754944e-38, %v3140_v31  ;;  %v3440_v6 = vadd.f32 0.001143296, %v3439_v61  ;;  %v12813_v34 = vmin.f32 %v3586_v45, 16.0 }
 0x487   : > { %v2983_v58 = vmul.f32 %v2982_v57, %v2958_v15  ;;  %v3130_v19 = vmul.f32 %v8057_v3, %v12778_v9  ;;  %v3274_v43 = vmul.f32 %v3273_v13, %v12759_v44  ;;  %v2187_v38 = vadd.f32 %v2186_v10, %v2114_v20 }
 0x488   : > { %v3285_v28 = vmul.f32 %v3284_v26, %v12759_v44  ;;  %v3430_v42 = vmul.f32 %v3429_v25, %v12794_v35  ;;  %v3441_v5 = vmul.f32 %v3440_v6, %v12794_v35  ;;  %v3588_v0 = vmul.f32 2.1237322e-06, %v12813_v34 }
 0x489   : > { %v7634_v59 = vclamps-f32 %v2983_v58, 1.0  ;;  %v3131_v22 = vsub.f32 1.0, %v3130_v19  ;;  %v3275_v40 = vadd.f32 0.18741608, %v3274_v43  ;;  %v3599_v50 = vmul.f32 3.8918573e-05, %v12813_v34 }
 0x48a   : > { %vm3135_vm9 = vweird.f32 %v8057_v3  ;;  %v3286_v15 = vadd.f32 0.4994258, %v3285_v28  ;;  %v3431_v7 = vadd.f32 0.0036580483, %v3430_v42  ;;  %v3442_v47 = vadd.f32 0.014752088, %v3441_v5 }
 0x48b   : > { %v6517_v52 = vadd.f32 1.0, %v7634_v59  ;;  %v3132_v11 = vmul.f32 %v8057_v3, %v3131_v22  ;;  %v3589_v18 = vadd.f32 0.00028619796, %v3588_v0  ;;  %v12822_v32 = vadd.f32 %v2259_v21, %v2187_v38  ;;  %vm3136_vm10 = vmor %vm3134_vm8, %vm3135_vm9  ;;  %v2045_v22 = vpop.f32.mrf.mxu0 }
 0x48c   : > { %v3287_v62 = vmul.f32 %v3286_v15, %v12759_v44  ;;  %v3432_v46 = vmul.f32 %v3431_v7, %v12794_v35  ;;  %v3443_v8 = vmul.f32 %v3442_v47, %v12794_v35  ;;  %v3600_v27 = vadd.f32 0.001143296, %v3599_v50 }
 0x48d   : > { %v6617_v39 = vmul.f32 %v6517_v52, %v12765_v14  ;;  %v3133_v41 = vadd.f32 %v8057_v3, %v3132_v11  ;;  %v3276_v33 = vmul.f32 %v3275_v40, %v12759_v44  ;;  %v3590_v29 = vmul.f32 %v3589_v18, %v12813_v34  ;;  %v2118_v40 = vpop.f32.mrf.mxu1 }
 0x48e   : > { %v12833_v31 = vadd.f32 1.0, %v3287_v62  ;;  %v3433_v23 = vadd.f32 0.05243302, %v3432_v46  ;;  %v3444_v1 = vadd.f32 0.112945676, %v3443_v8  ;;  %v3601_v49 = vmul.f32 %v3600_v27, %v12813_v34 }
 0x48f   : > { %6717 = vst [vmem:[%s8982_s18 + $0x58] sm:$0xff] %v6617_v39  ;;  %v3118_v37 = vmul.f32 %v3117_v51, %v12690_v2  ;;  %v3137_v24 = vsel %vm3136_vm10, %v8057_v3, %v3133_v41  ;;  %vm3139_vm11 = vcmp.eq.f32.partialorder %v3138_v4, 8.507059e+37  ;;  %v3591_v14 = vadd.f32 0.0036580483, %v3590_v29  ;;  %v2189_v51 = vpop.f32.mrf.mxu2  ;;  %v2262_v4 = vpop.f32.mrf.mxu3 }
 0x490   : > { %v3142_v61 = vsel %vm3139_vm11, %v3141_v48, %v3137_v24  ;;  %8058 = vrcp.f32 %v12833_v31  ;;  %v2044_v44 = vadd.f32 %v2043_v53, %v12518_v60  ;;  %v3277_v9 = vadd.f32 1.1283791, %v3276_v33 }
 0x491   : > { %v3143_v45 = vmul.f32 %v3142_v61, %v3118_v37  ;;  %v3434_v20 = vmul.f32 %v3433_v23, %v12794_v35  ;;  %v3445_v10 = vmul.f32 %v3444_v1, %v12794_v35  ;;  %v2321_v30 = vmul.f32 0.5, %v12670_v12 }
 0x492   : > { %v3592_v13 = vmul.f32 %v3591_v14, %v12813_v34  ;;  %v3602_v26 = vadd.f32 0.014752088, %v3601_v49  ;;  %v12845_v2 = vmul.f32 0.70710677, %v12822_v32  ;;  %v12848_v3 = vmul.f32 0.5, %v12729_v36 }
 0x493   : > { %v7638_v25 = vclamps-f32 %v3143_v45, 1.0  ;;  %v3435_v57 = vadd.f32 0.18741608, %v3434_v20  ;;  %v3446_v48 = vadd.f32 0.4994258, %v3445_v10  ;;  %v2117_v19 = vadd.f32 %v2116_v63, %v2044_v44 }
 0x494   : > { %v3593_v6 = vadd.f32 0.05243302, %v3592_v13  ;;  %v3603_v58 = vmul.f32 %v3602_v26, %v12813_v34  ;;  %v3746_v12 = vmul.f32 %v12845_v2, %v12845_v2  ;;  %v3278_v38 = vmul.f32 %v3277_v9, %v12743_v55 }
 0x495   : > { %v6521_v43 = vadd.f32 1.0, %v7638_v25  ;;  %v12855_v28 = vmul.f32 0.5, %v12756_v16  ;;  %v3447_v42 = vmul.f32 %v3446_v48, %v12794_v35  ;;  %v2190_v59 = vadd.f32 %v2189_v51, %v2117_v19  ;;  %v12899_v48 = vpop.f32.mrf.mxu1 }
 0x496   : > { %v8059_v36 = vpop.eup %8058  ;;  %v3594_v5 = vmul.f32 %v3593_v6, %v12813_v34  ;;  %v3604_v0 = vadd.f32 0.112945676, %v3603_v58  ;;  %v12859_v21 = vmin.f32 %v3746_v12, 16.0  ;;  %v3298_v55 = vand.u32 2147483647, %v12833_v31 }
 0x497   : > { %v6621_v50 = vmul.f32 %v6521_v43, %v2321_v30  ;;  %v3290_v15 = vmul.f32 %v8059_v36, %v12833_v31  ;;  %v3436_v16 = vmul.f32 %v3435_v57, %v12794_v35  ;;  %v3300_v7 = vand.u32 2147483648, %v12833_v31  ;;  %v2191_v1 = vpop.f32.mrf.mxu2  ;;  %v2264_v49 = vpop.f32.mrf.mxu3 }
 0x498   : > { %v12865_v47 = vadd.f32 1.0, %v3447_v42  ;;  %v3605_v52 = vmul.f32 %v3604_v0, %v12813_v34  ;;  %v3748_v11 = vmul.f32 2.1237322e-06, %v12859_v21  ;;  %vm3294_vm12 = vweird.f32 %v12833_v31  ;;  %v2048_v57 = vpop.f32.mrf.mxu0 }
 0x499   : > { %6721 = vst [vmem:[%s8982_s18 + $0x78] sm:$0xff] %v6621_v50  ;;  %v3291_v18 = vsub.f32 1.0, %v3290_v15  ;;  %v3759_v62 = vmul.f32 3.8918573e-05, %v12859_v21  ;;  %v2046_v46 = vadd.f32 %v2045_v22, %v12518_v60  ;;  %vm3295_vm13 = vweird.f32 %v8059_v36 }
 0x49a   : > { %8060 = vrcp.f32 %v12865_v47  ;;  %v3595_v35 = vadd.f32 0.18741608, %v3594_v5  ;;  %v12874_v8 = vadd.f32 %v2262_v4, %v2190_v59  ;;  %v3437_v53 = vadd.f32 1.1283791, %v3436_v16  ;;  %vm3296_vm15 = vmor %vm3294_vm12, %vm3295_vm13 }
 0x49b   : > { %v3292_v27 = vmul.f32 %v8059_v36, %v3291_v18  ;;  %v3606_v63 = vadd.f32 0.4994258, %v3605_v52  ;;  %v3749_v39 = vadd.f32 0.00028619796, %v3748_v11  ;;  %vm12876_vm14 = vcmp.eq.f32.partialorder %v3298_v55, 8.507059e+37 }
 0x49c   : > { %v3301_v33 = vor.u32 1.1754944e-38, %v3300_v7  ;;  %v3458_v29 = vand.u32 2147483647, %v12865_v47  ;;  %v3760_v23 = vadd.f32 0.001143296, %v3759_v62  ;;  %v3460_v24 = vand.u32 2147483648, %v12865_v47 }
 0x49d   : > { %v3293_v37 = vadd.f32 %v8059_v36, %v3292_v27  ;;  %v3607_v14 = vmul.f32 %v3606_v63, %v12813_v34  ;;  %v3750_v61 = vmul.f32 %v3749_v39, %v12859_v21  ;;  %v3596_v44 = vmul.f32 %v3595_v35, %v12813_v34 }
 0x49e   : > { %v3761_v45 = vmul.f32 %v3760_v23, %v12859_v21  ;;  %v12890_v9 = vmul.f32 0.70710677, %v12874_v8  ;;  %v2119_v20 = vadd.f32 %v2118_v40, %v2046_v46  ;;  %v3438_v30 = vmul.f32 %v3437_v53, %v12772_v56 }
 0x49f   : > { %v3297_v10 = vsel %vm3296_vm15, %v8059_v36, %v3293_v37  ;;  %v12893_v13 = vadd.f32 1.0, %v3607_v14  ;;  %v3751_v26 = vadd.f32 0.0036580483, %v3750_v61  ;;  %vm3454_vm0 = vweird.f32 %v12865_v47  ;;  %v2194_v18 = vpop.f32.mrf.mxu2  ;;  %v12922_v62 = vpop.f32.mrf.mxu3 }
 0x4a0   : > { %v8061_v51 = vpop.eup %8060  ;;  %v3302_v4 = vsel %vm12876_vm14, %v3301_v33, %v3297_v10  ;;  %v3762_v31 = vadd.f32 0.014752088, %v3761_v45  ;;  %v3906_v34 = vmul.f32 %v12890_v9, %v12890_v9  ;;  %v2192_v25 = vadd.f32 %v2191_v1, %v2119_v20  ;;  %v2123_v14 = vpop.f32.mrf.mxu1 }
 0x4a1   : > { %v3303_v6 = vmul.f32 %v3302_v4, %v3278_v38  ;;  %v3450_v58 = vmul.f32 %v8061_v51, %v12865_v47  ;;  %8062 = vrcp.f32 %v12893_v13  ;;  %vm12904_vm1 = vcmp.eq.f32.partialorder %v3458_v29, 8.507059e+37 }
 0x4a2   : > { %v3461_v12 = vor.u32 1.1754944e-38, %v3460_v24  ;;  %v3597_v19 = vadd.f32 1.1283791, %v3596_v44  ;;  %v3752_v43 = vmul.f32 %v3751_v26, %v12859_v21  ;;  %v3763_v5 = vmul.f32 %v3762_v31, %v12859_v21  ;;  %v2050_v24 = vpop.f32.mrf.mxu0 }
 0x4a3   : > { %v7642_v42 = vclamps-f32 %v3303_v6, 1.0  ;;  %v3451_v36 = vsub.f32 1.0, %v3450_v58  ;;  %v12910_v0 = vmin.f32 %v3906_v34, 16.0  ;;  %vm3455_vm2 = vweird.f32 %v8061_v51 }
 0x4a4   : > { %v3753_v38 = vadd.f32 0.05243302, %v3752_v43  ;;  %v12912_v59 = vadd.f32 %v2264_v49, %v2192_v25  ;;  %v2049_v22 = vadd.f32 %v2048_v57, %v12518_v60  ;;  %v3764_v15 = vadd.f32 0.112945676, %v3763_v5  ;;  %vm3456_vm3 = vmor %vm3454_vm0, %vm3455_vm2 }
 0x4a5   : > { %v6525_v40 = vadd.f32 1.0, %v7642_v42  ;;  %v3452_v50 = vmul.f32 %v8061_v51, %v3451_v36  ;;  %v3908_v55 = vmul.f32 2.1237322e-06, %v12910_v0  ;;  %v3598_v16 = vmul.f32 %v3597_v19, %v12798_v17 }
 0x4a6   : > { %v3754_v7 = vmul.f32 %v3753_v38, %v12859_v21  ;;  %v3919_v52 = vmul.f32 3.8918573e-05, %v12910_v0  ;;  %v12920_v11 = vmul.f32 0.70710677, %v12912_v59  ;;  %v3765_v53 = vmul.f32 %v3764_v15, %v12859_v21 }
 0x4a7   : > { %v8063_v46 = vpop.eup %8062  ;;  %v6625_v35 = vmul.f32 %v6525_v40, %v12848_v3  ;;  %v3453_v27 = vadd.f32 %v8061_v51, %v3452_v50  ;;  %v3909_v63 = vadd.f32 0.00028619796, %v3908_v55  ;;  %vm3614_vm4 = vweird.f32 %v12893_v13  ;;  %v2196_v5 = vpop.f32.mrf.mxu2 }
 0x4a8   : > { %v3610_v17 = vmul.f32 %v8063_v46, %v12893_v13  ;;  %v3620_v39 = vand.u32 2147483648, %v12893_v13  ;;  %v3920_v41 = vadd.f32 0.001143296, %v3919_v52  ;;  %v3766_v29 = vadd.f32 0.4994258, %v3765_v53  ;;  %v2269_v38 = vpop.f32.mrf.mxu3 }
 0x4a9   : > { %6725 = vst [vmem:[%s8982_s18 + $0x98] sm:$0xff] %v6625_v35  ;;  %v3457_v33 = vsel %vm3456_vm3, %v8061_v51, %v3453_v27  ;;  %v3910_v3 = vmul.f32 %v3909_v63, %v12910_v0  ;;  %v4066_v23 = vmul.f32 %v12920_v11, %v12920_v11  ;;  %v3755_v49 = vadd.f32 0.18741608, %v3754_v7 }
 0x4aa   : > { %v3462_v1 = vsel %vm12904_vm1, %v3461_v12, %v3457_v33  ;;  %v3611_v47 = vsub.f32 1.0, %v3610_v17  ;;  %v3921_v37 = vmul.f32 %v3920_v41, %v12910_v0  ;;  %v3767_v44 = vmul.f32 %v3766_v29, %v12859_v21  ;;  %v2053_v63 = vpop.f32.mrf.mxu0  ;;  %v2126_v17 = vpop.f32.mrf.mxu1 }
 0x4ab   : > { %v3463_v61 = vmul.f32 %v3462_v1, %v3438_v30  ;;  %v3911_v45 = vadd.f32 0.0036580483, %v3910_v3  ;;  %v12940_v20 = vmin.f32 %v4066_v23, 16.0  ;;  %vm3615_vm5 = vweird.f32 %v8063_v46 }
 0x4ac   : > { %v3612_v10 = vmul.f32 %v8063_v46, %v3611_v47  ;;  %v3618_v26 = vand.u32 2147483647, %v12893_v13  ;;  %v3922_v51 = vadd.f32 0.014752088, %v3921_v37  ;;  %v12943_v31 = vadd.f32 1.0, %v3767_v44  ;;  %vm3616_vm6 = vmor %vm3614_vm4, %vm3615_vm5 }
 0x4ad   : > { %v7646_v4 = vclamps-f32 %v3463_v61, 1.0  ;;  %v3912_v34 = vmul.f32 %v3911_v45, %v12910_v0  ;;  %v4068_v25 = vmul.f32 2.1237322e-06, %v12940_v20  ;;  %v3621_v6 = vor.u32 1.1754944e-38, %v3620_v39 }
 0x4ae   : > { %v3613_v57 = vadd.f32 %v8063_v46, %v3612_v10  ;;  %v3756_v30 = vmul.f32 %v3755_v49, %v12859_v21  ;;  %v3923_v58 = vmul.f32 %v3922_v51, %v12910_v0  ;;  %8064 = vrcp.f32 %v12943_v31 }
 0x4af   : > { %v6529_v56 = vadd.f32 1.0, %v7646_v4  ;;  %v4079_v12 = vmul.f32 3.8918573e-05, %v12940_v20  ;;  %v2122_v19 = vadd.f32 %v12899_v48, %v2049_v22  ;;  %vm3619_vm7 = vcmp.eq.f32.partialorder %v3618_v26, 8.507059e+37 }
 0x4b0   : > { %v3617_v43 = vsel %vm3616_vm6, %v8063_v46, %v3613_v57  ;;  %v3913_v42 = vadd.f32 0.05243302, %v3912_v34  ;;  %v3924_v36 = vadd.f32 0.112945676, %v3923_v58  ;;  %v4069_v50 = vadd.f32 0.00028619796, %v4068_v25  ;;  %v2199_v25 = vpop.f32.mrf.mxu2  ;;  %v2272_v57 = vpop.f32.mrf.mxu3 }
 0x4b1   : > { %v6629_v21 = vmul.f32 %v6529_v56, %v12855_v28  ;;  %v3622_v40 = vsel %vm3619_vm7, %v3621_v6, %v3617_v43  ;;  %v3757_v13 = vadd.f32 1.1283791, %v3756_v30  ;;  %v4080_v48 = vadd.f32 0.001143296, %v4079_v12 }
 0x4b2   : > { %v3623_v15 = vmul.f32 %v3622_v40, %v3598_v16  ;;  %v3914_v55 = vmul.f32 %v3913_v42, %v12910_v0  ;;  %v3925_v7 = vmul.f32 %v3924_v36, %v12910_v0  ;;  %v4070_v52 = vmul.f32 %v4069_v50, %v12940_v20 }
 0x4b3   : > { %6729 = vst [vmem:[%s8982_s18 + $0xb8] sm:$0xff] %v6629_v21  ;;  %v2195_v22 = vadd.f32 %v2194_v18, %v2122_v19  ;;  %v2051_v46 = vadd.f32 %v2050_v24, %v12518_v60  ;;  %v2333_v35 = vmul.f32 0.5, %v12785_v54  ;;  %v3778_v39 = vand.u32 2147483647, %v12943_v31  ;;  %v2128_v21 = vpop.f32.mrf.mxu1 }
 0x4b4   : > { %v7650_v27 = vclamps-f32 %v3623_v15, 1.0  ;;  %v3915_v53 = vadd.f32 0.18741608, %v3914_v55  ;;  %v3926_v28 = vadd.f32 0.4994258, %v3925_v7  ;;  %v8065_v16 = vpop.eup %8064  ;;  %v4081_v33 = vmul.f32 %v4080_v48, %v12940_v20 }
 0x4b5   : > { %v4071_v41 = vadd.f32 0.0036580483, %v4070_v52  ;;  %v12964_v29 = vadd.f32 %v12922_v62, %v2195_v22  ;;  %v3770_v18 = vmul.f32 %v8065_v16, %v12943_v31  ;;  %v3780_v54 = vand.u32 2147483648, %v12943_v31 }
 0x4b6   : > { %v6533_v3 = vadd.f32 1.0, %v7650_v27  ;;  %v2054_v23 = vadd.f32 %v2053_v63, %v12518_v60  ;;  %v3927_v1 = vmul.f32 %v3926_v28, %v12910_v0  ;;  %v4082_v49 = vadd.f32 0.014752088, %v4081_v33 }
 0x4b7   : > { %v4072_v47 = vmul.f32 %v4071_v41, %v12940_v20  ;;  %v2124_v37 = vadd.f32 %v2123_v14, %v2051_v46  ;;  %v3771_v61 = vsub.f32 1.0, %v3770_v18  ;;  %v3916_v44 = vmul.f32 %v3915_v53, %v12910_v0 }
 0x4b8   : > { %v6633_v24 = vmul.f32 %v6533_v3, %v2333_v35  ;;  %v12973_v62 = vmul.f32 0.70710677, %v12964_v29  ;;  %v12975_v45 = vadd.f32 1.0, %v3927_v1  ;;  %v4083_v26 = vmul.f32 %v4082_v49, %v12940_v20 }
 0x4b9   : > { %v4073_v10 = vadd.f32 0.05243302, %v4072_v47  ;;  %v2197_v51 = vadd.f32 %v2196_v5, %v2124_v37  ;;  %v2337_v4 = vmul.f32 0.5, %v12822_v32  ;;  %v3772_v34 = vmul.f32 %v8065_v16, %v3771_v61  ;;  %v2055_v5 = vpop.f32.mrf.mxu0 }
 0x4ba   : > { %6733 = vst [vmem:[%s8982_s18 + $0xd8] sm:$0xff] %v6633_v24  ;;  %vm3775_vm8 = vweird.f32 %v8065_v16  ;;  %v4226_v14 = vmul.f32 %v12973_v62, %v12973_v62  ;;  %v3758_v0 = vmul.f32 %v3757_v13, %v12845_v2  ;;  %vm3774_vm9 = vweird.f32 %v12943_v31 }
 0x4bb   : > { %8066 = vrcp.f32 %v12975_v45  ;;  %v2127_v6 = vadd.f32 %v2126_v17, %v2054_v23  ;;  %v3773_v30 = vadd.f32 %v8065_v16, %v3772_v34  ;;  %v4074_v58 = vmul.f32 %v4073_v10, %v12940_v20  ;;  %vm3776_vm10 = vmor %vm3774_vm9, %vm3775_vm8  ;;  %v13013_v23 = vpop.f32.mrf.mxu3 }
 0x4bc   : > { %v4084_v56 = vadd.f32 0.112945676, %v4083_v26  ;;  %v12986_v12 = vmin.f32 %v4226_v14, 16.0  ;;  %vm3779_vm11 = vcmp.eq.f32.partialorder %v3778_v39, 8.507059e+37  ;;  %v3781_v32 = vor.u32 1.1754944e-38, %v3780_v54  ;;  %v2201_v54 = vpop.f32.mrf.mxu2 }
 0x4bd   : > { %v3917_v19 = vadd.f32 1.1283791, %v3916_v44  ;;  %v12988_v43 = vadd.f32 %v2269_v38, %v2197_v51  ;;  %v3777_v42 = vsel %vm3776_vm10, %v8065_v16, %v3773_v30  ;;  %v4075_v36 = vadd.f32 0.18741608, %v4074_v58 }
 0x4be   : > { %v4085_v2 = vmul.f32 %v4084_v56, %v12940_v20  ;;  %v4228_v31 = vmul.f32 2.1237322e-06, %v12986_v12  ;;  %v3782_v40 = vsel %vm3779_vm11, %v3781_v32, %v3777_v42  ;;  %v4239_v50 = vmul.f32 3.8918573e-05, %v12986_v12 }
 0x4bf   : > { %v12994_v15 = vmul.f32 0.70710677, %v12988_v43  ;;  %v2200_v13 = vadd.f32 %v2199_v25, %v2127_v6  ;;  %v3783_v55 = vmul.f32 %v3782_v40, %v3758_v0  ;;  %v4076_v7 = vmul.f32 %v4075_v36, %v12940_v20  ;;  %v13029_v25 = vpop.f32.mrf.mxu1 }
 0x4c0   : > { %v4086_v38 = vadd.f32 0.4994258, %v4085_v2  ;;  %v4229_v52 = vadd.f32 0.00028619796, %v4228_v31  ;;  %v12998_v22 = vmul.f32 0.5, %v12874_v8  ;;  %v3918_v46 = vmul.f32 %v3917_v19, %v12890_v9 }
 0x4c1   : > { %v8067_v48 = vpop.eup %8066  ;;  %v4240_v35 = vadd.f32 0.001143296, %v4239_v50  ;;  %v4386_v27 = vmul.f32 %v12994_v15, %v12994_v15  ;;  %v7654_v53 = vclamps-f32 %v3783_v55, 1.0  ;;  %v3938_v63 = vand.u32 2147483647, %v12975_v45  ;;  %v2058_v14 = vpop.f32.mrf.mxu0 }
 0x4c2   : > { %v3930_v28 = vmul.f32 %v8067_v48, %v12975_v45  ;;  %v3940_v17 = vand.u32 2147483648, %v12975_v45  ;;  %v4087_v16 = vmul.f32 %v4086_v38, %v12940_v20  ;;  %v4230_v39 = vmul.f32 %v4229_v52, %v12986_v12 }
 0x4c3   : > { %v4241_v8 = vmul.f32 %v4240_v35, %v12986_v12  ;;  %v13009_v41 = vmin.f32 %v4386_v27, 16.0  ;;  %v6537_v9 = vadd.f32 1.0, %v7654_v53  ;;  %v4077_v3 = vadd.f32 1.1283791, %v4076_v7  ;;  %v13052_v35 = vpop.f32.mrf.mxu3 }
 0x4c4   : > { %v3931_v33 = vsub.f32 1.0, %v3930_v28  ;;  %v13011_v18 = vadd.f32 %v2272_v57, %v2200_v13  ;;  %vm3935_vm12 = vweird.f32 %v8067_v48  ;;  %v13015_v1 = vadd.f32 1.0, %v4087_v16 }
 0x4c5   : > { %v4231_v47 = vadd.f32 0.0036580483, %v4230_v39  ;;  %v4242_v20 = vadd.f32 0.014752088, %v4241_v8  ;;  %v6637_v49 = vmul.f32 %v6537_v9, %v2337_v4  ;;  %v4388_v24 = vmul.f32 2.1237322e-06, %v13009_v41 }
 0x4c6   : > { %v3932_v37 = vmul.f32 %v8067_v48, %v3931_v33  ;;  %v4399_v61 = vmul.f32 3.8918573e-05, %v13009_v41  ;;  %vm3934_vm13 = vweird.f32 %v12975_v45  ;;  %vm13020_vm14 = vcmp.eq.f32.partialorder %v3938_v63, 8.507059e+37 }
 0x4c7   : > { %8068 = vrcp.f32 %v13015_v1  ;;  %v2056_v10 = vadd.f32 %v2055_v5, %v12518_v60  ;;  %6737 = vst [vmem:[%s8982_s18 + $0xf8] sm:$0xff] %v6637_v49  ;;  %v4232_v51 = vmul.f32 %v4231_v47, %v12986_v12  ;;  %v4243_v4 = vmul.f32 %v4242_v20, %v12986_v12  ;;  %vm3936_vm15 = vmor %vm3934_vm13, %vm3935_vm12 }
 0x4c8   : > { %v3933_v26 = vadd.f32 %v8067_v48, %v3932_v37  ;;  %v4389_v34 = vadd.f32 0.00028619796, %v4388_v24  ;;  %v3941_v45 = vor.u32 1.1754944e-38, %v3940_v17  ;;  %v13033_v57 = vmul.f32 %v4077_v3, %v12920_v11  ;;  %v13060_v24 = vpop.f32.mrf.mxu1 }
 0x4c9   : > { %v4400_v0 = vadd.f32 0.001143296, %v4399_v61  ;;  %v13036_v6 = vmul.f32 0.70710677, %v13011_v18  ;;  %v4233_v58 = vadd.f32 0.05243302, %v4232_v51  ;;  %v2129_v2 = vadd.f32 %v2128_v21, %v2056_v10  ;;  %v2060_v37 = vpop.f32.mrf.mxu0 }
 0x4ca   : > { %v3937_v30 = vsel %vm3936_vm15, %v8067_v48, %v3933_v26  ;;  %v4244_v56 = vadd.f32 0.112945676, %v4243_v4  ;;  %v4390_v32 = vmul.f32 %v4389_v34, %v13009_v41  ;;  %vm4094_vm0 = vweird.f32 %v13015_v1 }
 0x4cb   : > { %v3942_v19 = vsel %vm13020_vm14, %v3941_v45, %v3937_v30  ;;  %v4401_v42 = vmul.f32 %v4400_v0, %v13009_v41  ;;  %v4546_v36 = vmul.f32 %v13036_v6, %v13036_v6  ;;  %v4234_v31 = vmul.f32 %v4233_v58, %v12986_v12 }
 0x4cc   : > { %v3943_v11 = vmul.f32 %v3942_v19, %v3918_v46  ;;  %v4245_v5 = vmul.f32 %v4244_v56, %v12986_v12  ;;  %v4391_v40 = vadd.f32 0.0036580483, %v4390_v32  ;;  %v4098_v13 = vand.u32 2147483647, %v13015_v1  ;;  %v2204_v46 = vpop.f32.mrf.mxu2 }
 0x4cd   : > { %v8069_v50 = vpop.eup %8068  ;;  %v4402_v55 = vadd.f32 0.014752088, %v4401_v42  ;;  %v13048_v7 = vmin.f32 %v4546_v36, 16.0  ;;  %v4100_v48 = vand.u32 2147483648, %v13015_v1  ;;  %v2202_v21 = vadd.f32 %v2201_v54, %v2129_v2 }
 0x4ce   : > { %v7658_v38 = vclamps-f32 %v3943_v11, 1.0  ;;  %v4090_v52 = vmul.f32 %v8069_v50, %v13015_v1  ;;  %v4246_v27 = vadd.f32 0.4994258, %v4245_v5  ;;  %v4392_v53 = vmul.f32 %v4391_v40, %v13009_v41 }
 0x4cf   : > { %v4403_v28 = vmul.f32 %v4402_v55, %v13009_v41  ;;  %v4548_v63 = vmul.f32 2.1237322e-06, %v13048_v7  ;;  %v4235_v39 = vadd.f32 0.18741608, %v4234_v31  ;;  %v4559_v8 = vmul.f32 3.8918573e-05, %v13048_v7 }
 0x4d0   : > { %v6541_v17 = vadd.f32 1.0, %v7658_v38  ;;  %v4091_v16 = vsub.f32 1.0, %v4090_v52  ;;  %v4247_v9 = vmul.f32 %v4246_v27, %v12986_v12  ;;  %v4393_v33 = vadd.f32 0.05243302, %v4392_v53 }
 0x4d1   : > { %v4404_v3 = vadd.f32 0.112945676, %v4403_v28  ;;  %v4549_v54 = vadd.f32 0.00028619796, %v4548_v63  ;;  %vm4095_vm1 = vweird.f32 %v8069_v50  ;;  %v4560_v49 = vadd.f32 0.001143296, %v4559_v8  ;;  %v2063_v63 = vpop.f32.mrf.mxu0 }
 0x4d2   : > { %v6641_v47 = vmul.f32 %v6541_v17, %v12998_v22  ;;  %v4092_v20 = vmul.f32 %v8069_v50, %v4091_v16  ;;  %v13062_v61 = vadd.f32 1.0, %v4247_v9  ;;  %v4394_v44 = vmul.f32 %v4393_v33, %v13009_v41  ;;  %vm4096_vm3 = vmor %vm4094_vm0, %vm4095_vm1  ;;  %v2136_v17 = vpop.f32.mrf.mxu1 }
 0x4d3   : > { %v4405_v10 = vmul.f32 %v4404_v3, %v13009_v41  ;;  %v4550_v26 = vmul.f32 %v4549_v54, %v13048_v7  ;;  %vm4099_vm2 = vcmp.eq.f32.partialorder %v4098_v13, 8.507059e+37  ;;  %v4236_v4 = vmul.f32 %v4235_v39, %v12986_v12 }
 0x4d4   : > { %6741 = vst [vmem:[%s8982_s18 + $0x118] sm:$0xff] %v6641_v47  ;;  %v4093_v51 = vadd.f32 %v8069_v50, %v4092_v20  ;;  %v4561_v22 = vmul.f32 %v4560_v49, %v13048_v7  ;;  %v4101_v34 = vor.u32 1.1754944e-38, %v4100_v48  ;;  %8070 = vrcp.f32 %v13062_v61  ;;  %v2206_v31 = vpop.f32.mrf.mxu2 }
 0x4d5   : > { %v13074_v45 = vadd.f32 %v13013_v23, %v2202_v21  ;;  %v2059_v0 = vadd.f32 %v2058_v14, %v12518_v60  ;;  %v4395_v58 = vadd.f32 0.18741608, %v4394_v44  ;;  %v4406_v56 = vadd.f32 0.4994258, %v4405_v10  ;;  %v13084_v14 = vpop.f32.mrf.mxu3 }
 0x4d6   : > { %v4097_v30 = vsel %vm4096_vm3, %v8069_v50, %v4093_v51  ;;  %v4551_v32 = vadd.f32 0.0036580483, %v4550_v26  ;;  %v2345_v19 = vmul.f32 0.5, %v12912_v59  ;;  %v13079_v42 = vmul.f32 0.5, %v12964_v29 }
 0x4d7   : > { %v4102_v12 = vsel %vm4099_vm2, %v4101_v34, %v4097_v30  ;;  %v4562_v1 = vadd.f32 0.014752088, %v4561_v22  ;;  %v4237_v2 = vadd.f32 1.1283791, %v4236_v4  ;;  %v4407_v11 = vmul.f32 %v4406_v56, %v13009_v41 }
 0x4d8   : > { %v4103_v36 = vmul.f32 %v4102_v12, %v13033_v57  ;;  %v4552_v23 = vmul.f32 %v4551_v32, %v13048_v7  ;;  %v4396_v5 = vmul.f32 %v4395_v58, %v13009_v41  ;;  %v13089_v59 = vmul.f32 0.70710677, %v13074_v45 }
 0x4d9   : > { %v4563_v40 = vmul.f32 %v4562_v1, %v13048_v7  ;;  %v2132_v29 = vadd.f32 %v13029_v25, %v2059_v0  ;;  %v4258_v57 = vand.u32 2147483647, %v13062_v61  ;;  %v13093_v13 = vadd.f32 1.0, %v4407_v11 }
 0x4da   : > { %v7662_v50 = vclamps-f32 %v4103_v36, 1.0  ;;  %v4553_v55 = vadd.f32 0.05243302, %v4552_v23  ;;  %v8071_v38 = vpop.eup %8070  ;;  %v4260_v52 = vand.u32 2147483648, %v13062_v61  ;;  %v4706_v41 = vmul.f32 %v13089_v59, %v13089_v59 }
 0x4db   : > { %v4564_v48 = vadd.f32 0.112945676, %v4563_v40  ;;  %v2205_v21 = vadd.f32 %v2204_v46, %v2132_v29  ;;  %v4238_v53 = vmul.f32 %v4237_v2, %v12973_v62  ;;  %v4250_v28 = vmul.f32 %v8071_v38, %v13062_v61  ;;  %v13150_v40 = vpop.f32.mrf.mxu1 }
 0x4dc   : > { %v6545_v27 = vadd.f32 1.0, %v7662_v50  ;;  %v13101_v25 = vmul.f32 0.5, %v12988_v43  ;;  %vm4254_vm4 = vweird.f32 %v13062_v61  ;;  %v4397_v16 = vadd.f32 1.1283791, %v4396_v5  ;;  %v13129_v34 = vpop.f32.mrf.mxu2  ;;  %v13148_v5 = vpop.f32.mrf.mxu0 }
 0x4dd   : > { %8072 = vrcp.f32 %v13093_v13  ;;  %v2061_v39 = vadd.f32 %v2060_v37, %v12518_v60  ;;  %v4251_v46 = vsub.f32 1.0, %v4250_v28  ;;  %v4554_v9 = vmul.f32 %v4553_v55, %v13048_v7  ;;  %v13131_v0 = vpop.f32.mrf.mxu3 }
 0x4de   : > { %v6645_v8 = vmul.f32 %v6545_v27, %v2345_v19  ;;  %v4565_v62 = vmul.f32 %v4564_v48, %v13048_v7  ;;  %vm13108_vm5 = vcmp.eq.f32.partialorder %v4258_v57, 8.507059e+37  ;;  %v4261_v43 = vor.u32 1.1754944e-38, %v4260_v52 }
 0x4df   : > { %v13112_v3 = vmin.f32 %v4706_v41, 16.0  ;;  %v13115_v54 = vadd.f32 %v13052_v35, %v2205_v21  ;;  %v4252_v47 = vmul.f32 %v8071_v38, %v4251_v46  ;;  %vm4255_vm6 = vweird.f32 %v8071_v38 }
 0x4e0   : > { %6745 = vst [vmem:[%s8982_s18 + $0x138] sm:$0xff] %v6645_v8  ;;  %v4555_v20 = vadd.f32 0.18741608, %v4554_v9  ;;  %v4566_v49 = vadd.f32 0.4994258, %v4565_v62  ;;  %v13119_v37 = vmul.f32 %v4397_v16, %v12994_v15  ;;  %v2134_v26 = vadd.f32 %v13060_v24, %v2061_v39  ;;  %vm4256_vm7 = vmor %vm4254_vm4, %vm4255_vm6 }
 0x4e1   : > { %v4708_v44 = vmul.f32 2.1237322e-06, %v13112_v3  ;;  %v4719_v10 = vmul.f32 3.8918573e-05, %v13112_v3  ;;  %v4253_v51 = vadd.f32 %v8071_v38, %v4252_v47  ;;  %v4418_v4 = vand.u32 2147483647, %v13093_v13 }
 0x4e2   : > { %v4567_v35 = vmul.f32 %v4566_v49, %v13048_v7  ;;  %v13127_v22 = vmul.f32 0.70710677, %v13115_v54  ;;  %v4556_v30 = vmul.f32 %v4555_v20, %v13048_v7  ;;  %v2207_v56 = vadd.f32 %v2206_v31, %v2134_v26 }
 0x4e3   : > { %v8073_v15 = vpop.eup %8072  ;;  %v4709_v58 = vadd.f32 0.00028619796, %v4708_v44  ;;  %v4720_v24 = vadd.f32 0.001143296, %v4719_v10  ;;  %v4257_v32 = vsel %vm4256_vm7, %v8071_v38, %v4253_v51  ;;  %v4420_v12 = vand.u32 2147483648, %v13093_v13 }
 0x4e4   : > { %v4410_v19 = vmul.f32 %v8073_v15, %v13093_v13  ;;  %v2064_v1 = vadd.f32 %v2063_v63, %v12518_v60  ;;  %v4262_v36 = vsel %vm13108_vm5, %v4261_v43, %v4257_v32  ;;  %v13141_v2 = vadd.f32 1.0, %v4567_v35  ;;  %v13198_v32 = vpop.f32.mrf.mxu0 }
 0x4e5   : > { %v4710_v61 = vmul.f32 %v4709_v58, %v13112_v3  ;;  %v4721_v11 = vmul.f32 %v4720_v24, %v13112_v3  ;;  %v4263_v7 = vmul.f32 %v4262_v36, %v4238_v53  ;;  %vm4414_vm8 = vweird.f32 %v13093_v13  ;;  %v13176_v13 = vpop.f32.mrf.mxu2  ;;  %v13178_v43 = vpop.f32.mrf.mxu3 }
 0x4e6   : > { %v4411_v23 = vsub.f32 1.0, %v4410_v19  ;;  %v4866_v31 = vmul.f32 %v13127_v22, %v13127_v22  ;;  %vm4415_vm9 = vweird.f32 %v8073_v15  ;;  %v4557_v29 = vadd.f32 1.1283791, %v4556_v30  ;;  %v13200_v19 = vpop.f32.mrf.mxu1 }
 0x4e7   : > { %8074 = vrcp.f32 %v13141_v2  ;;  %v13154_v50 = vadd.f32 %v13084_v14, %v2207_v56  ;;  %v7666_v57 = vclamps-f32 %v4263_v7, 1.0  ;;  %v4711_v38 = vadd.f32 0.0036580483, %v4710_v61  ;;  %vm4416_vm11 = vmor %vm4414_vm8, %vm4415_vm9 }
 0x4e8   : > { %v4412_v55 = vmul.f32 %v8073_v15, %v4411_v23  ;;  %v4722_v52 = vadd.f32 0.014752088, %v4721_v11  ;;  %vm13156_vm10 = vcmp.eq.f32.partialorder %v4418_v4, 8.507059e+37  ;;  %v4421_v41 = vor.u32 1.1754944e-38, %v4420_v12 }
 0x4e9   : > { %v13160_v21 = vmin.f32 %v4866_v31, 16.0  ;;  %v2137_v27 = vadd.f32 %v2136_v17, %v2064_v1  ;;  %v6549_v53 = vadd.f32 1.0, %v7666_v57  ;;  %v4712_v63 = vmul.f32 %v4711_v38, %v13112_v3 }
 0x4ea   : > { %v4413_v28 = vadd.f32 %v8073_v15, %v4412_v55  ;;  %v4723_v16 = vmul.f32 %v4722_v52, %v13112_v3  ;;  %v4558_v14 = vmul.f32 %v4557_v29, %v13036_v6  ;;  %v13171_v46 = vmul.f32 0.70710677, %v13154_v50 }
 0x4eb   : > { %v4868_v39 = vmul.f32 2.1237322e-06, %v13160_v21  ;;  %v4879_v8 = vmul.f32 3.8918573e-05, %v13160_v21  ;;  %v6649_v17 = vmul.f32 %v6549_v53, %v13079_v42  ;;  %vm4574_vm12 = vweird.f32 %v13141_v2 }
 0x4ec   : > { %v4417_v9 = vsel %vm4416_vm11, %v8073_v15, %v4413_v28  ;;  %v4578_v62 = vand.u32 2147483647, %v13141_v2  ;;  %v4724_v33 = vadd.f32 0.112945676, %v4723_v16  ;;  %v5026_v44 = vmul.f32 %v13171_v46, %v13171_v46 }
 0x4ed   : > { %v8075_v6 = vpop.eup %8074  ;;  %v4422_v47 = vsel %vm13156_vm10, %v4421_v41, %v4417_v9  ;;  %v4869_v20 = vadd.f32 0.00028619796, %v4868_v39  ;;  %v4880_v49 = vadd.f32 0.001143296, %v4879_v8  ;;  %6749 = vst [vmem:[%s8982_s18 + $0x158] sm:$0xff] %v6649_v17  ;;  %v4580_v26 = vand.u32 2147483648, %v13141_v2  ;;  %v13219_v8 = vpop.f32.mrf.mxu2 }
 0x4ee   : > { %v4423_v42 = vmul.f32 %v4422_v47, %v13119_v37  ;;  %v4570_v10 = vmul.f32 %v8075_v6, %v13141_v2  ;;  %v4713_v51 = vadd.f32 0.05243302, %v4712_v63  ;;  %v4725_v4 = vmul.f32 %v4724_v33, %v13112_v3  ;;  %v13221_v17 = vpop.f32.mrf.mxu3 }
 0x4ef   : > { %v4870_v35 = vmul.f32 %v4869_v20, %v13160_v21  ;;  %v4881_v15 = vmul.f32 %v4880_v49, %v13160_v21  ;;  %v13191_v30 = vmin.f32 %v5026_v44, 16.0  ;;  %vm13193_vm13 = vcmp.eq.f32.partialorder %v4578_v62, 8.507059e+37 }
 0x4f0   : > { %v7670_v58 = vclamps-f32 %v4423_v42, 1.0  ;;  %v4571_v24 = vsub.f32 1.0, %v4570_v10  ;;  %v2210_v37 = vadd.f32 %v13129_v34, %v2137_v27  ;;  %vm4575_vm14 = vweird.f32 %v8075_v6 }
 0x4f1   : > { %v4726_v12 = vadd.f32 0.4994258, %v4725_v4  ;;  %v4871_v1 = vadd.f32 0.0036580483, %v4870_v35  ;;  %v4882_v36 = vadd.f32 0.014752088, %v4881_v15  ;;  %v4714_v7 = vmul.f32 %v4713_v51, %v13112_v3  ;;  %vm4576_vm15 = vmor %vm4574_vm12, %vm4575_vm14 }
 0x4f2   : > { %v6553_v61 = vadd.f32 1.0, %v7670_v58  ;;  %v4572_v11 = vmul.f32 %v8075_v6, %v4571_v24  ;;  %v5028_v23 = vmul.f32 2.1237322e-06, %v13191_v30  ;;  %v5039_v57 = vmul.f32 3.8918573e-05, %v13191_v30 }
 0x4f3   : > { %v4727_v31 = vmul.f32 %v4726_v12, %v13112_v3  ;;  %v4872_v29 = vmul.f32 %v4871_v1, %v13160_v21  ;;  %v4883_v34 = vmul.f32 %v4882_v36, %v13160_v21  ;;  %v4581_v52 = vor.u32 1.1754944e-38, %v4580_v26  ;;  %v13241_v26 = vpop.f32.mrf.mxu1 }
 0x4f4   : > { %v6653_v55 = vmul.f32 %v6553_v61, %v13101_v25  ;;  %v4573_v38 = vadd.f32 %v8075_v6, %v4572_v11  ;;  %v5029_v48 = vadd.f32 0.00028619796, %v5028_v23  ;;  %v13215_v28 = vadd.f32 %v13131_v0, %v2210_v37 }
 0x4f5   : > { %v13212_v41 = vadd.f32 1.0, %v4727_v31  ;;  %v4873_v27 = vadd.f32 0.05243302, %v4872_v29  ;;  %v4884_v53 = vadd.f32 0.112945676, %v4883_v34  ;;  %v2066_v9 = vadd.f32 %v13148_v5, %v12518_v60 }
 0x4f6   : > { %6753 = vst [vmem:[%s8982_s18 + $0x178] sm:$0xff] %v6653_v55  ;;  %v4577_v63 = vsel %vm4576_vm15, %v8075_v6, %v4573_v38  ;;  %v4715_v16 = vadd.f32 0.18741608, %v4714_v7  ;;  %v5030_v39 = vmul.f32 %v5029_v48, %v13191_v30  ;;  %v5040_v25 = vadd.f32 0.001143296, %v5039_v57  ;;  %v13267_v55 = vpop.f32.mrf.mxu2  ;;  %v13269_v38 = vpop.f32.mrf.mxu3 }
 0x4f7   : > { %v4582_v2 = vsel %vm13193_vm13, %v4581_v52, %v4577_v63  ;;  %8076 = vrcp.f32 %v13212_v41  ;;  %v4874_v62 = vmul.f32 %v4873_v27, %v13160_v21  ;;  %v4885_v33 = vmul.f32 %v4884_v53, %v13160_v21 }
 0x4f8   : > { %v4583_v0 = vmul.f32 %v4582_v2, %v4558_v14  ;;  %v2357_v6 = vmul.f32 0.5, %v13011_v18  ;;  %v5031_v47 = vadd.f32 0.0036580483, %v5030_v39  ;;  %v5041_v20 = vmul.f32 %v5040_v25, %v13191_v30  ;;  %v13239_v14 = vpop.f32.mrf.mxu0 }
 0x4f9   : > { %v13233_v49 = vmul.f32 0.70710677, %v13215_v28  ;;  %v13236_v42 = vmul.f32 0.5, %v13074_v45  ;;  %v4716_v10 = vmul.f32 %v4715_v16, %v13112_v3  ;;  %v4886_v5 = vadd.f32 0.4994258, %v4885_v33 }
 0x4fa   : > { %v7674_v44 = vclamps-f32 %v4583_v0, 1.0  ;;  %v5032_v51 = vmul.f32 %v5031_v47, %v13191_v30  ;;  %v5042_v18 = vadd.f32 0.014752088, %v5041_v20  ;;  %v2139_v35 = vadd.f32 %v13150_v40, %v2066_v9 }
 0x4fb   : > { %v5186_v4 = vmul.f32 %v13233_v49, %v13233_v49  ;;  %v13248_v58 = vmul.f32 0.5, %v13115_v54  ;;  %v4875_v45 = vadd.f32 0.18741608, %v4874_v62  ;;  %v4887_v3 = vmul.f32 %v4886_v5, %v13160_v21  ;;  %v13284_v62 = vpop.f32.mrf.mxu1 }
 0x4fc   : > { %v6557_v15 = vadd.f32 1.0, %v7674_v44  ;;  %v5033_v56 = vadd.f32 0.05243302, %v5032_v51  ;;  %v5043_v37 = vmul.f32 %v5042_v18, %v13191_v30  ;;  %v2212_v1 = vadd.f32 %v13176_v13, %v2139_v35 }
 0x4fd   : > { %v8077_v24 = vpop.eup %8076  ;;  %v13252_v12 = vmin.f32 %v5186_v4, 16.0  ;;  %v4717_v61 = vadd.f32 1.1283791, %v4716_v10  ;;  %v13257_v11 = vmul.f32 0.5, %v13154_v50  ;;  %v13259_v54 = vadd.f32 1.0, %v4887_v3 }
 0x4fe   : > { %v6657_v36 = vmul.f32 %v6557_v15, %v2357_v6  ;;  %v4730_v40 = vmul.f32 %v8077_v24, %v13212_v41  ;;  %v5034_v7 = vmul.f32 %v5033_v56, %v13191_v30  ;;  %v5044_v23 = vadd.f32 0.112945676, %v5043_v37 }
 0x4ff   : > { %v5188_v31 = vmul.f32 2.1237322e-06, %v13252_v12  ;;  %v4738_v34 = vand.u32 2147483647, %v13212_v41  ;;  %v4876_v13 = vmul.f32 %v4875_v45, %v13160_v21  ;;  %v5199_v57 = vmul.f32 3.8918573e-05, %v13252_v12 }
 0x500   : > { %6757 = vst [vmem:[%s8982_s18 + $0x198] sm:$0xff] %v6657_v36  ;;  %v4731_v29 = vsub.f32 1.0, %v4730_v40  ;;  %v4740_v50 = vand.u32 2147483648, %v13212_v41  ;;  %8078 = vrcp.f32 %v13259_v54  ;;  %v13274_v52 = vadd.f32 %v13178_v43, %v2212_v1  ;;  %v13282_v0 = vpop.f32.mrf.mxu0 }
 0x501   : > { %v2069_v48 = vadd.f32 %v13198_v32, %v12518_v60  ;;  %vm4735_vm0 = vweird.f32 %v8077_v24  ;;  %v5045_v21 = vmul.f32 %v5044_v23, %v13191_v30  ;;  %v5189_v53 = vadd.f32 0.00028619796, %v5188_v31 }
 0x502   : > { %v4732_v27 = vmul.f32 %v8077_v24, %v4731_v29  ;;  %v4718_v63 = vmul.f32 %v4717_v61, %v13089_v59  ;;  %vm4734_vm1 = vweird.f32 %v13212_v41  ;;  %v5035_v16 = vadd.f32 0.18741608, %v5034_v7  ;;  %v13306_v61 = vpop.f32.mrf.mxu2 }
 0x503   : > { %v5200_v39 = vadd.f32 0.001143296, %v5199_v57  ;;  %v4877_v2 = vadd.f32 1.1283791, %v4876_v13  ;;  %v5046_v9 = vadd.f32 0.4994258, %v5045_v21  ;;  %v5190_v43 = vmul.f32 %v5189_v53, %v13252_v12  ;;  %vm4736_vm2 = vmor %vm4734_vm1, %vm4735_vm0  ;;  %v13323_v21 = vpop.f32.mrf.mxu1 }
 0x504   : > { %v4733_v25 = vadd.f32 %v8077_v24, %v4732_v27  ;;  %v4741_v32 = vor.u32 1.1754944e-38, %v4740_v50  ;;  %v13288_v6 = vmul.f32 0.70710677, %v13274_v52  ;;  %v2142_v59 = vadd.f32 %v13200_v19, %v2069_v48 }
 0x505   : > { %v5201_v33 = vmul.f32 %v5200_v39, %v13252_v12  ;;  %vm4739_vm3 = vcmp.eq.f32.partialorder %v4738_v34, 8.507059e+37  ;;  %v5047_v47 = vmul.f32 %v5046_v9, %v13191_v30  ;;  %v5191_v20 = vadd.f32 0.0036580483, %v5190_v43 }
 0x506   : > { %v4737_v41 = vsel %vm4736_vm2, %v8077_v24, %v4733_v25  ;;  %v8079_v44 = vpop.eup %8078  ;;  %v5036_v5 = vmul.f32 %v5035_v16, %v13191_v30  ;;  %v5346_v18 = vmul.f32 %v13288_v6, %v13288_v6  ;;  %v4878_v35 = vmul.f32 %v4877_v2, %v13127_v22  ;;  %v13308_v22 = vpop.f32.mrf.mxu3 }
 0x507   : > { %v4742_v10 = vsel %vm4739_vm3, %v4741_v32, %v4737_v41  ;;  %v5202_v51 = vadd.f32 0.014752088, %v5201_v33  ;;  %v4890_v15 = vmul.f32 %v8079_v44, %v13259_v54  ;;  %v2215_v19 = vadd.f32 %v13219_v8, %v2142_v59 }
 0x508   : > { %v4743_v4 = vmul.f32 %v4742_v10, %v4718_v63  ;;  %v13298_v45 = vadd.f32 1.0, %v5047_v47  ;;  %v5192_v3 = vmul.f32 %v5191_v20, %v13252_v12  ;;  %v13302_v56 = vmin.f32 %v5346_v18, 16.0  ;;  %v13321_v27 = vpop.f32.mrf.mxu0 }
 0x509   : > { %v5203_v24 = vmul.f32 %v5202_v51, %v13252_v12  ;;  %v4891_v37 = vsub.f32 1.0, %v4890_v15  ;;  %v4898_v1 = vand.u32 2147483647, %v13259_v54  ;;  %v4900_v36 = vand.u32 2147483648, %v13259_v54 }
 0x50a   : > { %v7678_v30 = vclamps-f32 %v4743_v4, 1.0  ;;  %vm4895_vm4 = vweird.f32 %v8079_v44  ;;  %v5037_v8 = vadd.f32 1.1283791, %v5036_v5  ;;  %8080 = vrcp.f32 %v13298_v45  ;;  %v13342_v15 = vpop.f32.mrf.mxu2 }
 0x50b   : > { %v2071_v40 = vadd.f32 %v13239_v14, %v12518_v60  ;;  %v4892_v23 = vmul.f32 %v8079_v44, %v4891_v37  ;;  %v5193_v31 = vadd.f32 0.05243302, %v5192_v3  ;;  %v5204_v29 = vadd.f32 0.112945676, %v5203_v24 }
 0x50c   : > { %v6561_v7 = vadd.f32 1.0, %v7678_v30  ;;  %vm4894_vm5 = vweird.f32 %v13259_v54  ;;  %v5348_v34 = vmul.f32 2.1237322e-06, %v13302_v56  ;;  %v5359_v13 = vmul.f32 3.8918573e-05, %v13302_v56 }
 0x50d   : > { %v13317_v57 = vadd.f32 %v13221_v17, %v2215_v19  ;;  %v4893_v48 = vadd.f32 %v8079_v44, %v4892_v23  ;;  %vm4899_vm6 = vcmp.eq.f32.partialorder %v4898_v1, 8.507059e+37  ;;  %v5205_v14 = vmul.f32 %v5204_v29, %v13252_v12  ;;  %vm4896_vm7 = vmor %vm4894_vm5, %vm4895_vm4 }
 0x50e   : > { %v6661_v50 = vmul.f32 %v6561_v7, %v13236_v42  ;;  %v4901_v54 = vor.u32 1.1754944e-38, %v4900_v36  ;;  %v5038_v53 = vmul.f32 %v5037_v8, %v13171_v46  ;;  %v5349_v63 = vadd.f32 0.00028619796, %v5348_v34 }
 0x50f   : > { %v5360_v16 = vadd.f32 0.001143296, %v5359_v13  ;;  %v4897_v17 = vsel %vm4896_vm7, %v8079_v44, %v4893_v48  ;;  %v5194_v39 = vmul.f32 %v5193_v31, %v13252_v12  ;;  %v5206_v42 = vadd.f32 0.4994258, %v5205_v14 }
 0x510   : > { %6761 = vst [vmem:[%s8982_s18 + $0x1b8] sm:$0xff] %v6661_v50  ;;  %v2144_v25 = vadd.f32 %v13241_v26, %v2071_v40  ;;  %v8081_v2 = vpop.eup %8080  ;;  %v4902_v9 = vsel %vm4899_vm6, %v4901_v54, %v4897_v17  ;;  %v5350_v43 = vmul.f32 %v5349_v63, %v13302_v56  ;;  %v13333_v33 = vmul.f32 0.70710677, %v13317_v57  ;;  %v13364_v29 = vpop.f32.mrf.mxu0 }
 0x511   : > { %v5361_v32 = vmul.f32 %v5360_v16, %v13302_v56  ;;  %v4903_v59 = vmul.f32 %v4902_v9, %v4878_v35  ;;  %v5050_v46 = vmul.f32 %v8081_v2, %v13298_v45  ;;  %v5058_v41 = vand.u32 2147483647, %v13298_v45  ;;  %v13344_v35 = vpop.f32.mrf.mxu3 }
 0x512   : > { %v2217_v47 = vadd.f32 %v13267_v55, %v2144_v25  ;;  %v5207_v20 = vmul.f32 %v5206_v42, %v13252_v12  ;;  %v5351_v44 = vadd.f32 0.0036580483, %v5350_v43  ;;  %v5506_v10 = vmul.f32 %v13333_v33, %v13333_v33 }
 0x513   : > { %v5362_v26 = vadd.f32 0.014752088, %v5361_v32  ;;  %v7682_v5 = vclamps-f32 %v4903_v59, 1.0  ;;  %v5051_v51 = vsub.f32 1.0, %v5050_v46  ;;  %v5060_v18 = vand.u32 2147483648, %v13298_v45 }
 0x514   : > { %v5195_v4 = vadd.f32 0.18741608, %v5194_v39  ;;  %v13346_v19 = vadd.f32 1.0, %v5207_v20  ;;  %v5352_v55 = vmul.f32 %v5351_v44, %v13302_v56  ;;  %v13350_v24 = vmin.f32 %v5506_v10, 16.0 }
 0x515   : > { %v5363_v3 = vmul.f32 %v5362_v26, %v13302_v56  ;;  %v6565_v30 = vadd.f32 1.0, %v7682_v5  ;;  %v5052_v37 = vmul.f32 %v8081_v2, %v5051_v51  ;;  %vm5055_vm8 = vweird.f32 %v8081_v2 }
 0x516   : > { %v13353_v1 = vadd.f32 %v13269_v38, %v2217_v47  ;;  %vm5054_vm9 = vweird.f32 %v13298_v45  ;;  %vm13356_vm10 = vcmp.eq.f32.partialorder %v5058_v41, 8.507059e+37  ;;  %8082 = vrcp.f32 %v13346_v19  ;;  %v13366_v38 = vpop.f32.mrf.mxu1 }
 0x517   : > { %v2074_v8 = vadd.f32 %v13282_v0, %v12518_v60  ;;  %v6665_v40 = vmul.f32 %v6565_v30, %v13248_v58  ;;  %v5053_v7 = vadd.f32 %v8081_v2, %v5052_v37  ;;  %v5353_v23 = vadd.f32 0.05243302, %v5352_v55  ;;  %vm5056_vm11 = vmor %vm5054_vm9, %vm5055_vm8 }
 0x518   : > { %v5364_v31 = vadd.f32 0.112945676, %v5363_v3  ;;  %v5061_v45 = vor.u32 1.1754944e-38, %v5060_v18  ;;  %v5196_v34 = vmul.f32 %v5195_v4, %v13252_v12  ;;  %v5508_v13 = vmul.f32 2.1237322e-06, %v13350_v24 }
 0x519   : > { %v5519_v50 = vmul.f32 3.8918573e-05, %v13350_v24  ;;  %6765 = vst [vmem:[%s8982_s18 + $0x1d8] sm:$0xff] %v6665_v40  ;;  %v5057_v48 = vsel %vm5056_vm11, %v8081_v2, %v5053_v7  ;;  %v5354_v0 = vmul.f32 %v5353_v23, %v13302_v56  ;;  %v13375_v14 = vmul.f32 0.70710677, %v13353_v1  ;;  %v13390_v20 = vpop.f32.mrf.mxu3  ;;  %v13406_v7 = vpop.f32.mrf.mxu0 }
 0x51a   : > { %v5365_v58 = vmul.f32 %v5364_v31, %v13302_v56  ;;  %v5062_v54 = vsel %vm13356_vm10, %v5061_v45, %v5057_v48  ;;  %v5509_v63 = vadd.f32 0.00028619796, %v5508_v13  ;;  %v2147_v12 = vadd.f32 %v13284_v62, %v2074_v8 }
 0x51b   : > { %v5520_v16 = vadd.f32 0.001143296, %v5519_v50  ;;  %v5063_v17 = vmul.f32 %v5062_v54, %v5038_v53  ;;  %v5355_v39 = vadd.f32 0.18741608, %v5354_v0  ;;  %v5666_v25 = vmul.f32 %v13375_v14, %v13375_v14  ;;  %v13388_v53 = vpop.f32.mrf.mxu2 }
 0x51c   : > { %v5366_v42 = vadd.f32 0.4994258, %v5365_v58  ;;  %v8083_v2 = vpop.eup %8082  ;;  %v5197_v9 = vadd.f32 1.1283791, %v5196_v34  ;;  %v5218_v43 = vand.u32 2147483647, %v13346_v19  ;;  %v5510_v32 = vmul.f32 %v5509_v63, %v13350_v24 }
 0x51d   : > { %v5521_v59 = vmul.f32 %v5520_v16, %v13350_v24  ;;  %v7686_v46 = vclamps-f32 %v5063_v17, 1.0  ;;  %v5210_v41 = vmul.f32 %v8083_v2, %v13346_v19  ;;  %v5220_v47 = vand.u32 2147483648, %v13346_v19 }
 0x51e   : > { %v2220_v62 = vadd.f32 %v13306_v61, %v2147_v12  ;;  %v5367_v44 = vmul.f32 %v5366_v42, %v13302_v56  ;;  %v5511_v26 = vadd.f32 0.0036580483, %v5510_v32  ;;  %v13393_v5 = vmin.f32 %v5666_v25, 16.0  ;;  %v13408_v23 = vpop.f32.mrf.mxu1 }
 0x51f   : > { %v5522_v10 = vadd.f32 0.014752088, %v5521_v59  ;;  %v6569_v51 = vadd.f32 1.0, %v7686_v46  ;;  %v5211_v18 = vsub.f32 1.0, %v5210_v41  ;;  %vm5215_vm12 = vweird.f32 %v8083_v2 }
 0x520   : > { %v5356_v4 = vmul.f32 %v5355_v39, %v13302_v56  ;;  %v13396_v55 = vadd.f32 1.0, %v5367_v44  ;;  %v5512_v61 = vmul.f32 %v5511_v26, %v13350_v24  ;;  %v5668_v30 = vmul.f32 2.1237322e-06, %v13393_v5 }
 0x521   : > { %v5523_v3 = vmul.f32 %v5522_v10, %v13350_v24  ;;  %v6669_v37 = vmul.f32 %v6569_v51, %v13257_v11  ;;  %v5212_v36 = vmul.f32 %v8083_v2, %v5211_v18  ;;  %v5679_v8 = vmul.f32 3.8918573e-05, %v13393_v5  ;;  %v13429_v25 = vpop.f32.mrf.mxu3 }
 0x522   : > { %v13404_v40 = vadd.f32 %v13308_v22, %v2220_v62  ;;  %vm5214_vm13 = vweird.f32 %v13346_v19  ;;  %v5221_v56 = vor.u32 1.1754944e-38, %v5220_v47  ;;  %8084 = vrcp.f32 %v13396_v55 }
 0x523   : > { %6769 = vst [vmem:[%s8982_s18 + $0x1f8] sm:$0xff] %v6669_v37  ;;  %v5213_v31 = vadd.f32 %v8083_v2, %v5212_v36  ;;  %v5513_v45 = vadd.f32 0.05243302, %v5512_v61  ;;  %v5524_v34 = vadd.f32 0.112945676, %v5523_v3  ;;  %v2076_v11 = vadd.f32 %v13321_v27, %v12518_v60  ;;  %vm5216_vm14 = vmor %vm5214_vm13, %vm5215_vm12  ;;  %v13427_v42 = vpop.f32.mrf.mxu2 }
 0x524   : > { %v5198_v13 = vmul.f32 %v5197_v9, %v13233_v49  ;;  %v5357_v22 = vadd.f32 1.1283791, %v5356_v4  ;;  %v5669_v50 = vadd.f32 0.00028619796, %v5668_v30  ;;  %v5680_v48 = vadd.f32 0.001143296, %v5679_v8  ;;  %v13443_v4 = vpop.f32.mrf.mxu0 }
 0x525   : > { %v5217_v0 = vsel %vm5216_vm14, %v8083_v2, %v5213_v31  ;;  %vm5219_vm15 = vcmp.eq.f32.partialorder %v5218_v43, 8.507059e+37  ;;  %v5525_v19 = vmul.f32 %v5524_v34, %v13350_v24  ;;  %v13419_v58 = vmul.f32 0.70710677, %v13404_v40 }
 0x526   : > { %v5222_v54 = vsel %vm5219_vm15, %v5221_v56, %v5217_v0  ;;  %v5514_v63 = vmul.f32 %v5513_v45, %v13350_v24  ;;  %v5670_v16 = vmul.f32 %v5669_v50, %v13393_v5  ;;  %v5681_v27 = vmul.f32 %v5680_v48, %v13393_v5 }
 0x527   : > { %v5223_v49 = vmul.f32 %v5222_v54, %v5198_v13  ;;  %v5526_v12 = vadd.f32 0.4994258, %v5525_v19  ;;  %v5826_v17 = vmul.f32 %v13419_v58, %v13419_v58  ;;  %v2149_v39 = vadd.f32 %v13323_v21, %v2076_v11 }
 0x528   : > { %v8085_v2 = vpop.eup %8084  ;;  %v2373_v9 = vmul.f32 0.5, %v13215_v28  ;;  %v5358_v43 = vmul.f32 %v5357_v22, %v13288_v6  ;;  %v5671_v32 = vadd.f32 0.0036580483, %v5670_v16  ;;  %v5682_v59 = vadd.f32 0.014752088, %v5681_v27 }
 0x529   : > { %v7690_v46 = vclamps-f32 %v5223_v49, 1.0  ;;  %v5370_v41 = vmul.f32 %v8085_v2, %v13396_v55  ;;  %v2222_v47 = vadd.f32 %v13342_v15, %v2149_v39  ;;  %v2079_v62 = vadd.f32 %v13364_v29, %v12518_v60  ;;  %v13445_v15 = vpop.f32.mrf.mxu1  ;;  %v13465_v54 = vpop.f32.mrf.mxu3 }
 0x52a   : > { %v5527_v21 = vmul.f32 %v5526_v12, %v13350_v24  ;;  %v5672_v44 = vmul.f32 %v5671_v32, %v13393_v5  ;;  %v5683_v26 = vmul.f32 %v5682_v59, %v13393_v5  ;;  %v13440_v10 = vmin.f32 %v5826_v17, 16.0 }
 0x52b   : > { %v6573_v28 = vadd.f32 1.0, %v7690_v46  ;;  %v5371_v6 = vsub.f32 1.0, %v5370_v41  ;;  %v5378_v51 = vand.u32 2147483647, %v13396_v55  ;;  %v5515_v18 = vadd.f32 0.18741608, %v5514_v63 }
 0x52c   : > { %v5380_v29 = vand.u32 2147483648, %v13396_v55  ;;  %v13448_v61 = vadd.f32 1.0, %v5527_v21  ;;  %v5673_v3 = vadd.f32 0.05243302, %v5672_v44  ;;  %v5684_v30 = vadd.f32 0.112945676, %v5683_v26  ;;  %v2085_v39 = vpop.f32.mrf.mxu0 }
 0x52d   : > { %v6673_v37 = vmul.f32 %v6573_v28, %v2373_v9  ;;  %v5372_v36 = vmul.f32 %v8085_v2, %v5371_v6  ;;  %vm5375_vm0 = vweird.f32 %v8085_v2  ;;  %v5828_v8 = vmul.f32 2.1237322e-06, %v13440_v10 }
 0x52e   : > { %vm5374_vm1 = vweird.f32 %v13396_v55  ;;  %8086 = vrcp.f32 %v13448_v61  ;;  %v13454_v56 = vadd.f32 %v13344_v35, %v2222_v47  ;;  %v2152_v31 = vadd.f32 %v13366_v38, %v2079_v62  ;;  %v13463_v38 = vpop.f32.mrf.mxu2 }
 0x52f   : > { %6773 = vst [vmem:[%s8982_s18 + $0x218] sm:$0xff] %v6673_v37  ;;  %v5373_v45 = vadd.f32 %v8085_v2, %v5372_v36  ;;  %v5674_v34 = vmul.f32 %v5673_v3, %v13393_v5  ;;  %v5685_v11 = vmul.f32 %v5684_v30, %v13393_v5  ;;  %v5829_v13 = vadd.f32 0.00028619796, %v5828_v8  ;;  %vm5376_vm2 = vmor %vm5374_vm1, %vm5375_vm0 }
 0x530   : > { %vm5379_vm3 = vcmp.eq.f32.partialorder %v5378_v51, 8.507059e+37  ;;  %v5381_v22 = vor.u32 1.1754944e-38, %v5380_v29  ;;  %v5516_v50 = vmul.f32 %v5515_v18, %v13350_v24  ;;  %v5839_v55 = vmul.f32 3.8918573e-05, %v13440_v10 }
 0x531   : > { %v5377_v48 = vsel %vm5376_vm2, %v8085_v2, %v5373_v45  ;;  %v5675_v0 = vadd.f32 0.18741608, %v5674_v34  ;;  %v5686_v35 = vadd.f32 0.4994258, %v5685_v11  ;;  %v5830_v19 = vmul.f32 %v5829_v13, %v13440_v10  ;;  %v2158_v2 = vpop.f32.mrf.mxu1  ;;  %v2304_v8 = vpop.f32.mrf.mxu3 }
 0x532   : > { %v5382_v63 = vsel %vm5379_vm3, %v5381_v22, %v5377_v48  ;;  %v5840_v16 = vadd.f32 0.001143296, %v5839_v55  ;;  %v13468_v27 = vmul.f32 0.70710677, %v13454_v56  ;;  %v2225_v17 = vadd.f32 %v13388_v53, %v2152_v31 }
 0x533   : > { %v5383_v49 = vmul.f32 %v5382_v63, %v5358_v43  ;;  %v5687_v12 = vmul.f32 %v5686_v35, %v13393_v5  ;;  %v5831_v24 = vadd.f32 0.0036580483, %v5830_v19  ;;  %v2377_v32 = vmul.f32 0.5, %v13274_v52 }
 0x534   : > { %v8087_v9 = vpop.eup %8086  ;;  %v5517_v59 = vadd.f32 1.1283791, %v5516_v50  ;;  %v5841_v46 = vmul.f32 %v5840_v16, %v13440_v10  ;;  %v5986_v41 = vmul.f32 %v13468_v27, %v13468_v27  ;;  %v13477_v62 = vmul.f32 0.5, %v13317_v57 }
 0x535   : > { %v7694_v47 = vclamps-f32 %v5383_v49, 1.0  ;;  %v5530_v43 = vmul.f32 %v8087_v9, %v13448_v61  ;;  %v5676_v21 = vmul.f32 %v5675_v0, %v13393_v5  ;;  %v13481_v53 = vadd.f32 1.0, %v5687_v12 }
 0x536   : > { %v5832_v44 = vmul.f32 %v5831_v24, %v13440_v10  ;;  %v5842_v26 = vadd.f32 0.014752088, %v5841_v46  ;;  %v13484_v52 = vmin.f32 %v5986_v41, 16.0  ;;  %v5538_v51 = vand.u32 2147483647, %v13448_v61  ;;  %v2231_v36 = vpop.f32.mrf.mxu2 }
 0x537   : > { %v6577_v28 = vadd.f32 1.0, %v7694_v47  ;;  %v5531_v6 = vsub.f32 1.0, %v5530_v43  ;;  %v13488_v18 = vadd.f32 %v13390_v20, %v2225_v17  ;;  %v5518_v57 = vmul.f32 %v5517_v59, %v13333_v33 }
 0x538   : > { %vm5535_vm4 = vweird.f32 %v8087_v9  ;;  %v5540_v5 = vand.u32 2147483648, %v13448_v61  ;;  %8088 = vrcp.f32 %v13481_v53  ;;  %v5677_v30 = vadd.f32 1.1283791, %v5676_v21 }
 0x539   : > { %v6677_v29 = vmul.f32 %v6577_v28, %v2377_v32  ;;  %v5532_v3 = vmul.f32 %v8087_v9, %v5531_v6  ;;  %v5843_v37 = vmul.f32 %v5842_v26, %v13440_v10  ;;  %vm5534_vm5 = vweird.f32 %v13448_v61 }
 0x53a   : > { %v5833_v31 = vadd.f32 0.05243302, %v5832_v44  ;;  %v5988_v20 = vmul.f32 2.1237322e-06, %v13484_v52  ;;  %v5999_v45 = vmul.f32 3.8918573e-05, %v13484_v52  ;;  %vm5536_vm7 = vmor %vm5534_vm5, %vm5535_vm4  ;;  %v2081_v61 = vadd.f32 %v13406_v7, %v12518_v60 }
 0x53b   : > { %6777 = vst [vmem:[%s8982_s18 + $0x238] sm:$0xff] %v6677_v29  ;;  %v5533_v33 = vadd.f32 %v8087_v9, %v5532_v3  ;;  %vm5539_vm6 = vcmp.eq.f32.partialorder %v5538_v51, 8.507059e+37  ;;  %v5844_v34 = vadd.f32 0.112945676, %v5843_v37  ;;  %v13499_v11 = vmul.f32 0.70710677, %v13488_v18 }
 0x53c   : > { %v5541_v13 = vor.u32 1.1754944e-38, %v5540_v5  ;;  %v5989_v22 = vadd.f32 0.00028619796, %v5988_v20  ;;  %v6000_v50 = vadd.f32 0.001143296, %v5999_v45  ;;  %v5678_v48 = vmul.f32 %v5677_v30, %v13375_v14 }
 0x53d   : > { %v5537_v55 = vsel %vm5536_vm7, %v8087_v9, %v5533_v33  ;;  %v5845_v0 = vmul.f32 %v5844_v34, %v13440_v10  ;;  %v6146_v35 = vmul.f32 %v13499_v11, %v13499_v11  ;;  %v5698_v16 = vand.u32 2147483647, %v13481_v53 }
 0x53e   : > { %v8089_v19 = vpop.eup %8088  ;;  %v5542_v63 = vsel %vm5539_vm6, %v5541_v13, %v5537_v55  ;;  %v5990_v49 = vmul.f32 %v5989_v22, %v13484_v52  ;;  %v6001_v12 = vmul.f32 %v6000_v50, %v13484_v52  ;;  %v5700_v7 = vand.u32 2147483648, %v13481_v53 }
 0x53f   : > { %v5543_v24 = vmul.f32 %v5542_v63, %v5518_v57  ;;  %v5690_v17 = vmul.f32 %v8089_v19, %v13481_v53  ;;  %v5834_v14 = vmul.f32 %v5833_v31, %v13440_v10  ;;  %v5846_v39 = vadd.f32 0.4994258, %v5845_v0 }
 0x540   : > { %v5991_v2 = vadd.f32 0.0036580483, %v5990_v49  ;;  %v6002_v9 = vadd.f32 0.014752088, %v6001_v12  ;;  %v2154_v32 = vadd.f32 %v13408_v23, %v2081_v61  ;;  %v13515_v41 = vmin.f32 %v6146_v35, 16.0 }
 0x541   : > { %v7698_v59 = vclamps-f32 %v5543_v24, 1.0  ;;  %v5691_v46 = vsub.f32 1.0, %v5690_v17  ;;  %v2084_v47 = vadd.f32 %v13443_v4, %v12518_v60  ;;  %vm5695_vm8 = vweird.f32 %v8089_v19 }
 0x542   : > { %v5847_v43 = vmul.f32 %v5846_v39, %v13440_v10  ;;  %v6003_v21 = vmul.f32 %v6002_v9, %v13484_v52  ;;  %v2227_v44 = vadd.f32 %v13427_v42, %v2154_v32  ;;  %v5992_v6 = vmul.f32 %v5991_v2, %v13484_v52 }
 0x543   : > { %v6581_v26 = vadd.f32 1.0, %v7698_v59  ;;  %v5692_v28 = vmul.f32 %v8089_v19, %v5691_v46  ;;  %v6148_v23 = vmul.f32 2.1237322e-06, %v13515_v41  ;;  %vm5694_vm9 = vweird.f32 %v13481_v53 }
 0x544   : > { %vm13525_vm10 = vcmp.eq.f32.partialorder %v5698_v16, 8.507059e+37  ;;  %v13529_v60 = vadd.f32 1.0, %v5847_v43  ;;  %v6004_v4 = vadd.f32 0.112945676, %v6003_v21  ;;  %v6159_v29 = vmul.f32 3.8918573e-05, %v13515_v41  ;;  %vm5696_vm11 = vmor %vm5694_vm9, %vm5695_vm8 }
 0x545   : > { %v6681_v57 = vmul.f32 %v6581_v26, %v13477_v62  ;;  %v5693_v5 = vadd.f32 %v8089_v19, %v5692_v28  ;;  %v6149_v42 = vadd.f32 0.00028619796, %v6148_v23  ;;  %v5701_v3 = vor.u32 1.1754944e-38, %v5700_v7 }
 0x546   : > { %8090 = vrcp.f32 %v13529_v60  ;;  %v13536_v53 = vadd.f32 %v13429_v25, %v2227_v44  ;;  %v2157_v30 = vadd.f32 %v13445_v15, %v2084_v47  ;;  %v5835_v36 = vadd.f32 0.18741608, %v5834_v14 }
 0x547   : > { %6781 = vst [vmem:[%s8982_s18 + $0x258] sm:$0xff] %v6681_v57  ;;  %v5697_v37 = vsel %vm5696_vm11, %v8089_v19, %v5693_v5  ;;  %v5993_v8 = vadd.f32 0.05243302, %v5992_v6  ;;  %v6005_v62 = vmul.f32 %v6004_v4, %v13484_v52  ;;  %v6150_v20 = vmul.f32 %v6149_v42, %v13515_v41 }
 0x548   : > { %v5702_v31 = vsel %vm13525_vm10, %v5701_v3, %v5697_v37  ;;  %v6160_v45 = vadd.f32 0.001143296, %v6159_v29  ;;  %v13546_v25 = vmul.f32 0.70710677, %v13536_v53  ;;  %v2230_v15 = vadd.f32 %v13463_v38, %v2157_v30 }
 0x549   : > { %v5703_v33 = vmul.f32 %v5702_v31, %v5678_v48  ;;  %v6006_v34 = vadd.f32 0.4994258, %v6005_v62  ;;  %v5836_v50 = vmul.f32 %v5835_v36, %v13440_v10  ;;  %v5994_v61 = vmul.f32 %v5993_v8, %v13484_v52 }
 0x54a   : > { %v6161_v13 = vmul.f32 %v6160_v45, %v13515_v41  ;;  %v6151_v35 = vadd.f32 0.0036580483, %v6150_v20  ;;  %v6306_v48 = vmul.f32 %v13546_v25, %v13546_v25  ;;  %v2385_v63 = vmul.f32 0.5, %v13353_v1 }
 0x54b   : > { %v7702_v22 = vclamps-f32 %v5703_v33, 1.0  ;;  %v6007_v55 = vmul.f32 %v6006_v34, %v13484_v52  ;;  %v13562_v24 = vadd.f32 %v13465_v54, %v2230_v15  ;;  %v5837_v7 = vadd.f32 1.1283791, %v5836_v50 }
 0x54c   : > { %v8091_v0 = vpop.eup %8090  ;;  %v6162_v19 = vadd.f32 0.014752088, %v6161_v13  ;;  %v13559_v12 = vmin.f32 %v6306_v48, 16.0  ;;  %v5995_v39 = vadd.f32 0.18741608, %v5994_v61  ;;  %v5860_v1 = vand.u32 2147483648, %v13529_v60 }
 0x54d   : > { %v6585_v16 = vadd.f32 1.0, %v7702_v22  ;;  %v5850_v49 = vmul.f32 %v8091_v0, %v13529_v60  ;;  %v13556_v38 = vadd.f32 1.0, %v6007_v55  ;;  %v5858_v2 = vand.u32 2147483647, %v13529_v60 }
 0x54e   : > { %v6163_v10 = vmul.f32 %v6162_v19, %v13515_v41  ;;  %v6152_v9 = vmul.f32 %v6151_v35, %v13515_v41  ;;  %vm5855_vm12 = vweird.f32 %v8091_v0  ;;  %v6308_v46 = vmul.f32 2.1237322e-06, %v13559_v12 }
 0x54f   : > { %v6685_v17 = vmul.f32 %v6585_v16, %v2385_v63  ;;  %v5851_v14 = vsub.f32 1.0, %v5850_v49  ;;  %8092 = vrcp.f32 %v13556_v38  ;;  %v2389_v54 = vmul.f32 0.5, %v13404_v40 }
 0x550   : > { %v6164_v59 = vadd.f32 0.112945676, %v6163_v10  ;;  %vm5854_vm13 = vweird.f32 %v13529_v60  ;;  %v6319_v47 = vmul.f32 3.8918573e-05, %v13559_v12  ;;  %v13574_v43 = vmul.f32 0.70710677, %v13562_v24 }
 0x551   : > { %6785 = vst [vmem:[%s8982_s18 + $0x278] sm:$0xff] %v6685_v17  ;;  %v5852_v32 = vmul.f32 %v8091_v0, %v5851_v14  ;;  %v5996_v44 = vmul.f32 %v5995_v39, %v13484_v52  ;;  %v6309_v28 = vadd.f32 0.00028619796, %v6308_v46  ;;  %v5838_v6 = vmul.f32 %v5837_v7, %v13419_v58  ;;  %vm5856_vm14 = vmor %vm5854_vm13, %vm5855_vm12 }
 0x552   : > { %v6165_v26 = vmul.f32 %v6164_v59, %v13515_v41  ;;  %v5861_v23 = vor.u32 1.1754944e-38, %v5860_v1  ;;  %v6320_v51 = vadd.f32 0.001143296, %v6319_v47  ;;  %v6466_v40 = vmul.f32 %v13574_v43, %v13574_v43 }
 0x553   : > { %v5853_v21 = vadd.f32 %v8091_v0, %v5852_v32  ;;  %vm5859_vm15 = vcmp.eq.f32.partialorder %v5858_v2, 8.507059e+37  ;;  %v6153_v4 = vadd.f32 0.05243302, %v6152_v9  ;;  %v6310_v29 = vmul.f32 %v6309_v28, %v13559_v12 }
 0x554   : > { %v6166_v57 = vadd.f32 0.4994258, %v6165_v26  ;;  %v6321_v52 = vmul.f32 %v6320_v51, %v13559_v12  ;;  %v13583_v3 = vmin.f32 %v6466_v40, 16.0  ;;  %v5997_v58 = vadd.f32 1.1283791, %v5996_v44 }
 0x555   : > { %v5857_v60 = vsel %vm5856_vm14, %v8091_v0, %v5853_v21  ;;  %v8093_v5 = vpop.eup %8092  ;;  %v6018_v36 = vand.u32 2147483647, %v13556_v38  ;;  %v6020_v8 = vand.u32 2147483648, %v13556_v38  ;;  %v6154_v34 = vmul.f32 %v6153_v4, %v13515_v41 }
 0x556   : > { %v5862_v42 = vsel %vm5859_vm15, %v5861_v23, %v5857_v60  ;;  %v6010_v37 = vmul.f32 %v8093_v5, %v13556_v38  ;;  %v6167_v62 = vmul.f32 %v6166_v57, %v13515_v41  ;;  %v6322_v31 = vadd.f32 0.014752088, %v6321_v52 }
 0x557   : > { %v5863_v30 = vmul.f32 %v5862_v42, %v5838_v6  ;;  %v6468_v20 = vmul.f32 2.1237322e-06, %v13583_v3  ;;  %v6479_v13 = vmul.f32 3.8918573e-05, %v13583_v3  ;;  %v6311_v22 = vadd.f32 0.0036580483, %v6310_v29 }
 0x558   : > { %v6011_v33 = vsub.f32 1.0, %v6010_v37  ;;  %v6168_v15 = vadd.f32 1.0, %v6167_v62  ;;  %v6323_v50 = vmul.f32 %v6322_v31, %v13559_v12  ;;  %vm6015_vm0 = vweird.f32 %v8093_v5 }
 0x559   : > { %v7706_v45 = vclamps-f32 %v5863_v30, 1.0  ;;  %v6469_v61 = vadd.f32 0.00028619796, %v6468_v20  ;;  %v6480_v35 = vadd.f32 0.001143296, %v6479_v13  ;;  %vm6014_vm1 = vweird.f32 %v13556_v38 }
 0x55a   : > { %v6012_v0 = vmul.f32 %v8093_v5, %v6011_v33  ;;  %8094 = vrcp.f32 %v6168_v15  ;;  %v6155_v63 = vadd.f32 0.18741608, %v6154_v34  ;;  %v6324_v16 = vadd.f32 0.112945676, %v6323_v50  ;;  %vm6016_vm2 = vmor %vm6014_vm1, %vm6015_vm0 }
 0x55b   : > { %v6589_v55 = vadd.f32 1.0, %v7706_v45  ;;  %v6021_v49 = vor.u32 1.1754944e-38, %v6020_v8  ;;  %v6312_v10 = vmul.f32 %v6311_v22, %v13559_v12  ;;  %v6470_v17 = vmul.f32 %v6469_v61, %v13583_v3 }
 0x55c   : > { %v6013_v48 = vadd.f32 %v8093_v5, %v6012_v0  ;;  %v6481_v7 = vmul.f32 %v6480_v35, %v13583_v3  ;;  %v5998_v14 = vmul.f32 %v5997_v58, %v13468_v27  ;;  %vm6019_vm3 = vcmp.eq.f32.partialorder %v6018_v36, 8.507059e+37 }
 0x55d   : > { %v6689_v19 = vmul.f32 %v6589_v55, %v2389_v54  ;;  %v6325_v38 = vmul.f32 %v6324_v16, %v13559_v12  ;;  %v6156_v32 = vmul.f32 %v6155_v63, %v13515_v41  ;;  %v6313_v54 = vadd.f32 0.05243302, %v6312_v10 }
 0x55e   : > { %v6017_v39 = vsel %vm6016_vm2, %v8093_v5, %v6013_v48  ;;  %v6482_v1 = vadd.f32 0.014752088, %v6481_v7  ;;  %v6471_v47 = vadd.f32 0.0036580483, %v6470_v17  ;;  %v2393_v28 = vmul.f32 0.5, %v13454_v56 }
 0x55f   : > { %6789 = vst [vmem:[%s8982_s18 + $0x298] sm:$0xff] %v6689_v19  ;;  %v6022_v2 = vsel %vm6019_vm3, %v6021_v49, %v6017_v39  ;;  %v6326_v59 = vadd.f32 0.4994258, %v6325_v38  ;;  %v6157_v51 = vadd.f32 1.1283791, %v6156_v32  ;;  %v6180_v60 = vand.u32 2147483648, %v6168_v15 }
 0x560   : > { %v6023_v9 = vmul.f32 %v6022_v2, %v5998_v14  ;;  %v8095_v46 = vpop.eup %8094  ;;  %v6483_v21 = vmul.f32 %v6482_v1, %v13583_v3  ;;  %v6314_v41 = vmul.f32 %v6313_v54, %v13559_v12  ;;  %v6472_v57 = vmul.f32 %v6471_v47, %v13583_v3 }
 0x561   : > { %v6170_v26 = vmul.f32 %v8095_v46, %v6168_v15  ;;  %v6327_v27 = vmul.f32 %v6326_v59, %v13559_v12  ;;  %vm6175_vm4 = vweird.f32 %v8095_v46  ;;  %v6178_v52 = vand.u32 2147483647, %v6168_v15 }
 0x562   : > { %v7710_v44 = vclamps-f32 %v6023_v9, 1.0  ;;  %v6484_v6 = vadd.f32 0.112945676, %v6483_v21  ;;  %vm6174_vm5 = vweird.f32 %v6168_v15  ;;  %v6181_v58 = vor.u32 1.1754944e-38, %v6180_v60  ;;  %v6834_v60 = vld [vmem:[%s8982_s18 + $0x18] sm:$0xff] (%p8237_p9) }
 0x563   : > { %v6171_v40 = vsub.f32 1.0, %v6170_v26  ;;  %v6328_v4 = vadd.f32 1.0, %v6327_v27  ;;  %vm6176_vm6 = vmor %vm6174_vm5, %vm6175_vm4  ;;  %v6315_v37 = vadd.f32 0.18741608, %v6314_v41  ;;  %v6473_v36 = vadd.f32 0.05243302, %v6472_v57 }
 0x564   : > { %v6593_v23 = vadd.f32 1.0, %v7710_v44  ;;  %v6485_v5 = vmul.f32 %v6484_v6, %v13583_v3  ;;  %v6158_v8 = vmul.f32 %v6157_v51, %v13499_v11  ;;  %vm6179_vm7 = vcmp.eq.f32.partialorder %v6178_v52, 8.507059e+37  ;;  %v6836_v41 = vld [vmem:[%s8982_s18 + $0x20] sm:$0xff] (%p8237_p9)  ;;  %6835 = vst [vmem:[%s13629_s22 + $0x18] sm:$0xff] (%p8237_p9), %v6834_v60  ;;  %v6840_v57 = vld [vmem:[%s8982_s18 + $0x30] sm:$0xff] (%p8237_p9)  ;;  %v6962_v60 = vld [vmem:[%s8982_s18 + $0x218] sm:$0xff] (%p8237_p9) }
 0x565   : > { %v6172_v29 = vmul.f32 %v8095_v46, %v6171_v40  ;;  %8096 = vrcp.f32 %v6328_v4  ;;  %v6316_v13 = vmul.f32 %v6315_v37, %v13559_v12  ;;  %v6474_v15 = vmul.f32 %v6473_v36, %v13583_v3  ;;  %6837 = vst [vmem:[%s13629_s22 + $0x80] sm:$0xff] (%p8237_p9), %v6836_v41  ;;  %v6848_v52 = vld [vmem:[%s8982_s18 + $0x50] sm:$0xff] (%p8237_p9)  ;;  %v6858_v36 = vld [vmem:[%s8982_s18 + $0x78] sm:$0xff] (%p8237_p9)  ;;  %v6964_v41 = vld [vmem:[%s8982_s18 + $0x220] sm:$0xff] (%p8237_p9) }
 0x566   : > { %v6693_v42 = vmul.f32 %v6593_v23, %v2393_v28  ;;  %v6486_v30 = vadd.f32 0.4994258, %v6485_v5  ;;  %v2397_v61 = vmul.f32 0.5, %v13488_v18  ;;  %v6340_v35 = vand.u32 2147483648, %v6328_v4  ;;  %v6842_v5 = vld [vmem:[%s8982_s18 + $0x38] sm:$0xff] (%p8237_p9)  ;;  %6841 = vst [vmem:[%s13629_s22 + $0x90] sm:$0xff] (%p8237_p9), %v6840_v57 }
 0x567   : > { %v6173_v56 = vadd.f32 %v8095_v46, %v6172_v29  ;;  %v6317_v0 = vadd.f32 1.1283791, %v6316_v13  ;;  %v6475_v19 = vadd.f32 0.18741608, %v6474_v15  ;;  %v6338_v16 = vand.u32 2147483647, %v6328_v4 }
 0x568   : > { %6793 = vst [vmem:[%s8982_s18 + $0x2b8] sm:$0xff] %v6693_v42  ;;  %v6487_v31 = vmul.f32 %v6486_v30, %v13583_v3  ;;  %vm6334_vm9 = vweird.f32 %v6328_v4  ;;  %v6341_v10 = vor.u32 1.1754944e-38, %v6340_v35  ;;  %v2401_v54 = vmul.f32 0.5, %v13536_v53  ;;  %v6828_v53 = vld [vmem:[%s8982_s18] sm:$0xff] (%p8237_p9)  ;;  %v6846_v29 = vld [vmem:[%s8982_s18 + $0x48] sm:$0xff] (%p8237_p9)  ;;  %v6856_v37 = vld [vmem:[%s8982_s18 + $0x70] sm:$0xff] (%p8237_p9) }
 0x569   : > { %v6177_v62 = vsel %vm6176_vm6, %v8095_v46, %v6173_v56  ;;  %v6476_v17 = vmul.f32 %v6475_v19, %v13583_v3  ;;  %v6318_v7 = vmul.f32 %v6317_v0, %v13546_v25  ;;  %vm6339_vm11 = vcmp.eq.f32.partialorder %v6338_v16, 8.507059e+37  ;;  %6829 = vst [vmem:[%s13629_s22] sm:$0xff] (%p8237_p9), %v6828_v53  ;;  %v6844_v42 = vld [vmem:[%s8982_s18 + $0x40] sm:$0xff] (%p8237_p9)  ;;  %v6850_v56 = vld [vmem:[%s8982_s18 + $0x58] sm:$0xff] (%p8237_p9)  ;;  %v6888_v0 = vld [vmem:[%s8982_s18 + $0xf0] sm:$0xff] (%p8237_p9) }
 0x56a   : > { %v6182_v20 = vsel %vm6179_vm7, %v6181_v58, %v6177_v62  ;;  %v6488_v33 = vadd.f32 1.0, %v6487_v31  ;;  %v2405_v23 = vmul.f32 0.5, %v13562_v24  ;;  %v6832_v24 = vld [vmem:[%s8982_s18 + $0x10] sm:$0xff] (%p8237_p9)  ;;  %6843 = vst [vmem:[%s13629_s22 + $0x98] sm:$0xff] (%p8237_p9), %v6842_v5  ;;  %v6852_v30 = vld [vmem:[%s8982_s18 + $0x60] sm:$0xff] (%p8237_p9)  ;;  %v6854_v58 = vld [vmem:[%s8982_s18 + $0x68] sm:$0xff] (%p8237_p9) }
 0x56b   : > { %v6183_v45 = vmul.f32 %v6182_v20, %v6158_v8  ;;  %v8097_v34 = vpop.eup %8096  ;;  %v6477_v1 = vadd.f32 1.1283791, %v6476_v17  ;;  %6833 = vst [vmem:[%s13629_s22 + $0x10] sm:$0xff] (%p8237_p9), %v6832_v24  ;;  %v6860_v8 = vld [vmem:[%s8982_s18 + $0x80] sm:$0xff] (%p8237_p9)  ;;  %v6862_v62 = vld [vmem:[%s8982_s18 + $0x88] sm:$0xff] (%p8237_p9)  ;;  %v6864_v31 = vld [vmem:[%s8982_s18 + $0x90] sm:$0xff] (%p8237_p9) }
 0x56c   : > { %v6330_v50 = vmul.f32 %v8097_v34, %v6328_v4  ;;  %8098 = vrcp.f32 %v6488_v33  ;;  %vm6335_vm8 = vweird.f32 %v8097_v34  ;;  %v6500_v9 = vand.u32 2147483648, %v6488_v33  ;;  %v6838_v4 = vld [vmem:[%s8982_s18 + $0x28] sm:$0xff] (%p8237_p9)  ;;  %6845 = vst [vmem:[%s13629_s22 + $0x100] sm:$0xff] (%p8237_p9), %v6844_v42  ;;  %v6866_v20 = vld [vmem:[%s8982_s18 + $0x98] sm:$0xff] (%p8237_p9)  ;;  %v6876_v15 = vld [vmem:[%s8982_s18 + $0xc0] sm:$0xff] (%p8237_p9) }
 0x56d   : > { %v7714_v22 = vclamps-f32 %v6183_v45, 1.0  ;;  %vm6336_vm10 = vmor %vm6334_vm9, %vm6335_vm8  ;;  %v6498_v46 = vand.u32 2147483647, %v6488_v33  ;;  %vm6494_vm13 = vweird.f32 %v6488_v33  ;;  %v6478_v44 = vmul.f32 %v6477_v1, %v13574_v43  ;;  %v6830_v43 = vld [vmem:[%s8982_s18 + $0x8] sm:$0xff] (%p8237_p9)  ;;  %6839 = vst [vmem:[%s13629_s22 + $0x88] sm:$0xff] (%p8237_p9), %v6838_v4  ;;  %v6868_v45 = vld [vmem:[%s8982_s18 + $0xa0] sm:$0xff] (%p8237_p9) }
 0x56e   : > { %v6331_v11 = vsub.f32 1.0, %v6330_v50  ;;  %v6501_v25 = vor.u32 1.1754944e-38, %v6500_v9  ;;  %6831 = vst [vmem:[%s13629_s22 + $0x8] sm:$0xff] (%p8237_p9), %v6830_v43  ;;  %v6874_v13 = vld [vmem:[%s8982_s18 + $0xb8] sm:$0xff] (%p8237_p9)  ;;  %v6880_v50 = vld [vmem:[%s8982_s18 + $0xd0] sm:$0xff] (%p8237_p9)  ;;  %v6892_v19 = vld [vmem:[%s8982_s18 + $0x100] sm:$0xff] (%p8237_p9) }
 0x56f   : > { %v6597_v55 = vadd.f32 1.0, %v7714_v22  ;;  %vm6499_vm15 = vcmp.eq.f32.partialorder %v6498_v46, 8.507059e+37  ;;  %6847 = vst [vmem:[%s13629_s22 + $0x108] sm:$0xff] (%p8237_p9), %v6846_v29  ;;  %v6878_v22 = vld [vmem:[%s8982_s18 + $0xc8] sm:$0xff] (%p8237_p9)  ;;  %v6890_v35 = vld [vmem:[%s8982_s18 + $0xf8] sm:$0xff] (%p8237_p9)  ;;  %v6920_v1 = vld [vmem:[%s8982_s18 + $0x170] sm:$0xff] (%p8237_p9) }
 0x570   : > { %v6332_v63 = vmul.f32 %v8097_v34, %v6331_v11  ;;  %6849 = vst [vmem:[%s13629_s22 + $0x110] sm:$0xff] (%p8237_p9), %v6848_v52  ;;  %v6886_v11 = vld [vmem:[%s8982_s18 + $0xe8] sm:$0xff] (%p8237_p9)  ;;  %v6898_v16 = vld [vmem:[%s8982_s18 + $0x118] sm:$0xff] (%p8237_p9)  ;;  %v6928_v46 = vld [vmem:[%s8982_s18 + $0x190] sm:$0xff] (%p8237_p9) }
 0x571   : > { %v6697_v48 = vmul.f32 %v6597_v55, %v2397_v61  ;;  %6851 = vst [vmem:[%s13629_s22 + $0x118] sm:$0xff] (%p8237_p9), %v6850_v56  ;;  %v6882_v61 = vld [vmem:[%s8982_s18 + $0xd8] sm:$0xff] (%p8237_p9)  ;;  %v6884_v55 = vld [vmem:[%s8982_s18 + $0xe0] sm:$0xff] (%p8237_p9)  ;;  %v6958_v43 = vld [vmem:[%s8982_s18 + $0x208] sm:$0xff] (%p8237_p9) }
 0x572   : > { %v6333_v49 = vadd.f32 %v8097_v34, %v6332_v63  ;;  %v8099_v12 = vpop.eup %8098  ;;  %6853 = vst [vmem:[%s13629_s22 + $0x180] sm:$0xff] (%p8237_p9), %v6852_v30  ;;  %v6896_v63 = vld [vmem:[%s8982_s18 + $0x110] sm:$0xff] (%p8237_p9)  ;;  %v6906_v17 = vld [vmem:[%s8982_s18 + $0x138] sm:$0xff] (%p8237_p9)  ;;  %v6956_v53 = vld [vmem:[%s8982_s18 + $0x200] sm:$0xff] (%p8237_p9) }
 0x573   : > { %6797 = vst [vmem:[%s8982_s18 + $0x2d8] sm:$0xff] %v6697_v48  ;;  %v6490_v14 = vmul.f32 %v8099_v12, %v6488_v33  ;;  %vm6495_vm12 = vweird.f32 %v8099_v12  ;;  %v6870_v33 = vld [vmem:[%s8982_s18 + $0xa8] sm:$0xff] (%p8237_p9)  ;;  %v6922_v9 = vld [vmem:[%s8982_s18 + $0x178] sm:$0xff] (%p8237_p9)  ;;  %v6960_v24 = vld [vmem:[%s8982_s18 + $0x210] sm:$0xff] (%p8237_p9) }
 0x574   : > { %v6337_v18 = vsel %vm6336_vm10, %v8097_v34, %v6333_v49  ;;  %vm6496_vm14 = vmor %vm6494_vm13, %vm6495_vm12  ;;  %6855 = vst [vmem:[%s13629_s22 + $0x188] sm:$0xff] (%p8237_p9), %v6854_v58  ;;  %v6872_v34 = vld [vmem:[%s8982_s18 + $0xb0] sm:$0xff] (%p8237_p9)  ;;  %v6894_v48 = vld [vmem:[%s8982_s18 + $0x108] sm:$0xff] (%p8237_p9) }
 0x575   : > { %v6342_v39 = vsel %vm6339_vm11, %v6341_v10, %v6337_v18  ;;  %v6491_v2 = vsub.f32 1.0, %v6490_v14  ;;  %6857 = vst [vmem:[%s13629_s22 + $0x190] sm:$0xff] (%p8237_p9), %v6856_v37  ;;  %v6900_v49 = vld [vmem:[%s8982_s18 + $0x120] sm:$0xff] (%p8237_p9)  ;;  %v6904_v10 = vld [vmem:[%s8982_s18 + $0x130] sm:$0xff] (%p8237_p9)  ;;  %v6910_v18 = vld [vmem:[%s8982_s18 + $0x148] sm:$0xff] (%p8237_p9) }
 0x576   : > { %v6343_v38 = vmul.f32 %v6342_v39, %v6318_v7  ;;  %6859 = vst [vmem:[%s13629_s22 + $0x198] sm:$0xff] (%p8237_p9), %v6858_v36  ;;  %v6908_v7 = vld [vmem:[%s8982_s18 + $0x140] sm:$0xff] (%p8237_p9)  ;;  %v6912_v14 = vld [vmem:[%s8982_s18 + $0x150] sm:$0xff] (%p8237_p9)  ;;  %v6914_v39 = vld [vmem:[%s8982_s18 + $0x158] sm:$0xff] (%p8237_p9) }
 0x577   : > { %v6492_v59 = vmul.f32 %v8099_v12, %v6491_v2  ;;  %6861 = vst [vmem:[%s13629_s22 + $0x200] sm:$0xff] (%p8237_p9), %v6860_v8  ;;  %v6918_v2 = vld [vmem:[%s8982_s18 + $0x168] sm:$0xff] (%p8237_p9)  ;;  %v6968_v57 = vld [vmem:[%s8982_s18 + $0x230] sm:$0xff] (%p8237_p9)  ;;  %v6970_v5 = vld [vmem:[%s8982_s18 + $0x238] sm:$0xff] (%p8237_p9) }
 0x578   : > { %v7718_v32 = vclamps-f32 %v6343_v38, 1.0  ;;  %6863 = vst [vmem:[%s13629_s22 + $0x208] sm:$0xff] (%p8237_p9), %v6862_v62  ;;  %v6916_v38 = vld [vmem:[%s8982_s18 + $0x160] sm:$0xff] (%p8237_p9)  ;;  %v6966_v4 = vld [vmem:[%s8982_s18 + $0x228] sm:$0xff] (%p8237_p9)  ;;  %v6976_v52 = vld [vmem:[%s8982_s18 + $0x250] sm:$0xff] (%p8237_p9) }
 0x579   : > { %v6493_v3 = vadd.f32 %v8099_v12, %v6492_v59  ;;  %6865 = vst [vmem:[%s13629_s22 + $0x210] sm:$0xff] (%p8237_p9), %v6864_v31  ;;  %v6926_v59 = vld [vmem:[%s8982_s18 + $0x188] sm:$0xff] (%p8237_p9)  ;;  %v6972_v42 = vld [vmem:[%s8982_s18 + $0x240] sm:$0xff] (%p8237_p9)  ;;  %v6978_v56 = vld [vmem:[%s8982_s18 + $0x258] sm:$0xff] (%p8237_p9) }
 0x57a   : > { %v6601_v47 = vadd.f32 1.0, %v7718_v32  ;;  %6867 = vst [vmem:[%s13629_s22 + $0x218] sm:$0xff] (%p8237_p9), %v6866_v20  ;;  %v6924_v32 = vld [vmem:[%s8982_s18 + $0x180] sm:$0xff] (%p8237_p9)  ;;  %v6974_v29 = vld [vmem:[%s8982_s18 + $0x248] sm:$0xff] (%p8237_p9)  ;;  %v6984_v37 = vld [vmem:[%s8982_s18 + $0x270] sm:$0xff] (%p8237_p9) }
 0x57b   : > { %v6497_v26 = vsel %vm6496_vm14, %v8099_v12, %v6493_v3  ;;  %6869 = vst [vmem:[%s13629_s22 + $0x280] sm:$0xff] (%p8237_p9), %v6868_v45  ;;  %v6902_v12 = vld [vmem:[%s8982_s18 + $0x128] sm:$0xff] (%p8237_p9)  ;;  %v6980_v30 = vld [vmem:[%s8982_s18 + $0x260] sm:$0xff] (%p8237_p9)  ;;  %v6986_v36 = vld [vmem:[%s8982_s18 + $0x278] sm:$0xff] (%p8237_p9) }
 0x57c   : > { %v6701_v21 = vmul.f32 %v6601_v47, %v2401_v54  ;;  %v6502_v28 = vsel %vm6499_vm15, %v6501_v25, %v6497_v26  ;;  %6871 = vst [vmem:[%s13629_s22 + $0x288] sm:$0xff] (%p8237_p9), %v6870_v33  ;;  %v6930_v54 = vld [vmem:[%s8982_s18 + $0x198] sm:$0xff] (%p8237_p9)  ;;  %v6932_v47 = vld [vmem:[%s8982_s18 + $0x1a0] sm:$0xff] (%p8237_p9)  ;;  %v6934_v3 = vld [vmem:[%s8982_s18 + $0x1a8] sm:$0xff] (%p8237_p9) }
 0x57d   : > { %v6503_v27 = vmul.f32 %v6502_v28, %v6478_v44  ;;  %6873 = vst [vmem:[%s13629_s22 + $0x290] sm:$0xff] (%p8237_p9), %v6872_v34  ;;  %v6936_v25 = vld [vmem:[%s8982_s18 + $0x1b0] sm:$0xff] (%p8237_p9)  ;;  %v6940_v44 = vld [vmem:[%s8982_s18 + $0x1c0] sm:$0xff] (%p8237_p9)  ;;  %v6942_v26 = vld [vmem:[%s8982_s18 + $0x1c8] sm:$0xff] (%p8237_p9) }
 0x57e   : > { %6801 = vst [vmem:[%s8982_s18 + $0x2f8] sm:$0xff] %v6701_v21  ;;  %v6938_v21 = vld [vmem:[%s8982_s18 + $0x1b8] sm:$0xff] (%p8237_p9)  ;;  %v6944_v28 = vld [vmem:[%s8982_s18 + $0x1d0] sm:$0xff] (%p8237_p9)  ;;  %v6982_v58 = vld [vmem:[%s8982_s18 + $0x268] sm:$0xff] (%p8237_p9) }
 0x57f   : > { %v7722_v6 = vclamps-f32 %v6503_v27, 1.0  ;;  %6875 = vst [vmem:[%s13629_s22 + $0x298] sm:$0xff] (%p8237_p9), %v6874_v13  ;;  %v6946_v27 = vld [vmem:[%s8982_s18 + $0x1d8] sm:$0xff] (%p8237_p9)  ;;  %v6988_v8 = vld [vmem:[%s8982_s18 + $0x280] sm:$0xff] (%p8237_p9)  ;;  %v6990_v62 = vld [vmem:[%s8982_s18 + $0x288] sm:$0xff] (%p8237_p9) }
 0x580   : > { %6877 = vst [vmem:[%s13629_s22 + $0x300] sm:$0xff] (%p8237_p9), %v6876_v15  ;;  %v6992_v31 = vld [vmem:[%s8982_s18 + $0x290] sm:$0xff] (%p8237_p9)  ;;  %v6994_v20 = vld [vmem:[%s8982_s18 + $0x298] sm:$0xff] (%p8237_p9)  ;;  %v6996_v45 = vld [vmem:[%s8982_s18 + $0x2a0] sm:$0xff] (%p8237_p9) }
 0x581   : > { %v6605_v51 = vadd.f32 1.0, %v7722_v6  ;;  %6812 = sbr.rel (!%p8237_p9) target bundleno = 1485 (0x5cd), region = 40  ;;  %6879 = vst [vmem:[%s13629_s22 + $0x308] sm:$0xff] (%p8237_p9), %v6878_v22  ;;  %v6948_v6 = vld [vmem:[%s8982_s18 + $0x1e0] sm:$0xff] (%p8237_p9)  ;;  %v6998_v33 = vld [vmem:[%s8982_s18 + $0x2a8] sm:$0xff] (%p8237_p9)  ;;  %v7000_v34 = vld [vmem:[%s8982_s18 + $0x2b0] sm:$0xff] (%p8237_p9) }
 0x582   : > { %6881 = vst [vmem:[%s13629_s22 + $0x310] sm:$0xff] (%p8237_p9), %v6880_v50  ;;  %v7002_v13 = vld [vmem:[%s8982_s18 + $0x2b8] sm:$0xff] (%p8237_p9)  ;;  %v7004_v15 = vld [vmem:[%s8982_s18 + $0x2c0] sm:$0xff] (%p8237_p9)  ;;  %v7006_v22 = vld [vmem:[%s8982_s18 + $0x2c8] sm:$0xff] (%p8237_p9) }
 0x583   : > { %v6705_v40 = vmul.f32 %v6605_v51, %v2405_v23  ;;  %6883 = vst [vmem:[%s13629_s22 + $0x318] sm:$0xff] (%p8237_p9), %v6882_v61  ;;  %v6950_v23 = vld [vmem:[%s8982_s18 + $0x1e8] sm:$0xff] (%p8237_p9)  ;;  %v6952_v51 = vld [vmem:[%s8982_s18 + $0x1f0] sm:$0xff] (%p8237_p9)  ;;  %v7010_v61 = vld [vmem:[%s8982_s18 + $0x2d8] sm:$0xff] (%p8237_p9) }
 0x584   : > { %6885 = vst [vmem:[%s13629_s22 + $0x380] sm:$0xff] (%p8237_p9), %v6884_v55  ;;  %v7008_v50 = vld [vmem:[%s8982_s18 + $0x2d0] sm:$0xff] (%p8237_p9)  ;;  %v7012_v55 = vld [vmem:[%s8982_s18 + $0x2e0] sm:$0xff] (%p8237_p9) }
 0x585   : > { %6805 = vst [vmem:[%s8982_s18 + $0x318] sm:$0xf] %v6705_v40  ;;  %v6954_v40 = vld [vmem:[%s8982_s18 + $0x1f8] sm:$0xff] (%p8237_p9) }
 0x586   : > { %6887 = vst [vmem:[%s13629_s22 + $0x388] sm:$0xff] %v6886_v11  ;;  %v7014_v11 = vld [vmem:[%s8982_s18 + $0x2e8] sm:$0xff] }
 0x587   : > { %6889 = vst [vmem:[%s13629_s22 + $0x390] sm:$0xff] %v6888_v0  ;;  %v7016_v0 = vld [vmem:[%s8982_s18 + $0x2f0] sm:$0xff] }
 0x588   : > { %6891 = vst [vmem:[%s13629_s22 + $0x398] sm:$0xff] %v6890_v35  ;;  %v7018_v35 = vld [vmem:[%s8982_s18 + $0x2f8] sm:$0xff] }
 0x589   : > { %6893 = vst [vmem:[%s13629_s22 + $0x400] sm:$0xff] %v6892_v19  ;;  %v7020_v19 = vld [vmem:[%s8982_s18 + $0x300] sm:$0xff] }
 0x58a   : > { %6895 = vst [vmem:[%s13629_s22 + $0x408] sm:$0xff] %v6894_v48  ;;  %v7022_v48 = vld [vmem:[%s8982_s18 + $0x308] sm:$0xff] }
 0x58b   : > { %6897 = vst [vmem:[%s13629_s22 + $0x410] sm:$0xff] %v6896_v63  ;;  %v7024_v63 = vld [vmem:[%s8982_s18 + $0x310] sm:$0xff] }
 0x58c   : > { %6899 = vst [vmem:[%s13629_s22 + $0x418] sm:$0xff] %v6898_v16  ;;  %v7026_v16 = vld [vmem:[%s8982_s18 + $0x318] sm:$0xff] }
 0x58d   : > { %6901 = vst [vmem:[%s13629_s22 + $0x480] sm:$0xff] %v6900_v49 }
 0x58e   : > { %6903 = vst [vmem:[%s13629_s22 + $0x488] sm:$0xff] %v6902_v12 }
 0x58f   : > { %6905 = vst [vmem:[%s13629_s22 + $0x490] sm:$0xff] %v6904_v10 }
 0x590   : > { %6907 = vst [vmem:[%s13629_s22 + $0x498] sm:$0xff] %v6906_v17 }
 0x591   : > { %6909 = vst [vmem:[%s13629_s22 + $0x500] sm:$0xff] %v6908_v7 }
 0x592   : > { %6911 = vst [vmem:[%s13629_s22 + $0x508] sm:$0xff] %v6910_v18 }
 0x593   : > { %6913 = vst [vmem:[%s13629_s22 + $0x510] sm:$0xff] %v6912_v14 }
 0x594   : > { %6915 = vst [vmem:[%s13629_s22 + $0x518] sm:$0xff] %v6914_v39 }
 0x595   : > { %6917 = vst [vmem:[%s13629_s22 + $0x580] sm:$0xff] %v6916_v38 }
 0x596   : > { %6919 = vst [vmem:[%s13629_s22 + $0x588] sm:$0xff] %v6918_v2 }
 0x597   : > { %6921 = vst [vmem:[%s13629_s22 + $0x590] sm:$0xff] %v6920_v1 }
 0x598   : > { %6923 = vst [vmem:[%s13629_s22 + $0x598] sm:$0xff] %v6922_v9 }
 0x599   : > { %6925 = vst [vmem:[%s13629_s22 + $0x600] sm:$0xff] %v6924_v32 }
 0x59a   : > { %6927 = vst [vmem:[%s13629_s22 + $0x608] sm:$0xff] %v6926_v59 }
 0x59b   : > { %6929 = vst [vmem:[%s13629_s22 + $0x610] sm:$0xff] %v6928_v46 }
 0x59c   : > { %6931 = vst [vmem:[%s13629_s22 + $0x618] sm:$0xff] %v6930_v54 }
 0x59d   : > { %6933 = vst [vmem:[%s13629_s22 + $0x680] sm:$0xff] %v6932_v47 }
 0x59e   : > { %6935 = vst [vmem:[%s13629_s22 + $0x688] sm:$0xff] %v6934_v3 }
 0x59f   : > { %6937 = vst [vmem:[%s13629_s22 + $0x690] sm:$0xff] %v6936_v25 }
 0x5a0   : > { %6939 = vst [vmem:[%s13629_s22 + $0x698] sm:$0xff] %v6938_v21 }
 0x5a1   : > { %6941 = vst [vmem:[%s13629_s22 + $0x700] sm:$0xff] %v6940_v44 }
 0x5a2   : > { %6943 = vst [vmem:[%s13629_s22 + $0x708] sm:$0xff] %v6942_v26 }
 0x5a3   : > { %6945 = vst [vmem:[%s13629_s22 + $0x710] sm:$0xff] %v6944_v28 }
 0x5a4   : > { %6947 = vst [vmem:[%s13629_s22 + $0x718] sm:$0xff] %v6946_v27 }
 0x5a5   : > { %6949 = vst [vmem:[%s13629_s22 + $0x780] sm:$0xff] %v6948_v6 }
 0x5a6   : > { %6951 = vst [vmem:[%s13629_s22 + $0x788] sm:$0xff] %v6950_v23 }
 0x5a7   : > { %6953 = vst [vmem:[%s13629_s22 + $0x790] sm:$0xff] %v6952_v51 }
 0x5a8   : > { %6955 = vst [vmem:[%s13629_s22 + $0x798] sm:$0xff] %v6954_v40 }
 0x5a9   : > { %6957 = vst [vmem:[%s13629_s22 + $0x800] sm:$0xff] %v6956_v53 }
 0x5aa   : > { %6959 = vst [vmem:[%s13629_s22 + $0x808] sm:$0xff] %v6958_v43 }
 0x5ab   : > { %6961 = vst [vmem:[%s13629_s22 + $0x810] sm:$0xff] %v6960_v24 }
 0x5ac   : > { %6963 = vst [vmem:[%s13629_s22 + $0x818] sm:$0xff] %v6962_v60 }
 0x5ad   : > { %6965 = vst [vmem:[%s13629_s22 + $0x880] sm:$0xff] %v6964_v41 }
 0x5ae   : > { %6967 = vst [vmem:[%s13629_s22 + $0x888] sm:$0xff] %v6966_v4 }
 0x5af   : > { %6969 = vst [vmem:[%s13629_s22 + $0x890] sm:$0xff] %v6968_v57 }
 0x5b0   : > { %6971 = vst [vmem:[%s13629_s22 + $0x898] sm:$0xff] %v6970_v5 }
 0x5b1   : > { %6973 = vst [vmem:[%s13629_s22 + $0x900] sm:$0xff] %v6972_v42 }
 0x5b2   : > { %6975 = vst [vmem:[%s13629_s22 + $0x908] sm:$0xff] %v6974_v29 }
 0x5b3   : > { %6977 = vst [vmem:[%s13629_s22 + $0x910] sm:$0xff] %v6976_v52 }
 0x5b4   : > { %6979 = vst [vmem:[%s13629_s22 + $0x918] sm:$0xff] %v6978_v56 }
 0x5b5   : > { %6981 = vst [vmem:[%s13629_s22 + $0x980] sm:$0xff] %v6980_v30 }
 0x5b6   : > { %6983 = vst [vmem:[%s13629_s22 + $0x988] sm:$0xff] %v6982_v58 }
 0x5b7   : > { %6985 = vst [vmem:[%s13629_s22 + $0x990] sm:$0xff] %v6984_v37 }
 0x5b8   : > { %6987 = vst [vmem:[%s13629_s22 + $0x998] sm:$0xff] %v6986_v36 }
 0x5b9   : > { %6989 = vst [vmem:[%s13629_s22 + $0xa00] sm:$0xff] %v6988_v8 }
 0x5ba   : > { %6991 = vst [vmem:[%s13629_s22 + $0xa08] sm:$0xff] %v6990_v62 }
 0x5bb   : > { %6993 = vst [vmem:[%s13629_s22 + $0xa10] sm:$0xff] %v6992_v31 }
 0x5bc   : > { %6995 = vst [vmem:[%s13629_s22 + $0xa18] sm:$0xff] %v6994_v20 }
 0x5bd   : > { %6997 = vst [vmem:[%s13629_s22 + $0xa80] sm:$0xff] %v6996_v45 }
 0x5be   : > { %6999 = vst [vmem:[%s13629_s22 + $0xa88] sm:$0xff] %v6998_v33 }
 0x5bf   : > { %7001 = vst [vmem:[%s13629_s22 + $0xa90] sm:$0xff] %v7000_v34 }
 0x5c0   : > { %7003 = vst [vmem:[%s13629_s22 + $0xa98] sm:$0xff] %v7002_v13 }
 0x5c1   : > { %7005 = vst [vmem:[%s13629_s22 + $0xb00] sm:$0xff] %v7004_v15 }
 0x5c2   : > { %7007 = vst [vmem:[%s13629_s22 + $0xb08] sm:$0xff] %v7006_v22 }
 0x5c3   : > { %7009 = vst [vmem:[%s13629_s22 + $0xb10] sm:$0xff] %v7008_v50 }
 0x5c4   : > { %7011 = vst [vmem:[%s13629_s22 + $0xb18] sm:$0xff] %v7010_v61 }
 0x5c5   : > { %7013 = vst [vmem:[%s13629_s22 + $0xb80] sm:$0xff] %v7012_v55 }
 0x5c6   : > { %7015 = vst [vmem:[%s13629_s22 + $0xb88] sm:$0xff] %v7014_v11 }
 0x5c7   : > { %7017 = vst [vmem:[%s13629_s22 + $0xb90] sm:$0xff] %v7016_v0 }
 0x5c8   : > { %7019 = vst [vmem:[%s13629_s22 + $0xb98] sm:$0xff] %v7018_v35 }
 0x5c9   : > { %7021 = vst [vmem:[%s13629_s22 + $0xc00] sm:$0xff] %v7020_v19 }
 0x5ca   : > { %7023 = vst [vmem:[%s13629_s22 + $0xc08] sm:$0xff] %v7022_v48 }
 0x5cb   : > { %7025 = vst [vmem:[%s13629_s22 + $0xc10] sm:$0xff] %v7024_v63 }
 0x5cc   : > { %7027 = vst [vmem:[%s13629_s22 + $0xc18] sm:$0xff] %v7026_v16 }
 0x5cd PF: > { %p13_p9 = scmp.ge.s32.totalorder %s8214_s17, 6   ;;  %s14223_s12 = smov %s8159_s13 }
 0x5ce   : > { %s14224_s13 = smov %s8163_s14  ;;  %s14225_s14 = smov %s8224_s20 }
 0x5cf   : > { %s14226_s15 = smov %s8214_s17  ;;  %15 = sbr.rel (!%p13_p9) target bundleno = 3 (0x3), region = 98 }
 0x5d4   :  { %7043 = vsyncpa [#allocation3], 1 }
 0x5d5   :  { %7045 = vsyncpa [#allocation3 + $0x1], 1 }

</bundles_post_ra>
